<compile_context>
chip_gen: v7x
topology: tpu7x:2x2x1
jax: 0.10.0
libtpu: 0.0.40
codegen_flags: <defaults>
</compile_context>

<pallas_src>
import functools

import jax
import jax.numpy as jnp
from jax.experimental import pallas as pl
from jax.experimental.pallas import tpu as pltpu


# ---------------------------------------------------------------------------
# fused ASPP kernel
# ---------------------------------------------------------------------------
def _aspp_fused_kernel(xp_ref, w1_ref, w3_ref, wf_ref, s_ref, b_ref,
                       o_ref, acc_ref, bacc_ref,
                       *, H, W, TH, Cin, Cp, dmax, dilations):
    """One (batch, row-tile) step of the fully fused ASPP forward.

    xp_ref : (1, H+2*dmax, W+2*dmax, Cin)  bf16   shared zero-padded input
    w1_ref : (2, Cin, Cp)                  bf16   [0]=conv1 (1x1), [1]=conv5 (pool 1x1)
    w3_ref : (3, 9, Cin, Cp)               bf16   dilated 3x3 weights (branch, tap)
    wf_ref : (5*Cp, Cp)                    bf16   final 1x1 over the virtual concat
    s_ref  : (6, Cp)  f32   folded-BN scales  [conv1..conv4, conv5, convf]
    b_ref  : (6, Cp)  f32   folded-BN biases
    o_ref  : (1, TH, W, Cp) f32
    acc_ref / bacc_ref : (TH*W, Cp) f32 VMEM scratch accumulators
    """
    i = pl.program_id(1)
    r0 = pl.multiple_of(i * TH, TH)          # first output row of this tile

    def bn_relu_bf16(y, idx):
        y = jnp.maximum(y * s_ref[idx][None, :] + b_ref[idx][None, :], 0.0)
        return y.astype(jnp.bfloat16)

    # ---- global average-pool branch (zero padding => sum(xp) == sum(x)) ----
    xsum = jnp.sum(xp_ref[0], axis=(0, 1), dtype=jnp.float32)            # (Cin,)
    pooled = (xsum * (1.0 / (H * W))).astype(jnp.bfloat16)[None, :]      # (1, Cin)
    y5 = bn_relu_bf16(
        jnp.dot(pooled, w1_ref[1], preferred_element_type=jnp.float32), 4)
    c5 = jnp.dot(y5, wf_ref[4 * Cp:5 * Cp, :],
                 preferred_element_type=jnp.float32)                     # (1, Cp)
    # init the fused-final accumulator with the (spatially constant) pool term
    acc_ref[...] = jnp.broadcast_to(c5, acc_ref.shape)

    # ---- 1x1 branch ---------------------------------------------------------
    x_c = xp_ref[0, pl.ds(r0 + dmax, TH), dmax:dmax + W, :].reshape(TH * W, Cin)
    y1 = bn_relu_bf16(
        jnp.dot(x_c, w1_ref[0], preferred_element_type=jnp.float32), 0)
    acc_ref[...] += jnp.dot(y1, wf_ref[0:Cp, :],
                            preferred_element_type=jnp.float32)

    # ---- three dilated 3x3 branches ----------------------------------------
    # TODO(synk): when Cin is a multiple of 128, build the 9-tap im2col matrix
    # and issue a single K=9*Cin matmul per branch (better MXU cadence on
    # v5e/v6e); with toy Cin=4 the lane-axis concat is not worth it, so we use
    # the 9-tap matmul-accumulate (fine on v7x's in-place MRB accumulation).
    for b_idx, d in enumerate(dilations):
        bacc_ref[...] = jnp.zeros_like(bacc_ref)
        for ky in range(3):
            for kx in range(3):
                row0 = r0 + dmax + (ky - 1) * d
                col0 = dmax + (kx - 1) * d
                patch = xp_ref[0, pl.ds(row0, TH),
                               col0:col0 + W, :].reshape(TH * W, Cin)
                bacc_ref[...] += jnp.dot(patch, w3_ref[b_idx, ky * 3 + kx],
                                         preferred_element_type=jnp.float32)
        yb = bn_relu_bf16(bacc_ref[...], 1 + b_idx)
        acc_ref[...] += jnp.dot(yb, wf_ref[(1 + b_idx) * Cp:(2 + b_idx) * Cp, :],
                                preferred_element_type=jnp.float32)

    # ---- final folded-BN + ReLU, single lane-dense store --------------------
    y = jnp.maximum(acc_ref[...] * s_ref[5][None, :] + b_ref[5][None, :], 0.0)
    o_ref[0] = y.reshape(TH, W, Cp)


# ---------------------------------------------------------------------------
# wrapper: weight prep (bf16 cast, lane padding, stacking) + pallas_call
# ---------------------------------------------------------------------------
def aspp_forward(x_nhwc, p, dilations, *, row_tile=8):
    """Fused ASPP forward. x_nhwc: (N, H, W, Cin) f32. Returns (N, H, W, Cout) f32."""
    N, H, W, Cin = x_nhwc.shape
    Cout = p["w1"].shape[1]
    dmax = max(dilations)
    Cp = ((Cout + 127) // 128) * 128               # lane-pad output channels
    TH = row_tile if H % row_tile == 0 else H      # row tile (multiple of 8 ideally)

    f32, bf16 = jnp.float32, jnp.bfloat16

    def pad_cout(w):                               # zero-pad last dim Cout -> Cp
        return jnp.pad(w, [(0, 0)] * (w.ndim - 1) + [(0, Cp - Cout)])

    def pad_vec(v):                                # (1, Cout) -> (Cp,)
        return jnp.pad(v[0], (0, Cp - Cout))

    # 1x1 weights: [conv1, conv5(pool)] -> (2, Cin, Cp) bf16
    w1x1 = jnp.stack([pad_cout(p["w1"]), pad_cout(p["w5"])]).astype(bf16)
    # dilated 3x3 weights -> (3 branches, 9 taps, Cin, Cp) bf16
    w3x3 = jnp.stack([pad_cout(p[k]).reshape(9, Cin, Cp)
                      for k in ("w2", "w3", "w4")]).astype(bf16)
    # final 1x1 over the virtual concat, re-laid-out for the padded channels
    wf = jnp.zeros((5 * Cp, Cp), f32)
    for k in range(5):
        wf = wf.at[k * Cp:k * Cp + Cout, :Cout].set(
            p["wf"][k * Cout:(k + 1) * Cout, :])
    wf = wf.astype(bf16)
    # folded BN params (padded channels get scale=0, bias=0 -> relu(0)=0)
    s_all = jnp.stack([pad_vec(p[k]) for k in ("s1", "s2", "s3", "s4", "s5", "sf")]).astype(f32)
    b_all = jnp.stack([pad_vec(p[k]) for k in ("b1", "b2", "b3", "b4", "b5", "bf")]).astype(f32)

    # single shared zero-padded bf16 input (pad = max dilation), reused by all branches
    xp = jnp.pad(x_nhwc.astype(bf16), ((0, 0), (dmax, dmax), (dmax, dmax), (0, 0)))
    Hp, Wp = H + 2 * dmax, W + 2 * dmax

    kern = functools.partial(_aspp_fused_kernel, H=H, W=W, TH=TH, Cin=Cin,
                             Cp=Cp, dmax=dmax, dilations=tuple(dilations))

    out_p = pl.pallas_call(
        kern,
        out_shape=jax.ShapeDtypeStruct((N, H, W, Cp), f32),
        grid=(N, H // TH),
        in_specs=[
            # padded input: block index constant across row tiles -> DMA'd once per image
            pl.BlockSpec((1, Hp, Wp, Cin), lambda n, i: (n, 0, 0, 0)),
            pl.BlockSpec((2, Cin, Cp), lambda n, i: (0, 0, 0)),
            pl.BlockSpec((3, 9, Cin, Cp), lambda n, i: (0, 0, 0, 0)),
            pl.BlockSpec((5 * Cp, Cp), lambda n, i: (0, 0)),
            pl.BlockSpec((6, Cp), lambda n, i: (0, 0)),
            pl.BlockSpec((6, Cp), lambda n, i: (0, 0)),
        ],
        out_specs=pl.BlockSpec((1, TH, W, Cp), lambda n, i: (n, i, 0, 0)),
        scratch_shapes=[pltpu.VMEM((TH * W, Cp), f32),   # fused-final accumulator
                        pltpu.VMEM((TH * W, Cp), f32)],  # per-branch pre-activation
        compiler_params=pltpu.CompilerParams(
            dimension_semantics=("parallel", "parallel"),
            # explicit budget that also fits v7x's 64 MiB physical VMEM
            vmem_limit_bytes=48 * 1024 * 1024),
    )(xp, w1x1, w3x3, wf, s_all, b_all)

    return out_p[..., :Cout]                       # drop lane padding


# ---------------------------------------------------------------------------
# pure-JAX reference (correctness check only; mirrors the kernel's bf16 storage)
# ---------------------------------------------------------------------------
def aspp_reference(x, p, dilations):
    f32 = jnp.float32
    q = lambda a: a.astype(jnp.bfloat16).astype(f32)   # bf16 storage, f32 math
    xq = q(x)

    def bn_relu(y, s, b):
        return jnp.maximum(y * s[0][None, None, None, :] + b[0][None, None, None, :], 0.0)

    def dil(xx, w, d):
        return jax.lax.conv_general_dilated(
            xx, w, window_strides=(1, 1), padding=((d, d), (d, d)),
            rhs_dilation=(d, d), dimension_numbers=("NHWC", "HWIO", "NHWC"),
            preferred_element_type=f32)

    x1 = bn_relu(jnp.einsum("nhwc,cd->nhwd", xq, q(p["w1"])), p["s1"], p["b1"])
    x2 = bn_relu(dil(xq, q(p["w2"]), dilations[0]), p["s2"], p["b2"])
    x3 = bn_relu(dil(xq, q(p["w3"]), dilations[1]), p["s3"], p["b3"])
    x4 = bn_relu(dil(xq, q(p["w4"]), dilations[2]), p["s4"], p["b4"])
    pooled = jnp.mean(xq, axis=(1, 2))                               # adapool(1)
    x5v = jnp.maximum(pooled @ q(p["w5"]) * p["s5"] + p["b5"], 0.0)  # (N, C)
    x5 = jnp.broadcast_to(x5v[:, None, None, :], x1.shape)           # bilinear 1x1->HxW
    cat = jnp.concatenate([x1, x2, x3, x4, x5], axis=-1)
    return bn_relu(jnp.einsum("nhwc,cd->nhwd", cat, q(p["wf"])), p["sf"], p["bf"])


def _fold_bn(gamma, beta, mean, var, eps=1e-5):
    scale = gamma / jnp.sqrt(var + eps)
    bias = beta - mean * scale
    return scale[None, :], bias[None, :]        # shape (1, Cout)


if __name__ == "__main__":
    N, Cin, H, W = 2, 4, 16, 16
    Cout = 32
    dilations = [6, 12, 18]

    key = jax.random.PRNGKey(0)
    ks = jax.random.split(key, 32)

    def bn_params(k, c):
        k1, k2, k3, k4 = jax.random.split(k, 4)
        gamma = 1.0 + 0.1 * jax.random.normal(k1, (c,), jnp.float32)
        beta = 0.1 * jax.random.normal(k2, (c,), jnp.float32)
        mean = 0.1 * jax.random.normal(k3, (c,), jnp.float32)
        var = jnp.abs(jax.random.normal(k4, (c,), jnp.float32)) + 0.5
        return _fold_bn(gamma, beta, mean, var)

    p = {}
    p["w1"] = 0.1 * jax.random.normal(ks[0], (Cin, Cout), jnp.float32)
    p["w2"] = 0.1 * jax.random.normal(ks[1], (3, 3, Cin, Cout), jnp.float32)
    p["w3"] = 0.1 * jax.random.normal(ks[2], (3, 3, Cin, Cout), jnp.float32)
    p["w4"] = 0.1 * jax.random.normal(ks[3], (3, 3, Cin, Cout), jnp.float32)
    p["w5"] = 0.1 * jax.random.normal(ks[4], (Cin, Cout), jnp.float32)
    p["wf"] = 0.1 * jax.random.normal(ks[5], (5 * Cout, Cout), jnp.float32)
    p["s1"], p["b1"] = bn_params(ks[6], Cout)
    p["s2"], p["b2"] = bn_params(ks[7], Cout)
    p["s3"], p["b3"] = bn_params(ks[8], Cout)
    p["s4"], p["b4"] = bn_params(ks[9], Cout)
    p["s5"], p["b5"] = bn_params(ks[10], Cout)
    p["sf"], p["bf"] = bn_params(ks[11], Cout)

    # PyTorch-style NCHW input, transposed to kernel layout NHWC.
    x_nchw = jax.random.normal(ks[12], (N, Cin, H, W), jnp.float32)
    x_nhwc = jnp.transpose(x_nchw, (0, 2, 3, 1))

    out_nhwc = aspp_forward(x_nhwc, p, dilations)
    out_nchw = jnp.transpose(out_nhwc, (0, 3, 1, 2))
    jax.block_until_ready(out_nchw)

    ref = aspp_reference(x_nhwc, p, dilations)
    assert out_nchw.shape == (N, Cout, H, W)
    assert jnp.allclose(out_nhwc, ref, atol=2e-2, rtol=2e-2), "mismatch vs JAX reference"

    print("KERNEL_OK")
</pallas_src>

<mosaic_0001>
module attributes {stable_mosaic.version = 11 : i64} {
  func.func @_aspp_fused_kernel(%arg0: i32, %arg1: i32, %arg2: memref<1x52x52x4xbf16, #tpu.memory_space<vmem>>, %arg3: memref<2x4x128xbf16, #tpu.memory_space<vmem>>, %arg4: memref<3x9x4x128xbf16, #tpu.memory_space<vmem>>, %arg5: memref<640x128xbf16, #tpu.memory_space<vmem>>, %arg6: memref<6x128xf32, #tpu.memory_space<vmem>>, %arg7: memref<6x128xf32, #tpu.memory_space<vmem>>, %arg8: memref<1x8x16x128xf32, #tpu.memory_space<vmem>>, %arg9: memref<128x128xf32, #tpu.memory_space<vmem>>, %arg10: memref<128x128xf32, #tpu.memory_space<vmem>>) attributes {dimension_semantics = [#tpu.dimension_semantics<parallel>, #tpu.dimension_semantics<parallel>], iteration_bounds = array<i64: 2, 2>, scalar_prefetch = 0 : i64, scratch_operands = 2 : i64, tpu.core_type = #tpu.core_type<tc>, window_params = [{transform_indices = @transform_0, window_bounds = array<i64: 1, 52, 52, 4>}, {pipeline_mode = #tpu.pipeline_mode<synchronous>, transform_indices = @transform_1, window_bounds = array<i64: 2, 4, 128>}, {pipeline_mode = #tpu.pipeline_mode<synchronous>, transform_indices = @transform_2, window_bounds = array<i64: 3, 9, 4, 128>}, {pipeline_mode = #tpu.pipeline_mode<synchronous>, transform_indices = @transform_3, window_bounds = array<i64: 640, 128>}, {pipeline_mode = #tpu.pipeline_mode<synchronous>, transform_indices = @transform_4, window_bounds = array<i64: 6, 128>}, {pipeline_mode = #tpu.pipeline_mode<synchronous>, transform_indices = @transform_5, window_bounds = array<i64: 6, 128>}, {transform_indices = @transform_6, window_bounds = array<i64: 1, 8, 16, 128>}]} {
    %c8_i32 = arith.constant 8 : i32
    %0 = arith.muli %arg1, %c8_i32 : i32
    %1 = tpu.assume_multiple %0, 8 : i32
    %c0 = arith.constant 0 : index
    %c0_0 = arith.constant 0 : index
    %c0_1 = arith.constant 0 : index
    %c0_2 = arith.constant 0 : index
    %2 = vector.load %arg2[%c0, %c0_0, %c0_1, %c0_2] : memref<1x52x52x4xbf16, #tpu.memory_space<vmem>>, vector<1x52x52x4xbf16>
    %3 = vector.shape_cast %2 : vector<1x52x52x4xbf16> to vector<52x52x4xbf16>
    %4 = arith.extf %3 : vector<52x52x4xbf16> to vector<52x52x4xf32>
    %cst = arith.constant dense<0.000000e+00> : vector<4xf32>
    %5 = vector.multi_reduction <add>, %4, %cst [0, 1] : vector<52x52x4xf32> to vector<4xf32>
    %cst_3 = arith.constant 3.906250e-03 : f32
    %6 = vector.broadcast %cst_3 : f32 to vector<4xf32>
    %7 = arith.mulf %5, %6 : vector<4xf32>
    %8 = arith.truncf %7 : vector<4xf32> to vector<4xbf16>
    %9 = vector.shape_cast %8 : vector<4xbf16> to vector<1x4xbf16>
    %c1 = arith.constant 1 : index
    %c0_4 = arith.constant 0 : index
    %c0_5 = arith.constant 0 : index
    %10 = vector.load %arg3[%c1, %c0_4, %c0_5] : memref<2x4x128xbf16, #tpu.memory_space<vmem>>, vector<1x4x128xbf16>
    %11 = vector.shape_cast %10 : vector<1x4x128xbf16> to vector<4x128xbf16>
    %cst_6 = arith.constant dense<0.000000e+00> : vector<1x128xf32>
    %12 = tpu.matmul %9, %11, %cst_6 {dimension_numbers = #tpu.dot_dimension_numbers<[1], [0], [0], [1], [0, 0, 1, 1], [], []>} : vector<1x4xbf16>, vector<4x128xbf16>, vector<1x128xf32> -> vector<1x128xf32>
    %c4 = arith.constant 4 : index
    %c0_7 = arith.constant 0 : index
    %13 = vector.load %arg6[%c4, %c0_7] : memref<6x128xf32, #tpu.memory_space<vmem>>, vector<1x128xf32>
    %14 = vector.shape_cast %13 : vector<1x128xf32> to vector<128xf32>
    %15 = vector.shape_cast %14 : vector<128xf32> to vector<1x128xf32>
    %16 = arith.mulf %12, %15 : vector<1x128xf32>
    %c4_8 = arith.constant 4 : index
    %c0_9 = arith.constant 0 : index
    %17 = vector.load %arg7[%c4_8, %c0_9] : memref<6x128xf32, #tpu.memory_space<vmem>>, vector<1x128xf32>
    %18 = vector.shape_cast %17 : vector<1x128xf32> to vector<128xf32>
    %19 = vector.shape_cast %18 : vector<128xf32> to vector<1x128xf32>
    %20 = arith.addf %16, %19 : vector<1x128xf32>
    %cst_10 = arith.constant 0.000000e+00 : f32
    %21 = vector.broadcast %cst_10 : f32 to vector<1x128xf32>
    %22 = arith.maximumf %20, %21 : vector<1x128xf32>
    %23 = arith.truncf %22 : vector<1x128xf32> to vector<1x128xbf16>
    %c512 = arith.constant 512 : index
    %c0_11 = arith.constant 0 : index
    %24 = vector.load %arg5[%c512, %c0_11] : memref<640x128xbf16, #tpu.memory_space<vmem>>, vector<128x128xbf16>
    %cst_12 = arith.constant dense<0.000000e+00> : vector<1x128xf32>
    %25 = tpu.matmul %23, %24, %cst_12 {dimension_numbers = #tpu.dot_dimension_numbers<[1], [0], [0], [1], [0, 0, 1, 1], [], []>} : vector<1x128xbf16>, vector<128x128xbf16>, vector<1x128xf32> -> vector<1x128xf32>
    %26 = vector.shape_cast %25 : vector<1x128xf32> to vector<1x128xf32>
    %27 = vector.broadcast %26 : vector<1x128xf32> to vector<128x128xf32>
    %c0_13 = arith.constant 0 : index
    %c0_14 = arith.constant 0 : index
    %28 = vector.load %arg9[%c0_13, %c0_14] : memref<128x128xf32, #tpu.memory_space<vmem>>, vector<128x128xf32>
    tpu.vector_store %arg9[%c0_13, %c0_14], %27 {strides = array<i32>} : memref<128x128xf32, #tpu.memory_space<vmem>>, vector<128x128xf32>,
    %c18_i32 = arith.constant 18 : i32
    %29 = arith.addi %1, %c18_i32 : i32
    %c0_15 = arith.constant 0 : index
    %30 = arith.index_cast %29 : i32 to index
    %c18 = arith.constant 18 : index
    %c0_16 = arith.constant 0 : index
    %31 = vector.load %arg2[%c0_15, %30, %c18, %c0_16] : memref<1x52x52x4xbf16, #tpu.memory_space<vmem>>, vector<1x8x16x4xbf16>
    %32 = vector.shape_cast %31 : vector<1x8x16x4xbf16> to vector<8x16x4xbf16>
    %33 = vector.shape_cast %32 : vector<8x16x4xbf16> to vector<128x4xbf16>
    %c0_17 = arith.constant 0 : index
    %c0_18 = arith.constant 0 : index
    %c0_19 = arith.constant 0 : index
    %34 = vector.load %arg3[%c0_17, %c0_18, %c0_19] : memref<2x4x128xbf16, #tpu.memory_space<vmem>>, vector<1x4x128xbf16>
    %35 = vector.shape_cast %34 : vector<1x4x128xbf16> to vector<4x128xbf16>
    %cst_20 = arith.constant dense<0.000000e+00> : vector<128x128xf32>
    %36 = tpu.matmul %33, %35, %cst_20 {dimension_numbers = #tpu.dot_dimension_numbers<[1], [0], [0], [1], [0, 0, 1, 1], [], []>} : vector<128x4xbf16>, vector<4x128xbf16>, vector<128x128xf32> -> vector<128x128xf32>
    %c0_21 = arith.constant 0 : index
    %c0_22 = arith.constant 0 : index
    %37 = vector.load %arg6[%c0_21, %c0_22] : memref<6x128xf32, #tpu.memory_space<vmem>>, vector<1x128xf32>
    %38 = vector.shape_cast %37 : vector<1x128xf32> to vector<128xf32>
    %39 = vector.shape_cast %38 : vector<128xf32> to vector<1x128xf32>
    %40 = vector.broadcast %39 : vector<1x128xf32> to vector<128x128xf32>
    %41 = arith.mulf %36, %40 : vector<128x128xf32>
    %c0_23 = arith.constant 0 : index
    %c0_24 = arith.constant 0 : index
    %42 = vector.load %arg7[%c0_23, %c0_24] : memref<6x128xf32, #tpu.memory_space<vmem>>, vector<1x128xf32>
    %43 = vector.shape_cast %42 : vector<1x128xf32> to vector<128xf32>
    %44 = vector.shape_cast %43 : vector<128xf32> to vector<1x128xf32>
    %45 = vector.broadcast %44 : vector<1x128xf32> to vector<128x128xf32>
    %46 = arith.addf %41, %45 : vector<128x128xf32>
    %cst_25 = arith.constant 0.000000e+00 : f32
    %47 = vector.broadcast %cst_25 : f32 to vector<128x128xf32>
    %48 = arith.maximumf %46, %47 : vector<128x128xf32>
    %49 = arith.truncf %48 : vector<128x128xf32> to vector<128x128xbf16>
    %c0_26 = arith.constant 0 : index
    %c0_27 = arith.constant 0 : index
    %50 = vector.load %arg9[%c0_26, %c0_27] : memref<128x128xf32, #tpu.memory_space<vmem>>, vector<128x128xf32>
    %c0_28 = arith.constant 0 : index
    %c0_29 = arith.constant 0 : index
    %51 = vector.load %arg5[%c0_28, %c0_29] : memref<640x128xbf16, #tpu.memory_space<vmem>>, vector<128x128xbf16>
    %cst_30 = arith.constant dense<0.000000e+00> : vector<128x128xf32>
    %52 = tpu.matmul %49, %51, %cst_30 {dimension_numbers = #tpu.dot_dimension_numbers<[1], [0], [0], [1], [0, 0, 1, 1], [], []>} : vector<128x128xbf16>, vector<128x128xbf16>, vector<128x128xf32> -> vector<128x128xf32>
    %53 = arith.addf %50, %52 : vector<128x128xf32>
    %c0_31 = arith.constant 0 : index
    %c0_32 = arith.constant 0 : index
    %54 = vector.load %arg9[%c0_31, %c0_32] : memref<128x128xf32, #tpu.memory_space<vmem>>, vector<128x128xf32>
    tpu.vector_store %arg9[%c0_31, %c0_32], %53 {strides = array<i32>} : memref<128x128xf32, #tpu.memory_space<vmem>>, vector<128x128xf32>,
    %cst_33 = arith.constant 0.000000e+00 : f32
    %55 = vector.broadcast %cst_33 : f32 to vector<128x128xf32>
    %c0_34 = arith.constant 0 : index
    %c0_35 = arith.constant 0 : index
    %56 = vector.load %arg10[%c0_34, %c0_35] : memref<128x128xf32, #tpu.memory_space<vmem>>, vector<128x128xf32>
    tpu.vector_store %arg10[%c0_34, %c0_35], %55 {strides = array<i32>} : memref<128x128xf32, #tpu.memory_space<vmem>>, vector<128x128xf32>,
    %c18_i32_36 = arith.constant 18 : i32
    %57 = arith.addi %1, %c18_i32_36 : i32
    %c-6_i32 = arith.constant -6 : i32
    %58 = arith.addi %57, %c-6_i32 : i32
    %c0_37 = arith.constant 0 : index
    %59 = arith.index_cast %58 : i32 to index
    %c12 = arith.constant 12 : index
    %c0_38 = arith.constant 0 : index
    %60 = vector.load %arg2[%c0_37, %59, %c12, %c0_38] : memref<1x52x52x4xbf16, #tpu.memory_space<vmem>>, vector<1x8x16x4xbf16>
    %61 = vector.shape_cast %60 : vector<1x8x16x4xbf16> to vector<8x16x4xbf16>
    %62 = vector.shape_cast %61 : vector<8x16x4xbf16> to vector<128x4xbf16>
    %c0_39 = arith.constant 0 : index
    %c0_40 = arith.constant 0 : index
    %63 = vector.load %arg10[%c0_39, %c0_40] : memref<128x128xf32, #tpu.memory_space<vmem>>, vector<128x128xf32>
    %c0_41 = arith.constant 0 : index
    %c0_42 = arith.constant 0 : index
    %c0_43 = arith.constant 0 : index
    %c0_44 = arith.constant 0 : index
    %64 = vector.load %arg4[%c0_41, %c0_42, %c0_43, %c0_44] : memref<3x9x4x128xbf16, #tpu.memory_space<vmem>>, vector<1x1x4x128xbf16>
    %65 = vector.shape_cast %64 : vector<1x1x4x128xbf16> to vector<4x128xbf16>
    %cst_45 = arith.constant dense<0.000000e+00> : vector<128x128xf32>
    %66 = tpu.matmul %62, %65, %cst_45 {dimension_numbers = #tpu.dot_dimension_numbers<[1], [0], [0], [1], [0, 0, 1, 1], [], []>} : vector<128x4xbf16>, vector<4x128xbf16>, vector<128x128xf32> -> vector<128x128xf32>
    %67 = arith.addf %63, %66 : vector<128x128xf32>
    %c0_46 = arith.constant 0 : index
    %c0_47 = arith.constant 0 : index
    %68 = vector.load %arg10[%c0_46, %c0_47] : memref<128x128xf32, #tpu.memory_space<vmem>>, vector<128x128xf32>
    tpu.vector_store %arg10[%c0_46, %c0_47], %67 {strides = array<i32>} : memref<128x128xf32, #tpu.memory_space<vmem>>, vector<128x128xf32>,
    %c18_i32_48 = arith.constant 18 : i32
    %69 = arith.addi %1, %c18_i32_48 : i32
    %c-6_i32_49 = arith.constant -6 : i32
    %70 = arith.addi %69, %c-6_i32_49 : i32
    %c0_50 = arith.constant 0 : index
    %71 = arith.index_cast %70 : i32 to index
    %c18_51 = arith.constant 18 : index
    %c0_52 = arith.constant 0 : index
    %72 = vector.load %arg2[%c0_50, %71, %c18_51, %c0_52] : memref<1x52x52x4xbf16, #tpu.memory_space<vmem>>, vector<1x8x16x4xbf16>
    %73 = vector.shape_cast %72 : vector<1x8x16x4xbf16> to vector<8x16x4xbf16>
    %74 = vector.shape_cast %73 : vector<8x16x4xbf16> to vector<128x4xbf16>
    %c0_53 = arith.constant 0 : index
    %c0_54 = arith.constant 0 : index
    %75 = vector.load %arg10[%c0_53, %c0_54] : memref<128x128xf32, #tpu.memory_space<vmem>>, vector<128x128xf32>
    %c0_55 = arith.constant 0 : index
    %c1_56 = arith.constant 1 : index
    %c0_57 = arith.constant 0 : index
    %c0_58 = arith.constant 0 : index
    %76 = vector.load %arg4[%c0_55, %c1_56, %c0_57, %c0_58] : memref<3x9x4x128xbf16, #tpu.memory_space<vmem>>, vector<1x1x4x128xbf16>
    %77 = vector.shape_cast %76 : vector<1x1x4x128xbf16> to vector<4x128xbf16>
    %cst_59 = arith.constant dense<0.000000e+00> : vector<128x128xf32>
    %78 = tpu.matmul %74, %77, %cst_59 {dimension_numbers = #tpu.dot_dimension_numbers<[1], [0], [0], [1], [0, 0, 1, 1], [], []>} : vector<128x4xbf16>, vector<4x128xbf16>, vector<128x128xf32> -> vector<128x128xf32>
    %79 = arith.addf %75, %78 : vector<128x128xf32>
    %c0_60 = arith.constant 0 : index
    %c0_61 = arith.constant 0 : index
    %80 = vector.load %arg10[%c0_60, %c0_61] : memref<128x128xf32, #tpu.memory_space<vmem>>, vector<128x128xf32>
    tpu.vector_store %arg10[%c0_60, %c0_61], %79 {strides = array<i32>} : memref<128x128xf32, #tpu.memory_space<vmem>>, vector<128x128xf32>,
    %c18_i32_62 = arith.constant 18 : i32
    %81 = arith.addi %1, %c18_i32_62 : i32
    %c-6_i32_63 = arith.constant -6 : i32
    %82 = arith.addi %81, %c-6_i32_63 : i32
    %c0_64 = arith.constant 0 : index
    %83 = arith.index_cast %82 : i32 to index
    %c24 = arith.constant 24 : index
    %c0_65 = arith.constant 0 : index
    %84 = vector.load %arg2[%c0_64, %83, %c24, %c0_65] : memref<1x52x52x4xbf16, #tpu.memory_space<vmem>>, vector<1x8x16x4xbf16>
    %85 = vector.shape_cast %84 : vector<1x8x16x4xbf16> to vector<8x16x4xbf16>
    %86 = vector.shape_cast %85 : vector<8x16x4xbf16> to vector<128x4xbf16>
    %c0_66 = arith.constant 0 : index
    %c0_67 = arith.constant 0 : index
    %87 = vector.load %arg10[%c0_66, %c0_67] : memref<128x128xf32, #tpu.memory_space<vmem>>, vector<128x128xf32>
    %c0_68 = arith.constant 0 : index
    %c2 = arith.constant 2 : index
    %c0_69 = arith.constant 0 : index
    %c0_70 = arith.constant 0 : index
    %88 = vector.load %arg4[%c0_68, %c2, %c0_69, %c0_70] : memref<3x9x4x128xbf16, #tpu.memory_space<vmem>>, vector<1x1x4x128xbf16>
    %89 = vector.shape_cast %88 : vector<1x1x4x128xbf16> to vector<4x128xbf16>
    %cst_71 = arith.constant dense<0.000000e+00> : vector<128x128xf32>
    %90 = tpu.matmul %86, %89, %cst_71 {dimension_numbers = #tpu.dot_dimension_numbers<[1], [0], [0], [1], [0, 0, 1, 1], [], []>} : vector<128x4xbf16>, vector<4x128xbf16>, vector<128x128xf32> -> vector<128x128xf32>
    %91 = arith.addf %87, %90 : vector<128x128xf32>
    %c0_72 = arith.constant 0 : index
    %c0_73 = arith.constant 0 : index
    %92 = vector.load %arg10[%c0_72, %c0_73] : memref<128x128xf32, #tpu.memory_space<vmem>>, vector<128x128xf32>
    tpu.vector_store %arg10[%c0_72, %c0_73], %91 {strides = array<i32>} : memref<128x128xf32, #tpu.memory_space<vmem>>, vector<128x128xf32>,
    %c18_i32_74 = arith.constant 18 : i32
    %93 = arith.addi %1, %c18_i32_74 : i32
    %c0_i32 = arith.constant 0 : i32
    %94 = arith.addi %93, %c0_i32 : i32
    %c0_75 = arith.constant 0 : index
    %95 = arith.index_cast %94 : i32 to index
    %c12_76 = arith.constant 12 : index
    %c0_77 = arith.constant 0 : index
    %96 = vector.load %arg2[%c0_75, %95, %c12_76, %c0_77] : memref<1x52x52x4xbf16, #tpu.memory_space<vmem>>, vector<1x8x16x4xbf16>
    %97 = vector.shape_cast %96 : vector<1x8x16x4xbf16> to vector<8x16x4xbf16>
    %98 = vector.shape_cast %97 : vector<8x16x4xbf16> to vector<128x4xbf16>
    %c0_78 = arith.constant 0 : index
    %c0_79 = arith.constant 0 : index
    %99 = vector.load %arg10[%c0_78, %c0_79] : memref<128x128xf32, #tpu.memory_space<vmem>>, vector<128x128xf32>
    %c0_80 = arith.constant 0 : index
    %c3 = arith.constant 3 : index
    %c0_81 = arith.constant 0 : index
    %c0_82 = arith.constant 0 : index
    %100 = vector.load %arg4[%c0_80, %c3, %c0_81, %c0_82] : memref<3x9x4x128xbf16, #tpu.memory_space<vmem>>, vector<1x1x4x128xbf16>
    %101 = vector.shape_cast %100 : vector<1x1x4x128xbf16> to vector<4x128xbf16>
    %cst_83 = arith.constant dense<0.000000e+00> : vector<128x128xf32>
    %102 = tpu.matmul %98, %101, %cst_83 {dimension_numbers = #tpu.dot_dimension_numbers<[1], [0], [0], [1], [0, 0, 1, 1], [], []>} : vector<128x4xbf16>, vector<4x128xbf16>, vector<128x128xf32> -> vector<128x128xf32>
    %103 = arith.addf %99, %102 : vector<128x128xf32>
    %c0_84 = arith.constant 0 : index
    %c0_85 = arith.constant 0 : index
    %104 = vector.load %arg10[%c0_84, %c0_85] : memref<128x128xf32, #tpu.memory_space<vmem>>, vector<128x128xf32>
    tpu.vector_store %arg10[%c0_84, %c0_85], %103 {strides = array<i32>} : memref<128x128xf32, #tpu.memory_space<vmem>>, vector<128x128xf32>,
    %c18_i32_86 = arith.constant 18 : i32
    %105 = arith.addi %1, %c18_i32_86 : i32
    %c0_i32_87 = arith.constant 0 : i32
    %106 = arith.addi %105, %c0_i32_87 : i32
    %c0_88 = arith.constant 0 : index
    %107 = arith.index_cast %106 : i32 to index
    %c18_89 = arith.constant 18 : index
    %c0_90 = arith.constant 0 : index
    %108 = vector.load %arg2[%c0_88, %107, %c18_89, %c0_90] : memref<1x52x52x4xbf16, #tpu.memory_space<vmem>>, vector<1x8x16x4xbf16>
    %109 = vector.shape_cast %108 : vector<1x8x16x4xbf16> to vector<8x16x4xbf16>
    %110 = vector.shape_cast %109 : vector<8x16x4xbf16> to vector<128x4xbf16>
    %c0_91 = arith.constant 0 : index
    %c0_92 = arith.constant 0 : index
    %111 = vector.load %arg10[%c0_91, %c0_92] : memref<128x128xf32, #tpu.memory_space<vmem>>, vector<128x128xf32>
    %c0_93 = arith.constant 0 : index
    %c4_94 = arith.constant 4 : index
    %c0_95 = arith.constant 0 : index
    %c0_96 = arith.constant 0 : index
    %112 = vector.load %arg4[%c0_93, %c4_94, %c0_95, %c0_96] : memref<3x9x4x128xbf16, #tpu.memory_space<vmem>>, vector<1x1x4x128xbf16>
    %113 = vector.shape_cast %112 : vector<1x1x4x128xbf16> to vector<4x128xbf16>
    %cst_97 = arith.constant dense<0.000000e+00> : vector<128x128xf32>
    %114 = tpu.matmul %110, %113, %cst_97 {dimension_numbers = #tpu.dot_dimension_numbers<[1], [0], [0], [1], [0, 0, 1, 1], [], []>} : vector<128x4xbf16>, vector<4x128xbf16>, vector<128x128xf32> -> vector<128x128xf32>
    %115 = arith.addf %111, %114 : vector<128x128xf32>
    %c0_98 = arith.constant 0 : index
    %c0_99 = arith.constant 0 : index
    %116 = vector.load %arg10[%c0_98, %c0_99] : memref<128x128xf32, #tpu.memory_space<vmem>>, vector<128x128xf32>
    tpu.vector_store %arg10[%c0_98, %c0_99], %115 {strides = array<i32>} : memref<128x128xf32, #tpu.memory_space<vmem>>, vector<128x128xf32>,
    %c18_i32_100 = arith.constant 18 : i32
    %117 = arith.addi %1, %c18_i32_100 : i32
    %c0_i32_101 = arith.constant 0 : i32
    %118 = arith.addi %117, %c0_i32_101 : i32
    %c0_102 = arith.constant 0 : index
    %119 = arith.index_cast %118 : i32 to index
    %c24_103 = arith.constant 24 : index
    %c0_104 = arith.constant 0 : index
    %120 = vector.load %arg2[%c0_102, %119, %c24_103, %c0_104] : memref<1x52x52x4xbf16, #tpu.memory_space<vmem>>, vector<1x8x16x4xbf16>
    %121 = vector.shape_cast %120 : vector<1x8x16x4xbf16> to vector<8x16x4xbf16>
    %122 = vector.shape_cast %121 : vector<8x16x4xbf16> to vector<128x4xbf16>
    %c0_105 = arith.constant 0 : index
    %c0_106 = arith.constant 0 : index
    %123 = vector.load %arg10[%c0_105, %c0_106] : memref<128x128xf32, #tpu.memory_space<vmem>>, vector<128x128xf32>
    %c0_107 = arith.constant 0 : index
    %c5 = arith.constant 5 : index
    %c0_108 = arith.constant 0 : index
    %c0_109 = arith.constant 0 : index
    %124 = vector.load %arg4[%c0_107, %c5, %c0_108, %c0_109] : memref<3x9x4x128xbf16, #tpu.memory_space<vmem>>, vector<1x1x4x128xbf16>
    %125 = vector.shape_cast %124 : vector<1x1x4x128xbf16> to vector<4x128xbf16>
    %cst_110 = arith.constant dense<0.000000e+00> : vector<128x128xf32>
    %126 = tpu.matmul %122, %125, %cst_110 {dimension_numbers = #tpu.dot_dimension_numbers<[1], [0], [0], [1], [0, 0, 1, 1], [], []>} : vector<128x4xbf16>, vector<4x128xbf16>, vector<128x128xf32> -> vector<128x128xf32>
    %127 = arith.addf %123, %126 : vector<128x128xf32>
    %c0_111 = arith.constant 0 : index
    %c0_112 = arith.constant 0 : index
    %128 = vector.load %arg10[%c0_111, %c0_112] : memref<128x128xf32, #tpu.memory_space<vmem>>, vector<128x128xf32>
    tpu.vector_store %arg10[%c0_111, %c0_112], %127 {strides = array<i32>} : memref<128x128xf32, #tpu.memory_space<vmem>>, vector<128x128xf32>,
    %c18_i32_113 = arith.constant 18 : i32
    %129 = arith.addi %1, %c18_i32_113 : i32
    %c6_i32 = arith.constant 6 : i32
    %130 = arith.addi %129, %c6_i32 : i32
    %c0_114 = arith.constant 0 : index
    %131 = arith.index_cast %130 : i32 to index
    %c12_115 = arith.constant 12 : index
    %c0_116 = arith.constant 0 : index
    %132 = vector.load %arg2[%c0_114, %131, %c12_115, %c0_116] : memref<1x52x52x4xbf16, #tpu.memory_space<vmem>>, vector<1x8x16x4xbf16>
    %133 = vector.shape_cast %132 : vector<1x8x16x4xbf16> to vector<8x16x4xbf16>
    %134 = vector.shape_cast %133 : vector<8x16x4xbf16> to vector<128x4xbf16>
    %c0_117 = arith.constant 0 : index
    %c0_118 = arith.constant 0 : index
    %135 = vector.load %arg10[%c0_117, %c0_118] : memref<128x128xf32, #tpu.memory_space<vmem>>, vector<128x128xf32>
    %c0_119 = arith.constant 0 : index
    %c6 = arith.constant 6 : index
    %c0_120 = arith.constant 0 : index
    %c0_121 = arith.constant 0 : index
    %136 = vector.load %arg4[%c0_119, %c6, %c0_120, %c0_121] : memref<3x9x4x128xbf16, #tpu.memory_space<vmem>>, vector<1x1x4x128xbf16>
    %137 = vector.shape_cast %136 : vector<1x1x4x128xbf16> to vector<4x128xbf16>
    %cst_122 = arith.constant dense<0.000000e+00> : vector<128x128xf32>
    %138 = tpu.matmul %134, %137, %cst_122 {dimension_numbers = #tpu.dot_dimension_numbers<[1], [0], [0], [1], [0, 0, 1, 1], [], []>} : vector<128x4xbf16>, vector<4x128xbf16>, vector<128x128xf32> -> vector<128x128xf32>
    %139 = arith.addf %135, %138 : vector<128x128xf32>
    %c0_123 = arith.constant 0 : index
    %c0_124 = arith.constant 0 : index
    %140 = vector.load %arg10[%c0_123, %c0_124] : memref<128x128xf32, #tpu.memory_space<vmem>>, vector<128x128xf32>
    tpu.vector_store %arg10[%c0_123, %c0_124], %139 {strides = array<i32>} : memref<128x128xf32, #tpu.memory_space<vmem>>, vector<128x128xf32>,
    %c18_i32_125 = arith.constant 18 : i32
    %141 = arith.addi %1, %c18_i32_125 : i32
    %c6_i32_126 = arith.constant 6 : i32
    %142 = arith.addi %141, %c6_i32_126 : i32
    %c0_127 = arith.constant 0 : index
    %143 = arith.index_cast %142 : i32 to index
    %c18_128 = arith.constant 18 : index
    %c0_129 = arith.constant 0 : index
    %144 = vector.load %arg2[%c0_127, %143, %c18_128, %c0_129] : memref<1x52x52x4xbf16, #tpu.memory_space<vmem>>, vector<1x8x16x4xbf16>
    %145 = vector.shape_cast %144 : vector<1x8x16x4xbf16> to vector<8x16x4xbf16>
    %146 = vector.shape_cast %145 : vector<8x16x4xbf16> to vector<128x4xbf16>
    %c0_130 = arith.constant 0 : index
    %c0_131 = arith.constant 0 : index
    %147 = vector.load %arg10[%c0_130, %c0_131] : memref<128x128xf32, #tpu.memory_space<vmem>>, vector<128x128xf32>
    %c0_132 = arith.constant 0 : index
    %c7 = arith.constant 7 : index
    %c0_133 = arith.constant 0 : index
    %c0_134 = arith.constant 0 : index
    %148 = vector.load %arg4[%c0_132, %c7, %c0_133, %c0_134] : memref<3x9x4x128xbf16, #tpu.memory_space<vmem>>, vector<1x1x4x128xbf16>
    %149 = vector.shape_cast %148 : vector<1x1x4x128xbf16> to vector<4x128xbf16>
    %cst_135 = arith.constant dense<0.000000e+00> : vector<128x128xf32>
    %150 = tpu.matmul %146, %149, %cst_135 {dimension_numbers = #tpu.dot_dimension_numbers<[1], [0], [0], [1], [0, 0, 1, 1], [], []>} : vector<128x4xbf16>, vector<4x128xbf16>, vector<128x128xf32> -> vector<128x128xf32>
    %151 = arith.addf %147, %150 : vector<128x128xf32>
    %c0_136 = arith.constant 0 : index
    %c0_137 = arith.constant 0 : index
    %152 = vector.load %arg10[%c0_136, %c0_137] : memref<128x128xf32, #tpu.memory_space<vmem>>, vector<128x128xf32>
    tpu.vector_store %arg10[%c0_136, %c0_137], %151 {strides = array<i32>} : memref<128x128xf32, #tpu.memory_space<vmem>>, vector<128x128xf32>,
    %c18_i32_138 = arith.constant 18 : i32
    %153 = arith.addi %1, %c18_i32_138 : i32
    %c6_i32_139 = arith.constant 6 : i32
    %154 = arith.addi %153, %c6_i32_139 : i32
    %c0_140 = arith.constant 0 : index
    %155 = arith.index_cast %154 : i32 to index
    %c24_141 = arith.constant 24 : index
    %c0_142 = arith.constant 0 : index
    %156 = vector.load %arg2[%c0_140, %155, %c24_141, %c0_142] : memref<1x52x52x4xbf16, #tpu.memory_space<vmem>>, vector<1x8x16x4xbf16>
    %157 = vector.shape_cast %156 : vector<1x8x16x4xbf16> to vector<8x16x4xbf16>
    %158 = vector.shape_cast %157 : vector<8x16x4xbf16> to vector<128x4xbf16>
    %c0_143 = arith.constant 0 : index
    %c0_144 = arith.constant 0 : index
    %159 = vector.load %arg10[%c0_143, %c0_144] : memref<128x128xf32, #tpu.memory_space<vmem>>, vector<128x128xf32>
    %c0_145 = arith.constant 0 : index
    %c8 = arith.constant 8 : index
    %c0_146 = arith.constant 0 : index
    %c0_147 = arith.constant 0 : index
    %160 = vector.load %arg4[%c0_145, %c8, %c0_146, %c0_147] : memref<3x9x4x128xbf16, #tpu.memory_space<vmem>>, vector<1x1x4x128xbf16>
    %161 = vector.shape_cast %160 : vector<1x1x4x128xbf16> to vector<4x128xbf16>
    %cst_148 = arith.constant dense<0.000000e+00> : vector<128x128xf32>
    %162 = tpu.matmul %158, %161, %cst_148 {dimension_numbers = #tpu.dot_dimension_numbers<[1], [0], [0], [1], [0, 0, 1, 1], [], []>} : vector<128x4xbf16>, vector<4x128xbf16>, vector<128x128xf32> -> vector<128x128xf32>
    %163 = arith.addf %159, %162 : vector<128x128xf32>
    %c0_149 = arith.constant 0 : index
    %c0_150 = arith.constant 0 : index
    %164 = vector.load %arg10[%c0_149, %c0_150] : memref<128x128xf32, #tpu.memory_space<vmem>>, vector<128x128xf32>
    tpu.vector_store %arg10[%c0_149, %c0_150], %163 {strides = array<i32>} : memref<128x128xf32, #tpu.memory_space<vmem>>, vector<128x128xf32>,
    %c0_151 = arith.constant 0 : index
    %c0_152 = arith.constant 0 : index
    %165 = vector.load %arg10[%c0_151, %c0_152] : memref<128x128xf32, #tpu.memory_space<vmem>>, vector<128x128xf32>
    %c1_153 = arith.constant 1 : index
    %c0_154 = arith.constant 0 : index
    %166 = vector.load %arg6[%c1_153, %c0_154] : memref<6x128xf32, #tpu.memory_space<vmem>>, vector<1x128xf32>
    %167 = vector.shape_cast %166 : vector<1x128xf32> to vector<128xf32>
    %168 = vector.shape_cast %167 : vector<128xf32> to vector<1x128xf32>
    %169 = vector.broadcast %168 : vector<1x128xf32> to vector<128x128xf32>
    %170 = arith.mulf %165, %169 : vector<128x128xf32>
    %c1_155 = arith.constant 1 : index
    %c0_156 = arith.constant 0 : index
    %171 = vector.load %arg7[%c1_155, %c0_156] : memref<6x128xf32, #tpu.memory_space<vmem>>, vector<1x128xf32>
    %172 = vector.shape_cast %171 : vector<1x128xf32> to vector<128xf32>
    %173 = vector.shape_cast %172 : vector<128xf32> to vector<1x128xf32>
    %174 = vector.broadcast %173 : vector<1x128xf32> to vector<128x128xf32>
    %175 = arith.addf %170, %174 : vector<128x128xf32>
    %cst_157 = arith.constant 0.000000e+00 : f32
    %176 = vector.broadcast %cst_157 : f32 to vector<128x128xf32>
    %177 = arith.maximumf %175, %176 : vector<128x128xf32>
    %178 = arith.truncf %177 : vector<128x128xf32> to vector<128x128xbf16>
    %c0_158 = arith.constant 0 : index
    %c0_159 = arith.constant 0 : index
    %179 = vector.load %arg9[%c0_158, %c0_159] : memref<128x128xf32, #tpu.memory_space<vmem>>, vector<128x128xf32>
    %c128 = arith.constant 128 : index
    %c0_160 = arith.constant 0 : index
    %180 = vector.load %arg5[%c128, %c0_160] : memref<640x128xbf16, #tpu.memory_space<vmem>>, vector<128x128xbf16>
    %cst_161 = arith.constant dense<0.000000e+00> : vector<128x128xf32>
    %181 = tpu.matmul %178, %180, %cst_161 {dimension_numbers = #tpu.dot_dimension_numbers<[1], [0], [0], [1], [0, 0, 1, 1], [], []>} : vector<128x128xbf16>, vector<128x128xbf16>, vector<128x128xf32> -> vector<128x128xf32>
    %182 = arith.addf %179, %181 : vector<128x128xf32>
    %c0_162 = arith.constant 0 : index
    %c0_163 = arith.constant 0 : index
    %183 = vector.load %arg9[%c0_162, %c0_163] : memref<128x128xf32, #tpu.memory_space<vmem>>, vector<128x128xf32>
    tpu.vector_store %arg9[%c0_162, %c0_163], %182 {strides = array<i32>} : memref<128x128xf32, #tpu.memory_space<vmem>>, vector<128x128xf32>,
    %cst_164 = arith.constant 0.000000e+00 : f32
    %184 = vector.broadcast %cst_164 : f32 to vector<128x128xf32>
    %c0_165 = arith.constant 0 : index
    %c0_166 = arith.constant 0 : index
    %185 = vector.load %arg10[%c0_165, %c0_166] : memref<128x128xf32, #tpu.memory_space<vmem>>, vector<128x128xf32>
    tpu.vector_store %arg10[%c0_165, %c0_166], %184 {strides = array<i32>} : memref<128x128xf32, #tpu.memory_space<vmem>>, vector<128x128xf32>,
    %c18_i32_167 = arith.constant 18 : i32
    %186 = arith.addi %1, %c18_i32_167 : i32
    %c-12_i32 = arith.constant -12 : i32
    %187 = arith.addi %186, %c-12_i32 : i32
    %c0_168 = arith.constant 0 : index
    %188 = arith.index_cast %187 : i32 to index
    %c6_169 = arith.constant 6 : index
    %c0_170 = arith.constant 0 : index
    %189 = vector.load %arg2[%c0_168, %188, %c6_169, %c0_170] : memref<1x52x52x4xbf16, #tpu.memory_space<vmem>>, vector<1x8x16x4xbf16>
    %190 = vector.shape_cast %189 : vector<1x8x16x4xbf16> to vector<8x16x4xbf16>
    %191 = vector.shape_cast %190 : vector<8x16x4xbf16> to vector<128x4xbf16>
    %c0_171 = arith.constant 0 : index
    %c0_172 = arith.constant 0 : index
    %192 = vector.load %arg10[%c0_171, %c0_172] : memref<128x128xf32, #tpu.memory_space<vmem>>, vector<128x128xf32>
    %c1_173 = arith.constant 1 : index
    %c0_174 = arith.constant 0 : index
    %c0_175 = arith.constant 0 : index
    %c0_176 = arith.constant 0 : index
    %193 = vector.load %arg4[%c1_173, %c0_174, %c0_175, %c0_176] : memref<3x9x4x128xbf16, #tpu.memory_space<vmem>>, vector<1x1x4x128xbf16>
    %194 = vector.shape_cast %193 : vector<1x1x4x128xbf16> to vector<4x128xbf16>
    %cst_177 = arith.constant dense<0.000000e+00> : vector<128x128xf32>
    %195 = tpu.matmul %191, %194, %cst_177 {dimension_numbers = #tpu.dot_dimension_numbers<[1], [0], [0], [1], [0, 0, 1, 1], [], []>} : vector<128x4xbf16>, vector<4x128xbf16>, vector<128x128xf32> -> vector<128x128xf32>
    %196 = arith.addf %192, %195 : vector<128x128xf32>
    %c0_178 = arith.constant 0 : index
    %c0_179 = arith.constant 0 : index
    %197 = vector.load %arg10[%c0_178, %c0_179] : memref<128x128xf32, #tpu.memory_space<vmem>>, vector<128x128xf32>
    tpu.vector_store %arg10[%c0_178, %c0_179], %196 {strides = array<i32>} : memref<128x128xf32, #tpu.memory_space<vmem>>, vector<128x128xf32>,
    %c18_i32_180 = arith.constant 18 : i32
    %198 = arith.addi %1, %c18_i32_180 : i32
    %c-12_i32_181 = arith.constant -12 : i32
    %199 = arith.addi %198, %c-12_i32_181 : i32
    %c0_182 = arith.constant 0 : index
    %200 = arith.index_cast %199 : i32 to index
    %c18_183 = arith.constant 18 : index
    %c0_184 = arith.constant 0 : index
    %201 = vector.load %arg2[%c0_182, %200, %c18_183, %c0_184] : memref<1x52x52x4xbf16, #tpu.memory_space<vmem>>, vector<1x8x16x4xbf16>
    %202 = vector.shape_cast %201 : vector<1x8x16x4xbf16> to vector<8x16x4xbf16>
    %203 = vector.shape_cast %202 : vector<8x16x4xbf16> to vector<128x4xbf16>
    %c0_185 = arith.constant 0 : index
    %c0_186 = arith.constant 0 : index
    %204 = vector.load %arg10[%c0_185, %c0_186] : memref<128x128xf32, #tpu.memory_space<vmem>>, vector<128x128xf32>
    %c1_187 = arith.constant 1 : index
    %c1_188 = arith.constant 1 : index
    %c0_189 = arith.constant 0 : index
    %c0_190 = arith.constant 0 : index
    %205 = vector.load %arg4[%c1_187, %c1_188, %c0_189, %c0_190] : memref<3x9x4x128xbf16, #tpu.memory_space<vmem>>, vector<1x1x4x128xbf16>
    %206 = vector.shape_cast %205 : vector<1x1x4x128xbf16> to vector<4x128xbf16>
    %cst_191 = arith.constant dense<0.000000e+00> : vector<128x128xf32>
    %207 = tpu.matmul %203, %206, %cst_191 {dimension_numbers = #tpu.dot_dimension_numbers<[1], [0], [0], [1], [0, 0, 1, 1], [], []>} : vector<128x4xbf16>, vector<4x128xbf16>, vector<128x128xf32> -> vector<128x128xf32>
    %208 = arith.addf %204, %207 : vector<128x128xf32>
    %c0_192 = arith.constant 0 : index
    %c0_193 = arith.constant 0 : index
    %209 = vector.load %arg10[%c0_192, %c0_193] : memref<128x128xf32, #tpu.memory_space<vmem>>, vector<128x128xf32>
    tpu.vector_store %arg10[%c0_192, %c0_193], %208 {strides = array<i32>} : memref<128x128xf32, #tpu.memory_space<vmem>>, vector<128x128xf32>,
    %c18_i32_194 = arith.constant 18 : i32
    %210 = arith.addi %1, %c18_i32_194 : i32
    %c-12_i32_195 = arith.constant -12 : i32
    %211 = arith.addi %210, %c-12_i32_195 : i32
    %c0_196 = arith.constant 0 : index
    %212 = arith.index_cast %211 : i32 to index
    %c30 = arith.constant 30 : index
    %c0_197 = arith.constant 0 : index
    %213 = vector.load %arg2[%c0_196, %212, %c30, %c0_197] : memref<1x52x52x4xbf16, #tpu.memory_space<vmem>>, vector<1x8x16x4xbf16>
    %214 = vector.shape_cast %213 : vector<1x8x16x4xbf16> to vector<8x16x4xbf16>
    %215 = vector.shape_cast %214 : vector<8x16x4xbf16> to vector<128x4xbf16>
    %c0_198 = arith.constant 0 : index
    %c0_199 = arith.constant 0 : index
    %216 = vector.load %arg10[%c0_198, %c0_199] : memref<128x128xf32, #tpu.memory_space<vmem>>, vector<128x128xf32>
    %c1_200 = arith.constant 1 : index
    %c2_201 = arith.constant 2 : index
    %c0_202 = arith.constant 0 : index
    %c0_203 = arith.constant 0 : index
    %217 = vector.load %arg4[%c1_200, %c2_201, %c0_202, %c0_203] : memref<3x9x4x128xbf16, #tpu.memory_space<vmem>>, vector<1x1x4x128xbf16>
    %218 = vector.shape_cast %217 : vector<1x1x4x128xbf16> to vector<4x128xbf16>
    %cst_204 = arith.constant dense<0.000000e+00> : vector<128x128xf32>
    %219 = tpu.matmul %215, %218, %cst_204 {dimension_numbers = #tpu.dot_dimension_numbers<[1], [0], [0], [1], [0, 0, 1, 1], [], []>} : vector<128x4xbf16>, vector<4x128xbf16>, vector<128x128xf32> -> vector<128x128xf32>
    %220 = arith.addf %216, %219 : vector<128x128xf32>
    %c0_205 = arith.constant 0 : index
    %c0_206 = arith.constant 0 : index
    %221 = vector.load %arg10[%c0_205, %c0_206] : memref<128x128xf32, #tpu.memory_space<vmem>>, vector<128x128xf32>
    tpu.vector_store %arg10[%c0_205, %c0_206], %220 {strides = array<i32>} : memref<128x128xf32, #tpu.memory_space<vmem>>, vector<128x128xf32>,
    %c18_i32_207 = arith.constant 18 : i32
    %222 = arith.addi %1, %c18_i32_207 : i32
    %c0_i32_208 = arith.constant 0 : i32
    %223 = arith.addi %222, %c0_i32_208 : i32
    %c0_209 = arith.constant 0 : index
    %224 = arith.index_cast %223 : i32 to index
    %c6_210 = arith.constant 6 : index
    %c0_211 = arith.constant 0 : index
    %225 = vector.load %arg2[%c0_209, %224, %c6_210, %c0_211] : memref<1x52x52x4xbf16, #tpu.memory_space<vmem>>, vector<1x8x16x4xbf16>
    %226 = vector.shape_cast %225 : vector<1x8x16x4xbf16> to vector<8x16x4xbf16>
    %227 = vector.shape_cast %226 : vector<8x16x4xbf16> to vector<128x4xbf16>
    %c0_212 = arith.constant 0 : index
    %c0_213 = arith.constant 0 : index
    %228 = vector.load %arg10[%c0_212, %c0_213] : memref<128x128xf32, #tpu.memory_space<vmem>>, vector<128x128xf32>
    %c1_214 = arith.constant 1 : index
    %c3_215 = arith.constant 3 : index
    %c0_216 = arith.constant 0 : index
    %c0_217 = arith.constant 0 : index
    %229 = vector.load %arg4[%c1_214, %c3_215, %c0_216, %c0_217] : memref<3x9x4x128xbf16, #tpu.memory_space<vmem>>, vector<1x1x4x128xbf16>
    %230 = vector.shape_cast %229 : vector<1x1x4x128xbf16> to vector<4x128xbf16>
    %cst_218 = arith.constant dense<0.000000e+00> : vector<128x128xf32>
    %231 = tpu.matmul %227, %230, %cst_218 {dimension_numbers = #tpu.dot_dimension_numbers<[1], [0], [0], [1], [0, 0, 1, 1], [], []>} : vector<128x4xbf16>, vector<4x128xbf16>, vector<128x128xf32> -> vector<128x128xf32>
    %232 = arith.addf %228, %231 : vector<128x128xf32>
    %c0_219 = arith.constant 0 : index
    %c0_220 = arith.constant 0 : index
    %233 = vector.load %arg10[%c0_219, %c0_220] : memref<128x128xf32, #tpu.memory_space<vmem>>, vector<128x128xf32>
    tpu.vector_store %arg10[%c0_219, %c0_220], %232 {strides = array<i32>} : memref<128x128xf32, #tpu.memory_space<vmem>>, vector<128x128xf32>,
    %c18_i32_221 = arith.constant 18 : i32
    %234 = arith.addi %1, %c18_i32_221 : i32
    %c0_i32_222 = arith.constant 0 : i32
    %235 = arith.addi %234, %c0_i32_222 : i32
    %c0_223 = arith.constant 0 : index
    %236 = arith.index_cast %235 : i32 to index
    %c18_224 = arith.constant 18 : index
    %c0_225 = arith.constant 0 : index
    %237 = vector.load %arg2[%c0_223, %236, %c18_224, %c0_225] : memref<1x52x52x4xbf16, #tpu.memory_space<vmem>>, vector<1x8x16x4xbf16>
    %238 = vector.shape_cast %237 : vector<1x8x16x4xbf16> to vector<8x16x4xbf16>
    %239 = vector.shape_cast %238 : vector<8x16x4xbf16> to vector<128x4xbf16>
    %c0_226 = arith.constant 0 : index
    %c0_227 = arith.constant 0 : index
    %240 = vector.load %arg10[%c0_226, %c0_227] : memref<128x128xf32, #tpu.memory_space<vmem>>, vector<128x128xf32>
    %c1_228 = arith.constant 1 : index
    %c4_229 = arith.constant 4 : index
    %c0_230 = arith.constant 0 : index
    %c0_231 = arith.constant 0 : index
    %241 = vector.load %arg4[%c1_228, %c4_229, %c0_230, %c0_231] : memref<3x9x4x128xbf16, #tpu.memory_space<vmem>>, vector<1x1x4x128xbf16>
    %242 = vector.shape_cast %241 : vector<1x1x4x128xbf16> to vector<4x128xbf16>
    %cst_232 = arith.constant dense<0.000000e+00> : vector<128x128xf32>
    %243 = tpu.matmul %239, %242, %cst_232 {dimension_numbers = #tpu.dot_dimension_numbers<[1], [0], [0], [1], [0, 0, 1, 1], [], []>} : vector<128x4xbf16>, vector<4x128xbf16>, vector<128x128xf32> -> vector<128x128xf32>
    %244 = arith.addf %240, %243 : vector<128x128xf32>
    %c0_233 = arith.constant 0 : index
    %c0_234 = arith.constant 0 : index
    %245 = vector.load %arg10[%c0_233, %c0_234] : memref<128x128xf32, #tpu.memory_space<vmem>>, vector<128x128xf32>
    tpu.vector_store %arg10[%c0_233, %c0_234], %244 {strides = array<i32>} : memref<128x128xf32, #tpu.memory_space<vmem>>, vector<128x128xf32>,
    %c18_i32_235 = arith.constant 18 : i32
    %246 = arith.addi %1, %c18_i32_235 : i32
    %c0_i32_236 = arith.constant 0 : i32
    %247 = arith.addi %246, %c0_i32_236 : i32
    %c0_237 = arith.constant 0 : index
    %248 = arith.index_cast %247 : i32 to index
    %c30_238 = arith.constant 30 : index
    %c0_239 = arith.constant 0 : index
    %249 = vector.load %arg2[%c0_237, %248, %c30_238, %c0_239] : memref<1x52x52x4xbf16, #tpu.memory_space<vmem>>, vector<1x8x16x4xbf16>
    %250 = vector.shape_cast %249 : vector<1x8x16x4xbf16> to vector<8x16x4xbf16>
    %251 = vector.shape_cast %250 : vector<8x16x4xbf16> to vector<128x4xbf16>
    %c0_240 = arith.constant 0 : index
    %c0_241 = arith.constant 0 : index
    %252 = vector.load %arg10[%c0_240, %c0_241] : memref<128x128xf32, #tpu.memory_space<vmem>>, vector<128x128xf32>
    %c1_242 = arith.constant 1 : index
    %c5_243 = arith.constant 5 : index
    %c0_244 = arith.constant 0 : index
    %c0_245 = arith.constant 0 : index
    %253 = vector.load %arg4[%c1_242, %c5_243, %c0_244, %c0_245] : memref<3x9x4x128xbf16, #tpu.memory_space<vmem>>, vector<1x1x4x128xbf16>
    %254 = vector.shape_cast %253 : vector<1x1x4x128xbf16> to vector<4x128xbf16>
    %cst_246 = arith.constant dense<0.000000e+00> : vector<128x128xf32>
    %255 = tpu.matmul %251, %254, %cst_246 {dimension_numbers = #tpu.dot_dimension_numbers<[1], [0], [0], [1], [0, 0, 1, 1], [], []>} : vector<128x4xbf16>, vector<4x128xbf16>, vector<128x128xf32> -> vector<128x128xf32>
    %256 = arith.addf %252, %255 : vector<128x128xf32>
    %c0_247 = arith.constant 0 : index
    %c0_248 = arith.constant 0 : index
    %257 = vector.load %arg10[%c0_247, %c0_248] : memref<128x128xf32, #tpu.memory_space<vmem>>, vector<128x128xf32>
    tpu.vector_store %arg10[%c0_247, %c0_248], %256 {strides = array<i32>} : memref<128x128xf32, #tpu.memory_space<vmem>>, vector<128x128xf32>,
    %c18_i32_249 = arith.constant 18 : i32
    %258 = arith.addi %1, %c18_i32_249 : i32
    %c12_i32 = arith.constant 12 : i32
    %259 = arith.addi %258, %c12_i32 : i32
    %c0_250 = arith.constant 0 : index
    %260 = arith.index_cast %259 : i32 to index
    %c6_251 = arith.constant 6 : index
    %c0_252 = arith.constant 0 : index
    %261 = vector.load %arg2[%c0_250, %260, %c6_251, %c0_252] : memref<1x52x52x4xbf16, #tpu.memory_space<vmem>>, vector<1x8x16x4xbf16>
    %262 = vector.shape_cast %261 : vector<1x8x16x4xbf16> to vector<8x16x4xbf16>
    %263 = vector.shape_cast %262 : vector<8x16x4xbf16> to vector<128x4xbf16>
    %c0_253 = arith.constant 0 : index
    %c0_254 = arith.constant 0 : index
    %264 = vector.load %arg10[%c0_253, %c0_254] : memref<128x128xf32, #tpu.memory_space<vmem>>, vector<128x128xf32>
    %c1_255 = arith.constant 1 : index
    %c6_256 = arith.constant 6 : index
    %c0_257 = arith.constant 0 : index
    %c0_258 = arith.constant 0 : index
    %265 = vector.load %arg4[%c1_255, %c6_256, %c0_257, %c0_258] : memref<3x9x4x128xbf16, #tpu.memory_space<vmem>>, vector<1x1x4x128xbf16>
    %266 = vector.shape_cast %265 : vector<1x1x4x128xbf16> to vector<4x128xbf16>
    %cst_259 = arith.constant dense<0.000000e+00> : vector<128x128xf32>
    %267 = tpu.matmul %263, %266, %cst_259 {dimension_numbers = #tpu.dot_dimension_numbers<[1], [0], [0], [1], [0, 0, 1, 1], [], []>} : vector<128x4xbf16>, vector<4x128xbf16>, vector<128x128xf32> -> vector<128x128xf32>
    %268 = arith.addf %264, %267 : vector<128x128xf32>
    %c0_260 = arith.constant 0 : index
    %c0_261 = arith.constant 0 : index
    %269 = vector.load %arg10[%c0_260, %c0_261] : memref<128x128xf32, #tpu.memory_space<vmem>>, vector<128x128xf32>
    tpu.vector_store %arg10[%c0_260, %c0_261], %268 {strides = array<i32>} : memref<128x128xf32, #tpu.memory_space<vmem>>, vector<128x128xf32>,
    %c18_i32_262 = arith.constant 18 : i32
    %270 = arith.addi %1, %c18_i32_262 : i32
    %c12_i32_263 = arith.constant 12 : i32
    %271 = arith.addi %270, %c12_i32_263 : i32
    %c0_264 = arith.constant 0 : index
    %272 = arith.index_cast %271 : i32 to index
    %c18_265 = arith.constant 18 : index
    %c0_266 = arith.constant 0 : index
    %273 = vector.load %arg2[%c0_264, %272, %c18_265, %c0_266] : memref<1x52x52x4xbf16, #tpu.memory_space<vmem>>, vector<1x8x16x4xbf16>
    %274 = vector.shape_cast %273 : vector<1x8x16x4xbf16> to vector<8x16x4xbf16>
    %275 = vector.shape_cast %274 : vector<8x16x4xbf16> to vector<128x4xbf16>
    %c0_267 = arith.constant 0 : index
    %c0_268 = arith.constant 0 : index
    %276 = vector.load %arg10[%c0_267, %c0_268] : memref<128x128xf32, #tpu.memory_space<vmem>>, vector<128x128xf32>
    %c1_269 = arith.constant 1 : index
    %c7_270 = arith.constant 7 : index
    %c0_271 = arith.constant 0 : index
    %c0_272 = arith.constant 0 : index
    %277 = vector.load %arg4[%c1_269, %c7_270, %c0_271, %c0_272] : memref<3x9x4x128xbf16, #tpu.memory_space<vmem>>, vector<1x1x4x128xbf16>
    %278 = vector.shape_cast %277 : vector<1x1x4x128xbf16> to vector<4x128xbf16>
    %cst_273 = arith.constant dense<0.000000e+00> : vector<128x128xf32>
    %279 = tpu.matmul %275, %278, %cst_273 {dimension_numbers = #tpu.dot_dimension_numbers<[1], [0], [0], [1], [0, 0, 1, 1], [], []>} : vector<128x4xbf16>, vector<4x128xbf16>, vector<128x128xf32> -> vector<128x128xf32>
    %280 = arith.addf %276, %279 : vector<128x128xf32>
    %c0_274 = arith.constant 0 : index
    %c0_275 = arith.constant 0 : index
    %281 = vector.load %arg10[%c0_274, %c0_275] : memref<128x128xf32, #tpu.memory_space<vmem>>, vector<128x128xf32>
    tpu.vector_store %arg10[%c0_274, %c0_275], %280 {strides = array<i32>} : memref<128x128xf32, #tpu.memory_space<vmem>>, vector<128x128xf32>,
    %c18_i32_276 = arith.constant 18 : i32
    %282 = arith.addi %1, %c18_i32_276 : i32
    %c12_i32_277 = arith.constant 12 : i32
    %283 = arith.addi %282, %c12_i32_277 : i32
    %c0_278 = arith.constant 0 : index
    %284 = arith.index_cast %283 : i32 to index
    %c30_279 = arith.constant 30 : index
    %c0_280 = arith.constant 0 : index
    %285 = vector.load %arg2[%c0_278, %284, %c30_279, %c0_280] : memref<1x52x52x4xbf16, #tpu.memory_space<vmem>>, vector<1x8x16x4xbf16>
    %286 = vector.shape_cast %285 : vector<1x8x16x4xbf16> to vector<8x16x4xbf16>
    %287 = vector.shape_cast %286 : vector<8x16x4xbf16> to vector<128x4xbf16>
    %c0_281 = arith.constant 0 : index
    %c0_282 = arith.constant 0 : index
    %288 = vector.load %arg10[%c0_281, %c0_282] : memref<128x128xf32, #tpu.memory_space<vmem>>, vector<128x128xf32>
    %c1_283 = arith.constant 1 : index
    %c8_284 = arith.constant 8 : index
    %c0_285 = arith.constant 0 : index
    %c0_286 = arith.constant 0 : index
    %289 = vector.load %arg4[%c1_283, %c8_284, %c0_285, %c0_286] : memref<3x9x4x128xbf16, #tpu.memory_space<vmem>>, vector<1x1x4x128xbf16>
    %290 = vector.shape_cast %289 : vector<1x1x4x128xbf16> to vector<4x128xbf16>
    %cst_287 = arith.constant dense<0.000000e+00> : vector<128x128xf32>
    %291 = tpu.matmul %287, %290, %cst_287 {dimension_numbers = #tpu.dot_dimension_numbers<[1], [0], [0], [1], [0, 0, 1, 1], [], []>} : vector<128x4xbf16>, vector<4x128xbf16>, vector<128x128xf32> -> vector<128x128xf32>
    %292 = arith.addf %288, %291 : vector<128x128xf32>
    %c0_288 = arith.constant 0 : index
    %c0_289 = arith.constant 0 : index
    %293 = vector.load %arg10[%c0_288, %c0_289] : memref<128x128xf32, #tpu.memory_space<vmem>>, vector<128x128xf32>
    tpu.vector_store %arg10[%c0_288, %c0_289], %292 {strides = array<i32>} : memref<128x128xf32, #tpu.memory_space<vmem>>, vector<128x128xf32>,
    %c0_290 = arith.constant 0 : index
    %c0_291 = arith.constant 0 : index
    %294 = vector.load %arg10[%c0_290, %c0_291] : memref<128x128xf32, #tpu.memory_space<vmem>>, vector<128x128xf32>
    %c2_292 = arith.constant 2 : index
    %c0_293 = arith.constant 0 : index
    %295 = vector.load %arg6[%c2_292, %c0_293] : memref<6x128xf32, #tpu.memory_space<vmem>>, vector<1x128xf32>
    %296 = vector.shape_cast %295 : vector<1x128xf32> to vector<128xf32>
    %297 = vector.shape_cast %296 : vector<128xf32> to vector<1x128xf32>
    %298 = vector.broadcast %297 : vector<1x128xf32> to vector<128x128xf32>
    %299 = arith.mulf %294, %298 : vector<128x128xf32>
    %c2_294 = arith.constant 2 : index
    %c0_295 = arith.constant 0 : index
    %300 = vector.load %arg7[%c2_294, %c0_295] : memref<6x128xf32, #tpu.memory_space<vmem>>, vector<1x128xf32>
    %301 = vector.shape_cast %300 : vector<1x128xf32> to vector<128xf32>
    %302 = vector.shape_cast %301 : vector<128xf32> to vector<1x128xf32>
    %303 = vector.broadcast %302 : vector<1x128xf32> to vector<128x128xf32>
    %304 = arith.addf %299, %303 : vector<128x128xf32>
    %cst_296 = arith.constant 0.000000e+00 : f32
    %305 = vector.broadcast %cst_296 : f32 to vector<128x128xf32>
    %306 = arith.maximumf %304, %305 : vector<128x128xf32>
    %307 = arith.truncf %306 : vector<128x128xf32> to vector<128x128xbf16>
    %c0_297 = arith.constant 0 : index
    %c0_298 = arith.constant 0 : index
    %308 = vector.load %arg9[%c0_297, %c0_298] : memref<128x128xf32, #tpu.memory_space<vmem>>, vector<128x128xf32>
    %c256 = arith.constant 256 : index
    %c0_299 = arith.constant 0 : index
    %309 = vector.load %arg5[%c256, %c0_299] : memref<640x128xbf16, #tpu.memory_space<vmem>>, vector<128x128xbf16>
    %cst_300 = arith.constant dense<0.000000e+00> : vector<128x128xf32>
    %310 = tpu.matmul %307, %309, %cst_300 {dimension_numbers = #tpu.dot_dimension_numbers<[1], [0], [0], [1], [0, 0, 1, 1], [], []>} : vector<128x128xbf16>, vector<128x128xbf16>, vector<128x128xf32> -> vector<128x128xf32>
    %311 = arith.addf %308, %310 : vector<128x128xf32>
    %c0_301 = arith.constant 0 : index
    %c0_302 = arith.constant 0 : index
    %312 = vector.load %arg9[%c0_301, %c0_302] : memref<128x128xf32, #tpu.memory_space<vmem>>, vector<128x128xf32>
    tpu.vector_store %arg9[%c0_301, %c0_302], %311 {strides = array<i32>} : memref<128x128xf32, #tpu.memory_space<vmem>>, vector<128x128xf32>,
    %cst_303 = arith.constant 0.000000e+00 : f32
    %313 = vector.broadcast %cst_303 : f32 to vector<128x128xf32>
    %c0_304 = arith.constant 0 : index
    %c0_305 = arith.constant 0 : index
    %314 = vector.load %arg10[%c0_304, %c0_305] : memref<128x128xf32, #tpu.memory_space<vmem>>, vector<128x128xf32>
    tpu.vector_store %arg10[%c0_304, %c0_305], %313 {strides = array<i32>} : memref<128x128xf32, #tpu.memory_space<vmem>>, vector<128x128xf32>,
    %c18_i32_306 = arith.constant 18 : i32
    %315 = arith.addi %1, %c18_i32_306 : i32
    %c-18_i32 = arith.constant -18 : i32
    %316 = arith.addi %315, %c-18_i32 : i32
    %c0_307 = arith.constant 0 : index
    %317 = arith.index_cast %316 : i32 to index
    %c0_308 = arith.constant 0 : index
    %c0_309 = arith.constant 0 : index
    %318 = vector.load %arg2[%c0_307, %317, %c0_308, %c0_309] : memref<1x52x52x4xbf16, #tpu.memory_space<vmem>>, vector<1x8x16x4xbf16>
    %319 = vector.shape_cast %318 : vector<1x8x16x4xbf16> to vector<8x16x4xbf16>
    %320 = vector.shape_cast %319 : vector<8x16x4xbf16> to vector<128x4xbf16>
    %c0_310 = arith.constant 0 : index
    %c0_311 = arith.constant 0 : index
    %321 = vector.load %arg10[%c0_310, %c0_311] : memref<128x128xf32, #tpu.memory_space<vmem>>, vector<128x128xf32>
    %c2_312 = arith.constant 2 : index
    %c0_313 = arith.constant 0 : index
    %c0_314 = arith.constant 0 : index
    %c0_315 = arith.constant 0 : index
    %322 = vector.load %arg4[%c2_312, %c0_313, %c0_314, %c0_315] : memref<3x9x4x128xbf16, #tpu.memory_space<vmem>>, vector<1x1x4x128xbf16>
    %323 = vector.shape_cast %322 : vector<1x1x4x128xbf16> to vector<4x128xbf16>
    %cst_316 = arith.constant dense<0.000000e+00> : vector<128x128xf32>
    %324 = tpu.matmul %320, %323, %cst_316 {dimension_numbers = #tpu.dot_dimension_numbers<[1], [0], [0], [1], [0, 0, 1, 1], [], []>} : vector<128x4xbf16>, vector<4x128xbf16>, vector<128x128xf32> -> vector<128x128xf32>
    %325 = arith.addf %321, %324 : vector<128x128xf32>
    %c0_317 = arith.constant 0 : index
    %c0_318 = arith.constant 0 : index
    %326 = vector.load %arg10[%c0_317, %c0_318] : memref<128x128xf32, #tpu.memory_space<vmem>>, vector<128x128xf32>
    tpu.vector_store %arg10[%c0_317, %c0_318], %325 {strides = array<i32>} : memref<128x128xf32, #tpu.memory_space<vmem>>, vector<128x128xf32>,
    %c18_i32_319 = arith.constant 18 : i32
    %327 = arith.addi %1, %c18_i32_319 : i32
    %c-18_i32_320 = arith.constant -18 : i32
    %328 = arith.addi %327, %c-18_i32_320 : i32
    %c0_321 = arith.constant 0 : index
    %329 = arith.index_cast %328 : i32 to index
    %c18_322 = arith.constant 18 : index
    %c0_323 = arith.constant 0 : index
    %330 = vector.load %arg2[%c0_321, %329, %c18_322, %c0_323] : memref<1x52x52x4xbf16, #tpu.memory_space<vmem>>, vector<1x8x16x4xbf16>
    %331 = vector.shape_cast %330 : vector<1x8x16x4xbf16> to vector<8x16x4xbf16>
    %332 = vector.shape_cast %331 : vector<8x16x4xbf16> to vector<128x4xbf16>
    %c0_324 = arith.constant 0 : index
    %c0_325 = arith.constant 0 : index
    %333 = vector.load %arg10[%c0_324, %c0_325] : memref<128x128xf32, #tpu.memory_space<vmem>>, vector<128x128xf32>
    %c2_326 = arith.constant 2 : index
    %c1_327 = arith.constant 1 : index
    %c0_328 = arith.constant 0 : index
    %c0_329 = arith.constant 0 : index
    %334 = vector.load %arg4[%c2_326, %c1_327, %c0_328, %c0_329] : memref<3x9x4x128xbf16, #tpu.memory_space<vmem>>, vector<1x1x4x128xbf16>
    %335 = vector.shape_cast %334 : vector<1x1x4x128xbf16> to vector<4x128xbf16>
    %cst_330 = arith.constant dense<0.000000e+00> : vector<128x128xf32>
    %336 = tpu.matmul %332, %335, %cst_330 {dimension_numbers = #tpu.dot_dimension_numbers<[1], [0], [0], [1], [0, 0, 1, 1], [], []>} : vector<128x4xbf16>, vector<4x128xbf16>, vector<128x128xf32> -> vector<128x128xf32>
    %337 = arith.addf %333, %336 : vector<128x128xf32>
    %c0_331 = arith.constant 0 : index
    %c0_332 = arith.constant 0 : index
    %338 = vector.load %arg10[%c0_331, %c0_332] : memref<128x128xf32, #tpu.memory_space<vmem>>, vector<128x128xf32>
    tpu.vector_store %arg10[%c0_331, %c0_332], %337 {strides = array<i32>} : memref<128x128xf32, #tpu.memory_space<vmem>>, vector<128x128xf32>,
    %c18_i32_333 = arith.constant 18 : i32
    %339 = arith.addi %1, %c18_i32_333 : i32
    %c-18_i32_334 = arith.constant -18 : i32
    %340 = arith.addi %339, %c-18_i32_334 : i32
    %c0_335 = arith.constant 0 : index
    %341 = arith.index_cast %340 : i32 to index
    %c36 = arith.constant 36 : index
    %c0_336 = arith.constant 0 : index
    %342 = vector.load %arg2[%c0_335, %341, %c36, %c0_336] : memref<1x52x52x4xbf16, #tpu.memory_space<vmem>>, vector<1x8x16x4xbf16>
    %343 = vector.shape_cast %342 : vector<1x8x16x4xbf16> to vector<8x16x4xbf16>
    %344 = vector.shape_cast %343 : vector<8x16x4xbf16> to vector<128x4xbf16>
    %c0_337 = arith.constant 0 : index
    %c0_338 = arith.constant 0 : index
    %345 = vector.load %arg10[%c0_337, %c0_338] : memref<128x128xf32, #tpu.memory_space<vmem>>, vector<128x128xf32>
    %c2_339 = arith.constant 2 : index
    %c2_340 = arith.constant 2 : index
    %c0_341 = arith.constant 0 : index
    %c0_342 = arith.constant 0 : index
    %346 = vector.load %arg4[%c2_339, %c2_340, %c0_341, %c0_342] : memref<3x9x4x128xbf16, #tpu.memory_space<vmem>>, vector<1x1x4x128xbf16>
    %347 = vector.shape_cast %346 : vector<1x1x4x128xbf16> to vector<4x128xbf16>
    %cst_343 = arith.constant dense<0.000000e+00> : vector<128x128xf32>
    %348 = tpu.matmul %344, %347, %cst_343 {dimension_numbers = #tpu.dot_dimension_numbers<[1], [0], [0], [1], [0, 0, 1, 1], [], []>} : vector<128x4xbf16>, vector<4x128xbf16>, vector<128x128xf32> -> vector<128x128xf32>
    %349 = arith.addf %345, %348 : vector<128x128xf32>
    %c0_344 = arith.constant 0 : index
    %c0_345 = arith.constant 0 : index
    %350 = vector.load %arg10[%c0_344, %c0_345] : memref<128x128xf32, #tpu.memory_space<vmem>>, vector<128x128xf32>
    tpu.vector_store %arg10[%c0_344, %c0_345], %349 {strides = array<i32>} : memref<128x128xf32, #tpu.memory_space<vmem>>, vector<128x128xf32>,
    %c18_i32_346 = arith.constant 18 : i32
    %351 = arith.addi %1, %c18_i32_346 : i32
    %c0_i32_347 = arith.constant 0 : i32
    %352 = arith.addi %351, %c0_i32_347 : i32
    %c0_348 = arith.constant 0 : index
    %353 = arith.index_cast %352 : i32 to index
    %c0_349 = arith.constant 0 : index
    %c0_350 = arith.constant 0 : index
    %354 = vector.load %arg2[%c0_348, %353, %c0_349, %c0_350] : memref<1x52x52x4xbf16, #tpu.memory_space<vmem>>, vector<1x8x16x4xbf16>
    %355 = vector.shape_cast %354 : vector<1x8x16x4xbf16> to vector<8x16x4xbf16>
    %356 = vector.shape_cast %355 : vector<8x16x4xbf16> to vector<128x4xbf16>
    %c0_351 = arith.constant 0 : index
    %c0_352 = arith.constant 0 : index
    %357 = vector.load %arg10[%c0_351, %c0_352] : memref<128x128xf32, #tpu.memory_space<vmem>>, vector<128x128xf32>
    %c2_353 = arith.constant 2 : index
    %c3_354 = arith.constant 3 : index
    %c0_355 = arith.constant 0 : index
    %c0_356 = arith.constant 0 : index
    %358 = vector.load %arg4[%c2_353, %c3_354, %c0_355, %c0_356] : memref<3x9x4x128xbf16, #tpu.memory_space<vmem>>, vector<1x1x4x128xbf16>
    %359 = vector.shape_cast %358 : vector<1x1x4x128xbf16> to vector<4x128xbf16>
    %cst_357 = arith.constant dense<0.000000e+00> : vector<128x128xf32>
    %360 = tpu.matmul %356, %359, %cst_357 {dimension_numbers = #tpu.dot_dimension_numbers<[1], [0], [0], [1], [0, 0, 1, 1], [], []>} : vector<128x4xbf16>, vector<4x128xbf16>, vector<128x128xf32> -> vector<128x128xf32>
    %361 = arith.addf %357, %360 : vector<128x128xf32>
    %c0_358 = arith.constant 0 : index
    %c0_359 = arith.constant 0 : index
    %362 = vector.load %arg10[%c0_358, %c0_359] : memref<128x128xf32, #tpu.memory_space<vmem>>, vector<128x128xf32>
    tpu.vector_store %arg10[%c0_358, %c0_359], %361 {strides = array<i32>} : memref<128x128xf32, #tpu.memory_space<vmem>>, vector<128x128xf32>,
    %c18_i32_360 = arith.constant 18 : i32
    %363 = arith.addi %1, %c18_i32_360 : i32
    %c0_i32_361 = arith.constant 0 : i32
    %364 = arith.addi %363, %c0_i32_361 : i32
    %c0_362 = arith.constant 0 : index
    %365 = arith.index_cast %364 : i32 to index
    %c18_363 = arith.constant 18 : index
    %c0_364 = arith.constant 0 : index
    %366 = vector.load %arg2[%c0_362, %365, %c18_363, %c0_364] : memref<1x52x52x4xbf16, #tpu.memory_space<vmem>>, vector<1x8x16x4xbf16>
    %367 = vector.shape_cast %366 : vector<1x8x16x4xbf16> to vector<8x16x4xbf16>
    %368 = vector.shape_cast %367 : vector<8x16x4xbf16> to vector<128x4xbf16>
    %c0_365 = arith.constant 0 : index
    %c0_366 = arith.constant 0 : index
    %369 = vector.load %arg10[%c0_365, %c0_366] : memref<128x128xf32, #tpu.memory_space<vmem>>, vector<128x128xf32>
    %c2_367 = arith.constant 2 : index
    %c4_368 = arith.constant 4 : index
    %c0_369 = arith.constant 0 : index
    %c0_370 = arith.constant 0 : index
    %370 = vector.load %arg4[%c2_367, %c4_368, %c0_369, %c0_370] : memref<3x9x4x128xbf16, #tpu.memory_space<vmem>>, vector<1x1x4x128xbf16>
    %371 = vector.shape_cast %370 : vector<1x1x4x128xbf16> to vector<4x128xbf16>
    %cst_371 = arith.constant dense<0.000000e+00> : vector<128x128xf32>
    %372 = tpu.matmul %368, %371, %cst_371 {dimension_numbers = #tpu.dot_dimension_numbers<[1], [0], [0], [1], [0, 0, 1, 1], [], []>} : vector<128x4xbf16>, vector<4x128xbf16>, vector<128x128xf32> -> vector<128x128xf32>
    %373 = arith.addf %369, %372 : vector<128x128xf32>
    %c0_372 = arith.constant 0 : index
    %c0_373 = arith.constant 0 : index
    %374 = vector.load %arg10[%c0_372, %c0_373] : memref<128x128xf32, #tpu.memory_space<vmem>>, vector<128x128xf32>
    tpu.vector_store %arg10[%c0_372, %c0_373], %373 {strides = array<i32>} : memref<128x128xf32, #tpu.memory_space<vmem>>, vector<128x128xf32>,
    %c18_i32_374 = arith.constant 18 : i32
    %375 = arith.addi %1, %c18_i32_374 : i32
    %c0_i32_375 = arith.constant 0 : i32
    %376 = arith.addi %375, %c0_i32_375 : i32
    %c0_376 = arith.constant 0 : index
    %377 = arith.index_cast %376 : i32 to index
    %c36_377 = arith.constant 36 : index
    %c0_378 = arith.constant 0 : index
    %378 = vector.load %arg2[%c0_376, %377, %c36_377, %c0_378] : memref<1x52x52x4xbf16, #tpu.memory_space<vmem>>, vector<1x8x16x4xbf16>
    %379 = vector.shape_cast %378 : vector<1x8x16x4xbf16> to vector<8x16x4xbf16>
    %380 = vector.shape_cast %379 : vector<8x16x4xbf16> to vector<128x4xbf16>
    %c0_379 = arith.constant 0 : index
    %c0_380 = arith.constant 0 : index
    %381 = vector.load %arg10[%c0_379, %c0_380] : memref<128x128xf32, #tpu.memory_space<vmem>>, vector<128x128xf32>
    %c2_381 = arith.constant 2 : index
    %c5_382 = arith.constant 5 : index
    %c0_383 = arith.constant 0 : index
    %c0_384 = arith.constant 0 : index
    %382 = vector.load %arg4[%c2_381, %c5_382, %c0_383, %c0_384] : memref<3x9x4x128xbf16, #tpu.memory_space<vmem>>, vector<1x1x4x128xbf16>
    %383 = vector.shape_cast %382 : vector<1x1x4x128xbf16> to vector<4x128xbf16>
    %cst_385 = arith.constant dense<0.000000e+00> : vector<128x128xf32>
    %384 = tpu.matmul %380, %383, %cst_385 {dimension_numbers = #tpu.dot_dimension_numbers<[1], [0], [0], [1], [0, 0, 1, 1], [], []>} : vector<128x4xbf16>, vector<4x128xbf16>, vector<128x128xf32> -> vector<128x128xf32>
    %385 = arith.addf %381, %384 : vector<128x128xf32>
    %c0_386 = arith.constant 0 : index
    %c0_387 = arith.constant 0 : index
    %386 = vector.load %arg10[%c0_386, %c0_387] : memref<128x128xf32, #tpu.memory_space<vmem>>, vector<128x128xf32>
    tpu.vector_store %arg10[%c0_386, %c0_387], %385 {strides = array<i32>} : memref<128x128xf32, #tpu.memory_space<vmem>>, vector<128x128xf32>,
    %c18_i32_388 = arith.constant 18 : i32
    %387 = arith.addi %1, %c18_i32_388 : i32
    %c18_i32_389 = arith.constant 18 : i32
    %388 = arith.addi %387, %c18_i32_389 : i32
    %c0_390 = arith.constant 0 : index
    %389 = arith.index_cast %388 : i32 to index
    %c0_391 = arith.constant 0 : index
    %c0_392 = arith.constant 0 : index
    %390 = vector.load %arg2[%c0_390, %389, %c0_391, %c0_392] : memref<1x52x52x4xbf16, #tpu.memory_space<vmem>>, vector<1x8x16x4xbf16>
    %391 = vector.shape_cast %390 : vector<1x8x16x4xbf16> to vector<8x16x4xbf16>
    %392 = vector.shape_cast %391 : vector<8x16x4xbf16> to vector<128x4xbf16>
    %c0_393 = arith.constant 0 : index
    %c0_394 = arith.constant 0 : index
    %393 = vector.load %arg10[%c0_393, %c0_394] : memref<128x128xf32, #tpu.memory_space<vmem>>, vector<128x128xf32>
    %c2_395 = arith.constant 2 : index
    %c6_396 = arith.constant 6 : index
    %c0_397 = arith.constant 0 : index
    %c0_398 = arith.constant 0 : index
    %394 = vector.load %arg4[%c2_395, %c6_396, %c0_397, %c0_398] : memref<3x9x4x128xbf16, #tpu.memory_space<vmem>>, vector<1x1x4x128xbf16>
    %395 = vector.shape_cast %394 : vector<1x1x4x128xbf16> to vector<4x128xbf16>
    %cst_399 = arith.constant dense<0.000000e+00> : vector<128x128xf32>
    %396 = tpu.matmul %392, %395, %cst_399 {dimension_numbers = #tpu.dot_dimension_numbers<[1], [0], [0], [1], [0, 0, 1, 1], [], []>} : vector<128x4xbf16>, vector<4x128xbf16>, vector<128x128xf32> -> vector<128x128xf32>
    %397 = arith.addf %393, %396 : vector<128x128xf32>
    %c0_400 = arith.constant 0 : index
    %c0_401 = arith.constant 0 : index
    %398 = vector.load %arg10[%c0_400, %c0_401] : memref<128x128xf32, #tpu.memory_space<vmem>>, vector<128x128xf32>
    tpu.vector_store %arg10[%c0_400, %c0_401], %397 {strides = array<i32>} : memref<128x128xf32, #tpu.memory_space<vmem>>, vector<128x128xf32>,
    %c18_i32_402 = arith.constant 18 : i32
    %399 = arith.addi %1, %c18_i32_402 : i32
    %c18_i32_403 = arith.constant 18 : i32
    %400 = arith.addi %399, %c18_i32_403 : i32
    %c0_404 = arith.constant 0 : index
    %401 = arith.index_cast %400 : i32 to index
    %c18_405 = arith.constant 18 : index
    %c0_406 = arith.constant 0 : index
    %402 = vector.load %arg2[%c0_404, %401, %c18_405, %c0_406] : memref<1x52x52x4xbf16, #tpu.memory_space<vmem>>, vector<1x8x16x4xbf16>
    %403 = vector.shape_cast %402 : vector<1x8x16x4xbf16> to vector<8x16x4xbf16>
    %404 = vector.shape_cast %403 : vector<8x16x4xbf16> to vector<128x4xbf16>
    %c0_407 = arith.constant 0 : index
    %c0_408 = arith.constant 0 : index
    %405 = vector.load %arg10[%c0_407, %c0_408] : memref<128x128xf32, #tpu.memory_space<vmem>>, vector<128x128xf32>
    %c2_409 = arith.constant 2 : index
    %c7_410 = arith.constant 7 : index
    %c0_411 = arith.constant 0 : index
    %c0_412 = arith.constant 0 : index
    %406 = vector.load %arg4[%c2_409, %c7_410, %c0_411, %c0_412] : memref<3x9x4x128xbf16, #tpu.memory_space<vmem>>, vector<1x1x4x128xbf16>
    %407 = vector.shape_cast %406 : vector<1x1x4x128xbf16> to vector<4x128xbf16>
    %cst_413 = arith.constant dense<0.000000e+00> : vector<128x128xf32>
    %408 = tpu.matmul %404, %407, %cst_413 {dimension_numbers = #tpu.dot_dimension_numbers<[1], [0], [0], [1], [0, 0, 1, 1], [], []>} : vector<128x4xbf16>, vector<4x128xbf16>, vector<128x128xf32> -> vector<128x128xf32>
    %409 = arith.addf %405, %408 : vector<128x128xf32>
    %c0_414 = arith.constant 0 : index
    %c0_415 = arith.constant 0 : index
    %410 = vector.load %arg10[%c0_414, %c0_415] : memref<128x128xf32, #tpu.memory_space<vmem>>, vector<128x128xf32>
    tpu.vector_store %arg10[%c0_414, %c0_415], %409 {strides = array<i32>} : memref<128x128xf32, #tpu.memory_space<vmem>>, vector<128x128xf32>,
    %c18_i32_416 = arith.constant 18 : i32
    %411 = arith.addi %1, %c18_i32_416 : i32
    %c18_i32_417 = arith.constant 18 : i32
    %412 = arith.addi %411, %c18_i32_417 : i32
    %c0_418 = arith.constant 0 : index
    %413 = arith.index_cast %412 : i32 to index
    %c36_419 = arith.constant 36 : index
    %c0_420 = arith.constant 0 : index
    %414 = vector.load %arg2[%c0_418, %413, %c36_419, %c0_420] : memref<1x52x52x4xbf16, #tpu.memory_space<vmem>>, vector<1x8x16x4xbf16>
    %415 = vector.shape_cast %414 : vector<1x8x16x4xbf16> to vector<8x16x4xbf16>
    %416 = vector.shape_cast %415 : vector<8x16x4xbf16> to vector<128x4xbf16>
    %c0_421 = arith.constant 0 : index
    %c0_422 = arith.constant 0 : index
    %417 = vector.load %arg10[%c0_421, %c0_422] : memref<128x128xf32, #tpu.memory_space<vmem>>, vector<128x128xf32>
    %c2_423 = arith.constant 2 : index
    %c8_424 = arith.constant 8 : index
    %c0_425 = arith.constant 0 : index
    %c0_426 = arith.constant 0 : index
    %418 = vector.load %arg4[%c2_423, %c8_424, %c0_425, %c0_426] : memref<3x9x4x128xbf16, #tpu.memory_space<vmem>>, vector<1x1x4x128xbf16>
    %419 = vector.shape_cast %418 : vector<1x1x4x128xbf16> to vector<4x128xbf16>
    %cst_427 = arith.constant dense<0.000000e+00> : vector<128x128xf32>
    %420 = tpu.matmul %416, %419, %cst_427 {dimension_numbers = #tpu.dot_dimension_numbers<[1], [0], [0], [1], [0, 0, 1, 1], [], []>} : vector<128x4xbf16>, vector<4x128xbf16>, vector<128x128xf32> -> vector<128x128xf32>
    %421 = arith.addf %417, %420 : vector<128x128xf32>
    %c0_428 = arith.constant 0 : index
    %c0_429 = arith.constant 0 : index
    %422 = vector.load %arg10[%c0_428, %c0_429] : memref<128x128xf32, #tpu.memory_space<vmem>>, vector<128x128xf32>
    tpu.vector_store %arg10[%c0_428, %c0_429], %421 {strides = array<i32>} : memref<128x128xf32, #tpu.memory_space<vmem>>, vector<128x128xf32>,
    %c0_430 = arith.constant 0 : index
    %c0_431 = arith.constant 0 : index
    %423 = vector.load %arg10[%c0_430, %c0_431] : memref<128x128xf32, #tpu.memory_space<vmem>>, vector<128x128xf32>
    %c3_432 = arith.constant 3 : index
    %c0_433 = arith.constant 0 : index
    %424 = vector.load %arg6[%c3_432, %c0_433] : memref<6x128xf32, #tpu.memory_space<vmem>>, vector<1x128xf32>
    %425 = vector.shape_cast %424 : vector<1x128xf32> to vector<128xf32>
    %426 = vector.shape_cast %425 : vector<128xf32> to vector<1x128xf32>
    %427 = vector.broadcast %426 : vector<1x128xf32> to vector<128x128xf32>
    %428 = arith.mulf %423, %427 : vector<128x128xf32>
    %c3_434 = arith.constant 3 : index
    %c0_435 = arith.constant 0 : index
    %429 = vector.load %arg7[%c3_434, %c0_435] : memref<6x128xf32, #tpu.memory_space<vmem>>, vector<1x128xf32>
    %430 = vector.shape_cast %429 : vector<1x128xf32> to vector<128xf32>
    %431 = vector.shape_cast %430 : vector<128xf32> to vector<1x128xf32>
    %432 = vector.broadcast %431 : vector<1x128xf32> to vector<128x128xf32>
    %433 = arith.addf %428, %432 : vector<128x128xf32>
    %cst_436 = arith.constant 0.000000e+00 : f32
    %434 = vector.broadcast %cst_436 : f32 to vector<128x128xf32>
    %435 = arith.maximumf %433, %434 : vector<128x128xf32>
    %436 = arith.truncf %435 : vector<128x128xf32> to vector<128x128xbf16>
    %c0_437 = arith.constant 0 : index
    %c0_438 = arith.constant 0 : index
    %437 = vector.load %arg9[%c0_437, %c0_438] : memref<128x128xf32, #tpu.memory_space<vmem>>, vector<128x128xf32>
    %c384 = arith.constant 384 : index
    %c0_439 = arith.constant 0 : index
    %438 = vector.load %arg5[%c384, %c0_439] : memref<640x128xbf16, #tpu.memory_space<vmem>>, vector<128x128xbf16>
    %cst_440 = arith.constant dense<0.000000e+00> : vector<128x128xf32>
    %439 = tpu.matmul %436, %438, %cst_440 {dimension_numbers = #tpu.dot_dimension_numbers<[1], [0], [0], [1], [0, 0, 1, 1], [], []>} : vector<128x128xbf16>, vector<128x128xbf16>, vector<128x128xf32> -> vector<128x128xf32>
    %440 = arith.addf %437, %439 : vector<128x128xf32>
    %c0_441 = arith.constant 0 : index
    %c0_442 = arith.constant 0 : index
    %441 = vector.load %arg9[%c0_441, %c0_442] : memref<128x128xf32, #tpu.memory_space<vmem>>, vector<128x128xf32>
    tpu.vector_store %arg9[%c0_441, %c0_442], %440 {strides = array<i32>} : memref<128x128xf32, #tpu.memory_space<vmem>>, vector<128x128xf32>,
    %c0_443 = arith.constant 0 : index
    %c0_444 = arith.constant 0 : index
    %442 = vector.load %arg9[%c0_443, %c0_444] : memref<128x128xf32, #tpu.memory_space<vmem>>, vector<128x128xf32>
    %c5_445 = arith.constant 5 : index
    %c0_446 = arith.constant 0 : index
    %443 = vector.load %arg6[%c5_445, %c0_446] : memref<6x128xf32, #tpu.memory_space<vmem>>, vector<1x128xf32>
    %444 = vector.shape_cast %443 : vector<1x128xf32> to vector<128xf32>
    %445 = vector.shape_cast %444 : vector<128xf32> to vector<1x128xf32>
    %446 = vector.broadcast %445 : vector<1x128xf32> to vector<128x128xf32>
    %447 = arith.mulf %442, %446 : vector<128x128xf32>
    %c5_447 = arith.constant 5 : index
    %c0_448 = arith.constant 0 : index
    %448 = vector.load %arg7[%c5_447, %c0_448] : memref<6x128xf32, #tpu.memory_space<vmem>>, vector<1x128xf32>
    %449 = vector.shape_cast %448 : vector<1x128xf32> to vector<128xf32>
    %450 = vector.shape_cast %449 : vector<128xf32> to vector<1x128xf32>
    %451 = vector.broadcast %450 : vector<1x128xf32> to vector<128x128xf32>
    %452 = arith.addf %447, %451 : vector<128x128xf32>
    %cst_449 = arith.constant 0.000000e+00 : f32
    %453 = vector.broadcast %cst_449 : f32 to vector<128x128xf32>
    %454 = arith.maximumf %452, %453 : vector<128x128xf32>
    %455 = vector.shape_cast %454 : vector<128x128xf32> to vector<8x16x128xf32>
    %c0_450 = arith.constant 0 : index
    %c0_451 = arith.constant 0 : index
    %c0_452 = arith.constant 0 : index
    %c0_453 = arith.constant 0 : index
    %456 = vector.load %arg8[%c0_450, %c0_451, %c0_452, %c0_453] : memref<1x8x16x128xf32, #tpu.memory_space<vmem>>, vector<1x8x16x128xf32>
    %457 = vector.shape_cast %456 : vector<1x8x16x128xf32> to vector<8x16x128xf32>
    %458 = vector.shape_cast %455 : vector<8x16x128xf32> to vector<1x8x16x128xf32>
    tpu.vector_store %arg8[%c0_450, %c0_451, %c0_452, %c0_453], %458 {strides = array<i32>} : memref<1x8x16x128xf32, #tpu.memory_space<vmem>>, vector<1x8x16x128xf32>,
    return
  }
  func.func @transform_0(%arg0: i32, %arg1: i32) -> (i32, i32, i32, i32) {
    %c0_i32 = arith.constant 0 : i32
    %c0_i32_0 = arith.constant 0 : i32
    %c0_i32_1 = arith.constant 0 : i32
    %c0_i32_2 = arith.constant 0 : i32
    return %arg0, %c0_i32, %c0_i32_0, %c0_i32_1 : i32, i32, i32, i32
  }
  func.func @transform_1(%arg0: i32, %arg1: i32) -> (i32, i32, i32) {
    %c0_i32 = arith.constant 0 : i32
    %c0_i32_0 = arith.constant 0 : i32
    %c0_i32_1 = arith.constant 0 : i32
    %c0_i32_2 = arith.constant 0 : i32
    return %c0_i32, %c0_i32_0, %c0_i32_1 : i32, i32, i32
  }
  func.func @transform_2(%arg0: i32, %arg1: i32) -> (i32, i32, i32, i32) {
    %c0_i32 = arith.constant 0 : i32
    %c0_i32_0 = arith.constant 0 : i32
    %c0_i32_1 = arith.constant 0 : i32
    %c0_i32_2 = arith.constant 0 : i32
    %c0_i32_3 = arith.constant 0 : i32
    return %c0_i32, %c0_i32_0, %c0_i32_1, %c0_i32_2 : i32, i32, i32, i32
  }
  func.func @transform_3(%arg0: i32, %arg1: i32) -> (i32, i32) {
    %c0_i32 = arith.constant 0 : i32
    %c0_i32_0 = arith.constant 0 : i32
    %c0_i32_1 = arith.constant 0 : i32
    return %c0_i32, %c0_i32_0 : i32, i32
  }
  func.func @transform_4(%arg0: i32, %arg1: i32) -> (i32, i32) {
    %c0_i32 = arith.constant 0 : i32
    %c0_i32_0 = arith.constant 0 : i32
    %c0_i32_1 = arith.constant 0 : i32
    return %c0_i32, %c0_i32_0 : i32, i32
  }
  func.func @transform_5(%arg0: i32, %arg1: i32) -> (i32, i32) {
    %c0_i32 = arith.constant 0 : i32
    %c0_i32_0 = arith.constant 0 : i32
    %c0_i32_1 = arith.constant 0 : i32
    return %c0_i32, %c0_i32_0 : i32, i32
  }
  func.func @transform_6(%arg0: i32, %arg1: i32) -> (i32, i32, i32, i32) {
    %c0_i32 = arith.constant 0 : i32
    %c0_i32_0 = arith.constant 0 : i32
    %c0_i32_1 = arith.constant 0 : i32
    return %arg0, %arg1, %c0_i32, %c0_i32_0 : i32, i32, i32, i32
  }
}

</mosaic_0001>

<bundles_post_ra>
// kernel: tpu_custom_call.1
= control target key start
LH: loop header
LB: loop body
LE: loop exit
PB: predicated region body
PF: predicated region fallthrough
CT: control target
= control target key end

     0   :  { %11 = vsyncpa [#allocation5], 0  ;;  %s18102_s0 = inlined_call_operand.vmem [shape: bf16[2,52,52,4], index: 0, kind: input, shape index: {}]   ;;  %s18103_s1 = inlined_call_operand.vmem [shape: bf16[2,4,128], index: 1, kind: input, shape index: {}]   ;;  %s18104_s2 = inlined_call_operand.vmem [shape: bf16[3,9,4,128], index: 2, kind: input, shape index: {}]   ;;  %s18105_s3 = inlined_call_operand.vmem [shape: bf16[640,128], index: 3, kind: input, shape index: {}]   ;;  %s18106_s4 = inlined_call_operand.vmem [shape: f32[6,128], index: 4, kind: input, shape index: {}]   ;;  %s18107_s5 = inlined_call_operand.vmem [shape: f32[6,128], index: 5, kind: input, shape index: {}]   ;;  %s18108_s6 = inlined_call_operand.hbm [shape: f32[2,16,16,128], index: 6, kind: output, shape index: {}]  }
   0x1   :  { %13 = vsyncpa [#allocation5 + $0x1], 0  ;;  %s15029_s21 = smov 0   ;;  %s15031_s22 = smov 0  }
   0x2   :  { %s15033_s23 = smov 0   ;;  %s15035_s24 = smov 0  }
   0x3   :  { %s15037_s25 = smov 0   ;;  %s15039_s26 = smov 0  }
   0x4   :  { %s15041_s27 = smov 0   ;;  %s15043_s28 = smov 0  }
   0x5 LB: > { %s11326_s29 = sadd.s32 4294967295, %s14987_s28   ;;  %s11327_s30 = sadd.s32 4294967294, %s14987_s28   ;;  %s14987_s28 = sphi %s15043_s28, %s19_s28   ;;  %s14983_s27 = sphi %s15041_s27, %s18123_s27   ;;  %s14979_s26 = sphi %s15039_s26, %s18122_s26   ;;  %s14975_s25 = sphi %s15037_s25, %s18121_s25   ;;  %s14971_s24 = sphi %s15035_s24, %s18120_s24   ;;  %s14967_s23 = sphi %s15033_s23, %s18119_s23   ;;  %s14963_s22 = sphi %s15031_s22, %s18118_s22   ;;  %s14959_s21 = sphi %s15029_s21, %s18117_s21  }
   0x6   : > { %s28_s7 = sadd.s32 1, %s14979_s26  ;;  %s31_s8 = sadd.s32 1, %s14983_s27 }
   0x7   : > { %p29_p0 = scmp.ge.s32.totalorder %s28_s7, 2  ;;  %p181_p1 = scmp.ne.s32.totalorder %s14967_s23, %s14963_s22 }
   0x8   : > { %p182_p2 = scmp.eq.s32.totalorder %s11326_s29, 3  ;;  %p187_p5 = scmp.ne.s32.totalorder %s14963_s22, %s14959_s21 }
   0x9   : > { %s18125_s7 = smov (%p29_p0, %s28_s7), 0  ;;  %s18127_s8 = smov (!%p29_p0, %s31_s8), %s14983_s27 }
   0xa   : > { %s167_s9 = ssub.s32 %s14979_s26, %s18125_s7  ;;  %p15080_p3 = por %p182_p2, %p181_p1 }
   0xb   : > { %p33_p4 = scmp.ge.s32.totalorder %s18127_s8, 2  ;;  %p188_p6 = scmp.eq.s32.totalorder %s11327_s30, 3 }
   0xc   : > { %p11330_p7 = scmp.ge.s32.totalorder %s14987_s28, 1  ;;  %p229_p9 = scmp.lt.s32.totalorder %s14987_s28, 5 }
   0xd   : > { %s18129_s8 = smov (%p33_p4, %s18127_s8), 0  ;;  %p15089_p8 = por %p188_p6, %p187_p5 }
   0xe   : > { %s166_s12 = ssub.s32 %s14983_s27, %s18129_s8  ;;  %s171_s13 = sadd.s32 1, %s14967_s23 }
   0xf   : > { %s168_s14 = sor.u32 %s167_s9, %s166_s12  ;;  %p230_p10 = pnand %p11330_p7, %p229_p9 }
  0x10   : > { %p169_p11 = scmp.eq.s32.totalorder %s168_s14, 0  ;;  %v11334_v0 = vld [vmem:[%s18103_s1 + $0x2] sm:$0x3] (!%p230_p10)  ;;  %vm1737_vm0 = vcmask (!%p230_p10), 1041408   ;;  %v14989_v1 = vmov (!%p230_p10), 0.0   ;;  %vm14990_vm1 = vmmov (!%p230_p10), 0  }
  0x11   : > { %233 = sbr.rel (%p230_p10) target bundleno = 2291 (0x8f3), region = 44  ;;  %13595 = vmatprep.subr.bf16.mxu0 (!%p230_p10), %v14989_v1  ;;  %v1739_v2 = vsel (!%p230_p10), %vm1737_vm0, %v11334_v0, 0  ;;  %13597 = vmatprep.mubr.msk.bf16.mxu0 (!%p230_p10), %vm14990_vm1, %v14989_v1  ;;  %p259_p12 = scmp.lt.s32.totalorder (!%p230_p10), %s14975_s25, 1  ;;  %vm995_vm2 = vcmask (!%p230_p10), 31744   ;;  %vm1007_vm3 = vcmask (!%p230_p10), 27648   ;;  %vm1963_vm4 = vcmask (!%p230_p10), 1042432  }
  0x12   : > { %s15098_s15 = scalar_select %p169_p11, %s14967_s23, %s171_s13  }
  0x13   : > { %13596 = vmatpush3.bf16.msra.mxu0 (!%p230_p10), %v1739_v2  ;;  %s11345_s13 = smul.u32 (!%p230_p10), 224, %s14971_s24  ;;  %vm1964_vm5 = vcmask (!%p230_p10), 1046532   ;;  %vm2515_vm7 = vcmask (!%p230_p10), 1045508   ;;  %vm5333_vm9 = vcmask (!%p230_p10), 1040384   ;;  %vm5334_vm10 = vcmask (!%p230_p10), 1044484   ;;  %s256_s16 = sand.u32 (!%p230_p10), 1, %s14963_s22  }
  0x14   : > { %13601 = vmatprep.subr.bf16.mxu0 (!%p230_p10), %v14989_v1  ;;  %vm15636_vm6 = vmor (!%p230_p10), %vm1963_vm4, %vm1964_vm5  ;;  %s11331_s9 = sshll.u32 (!%p230_p10), %s256_s16, 7  ;;  %s18050_s20 = scalar_lea.sflag (!%p230_p10), [#allocation5], %s256_s16 }
  0x15   : > { %vm15868_vm8 = vmor (!%p230_p10), %vm1737_vm0, %vm2515_vm7  ;;  %s17984_s12 = scalar_lea.vmem (!%p230_p10), [#allocation4], %s11331_s9  ;;  %s14991_s9 = smov (!%p230_p10), [#allocation4]  }
  0x16   : > { %vm17150_vm11 = vmor (!%p230_p10), %vm5333_vm9, %vm5334_vm10 }
  0x18   : > { %s260_s18 = scalar_select %p259_p12, %s14975_s25, 1 }
  0x1a   : > { %s14729_s19 = smul.u32 1456, %s260_s18 }
  0x1c   : > { %s15113_s30 = scalar_lea.vmem %s18102_s0, %s14729_s19 }
  0x1d   : > { %v12620_v3 = vld [vmem:[%s15113_s30] sm:$0xff]   ;;  %v13139_v4 = vld [vmem:[%s15113_s30 + $0x8] sm:$0xff]   ;;  %v13140_v5 = vld [vmem:[%s15113_s30 + $0x10] sm:$0xff]   ;;  %s15634_s17 = scalar_lea.vmem %s15113_s30, %s11345_s13  ;;  %s11224_s13 = sshll.u32 %s17984_s12, 4  ;;  %s18043_s13 = int_to_ptr.vmem [resolvable:$true] %s11224_s13 }
  0x1e   : > { %v12621_v6 = vunpack.c.l.bf16 %v12620_v3  ;;  %v12622_v7 = vunpack.c.h.bf16 %v12620_v3  ;;  %v12625_v8 = vunpack.c.l.bf16 %v13139_v4  ;;  %v12626_v9 = vunpack.c.h.bf16 %v13139_v4  ;;  %v273_v14 = vld [vmem:[%s15113_s30 + $0x18] sm:$0x3]  ;;  %v274_v18 = vld [vmem:[%s15113_s30 + $0x1c] ss:$20 sps:$4 sm:$0xff]   ;;  %v13141_v22 = vld [vmem:[%s15113_s30 + $0x20] sm:$0xff]   ;;  %s14893_s29 = scalar_lea.vmem %s18043_s13, 2048 }
  0x1f   : > { %v12629_v10 = vunpack.c.l.bf16 %v13140_v5  ;;  %v12630_v16 = vunpack.c.h.bf16 %v13140_v5  ;;  %v637_v20 = vunpack.c.l.bf16 %v273_v14  ;;  %v638_v24 = vunpack.c.l.bf16 %v274_v18  ;;  %v13142_v29 = vld [vmem:[%s15113_s30 + $0x28] sm:$0xff]   ;;  %v280_v39 = vld [vmem:[%s15113_s30 + $0x34] sm:$0x3]  ;;  %v13143_v43 = vld [vmem:[%s15113_s30 + $0x38] sm:$0xff]   ;;  %p14894_p13 = scmp.ne.s32.totalorder %s18043_s13, %s14893_s29 }
  0x20   : > { %v996_v11 = vsel %vm995_vm2, %v12621_v6, 0.0  ;;  %v997_v12 = vsel %vm995_vm2, %v12622_v7, 0.0  ;;  %v999_v13 = vsel %vm995_vm2, %v12625_v8, 0.0  ;;  %v1001_v17 = vsel %vm995_vm2, %v12626_v9, 0.0  ;;  %v13144_v50 = vld [vmem:[%s15113_s30 + $0x40] sm:$0xff]   ;;  %v13145_v57 = vld [vmem:[%s15113_s30 + $0x48] sm:$0xff]  }
  0x21   : > { %v998_v15 = vadd.f32 %v997_v12, %v996_v11  ;;  %v1003_v21 = vsel %vm995_vm2, %v12629_v10, 0.0  ;;  %v1005_v25 = vsel %vm995_vm2, %v12630_v16, 0.0  ;;  %v12633_v27 = vunpack.c.l.bf16 %v13141_v22  ;;  %v287_v0 = vld [vmem:[%s15113_s30 + $0x50] sm:$0x3]  ;;  %v288_v5 = vld [vmem:[%s15113_s30 + $0x54] ss:$20 sps:$4 sm:$0xff]   ;;  %p14895_p0 = pnand %p14894_p13, %p15080_p3 }
  0x22   : > { %v1008_v28 = vsel %vm1007_vm3, %v637_v20, 0.0  ;;  %v12634_v31 = vunpack.c.h.bf16 %v13141_v22  ;;  %v1010_v32 = vsel %vm995_vm2, %v638_v24, 0.0  ;;  %v12637_v34 = vunpack.c.l.bf16 %v13142_v29  ;;  %v13146_v9 = vld [vmem:[%s15113_s30 + $0x58] sm:$0xff]   ;;  %v13147_v16 = vld [vmem:[%s15113_s30 + $0x60] sm:$0xff]  }
  0x23   : > { %v1000_v19 = vadd.f32 %v999_v13, %v998_v15  ;;  %v1012_v35 = vsel %vm995_vm2, %v12633_v27, 0.0  ;;  %v12638_v37 = vunpack.c.h.bf16 %v13142_v29  ;;  %v643_v41 = vunpack.c.h.bf16 %v274_v18  ;;  %p14896_p1 = pneg %p14895_p0 }
  0x24   : > { %v1014_v38 = vsel %vm995_vm2, %v12634_v31, 0.0  ;;  %v1016_v42 = vsel %vm995_vm2, %v12637_v34, 0.0  ;;  %v644_v45 = vunpack.c.l.bf16 %v280_v39  ;;  %v12641_v48 = vunpack.c.l.bf16 %v13143_v43 }
  0x25   : > { %v1002_v23 = vadd.f32 %v1001_v17, %v1000_v19  ;;  %v1018_v46 = vsel %vm995_vm2, %v12638_v37, 0.0  ;;  %v1020_v49 = vsel %vm995_vm2, %v643_v41, 0.0  ;;  %v12642_v52 = vunpack.c.h.bf16 %v13143_v43  ;;  %v13149_v37 = vld [vmem:[%s15113_s30 + $0x78] sm:$0xff]  }
  0x26   : > { %v1022_v53 = vsel %vm1007_vm3, %v644_v45, 0.0  ;;  %v12645_v55 = vunpack.c.l.bf16 %v13144_v50  ;;  %v1024_v56 = vsel %vm995_vm2, %v12641_v48, 0.0  ;;  %v12646_v59 = vunpack.c.h.bf16 %v13144_v50 }
  0x27   : > { %v1004_v26 = vadd.f32 %v1003_v21, %v1002_v23  ;;  %v1026_v60 = vsel %vm995_vm2, %v12642_v52, 0.0  ;;  %v12649_v62 = vunpack.c.l.bf16 %v13145_v57  ;;  %v12650_v3 = vunpack.c.h.bf16 %v13145_v57 }
  0x28   : > { %v1028_v63 = vsel %vm995_vm2, %v12645_v55, 0.0  ;;  %v1030_v4 = vsel %vm995_vm2, %v12646_v59, 0.0  ;;  %v651_v7 = vunpack.c.l.bf16 %v287_v0  ;;  %v652_v11 = vunpack.c.l.bf16 %v288_v5  ;;  %v302_v55 = vld [vmem:[%s15113_s30 + $0x8c] ss:$20 sps:$4 sm:$0xff]   ;;  %v13151_v59 = vld [vmem:[%s15113_s30 + $0x90] sm:$0xff]  }
  0x29   : > { %v1006_v30 = vadd.f32 %v1005_v25, %v1004_v26  ;;  %v1032_v8 = vsel %vm995_vm2, %v12649_v62, 0.0  ;;  %v1034_v12 = vsel %vm995_vm2, %v12650_v3, 0.0  ;;  %v12653_v14 = vunpack.c.l.bf16 %v13146_v9  ;;  %v294_v26 = vld [vmem:[%s15113_s30 + $0x6c] sm:$0x3]  ;;  %v13152_v3 = vld [vmem:[%s15113_s30 + $0x98] sm:$0xff]  }
  0x2a   : > { %v1036_v15 = vsel %vm1007_vm3, %v651_v7, 0.0  ;;  %v12654_v18 = vunpack.c.h.bf16 %v13146_v9  ;;  %v1038_v19 = vsel %vm995_vm2, %v652_v11, 0.0  ;;  %v12657_v21 = vunpack.c.l.bf16 %v13147_v16 }
  0x2b   : > { %v1009_v33 = vadd.f32 %v1008_v28, %v1006_v30  ;;  %v1040_v22 = vsel %vm995_vm2, %v12653_v14, 0.0  ;;  %v12658_v24 = vunpack.c.h.bf16 %v13147_v16  ;;  %v657_v28 = vunpack.c.h.bf16 %v288_v5  ;;  %v13148_v30 = vld [vmem:[%s15113_s30 + $0x70] sm:$0xff]  }
  0x2c   : > { %v1042_v25 = vsel %vm995_vm2, %v12654_v18, 0.0  ;;  %v1044_v29 = vsel %vm995_vm2, %v12657_v21, 0.0  ;;  %v12662_v39 = vunpack.c.h.bf16 %v13148_v30  ;;  %v12673_v0 = vunpack.c.l.bf16 %v13151_v59 }
  0x2d   : > { %v1011_v36 = vadd.f32 %v1010_v32, %v1009_v33  ;;  %v658_v32 = vunpack.c.l.bf16 %v294_v26  ;;  %v1046_v33 = vsel %vm995_vm2, %v12658_v24, 0.0  ;;  %v12674_v5 = vunpack.c.h.bf16 %v13151_v59  ;;  %v13154_v24 = vld [vmem:[%s15113_s30 + $0xb0] sm:$0xff]  }
  0x2e   : > { %v1068_v9 = vsel %vm995_vm2, %v12673_v0, 0.0  ;;  %v12678_v11 = vunpack.c.h.bf16 %v13152_v3 }
  0x2f   : > { %v1013_v40 = vadd.f32 %v1012_v35, %v1011_v36  ;;  %v12661_v35 = vunpack.c.l.bf16 %v13148_v30  ;;  %v1048_v36 = vsel %vm995_vm2, %v657_v28, 0.0 }
  0x31   : > { %v1015_v44 = vadd.f32 %v1014_v38, %v1013_v40  ;;  %v1050_v40 = vsel %vm1007_vm3, %v658_v32, 0.0  ;;  %v1052_v43 = vsel %vm995_vm2, %v12661_v35, 0.0 }
  0x33   : > { %v1017_v47 = vadd.f32 %v1016_v42, %v1015_v44  ;;  %v12665_v42 = vunpack.c.l.bf16 %v13149_v37  ;;  %v13150_v44 = vld [vmem:[%s15113_s30 + $0x80] sm:$0xff]  }
  0x35   : > { %v1019_v51 = vadd.f32 %v1018_v46, %v1017_v47  ;;  %v12666_v46 = vunpack.c.h.bf16 %v13149_v37  ;;  %v1054_v47 = vsel %vm995_vm2, %v12662_v39, 0.0  ;;  %v1056_v50 = vsel %vm995_vm2, %v12665_v42, 0.0  ;;  %v316_v42 = vld [vmem:[%s15113_s30 + $0xc4] ss:$20 sps:$4 sm:$0xff]  }
  0x37   : > { %v1021_v54 = vadd.f32 %v1020_v49, %v1019_v51  ;;  %v12669_v49 = vunpack.c.l.bf16 %v13150_v44  ;;  %v301_v51 = vld [vmem:[%s15113_s30 + $0x88] sm:$0x3] }
  0x38   : > { %v665_v57 = vunpack.c.l.bf16 %v301_v51 }
  0x39   : > { %v1023_v58 = vadd.f32 %v1022_v53, %v1021_v54  ;;  %v12670_v53 = vunpack.c.h.bf16 %v13150_v44  ;;  %v1058_v54 = vsel %vm995_vm2, %v12666_v46, 0.0  ;;  %v13156_v46 = vld [vmem:[%s15113_s30 + $0xc8] sm:$0xff]  }
  0x3a   : > { %v12693_v51 = vunpack.c.l.bf16 %v13156_v46 }
  0x3b   : > { %v1025_v61 = vadd.f32 %v1024_v56, %v1023_v58  ;;  %v1060_v58 = vsel %vm995_vm2, %v12669_v49, 0.0  ;;  %v1062_v62 = vsel %vm995_vm2, %v12670_v53, 0.0  ;;  %v13157_v53 = vld [vmem:[%s15113_s30 + $0xd0] sm:$0xff]  }
  0x3c   : > { %v1096_v59 = vsel %vm995_vm2, %v12693_v51, 0.0 }
  0x3d   : > { %v1027_v2 = vadd.f32 %v1026_v60, %v1025_v61  ;;  %v666_v61 = vunpack.c.l.bf16 %v302_v55 }
  0x3f   : > { %v1029_v6 = vadd.f32 %v1028_v63, %v1027_v2  ;;  %v1064_v2 = vsel %vm1007_vm3, %v665_v57, 0.0 }
  0x41   : > { %v1031_v10 = vadd.f32 %v1030_v4, %v1029_v6  ;;  %v1066_v6 = vsel %vm995_vm2, %v666_v61, 0.0  ;;  %v12698_v61 = vunpack.c.h.bf16 %v13157_v53 }
  0x43   : > { %v1033_v13 = vadd.f32 %v1032_v8, %v1031_v10  ;;  %v12677_v8 = vunpack.c.l.bf16 %v13152_v3 }
  0x45   : > { %v1035_v17 = vadd.f32 %v1034_v12, %v1033_v13  ;;  %v1070_v12 = vsel %vm995_vm2, %v12674_v5, 0.0  ;;  %v308_v13 = vld [vmem:[%s15113_s30 + $0xa4] sm:$0x3]  ;;  %v1072_v16 = vsel %vm995_vm2, %v12677_v8, 0.0 }
  0x47   : > { %v1037_v20 = vadd.f32 %v1036_v15, %v1035_v17  ;;  %v671_v15 = vunpack.c.h.bf16 %v302_v55  ;;  %v13153_v17 = vld [vmem:[%s15113_s30 + $0xa8] sm:$0xff]   ;;  %v12694_v55 = vunpack.c.h.bf16 %v13156_v46 }
  0x48   : > { %v12682_v26 = vunpack.c.h.bf16 %v13153_v17 }
  0x49   : > { %v1039_v23 = vadd.f32 %v1038_v19, %v1037_v20  ;;  %v672_v19 = vunpack.c.l.bf16 %v308_v13  ;;  %v1074_v20 = vsel %vm995_vm2, %v12678_v11, 0.0  ;;  %v13159_v11 = vld [vmem:[%s15113_s30 + $0xe8] sm:$0xff]  }
  0x4b   : > { %v1041_v27 = vadd.f32 %v1040_v22, %v1039_v23  ;;  %v12681_v22 = vunpack.c.l.bf16 %v13153_v17  ;;  %v1076_v23 = vsel %vm995_vm2, %v671_v15, 0.0 }
  0x4d   : > { %v1043_v31 = vadd.f32 %v1042_v25, %v1041_v27  ;;  %v1078_v27 = vsel %vm1007_vm3, %v672_v19, 0.0  ;;  %v1080_v30 = vsel %vm995_vm2, %v12681_v22, 0.0 }
  0x4f   : > { %v1045_v34 = vadd.f32 %v1044_v29, %v1043_v31  ;;  %v12685_v29 = vunpack.c.l.bf16 %v13154_v24  ;;  %v13155_v31 = vld [vmem:[%s15113_s30 + $0xb8] sm:$0xff]  }
  0x51   : > { %v1047_v38 = vadd.f32 %v1046_v33, %v1045_v34  ;;  %v12686_v33 = vunpack.c.h.bf16 %v13154_v24  ;;  %v1082_v34 = vsel %vm995_vm2, %v12682_v26, 0.0  ;;  %v1084_v37 = vsel %vm995_vm2, %v12685_v29, 0.0  ;;  %v330_v29 = vld [vmem:[%s15113_s30 + $0xfc] ss:$20 sps:$4 sm:$0xff]  }
  0x53   : > { %v1049_v41 = vadd.f32 %v1048_v36, %v1047_v38  ;;  %v12689_v36 = vunpack.c.l.bf16 %v13155_v31  ;;  %v315_v38 = vld [vmem:[%s15113_s30 + $0xc0] sm:$0x3] }
  0x54   : > { %v679_v44 = vunpack.c.l.bf16 %v315_v38 }
  0x55   : > { %v1051_v45 = vadd.f32 %v1050_v40, %v1049_v41  ;;  %v12690_v40 = vunpack.c.h.bf16 %v13155_v31  ;;  %v1086_v41 = vsel %vm995_vm2, %v12686_v33, 0.0  ;;  %v13161_v33 = vld [vmem:[%s15113_s30 + $0x100] sm:$0xff]  }
  0x56   : > { %v12713_v38 = vunpack.c.l.bf16 %v13161_v33 }
  0x57   : > { %v1053_v48 = vadd.f32 %v1052_v43, %v1051_v45  ;;  %v1088_v45 = vsel %vm995_vm2, %v12689_v36, 0.0  ;;  %v1090_v49 = vsel %vm995_vm2, %v12690_v40, 0.0  ;;  %v13162_v40 = vld [vmem:[%s15113_s30 + $0x108] sm:$0xff]  }
  0x58   : > { %v1124_v46 = vsel %vm995_vm2, %v12713_v38, 0.0 }
  0x59   : > { %v1055_v52 = vadd.f32 %v1054_v47, %v1053_v48  ;;  %v680_v48 = vunpack.c.l.bf16 %v316_v42 }
  0x5b   : > { %v1057_v56 = vadd.f32 %v1056_v50, %v1055_v52  ;;  %v1092_v52 = vsel %vm1007_vm3, %v679_v44, 0.0 }
  0x5d   : > { %v1059_v60 = vadd.f32 %v1058_v54, %v1057_v56  ;;  %v1094_v56 = vsel %vm995_vm2, %v680_v48, 0.0  ;;  %v12718_v48 = vunpack.c.h.bf16 %v13162_v40 }
  0x5f   : > { %v1061_v63 = vadd.f32 %v1060_v58, %v1059_v60  ;;  %v12697_v58 = vunpack.c.l.bf16 %v13157_v53 }
  0x61   : > { %v1063_v4 = vadd.f32 %v1062_v62, %v1061_v63  ;;  %v1098_v62 = vsel %vm995_vm2, %v12694_v55, 0.0  ;;  %v322_v63 = vld [vmem:[%s15113_s30 + $0xdc] sm:$0x3]  ;;  %v1100_v3 = vsel %vm995_vm2, %v12697_v58, 0.0 }
  0x63   : > { %v1065_v7 = vadd.f32 %v1064_v2, %v1063_v4  ;;  %v685_v2 = vunpack.c.h.bf16 %v316_v42  ;;  %v13158_v4 = vld [vmem:[%s15113_s30 + $0xe0] sm:$0xff]   ;;  %v12714_v42 = vunpack.c.h.bf16 %v13161_v33 }
  0x64   : > { %v12702_v13 = vunpack.c.h.bf16 %v13158_v4 }
  0x65   : > { %v1067_v10 = vadd.f32 %v1066_v6, %v1065_v7  ;;  %v686_v6 = vunpack.c.l.bf16 %v322_v63  ;;  %v1102_v7 = vsel %vm995_vm2, %v12698_v61, 0.0  ;;  %v13164_v61 = vld [vmem:[%s15113_s30 + $0x120] sm:$0xff]  }
  0x67   : > { %v1069_v14 = vadd.f32 %v1068_v9, %v1067_v10  ;;  %v12701_v9 = vunpack.c.l.bf16 %v13158_v4  ;;  %v1104_v10 = vsel %vm995_vm2, %v685_v2, 0.0 }
  0x69   : > { %v1071_v18 = vadd.f32 %v1070_v12, %v1069_v14  ;;  %v1106_v14 = vsel %vm1007_vm3, %v686_v6, 0.0  ;;  %v1108_v17 = vsel %vm995_vm2, %v12701_v9, 0.0 }
  0x6b   : > { %v1073_v21 = vadd.f32 %v1072_v16, %v1071_v18  ;;  %v12705_v16 = vunpack.c.l.bf16 %v13159_v11  ;;  %v13160_v18 = vld [vmem:[%s15113_s30 + $0xf0] sm:$0xff]  }
  0x6d   : > { %v1075_v25 = vadd.f32 %v1074_v20, %v1073_v21  ;;  %v12706_v20 = vunpack.c.h.bf16 %v13159_v11  ;;  %v1110_v21 = vsel %vm995_vm2, %v12702_v13, 0.0  ;;  %v1112_v24 = vsel %vm995_vm2, %v12705_v16, 0.0  ;;  %v344_v16 = vld [vmem:[%s15113_s30 + $0x134] ss:$20 sps:$4 sm:$0xff]  }
  0x6f   : > { %v1077_v28 = vadd.f32 %v1076_v23, %v1075_v25  ;;  %v12709_v23 = vunpack.c.l.bf16 %v13160_v18  ;;  %v329_v25 = vld [vmem:[%s15113_s30 + $0xf8] sm:$0x3] }
  0x70   : > { %v693_v31 = vunpack.c.l.bf16 %v329_v25 }
  0x71   : > { %v1079_v32 = vadd.f32 %v1078_v27, %v1077_v28  ;;  %v12710_v27 = vunpack.c.h.bf16 %v13160_v18  ;;  %v1114_v28 = vsel %vm995_vm2, %v12706_v20, 0.0  ;;  %v13166_v20 = vld [vmem:[%s15113_s30 + $0x138] sm:$0xff]  }
  0x72   : > { %v12733_v25 = vunpack.c.l.bf16 %v13166_v20 }
  0x73   : > { %v1081_v35 = vadd.f32 %v1080_v30, %v1079_v32  ;;  %v1116_v32 = vsel %vm995_vm2, %v12709_v23, 0.0  ;;  %v1118_v36 = vsel %vm995_vm2, %v12710_v27, 0.0  ;;  %v13167_v27 = vld [vmem:[%s15113_s30 + $0x140] sm:$0xff]  }
  0x74   : > { %v1152_v33 = vsel %vm995_vm2, %v12733_v25, 0.0 }
  0x75   : > { %v1083_v39 = vadd.f32 %v1082_v34, %v1081_v35  ;;  %v694_v35 = vunpack.c.l.bf16 %v330_v29 }
  0x77   : > { %v1085_v43 = vadd.f32 %v1084_v37, %v1083_v39  ;;  %v1120_v39 = vsel %vm1007_vm3, %v693_v31, 0.0 }
  0x79   : > { %v1087_v47 = vadd.f32 %v1086_v41, %v1085_v43  ;;  %v1122_v43 = vsel %vm995_vm2, %v694_v35, 0.0  ;;  %v12738_v35 = vunpack.c.h.bf16 %v13167_v27 }
  0x7b   : > { %v1089_v50 = vadd.f32 %v1088_v45, %v1087_v47  ;;  %v12717_v45 = vunpack.c.l.bf16 %v13162_v40 }
  0x7d   : > { %v1091_v54 = vadd.f32 %v1090_v49, %v1089_v50  ;;  %v1126_v49 = vsel %vm995_vm2, %v12714_v42, 0.0  ;;  %v336_v50 = vld [vmem:[%s15113_s30 + $0x114] sm:$0x3]  ;;  %v1128_v53 = vsel %vm995_vm2, %v12717_v45, 0.0 }
  0x7f   : > { %v1093_v57 = vadd.f32 %v1092_v52, %v1091_v54  ;;  %v699_v52 = vunpack.c.h.bf16 %v330_v29  ;;  %v13163_v54 = vld [vmem:[%s15113_s30 + $0x118] sm:$0xff]   ;;  %v12734_v29 = vunpack.c.h.bf16 %v13166_v20 }
  0x80   : > { %v12722_v63 = vunpack.c.h.bf16 %v13163_v54 }
  0x81   : > { %v1095_v60 = vadd.f32 %v1094_v56, %v1093_v57  ;;  %v700_v56 = vunpack.c.l.bf16 %v336_v50  ;;  %v1130_v57 = vsel %vm995_vm2, %v12718_v48, 0.0  ;;  %v13169_v48 = vld [vmem:[%s15113_s30 + $0x158] sm:$0xff]  }
  0x83   : > { %v1097_v0 = vadd.f32 %v1096_v59, %v1095_v60  ;;  %v12721_v59 = vunpack.c.l.bf16 %v13163_v54  ;;  %v1132_v60 = vsel %vm995_vm2, %v699_v52, 0.0 }
  0x85   : > { %v1099_v5 = vadd.f32 %v1098_v62, %v1097_v0  ;;  %v1134_v0 = vsel %vm1007_vm3, %v700_v56, 0.0  ;;  %v1136_v4 = vsel %vm995_vm2, %v12721_v59, 0.0 }
  0x87   : > { %v1101_v8 = vadd.f32 %v1100_v3, %v1099_v5  ;;  %v12725_v3 = vunpack.c.l.bf16 %v13164_v61  ;;  %v13165_v5 = vld [vmem:[%s15113_s30 + $0x128] sm:$0xff]  }
  0x89   : > { %v1103_v12 = vadd.f32 %v1102_v7, %v1101_v8  ;;  %v12726_v7 = vunpack.c.h.bf16 %v13164_v61  ;;  %v1138_v8 = vsel %vm995_vm2, %v12722_v63, 0.0  ;;  %v1140_v11 = vsel %vm995_vm2, %v12725_v3, 0.0  ;;  %v358_v3 = vld [vmem:[%s15113_s30 + $0x16c] ss:$20 sps:$4 sm:$0xff]  }
  0x8b   : > { %v1105_v15 = vadd.f32 %v1104_v10, %v1103_v12  ;;  %v12729_v10 = vunpack.c.l.bf16 %v13165_v5  ;;  %v343_v12 = vld [vmem:[%s15113_s30 + $0x130] sm:$0x3] }
  0x8c   : > { %v707_v18 = vunpack.c.l.bf16 %v343_v12 }
  0x8d   : > { %v1107_v19 = vadd.f32 %v1106_v14, %v1105_v15  ;;  %v12730_v14 = vunpack.c.h.bf16 %v13165_v5  ;;  %v1142_v15 = vsel %vm995_vm2, %v12726_v7, 0.0  ;;  %v13171_v7 = vld [vmem:[%s15113_s30 + $0x170] sm:$0xff]  }
  0x8e   : > { %v12753_v12 = vunpack.c.l.bf16 %v13171_v7 }
  0x8f   : > { %v1109_v22 = vadd.f32 %v1108_v17, %v1107_v19  ;;  %v1144_v19 = vsel %vm995_vm2, %v12729_v10, 0.0  ;;  %v1146_v23 = vsel %vm995_vm2, %v12730_v14, 0.0  ;;  %v13172_v14 = vld [vmem:[%s15113_s30 + $0x178] sm:$0xff]  }
  0x90   : > { %v1180_v20 = vsel %vm995_vm2, %v12753_v12, 0.0 }
  0x91   : > { %v1111_v26 = vadd.f32 %v1110_v21, %v1109_v22  ;;  %v708_v22 = vunpack.c.l.bf16 %v344_v16 }
  0x93   : > { %v1113_v30 = vadd.f32 %v1112_v24, %v1111_v26  ;;  %v1148_v26 = vsel %vm1007_vm3, %v707_v18, 0.0 }
  0x95   : > { %v1115_v34 = vadd.f32 %v1114_v28, %v1113_v30  ;;  %v1150_v30 = vsel %vm995_vm2, %v708_v22, 0.0  ;;  %v12758_v22 = vunpack.c.h.bf16 %v13172_v14 }
  0x97   : > { %v1117_v37 = vadd.f32 %v1116_v32, %v1115_v34  ;;  %v12737_v32 = vunpack.c.l.bf16 %v13167_v27 }
  0x99   : > { %v1119_v41 = vadd.f32 %v1118_v36, %v1117_v37  ;;  %v1154_v36 = vsel %vm995_vm2, %v12734_v29, 0.0  ;;  %v350_v37 = vld [vmem:[%s15113_s30 + $0x14c] sm:$0x3]  ;;  %v1156_v40 = vsel %vm995_vm2, %v12737_v32, 0.0 }
  0x9b   : > { %v1121_v44 = vadd.f32 %v1120_v39, %v1119_v41  ;;  %v713_v39 = vunpack.c.h.bf16 %v344_v16  ;;  %v13168_v41 = vld [vmem:[%s15113_s30 + $0x150] sm:$0xff]   ;;  %v12754_v16 = vunpack.c.h.bf16 %v13171_v7 }
  0x9c   : > { %v12742_v50 = vunpack.c.h.bf16 %v13168_v41 }
  0x9d   : > { %v1123_v47 = vadd.f32 %v1122_v43, %v1121_v44  ;;  %v714_v43 = vunpack.c.l.bf16 %v350_v37  ;;  %v1158_v44 = vsel %vm995_vm2, %v12738_v35, 0.0  ;;  %v13174_v35 = vld [vmem:[%s15113_s30 + $0x190] sm:$0xff]  }
  0x9f   : > { %v1125_v51 = vadd.f32 %v1124_v46, %v1123_v47  ;;  %v12741_v46 = vunpack.c.l.bf16 %v13168_v41  ;;  %v1160_v47 = vsel %vm995_vm2, %v713_v39, 0.0 }
  0xa1   : > { %v1127_v55 = vadd.f32 %v1126_v49, %v1125_v51  ;;  %v1162_v51 = vsel %vm1007_vm3, %v714_v43, 0.0  ;;  %v1164_v54 = vsel %vm995_vm2, %v12741_v46, 0.0 }
  0xa3   : > { %v1129_v58 = vadd.f32 %v1128_v53, %v1127_v55  ;;  %v12745_v53 = vunpack.c.l.bf16 %v13169_v48  ;;  %v13170_v55 = vld [vmem:[%s15113_s30 + $0x160] sm:$0xff]  }
  0xa5   : > { %v1131_v62 = vadd.f32 %v1130_v57, %v1129_v58  ;;  %v12746_v57 = vunpack.c.h.bf16 %v13169_v48  ;;  %v1166_v58 = vsel %vm995_vm2, %v12742_v50, 0.0  ;;  %v1168_v61 = vsel %vm995_vm2, %v12745_v53, 0.0  ;;  %v372_v53 = vld [vmem:[%s15113_s30 + $0x1a4] ss:$20 sps:$4 sm:$0xff]  }
  0xa7   : > { %v1133_v2 = vadd.f32 %v1132_v60, %v1131_v62  ;;  %v12749_v60 = vunpack.c.l.bf16 %v13170_v55  ;;  %v357_v62 = vld [vmem:[%s15113_s30 + $0x168] sm:$0x3] }
  0xa8   : > { %v721_v5 = vunpack.c.l.bf16 %v357_v62 }
  0xa9   : > { %v1135_v6 = vadd.f32 %v1134_v0, %v1133_v2  ;;  %v12750_v0 = vunpack.c.h.bf16 %v13170_v55  ;;  %v1170_v2 = vsel %vm995_vm2, %v12746_v57, 0.0  ;;  %v13176_v57 = vld [vmem:[%s15113_s30 + $0x1a8] sm:$0xff]  }
  0xaa   : > { %v12773_v62 = vunpack.c.l.bf16 %v13176_v57 }
  0xab   : > { %v1137_v9 = vadd.f32 %v1136_v4, %v1135_v6  ;;  %v1172_v6 = vsel %vm995_vm2, %v12749_v60, 0.0  ;;  %v1174_v10 = vsel %vm995_vm2, %v12750_v0, 0.0  ;;  %v13177_v0 = vld [vmem:[%s15113_s30 + $0x1b0] sm:$0xff]  }
  0xac   : > { %v1208_v7 = vsel %vm995_vm2, %v12773_v62, 0.0 }
  0xad   : > { %v1139_v13 = vadd.f32 %v1138_v8, %v1137_v9  ;;  %v722_v9 = vunpack.c.l.bf16 %v358_v3 }
  0xaf   : > { %v1141_v17 = vadd.f32 %v1140_v11, %v1139_v13  ;;  %v1176_v13 = vsel %vm1007_vm3, %v721_v5, 0.0 }
  0xb1   : > { %v1143_v21 = vadd.f32 %v1142_v15, %v1141_v17  ;;  %v1178_v17 = vsel %vm995_vm2, %v722_v9, 0.0  ;;  %v12778_v9 = vunpack.c.h.bf16 %v13177_v0 }
  0xb3   : > { %v1145_v24 = vadd.f32 %v1144_v19, %v1143_v21  ;;  %v12757_v19 = vunpack.c.l.bf16 %v13172_v14 }
  0xb5   : > { %v1147_v28 = vadd.f32 %v1146_v23, %v1145_v24  ;;  %v1182_v23 = vsel %vm995_vm2, %v12754_v16, 0.0  ;;  %v364_v24 = vld [vmem:[%s15113_s30 + $0x184] sm:$0x3]  ;;  %v1184_v27 = vsel %vm995_vm2, %v12757_v19, 0.0 }
  0xb7   : > { %v1149_v31 = vadd.f32 %v1148_v26, %v1147_v28  ;;  %v727_v26 = vunpack.c.h.bf16 %v358_v3  ;;  %v13173_v28 = vld [vmem:[%s15113_s30 + $0x188] sm:$0xff]   ;;  %v12774_v3 = vunpack.c.h.bf16 %v13176_v57 }
  0xb8   : > { %v12762_v37 = vunpack.c.h.bf16 %v13173_v28 }
  0xb9   : > { %v1151_v34 = vadd.f32 %v1150_v30, %v1149_v31  ;;  %v728_v30 = vunpack.c.l.bf16 %v364_v24  ;;  %v1186_v31 = vsel %vm995_vm2, %v12758_v22, 0.0  ;;  %v13179_v22 = vld [vmem:[%s15113_s30 + $0x1c8] sm:$0xff]  }
  0xbb   : > { %v1153_v38 = vadd.f32 %v1152_v33, %v1151_v34  ;;  %v12761_v33 = vunpack.c.l.bf16 %v13173_v28  ;;  %v1188_v34 = vsel %vm995_vm2, %v727_v26, 0.0 }
  0xbd   : > { %v1155_v42 = vadd.f32 %v1154_v36, %v1153_v38  ;;  %v1190_v38 = vsel %vm1007_vm3, %v728_v30, 0.0  ;;  %v1192_v41 = vsel %vm995_vm2, %v12761_v33, 0.0 }
  0xbf   : > { %v1157_v45 = vadd.f32 %v1156_v40, %v1155_v42  ;;  %v12765_v40 = vunpack.c.l.bf16 %v13174_v35  ;;  %v13175_v42 = vld [vmem:[%s15113_s30 + $0x198] sm:$0xff]  }
  0xc1   : > { %v1159_v49 = vadd.f32 %v1158_v44, %v1157_v45  ;;  %v12766_v44 = vunpack.c.h.bf16 %v13174_v35  ;;  %v1194_v45 = vsel %vm995_vm2, %v12762_v37, 0.0  ;;  %v1196_v48 = vsel %vm995_vm2, %v12765_v40, 0.0  ;;  %v386_v40 = vld [vmem:[%s15113_s30 + $0x1dc] ss:$20 sps:$4 sm:$0xff]  }
  0xc3   : > { %v1161_v52 = vadd.f32 %v1160_v47, %v1159_v49  ;;  %v12769_v47 = vunpack.c.l.bf16 %v13175_v42  ;;  %v371_v49 = vld [vmem:[%s15113_s30 + $0x1a0] sm:$0x3] }
  0xc4   : > { %v735_v55 = vunpack.c.l.bf16 %v371_v49 }
  0xc5   : > { %v1163_v56 = vadd.f32 %v1162_v51, %v1161_v52  ;;  %v12770_v51 = vunpack.c.h.bf16 %v13175_v42  ;;  %v1198_v52 = vsel %vm995_vm2, %v12766_v44, 0.0  ;;  %v13181_v44 = vld [vmem:[%s15113_s30 + $0x1e0] sm:$0xff]  }
  0xc6   : > { %v12793_v49 = vunpack.c.l.bf16 %v13181_v44 }
  0xc7   : > { %v1165_v59 = vadd.f32 %v1164_v54, %v1163_v56  ;;  %v1200_v56 = vsel %vm995_vm2, %v12769_v47, 0.0  ;;  %v1202_v60 = vsel %vm995_vm2, %v12770_v51, 0.0  ;;  %v13182_v51 = vld [vmem:[%s15113_s30 + $0x1e8] sm:$0xff]  }
  0xc8   : > { %v1236_v57 = vsel %vm995_vm2, %v12793_v49, 0.0 }
  0xc9   : > { %v1167_v63 = vadd.f32 %v1166_v58, %v1165_v59  ;;  %v736_v59 = vunpack.c.l.bf16 %v372_v53 }
  0xcb   : > { %v1169_v4 = vadd.f32 %v1168_v61, %v1167_v63  ;;  %v1204_v63 = vsel %vm1007_vm3, %v735_v55, 0.0 }
  0xcd   : > { %v1171_v8 = vadd.f32 %v1170_v2, %v1169_v4  ;;  %v1206_v4 = vsel %vm995_vm2, %v736_v59, 0.0  ;;  %v12798_v59 = vunpack.c.h.bf16 %v13182_v51 }
  0xcf   : > { %v1173_v11 = vadd.f32 %v1172_v6, %v1171_v8  ;;  %v12777_v6 = vunpack.c.l.bf16 %v13177_v0 }
  0xd1   : > { %v1175_v15 = vadd.f32 %v1174_v10, %v1173_v11  ;;  %v1210_v10 = vsel %vm995_vm2, %v12774_v3, 0.0  ;;  %v378_v11 = vld [vmem:[%s15113_s30 + $0x1bc] sm:$0x3]  ;;  %v1212_v14 = vsel %vm995_vm2, %v12777_v6, 0.0 }
  0xd3   : > { %v1177_v18 = vadd.f32 %v1176_v13, %v1175_v15  ;;  %v741_v13 = vunpack.c.h.bf16 %v372_v53  ;;  %v13178_v15 = vld [vmem:[%s15113_s30 + $0x1c0] sm:$0xff]   ;;  %v12794_v53 = vunpack.c.h.bf16 %v13181_v44 }
  0xd4   : > { %v12782_v24 = vunpack.c.h.bf16 %v13178_v15 }
  0xd5   : > { %v1179_v21 = vadd.f32 %v1178_v17, %v1177_v18  ;;  %v742_v17 = vunpack.c.l.bf16 %v378_v11  ;;  %v1214_v18 = vsel %vm995_vm2, %v12778_v9, 0.0  ;;  %v13184_v9 = vld [vmem:[%s15113_s30 + $0x200] sm:$0xff]  }
  0xd7   : > { %v1181_v25 = vadd.f32 %v1180_v20, %v1179_v21  ;;  %v12781_v20 = vunpack.c.l.bf16 %v13178_v15  ;;  %v1216_v21 = vsel %vm995_vm2, %v741_v13, 0.0 }
  0xd9   : > { %v1183_v29 = vadd.f32 %v1182_v23, %v1181_v25  ;;  %v1218_v25 = vsel %vm1007_vm3, %v742_v17, 0.0  ;;  %v1220_v28 = vsel %vm995_vm2, %v12781_v20, 0.0 }
  0xdb   : > { %v1185_v32 = vadd.f32 %v1184_v27, %v1183_v29  ;;  %v12785_v27 = vunpack.c.l.bf16 %v13179_v22  ;;  %v13180_v29 = vld [vmem:[%s15113_s30 + $0x1d0] sm:$0xff]  }
  0xdd   : > { %v1187_v36 = vadd.f32 %v1186_v31, %v1185_v32  ;;  %v12786_v31 = vunpack.c.h.bf16 %v13179_v22  ;;  %v1222_v32 = vsel %vm995_vm2, %v12782_v24, 0.0  ;;  %v1224_v35 = vsel %vm995_vm2, %v12785_v27, 0.0  ;;  %v400_v27 = vld [vmem:[%s15113_s30 + $0x214] ss:$20 sps:$4 sm:$0xff]  }
  0xdf   : > { %v1189_v39 = vadd.f32 %v1188_v34, %v1187_v36  ;;  %v12789_v34 = vunpack.c.l.bf16 %v13180_v29  ;;  %v385_v36 = vld [vmem:[%s15113_s30 + $0x1d8] sm:$0x3] }
  0xe0   : > { %v749_v42 = vunpack.c.l.bf16 %v385_v36 }
  0xe1   : > { %v1191_v43 = vadd.f32 %v1190_v38, %v1189_v39  ;;  %v12790_v38 = vunpack.c.h.bf16 %v13180_v29  ;;  %v1226_v39 = vsel %vm995_vm2, %v12786_v31, 0.0  ;;  %v13186_v31 = vld [vmem:[%s15113_s30 + $0x218] sm:$0xff]  }
  0xe2   : > { %v12813_v36 = vunpack.c.l.bf16 %v13186_v31 }
  0xe3   : > { %v1193_v46 = vadd.f32 %v1192_v41, %v1191_v43  ;;  %v1228_v43 = vsel %vm995_vm2, %v12789_v34, 0.0  ;;  %v1230_v47 = vsel %vm995_vm2, %v12790_v38, 0.0  ;;  %v13187_v38 = vld [vmem:[%s15113_s30 + $0x220] sm:$0xff]  }
  0xe4   : > { %v1264_v44 = vsel %vm995_vm2, %v12813_v36, 0.0 }
  0xe5   : > { %v1195_v50 = vadd.f32 %v1194_v45, %v1193_v46  ;;  %v750_v46 = vunpack.c.l.bf16 %v386_v40 }
  0xe7   : > { %v1197_v54 = vadd.f32 %v1196_v48, %v1195_v50  ;;  %v1232_v50 = vsel %vm1007_vm3, %v749_v42, 0.0 }
  0xe9   : > { %v1199_v58 = vadd.f32 %v1198_v52, %v1197_v54  ;;  %v1234_v54 = vsel %vm995_vm2, %v750_v46, 0.0  ;;  %v12818_v46 = vunpack.c.h.bf16 %v13187_v38 }
  0xeb   : > { %v1201_v61 = vadd.f32 %v1200_v56, %v1199_v58  ;;  %v12797_v56 = vunpack.c.l.bf16 %v13182_v51 }
  0xed   : > { %v1203_v2 = vadd.f32 %v1202_v60, %v1201_v61  ;;  %v1238_v60 = vsel %vm995_vm2, %v12794_v53, 0.0  ;;  %v392_v61 = vld [vmem:[%s15113_s30 + $0x1f4] sm:$0x3]  ;;  %v1240_v0 = vsel %vm995_vm2, %v12797_v56, 0.0 }
  0xef   : > { %v1205_v5 = vadd.f32 %v1204_v63, %v1203_v2  ;;  %v755_v63 = vunpack.c.h.bf16 %v386_v40  ;;  %v13183_v2 = vld [vmem:[%s15113_s30 + $0x1f8] sm:$0xff]   ;;  %v12814_v40 = vunpack.c.h.bf16 %v13186_v31 }
  0xf0   : > { %v12802_v11 = vunpack.c.h.bf16 %v13183_v2 }
  0xf1   : > { %v1207_v8 = vadd.f32 %v1206_v4, %v1205_v5  ;;  %v756_v4 = vunpack.c.l.bf16 %v392_v61  ;;  %v1242_v5 = vsel %vm995_vm2, %v12798_v59, 0.0  ;;  %v13189_v59 = vld [vmem:[%s15113_s30 + $0x238] sm:$0xff]  }
  0xf3   : > { %v1209_v12 = vadd.f32 %v1208_v7, %v1207_v8  ;;  %v12801_v7 = vunpack.c.l.bf16 %v13183_v2  ;;  %v1244_v8 = vsel %vm995_vm2, %v755_v63, 0.0 }
  0xf5   : > { %v1211_v16 = vadd.f32 %v1210_v10, %v1209_v12  ;;  %v1246_v12 = vsel %vm1007_vm3, %v756_v4, 0.0  ;;  %v1248_v15 = vsel %vm995_vm2, %v12801_v7, 0.0 }
  0xf7   : > { %v1213_v19 = vadd.f32 %v1212_v14, %v1211_v16  ;;  %v12805_v14 = vunpack.c.l.bf16 %v13184_v9  ;;  %v13185_v16 = vld [vmem:[%s15113_s30 + $0x208] sm:$0xff]  }
  0xf9   : > { %v1215_v23 = vadd.f32 %v1214_v18, %v1213_v19  ;;  %v12806_v18 = vunpack.c.h.bf16 %v13184_v9  ;;  %v1250_v19 = vsel %vm995_vm2, %v12802_v11, 0.0  ;;  %v1252_v22 = vsel %vm995_vm2, %v12805_v14, 0.0  ;;  %v414_v14 = vld [vmem:[%s15113_s30 + $0x24c] ss:$20 sps:$4 sm:$0xff]  }
  0xfb   : > { %v1217_v26 = vadd.f32 %v1216_v21, %v1215_v23  ;;  %v12809_v21 = vunpack.c.l.bf16 %v13185_v16  ;;  %v399_v23 = vld [vmem:[%s15113_s30 + $0x210] sm:$0x3] }
  0xfc   : > { %v763_v29 = vunpack.c.l.bf16 %v399_v23 }
  0xfd   : > { %v1219_v30 = vadd.f32 %v1218_v25, %v1217_v26  ;;  %v12810_v25 = vunpack.c.h.bf16 %v13185_v16  ;;  %v1254_v26 = vsel %vm995_vm2, %v12806_v18, 0.0  ;;  %v13191_v18 = vld [vmem:[%s15113_s30 + $0x250] sm:$0xff]  }
  0xfe   : > { %v12833_v23 = vunpack.c.l.bf16 %v13191_v18 }
  0xff   : > { %v1221_v33 = vadd.f32 %v1220_v28, %v1219_v30  ;;  %v1256_v30 = vsel %vm995_vm2, %v12809_v21, 0.0  ;;  %v1258_v34 = vsel %vm995_vm2, %v12810_v25, 0.0  ;;  %v13192_v25 = vld [vmem:[%s15113_s30 + $0x258] sm:$0xff]  }
 0x100   : > { %v1292_v31 = vsel %vm995_vm2, %v12833_v23, 0.0 }
 0x101   : > { %v1223_v37 = vadd.f32 %v1222_v32, %v1221_v33  ;;  %v764_v33 = vunpack.c.l.bf16 %v400_v27 }
 0x103   : > { %v1225_v41 = vadd.f32 %v1224_v35, %v1223_v37  ;;  %v1260_v37 = vsel %vm1007_vm3, %v763_v29, 0.0 }
 0x105   : > { %v1227_v45 = vadd.f32 %v1226_v39, %v1225_v41  ;;  %v1262_v41 = vsel %vm995_vm2, %v764_v33, 0.0  ;;  %v12838_v33 = vunpack.c.h.bf16 %v13192_v25 }
 0x107   : > { %v1229_v48 = vadd.f32 %v1228_v43, %v1227_v45  ;;  %v12817_v43 = vunpack.c.l.bf16 %v13187_v38 }
 0x109   : > { %v1231_v52 = vadd.f32 %v1230_v47, %v1229_v48  ;;  %v1266_v47 = vsel %vm995_vm2, %v12814_v40, 0.0  ;;  %v406_v48 = vld [vmem:[%s15113_s30 + $0x22c] sm:$0x3]  ;;  %v1268_v51 = vsel %vm995_vm2, %v12817_v43, 0.0 }
 0x10b   : > { %v1233_v55 = vadd.f32 %v1232_v50, %v1231_v52  ;;  %v769_v50 = vunpack.c.h.bf16 %v400_v27  ;;  %v13188_v52 = vld [vmem:[%s15113_s30 + $0x230] sm:$0xff]   ;;  %v12834_v27 = vunpack.c.h.bf16 %v13191_v18 }
 0x10c   : > { %v12822_v61 = vunpack.c.h.bf16 %v13188_v52 }
 0x10d   : > { %v1235_v58 = vadd.f32 %v1234_v54, %v1233_v55  ;;  %v770_v54 = vunpack.c.l.bf16 %v406_v48  ;;  %v1270_v55 = vsel %vm995_vm2, %v12818_v46, 0.0  ;;  %v13194_v46 = vld [vmem:[%s15113_s30 + $0x270] sm:$0xff]  }
 0x10f   : > { %v1237_v62 = vadd.f32 %v1236_v57, %v1235_v58  ;;  %v12821_v57 = vunpack.c.l.bf16 %v13188_v52  ;;  %v1272_v58 = vsel %vm995_vm2, %v769_v50, 0.0 }
 0x111   : > { %v1239_v3 = vadd.f32 %v1238_v60, %v1237_v62  ;;  %v1274_v62 = vsel %vm1007_vm3, %v770_v54, 0.0  ;;  %v1276_v2 = vsel %vm995_vm2, %v12821_v57, 0.0 }
 0x113   : > { %v1241_v6 = vadd.f32 %v1240_v0, %v1239_v3  ;;  %v12825_v0 = vunpack.c.l.bf16 %v13189_v59  ;;  %v13190_v3 = vld [vmem:[%s15113_s30 + $0x240] sm:$0xff]  }
 0x115   : > { %v1243_v10 = vadd.f32 %v1242_v5, %v1241_v6  ;;  %v12826_v5 = vunpack.c.h.bf16 %v13189_v59  ;;  %v1278_v6 = vsel %vm995_vm2, %v12822_v61, 0.0  ;;  %v1280_v9 = vsel %vm995_vm2, %v12825_v0, 0.0  ;;  %v428_v0 = vld [vmem:[%s15113_s30 + $0x284] ss:$20 sps:$4 sm:$0xff]  }
 0x117   : > { %v1245_v13 = vadd.f32 %v1244_v8, %v1243_v10  ;;  %v12829_v8 = vunpack.c.l.bf16 %v13190_v3  ;;  %v413_v10 = vld [vmem:[%s15113_s30 + $0x248] sm:$0x3] }
 0x118   : > { %v777_v16 = vunpack.c.l.bf16 %v413_v10 }
 0x119   : > { %v1247_v17 = vadd.f32 %v1246_v12, %v1245_v13  ;;  %v12830_v12 = vunpack.c.h.bf16 %v13190_v3  ;;  %v1282_v13 = vsel %vm995_vm2, %v12826_v5, 0.0  ;;  %v13196_v5 = vld [vmem:[%s15113_s30 + $0x288] sm:$0xff]  }
 0x11a   : > { %v12853_v10 = vunpack.c.l.bf16 %v13196_v5 }
 0x11b   : > { %v1249_v20 = vadd.f32 %v1248_v15, %v1247_v17  ;;  %v1284_v17 = vsel %vm995_vm2, %v12829_v8, 0.0  ;;  %v1286_v21 = vsel %vm995_vm2, %v12830_v12, 0.0  ;;  %v13197_v12 = vld [vmem:[%s15113_s30 + $0x290] sm:$0xff]  }
 0x11c   : > { %v1320_v18 = vsel %vm995_vm2, %v12853_v10, 0.0 }
 0x11d   : > { %v1251_v24 = vadd.f32 %v1250_v19, %v1249_v20  ;;  %v778_v20 = vunpack.c.l.bf16 %v414_v14 }
 0x11f   : > { %v1253_v28 = vadd.f32 %v1252_v22, %v1251_v24  ;;  %v1288_v24 = vsel %vm1007_vm3, %v777_v16, 0.0 }
 0x121   : > { %v1255_v32 = vadd.f32 %v1254_v26, %v1253_v28  ;;  %v1290_v28 = vsel %vm995_vm2, %v778_v20, 0.0  ;;  %v12858_v20 = vunpack.c.h.bf16 %v13197_v12 }
 0x123   : > { %v1257_v35 = vadd.f32 %v1256_v30, %v1255_v32  ;;  %v12837_v30 = vunpack.c.l.bf16 %v13192_v25 }
 0x125   : > { %v1259_v39 = vadd.f32 %v1258_v34, %v1257_v35  ;;  %v1294_v34 = vsel %vm995_vm2, %v12834_v27, 0.0  ;;  %v420_v35 = vld [vmem:[%s15113_s30 + $0x264] sm:$0x3]  ;;  %v1296_v38 = vsel %vm995_vm2, %v12837_v30, 0.0 }
 0x127   : > { %v1261_v42 = vadd.f32 %v1260_v37, %v1259_v39  ;;  %v783_v37 = vunpack.c.h.bf16 %v414_v14  ;;  %v13193_v39 = vld [vmem:[%s15113_s30 + $0x268] sm:$0xff]   ;;  %v12854_v14 = vunpack.c.h.bf16 %v13196_v5 }
 0x128   : > { %v12842_v48 = vunpack.c.h.bf16 %v13193_v39 }
 0x129   : > { %v1263_v45 = vadd.f32 %v1262_v41, %v1261_v42  ;;  %v784_v41 = vunpack.c.l.bf16 %v420_v35  ;;  %v1298_v42 = vsel %vm995_vm2, %v12838_v33, 0.0  ;;  %v13199_v33 = vld [vmem:[%s15113_s30 + $0x2a8] sm:$0xff]  }
 0x12b   : > { %v1265_v49 = vadd.f32 %v1264_v44, %v1263_v45  ;;  %v12841_v44 = vunpack.c.l.bf16 %v13193_v39  ;;  %v1300_v45 = vsel %vm995_vm2, %v783_v37, 0.0 }
 0x12d   : > { %v1267_v53 = vadd.f32 %v1266_v47, %v1265_v49  ;;  %v1302_v49 = vsel %vm1007_vm3, %v784_v41, 0.0  ;;  %v1304_v52 = vsel %vm995_vm2, %v12841_v44, 0.0 }
 0x12f   : > { %v1269_v56 = vadd.f32 %v1268_v51, %v1267_v53  ;;  %v12845_v51 = vunpack.c.l.bf16 %v13194_v46  ;;  %v13195_v53 = vld [vmem:[%s15113_s30 + $0x278] sm:$0xff]  }
 0x131   : > { %v1271_v60 = vadd.f32 %v1270_v55, %v1269_v56  ;;  %v12846_v55 = vunpack.c.h.bf16 %v13194_v46  ;;  %v1306_v56 = vsel %vm995_vm2, %v12842_v48, 0.0  ;;  %v1308_v59 = vsel %vm995_vm2, %v12845_v51, 0.0  ;;  %v442_v51 = vld [vmem:[%s15113_s30 + $0x2bc] ss:$20 sps:$4 sm:$0xff]  }
 0x133   : > { %v1273_v63 = vadd.f32 %v1272_v58, %v1271_v60  ;;  %v12849_v58 = vunpack.c.l.bf16 %v13195_v53  ;;  %v427_v60 = vld [vmem:[%s15113_s30 + $0x280] sm:$0x3] }
 0x134   : > { %v791_v3 = vunpack.c.l.bf16 %v427_v60 }
 0x135   : > { %v1275_v4 = vadd.f32 %v1274_v62, %v1273_v63  ;;  %v12850_v62 = vunpack.c.h.bf16 %v13195_v53  ;;  %v1310_v63 = vsel %vm995_vm2, %v12846_v55, 0.0  ;;  %v13201_v55 = vld [vmem:[%s15113_s30 + $0x2c0] sm:$0xff]  }
 0x136   : > { %v12873_v60 = vunpack.c.l.bf16 %v13201_v55 }
 0x137   : > { %v1277_v7 = vadd.f32 %v1276_v2, %v1275_v4  ;;  %v1312_v4 = vsel %vm995_vm2, %v12849_v58, 0.0  ;;  %v1314_v8 = vsel %vm995_vm2, %v12850_v62, 0.0  ;;  %v13202_v62 = vld [vmem:[%s15113_s30 + $0x2c8] sm:$0xff]  }
 0x138   : > { %v1348_v5 = vsel %vm995_vm2, %v12873_v60, 0.0 }
 0x139   : > { %v1279_v11 = vadd.f32 %v1278_v6, %v1277_v7  ;;  %v792_v7 = vunpack.c.l.bf16 %v428_v0 }
 0x13b   : > { %v1281_v15 = vadd.f32 %v1280_v9, %v1279_v11  ;;  %v1316_v11 = vsel %vm1007_vm3, %v791_v3, 0.0 }
 0x13d   : > { %v1283_v19 = vadd.f32 %v1282_v13, %v1281_v15  ;;  %v1318_v15 = vsel %vm995_vm2, %v792_v7, 0.0  ;;  %v12878_v7 = vunpack.c.h.bf16 %v13202_v62 }
 0x13f   : > { %v1285_v22 = vadd.f32 %v1284_v17, %v1283_v19  ;;  %v12857_v17 = vunpack.c.l.bf16 %v13197_v12 }
 0x141   : > { %v1287_v26 = vadd.f32 %v1286_v21, %v1285_v22  ;;  %v1322_v21 = vsel %vm995_vm2, %v12854_v14, 0.0  ;;  %v434_v22 = vld [vmem:[%s15113_s30 + $0x29c] sm:$0x3]  ;;  %v1324_v25 = vsel %vm995_vm2, %v12857_v17, 0.0 }
 0x143   : > { %v1289_v29 = vadd.f32 %v1288_v24, %v1287_v26  ;;  %v797_v24 = vunpack.c.h.bf16 %v428_v0  ;;  %v13198_v26 = vld [vmem:[%s15113_s30 + $0x2a0] sm:$0xff]   ;;  %v12874_v0 = vunpack.c.h.bf16 %v13201_v55 }
 0x144   : > { %v12862_v35 = vunpack.c.h.bf16 %v13198_v26 }
 0x145   : > { %v1291_v32 = vadd.f32 %v1290_v28, %v1289_v29  ;;  %v798_v28 = vunpack.c.l.bf16 %v434_v22  ;;  %v1326_v29 = vsel %vm995_vm2, %v12858_v20, 0.0  ;;  %v13204_v20 = vld [vmem:[%s15113_s30 + $0x2e0] sm:$0xff]  }
 0x147   : > { %v1293_v36 = vadd.f32 %v1292_v31, %v1291_v32  ;;  %v12861_v31 = vunpack.c.l.bf16 %v13198_v26  ;;  %v1328_v32 = vsel %vm995_vm2, %v797_v24, 0.0 }
 0x149   : > { %v1295_v40 = vadd.f32 %v1294_v34, %v1293_v36  ;;  %v1330_v36 = vsel %vm1007_vm3, %v798_v28, 0.0  ;;  %v1332_v39 = vsel %vm995_vm2, %v12861_v31, 0.0 }
 0x14b   : > { %v1297_v43 = vadd.f32 %v1296_v38, %v1295_v40  ;;  %v12865_v38 = vunpack.c.l.bf16 %v13199_v33  ;;  %v13200_v40 = vld [vmem:[%s15113_s30 + $0x2b0] sm:$0xff]  }
 0x14d   : > { %v1299_v47 = vadd.f32 %v1298_v42, %v1297_v43  ;;  %v12866_v42 = vunpack.c.h.bf16 %v13199_v33  ;;  %v1334_v43 = vsel %vm995_vm2, %v12862_v35, 0.0  ;;  %v1336_v46 = vsel %vm995_vm2, %v12865_v38, 0.0  ;;  %v456_v38 = vld [vmem:[%s15113_s30 + $0x2f4] ss:$20 sps:$4 sm:$0xff]  }
 0x14f   : > { %v1301_v50 = vadd.f32 %v1300_v45, %v1299_v47  ;;  %v12869_v45 = vunpack.c.l.bf16 %v13200_v40  ;;  %v441_v47 = vld [vmem:[%s15113_s30 + $0x2b8] sm:$0x3] }
 0x150   : > { %v805_v53 = vunpack.c.l.bf16 %v441_v47 }
 0x151   : > { %v1303_v54 = vadd.f32 %v1302_v49, %v1301_v50  ;;  %v12870_v49 = vunpack.c.h.bf16 %v13200_v40  ;;  %v1338_v50 = vsel %vm995_vm2, %v12866_v42, 0.0  ;;  %v13206_v42 = vld [vmem:[%s15113_s30 + $0x2f8] sm:$0xff]  }
 0x152   : > { %v12893_v47 = vunpack.c.l.bf16 %v13206_v42 }
 0x153   : > { %v1305_v57 = vadd.f32 %v1304_v52, %v1303_v54  ;;  %v1340_v54 = vsel %vm995_vm2, %v12869_v45, 0.0  ;;  %v1342_v58 = vsel %vm995_vm2, %v12870_v49, 0.0  ;;  %v13207_v49 = vld [vmem:[%s15113_s30 + $0x300] sm:$0xff]  }
 0x154   : > { %v1376_v55 = vsel %vm995_vm2, %v12893_v47, 0.0 }
 0x155   : > { %v1307_v61 = vadd.f32 %v1306_v56, %v1305_v57  ;;  %v806_v57 = vunpack.c.l.bf16 %v442_v51 }
 0x157   : > { %v1309_v2 = vadd.f32 %v1308_v59, %v1307_v61  ;;  %v1344_v61 = vsel %vm1007_vm3, %v805_v53, 0.0 }
 0x159   : > { %v1311_v6 = vadd.f32 %v1310_v63, %v1309_v2  ;;  %v1346_v2 = vsel %vm995_vm2, %v806_v57, 0.0  ;;  %v12898_v57 = vunpack.c.h.bf16 %v13207_v49 }
 0x15b   : > { %v1313_v9 = vadd.f32 %v1312_v4, %v1311_v6  ;;  %v12877_v4 = vunpack.c.l.bf16 %v13202_v62 }
 0x15d   : > { %v1315_v13 = vadd.f32 %v1314_v8, %v1313_v9  ;;  %v1350_v8 = vsel %vm995_vm2, %v12874_v0, 0.0  ;;  %v448_v9 = vld [vmem:[%s15113_s30 + $0x2d4] sm:$0x3]  ;;  %v1352_v12 = vsel %vm995_vm2, %v12877_v4, 0.0 }
 0x15f   : > { %v1317_v16 = vadd.f32 %v1316_v11, %v1315_v13  ;;  %v811_v11 = vunpack.c.h.bf16 %v442_v51  ;;  %v13203_v13 = vld [vmem:[%s15113_s30 + $0x2d8] sm:$0xff]   ;;  %v12894_v51 = vunpack.c.h.bf16 %v13206_v42 }
 0x160   : > { %v12882_v22 = vunpack.c.h.bf16 %v13203_v13 }
 0x161   : > { %v1319_v19 = vadd.f32 %v1318_v15, %v1317_v16  ;;  %v812_v15 = vunpack.c.l.bf16 %v448_v9  ;;  %v1354_v16 = vsel %vm995_vm2, %v12878_v7, 0.0  ;;  %v13209_v7 = vld [vmem:[%s15113_s30 + $0x318] sm:$0xff]  }
 0x163   : > { %v1321_v23 = vadd.f32 %v1320_v18, %v1319_v19  ;;  %v12881_v18 = vunpack.c.l.bf16 %v13203_v13  ;;  %v1356_v19 = vsel %vm995_vm2, %v811_v11, 0.0 }
 0x165   : > { %v1323_v27 = vadd.f32 %v1322_v21, %v1321_v23  ;;  %v1358_v23 = vsel %vm1007_vm3, %v812_v15, 0.0  ;;  %v1360_v26 = vsel %vm995_vm2, %v12881_v18, 0.0 }
 0x167   : > { %v1325_v30 = vadd.f32 %v1324_v25, %v1323_v27  ;;  %v12885_v25 = vunpack.c.l.bf16 %v13204_v20  ;;  %v13205_v27 = vld [vmem:[%s15113_s30 + $0x2e8] sm:$0xff]  }
 0x169   : > { %v1327_v34 = vadd.f32 %v1326_v29, %v1325_v30  ;;  %v12886_v29 = vunpack.c.h.bf16 %v13204_v20  ;;  %v1362_v30 = vsel %vm995_vm2, %v12882_v22, 0.0  ;;  %v1364_v33 = vsel %vm995_vm2, %v12885_v25, 0.0  ;;  %v470_v25 = vld [vmem:[%s15113_s30 + $0x32c] ss:$20 sps:$4 sm:$0xff]  }
 0x16b   : > { %v1329_v37 = vadd.f32 %v1328_v32, %v1327_v34  ;;  %v12889_v32 = vunpack.c.l.bf16 %v13205_v27  ;;  %v455_v34 = vld [vmem:[%s15113_s30 + $0x2f0] sm:$0x3] }
 0x16c   : > { %v819_v40 = vunpack.c.l.bf16 %v455_v34 }
 0x16d   : > { %v1331_v41 = vadd.f32 %v1330_v36, %v1329_v37  ;;  %v12890_v36 = vunpack.c.h.bf16 %v13205_v27  ;;  %v1366_v37 = vsel %vm995_vm2, %v12886_v29, 0.0  ;;  %v13211_v29 = vld [vmem:[%s15113_s30 + $0x330] sm:$0xff]  }
 0x16e   : > { %v12913_v34 = vunpack.c.l.bf16 %v13211_v29 }
 0x16f   : > { %v1333_v44 = vadd.f32 %v1332_v39, %v1331_v41  ;;  %v1368_v41 = vsel %vm995_vm2, %v12889_v32, 0.0  ;;  %v1370_v45 = vsel %vm995_vm2, %v12890_v36, 0.0  ;;  %v13212_v36 = vld [vmem:[%s15113_s30 + $0x338] sm:$0xff]  }
 0x170   : > { %v1404_v42 = vsel %vm995_vm2, %v12913_v34, 0.0 }
 0x171   : > { %v1335_v48 = vadd.f32 %v1334_v43, %v1333_v44  ;;  %v820_v44 = vunpack.c.l.bf16 %v456_v38 }
 0x173   : > { %v1337_v52 = vadd.f32 %v1336_v46, %v1335_v48  ;;  %v1372_v48 = vsel %vm1007_vm3, %v819_v40, 0.0 }
 0x175   : > { %v1339_v56 = vadd.f32 %v1338_v50, %v1337_v52  ;;  %v1374_v52 = vsel %vm995_vm2, %v820_v44, 0.0  ;;  %v12918_v44 = vunpack.c.h.bf16 %v13212_v36 }
 0x177   : > { %v1341_v59 = vadd.f32 %v1340_v54, %v1339_v56  ;;  %v12897_v54 = vunpack.c.l.bf16 %v13207_v49 }
 0x179   : > { %v1343_v63 = vadd.f32 %v1342_v58, %v1341_v59  ;;  %v1378_v58 = vsel %vm995_vm2, %v12894_v51, 0.0  ;;  %v462_v59 = vld [vmem:[%s15113_s30 + $0x30c] sm:$0x3]  ;;  %v1380_v62 = vsel %vm995_vm2, %v12897_v54, 0.0 }
 0x17b   : > { %v1345_v3 = vadd.f32 %v1344_v61, %v1343_v63  ;;  %v825_v61 = vunpack.c.h.bf16 %v456_v38  ;;  %v13208_v63 = vld [vmem:[%s15113_s30 + $0x310] sm:$0xff]   ;;  %v12914_v38 = vunpack.c.h.bf16 %v13211_v29 }
 0x17c   : > { %v12902_v9 = vunpack.c.h.bf16 %v13208_v63 }
 0x17d   : > { %v1347_v6 = vadd.f32 %v1346_v2, %v1345_v3  ;;  %v826_v2 = vunpack.c.l.bf16 %v462_v59  ;;  %v1382_v3 = vsel %vm995_vm2, %v12898_v57, 0.0  ;;  %v13214_v57 = vld [vmem:[%s15113_s30 + $0x350] sm:$0xff]  }
 0x17f   : > { %v1349_v10 = vadd.f32 %v1348_v5, %v1347_v6  ;;  %v12901_v5 = vunpack.c.l.bf16 %v13208_v63  ;;  %v1384_v6 = vsel %vm995_vm2, %v825_v61, 0.0 }
 0x181   : > { %v1351_v14 = vadd.f32 %v1350_v8, %v1349_v10  ;;  %v1386_v10 = vsel %vm1007_vm3, %v826_v2, 0.0  ;;  %v1388_v13 = vsel %vm995_vm2, %v12901_v5, 0.0 }
 0x183   : > { %v1353_v17 = vadd.f32 %v1352_v12, %v1351_v14  ;;  %v12905_v12 = vunpack.c.l.bf16 %v13209_v7  ;;  %v13210_v14 = vld [vmem:[%s15113_s30 + $0x320] sm:$0xff]  }
 0x185   : > { %v1355_v21 = vadd.f32 %v1354_v16, %v1353_v17  ;;  %v12906_v16 = vunpack.c.h.bf16 %v13209_v7  ;;  %v1390_v17 = vsel %vm995_vm2, %v12902_v9, 0.0  ;;  %v1392_v20 = vsel %vm995_vm2, %v12905_v12, 0.0  ;;  %v484_v12 = vld [vmem:[%s15113_s30 + $0x364] ss:$20 sps:$4 sm:$0xff]  }
 0x187   : > { %v1357_v24 = vadd.f32 %v1356_v19, %v1355_v21  ;;  %v12909_v19 = vunpack.c.l.bf16 %v13210_v14  ;;  %v469_v21 = vld [vmem:[%s15113_s30 + $0x328] sm:$0x3] }
 0x188   : > { %v833_v27 = vunpack.c.l.bf16 %v469_v21 }
 0x189   : > { %v1359_v28 = vadd.f32 %v1358_v23, %v1357_v24  ;;  %v12910_v23 = vunpack.c.h.bf16 %v13210_v14  ;;  %v1394_v24 = vsel %vm995_vm2, %v12906_v16, 0.0  ;;  %v13216_v16 = vld [vmem:[%s15113_s30 + $0x368] sm:$0xff]  }
 0x18a   : > { %v12933_v21 = vunpack.c.l.bf16 %v13216_v16 }
 0x18b   : > { %v1361_v31 = vadd.f32 %v1360_v26, %v1359_v28  ;;  %v1396_v28 = vsel %vm995_vm2, %v12909_v19, 0.0  ;;  %v1398_v32 = vsel %vm995_vm2, %v12910_v23, 0.0  ;;  %v13217_v23 = vld [vmem:[%s15113_s30 + $0x370] sm:$0xff]  }
 0x18c   : > { %v1432_v29 = vsel %vm995_vm2, %v12933_v21, 0.0 }
 0x18d   : > { %v1363_v35 = vadd.f32 %v1362_v30, %v1361_v31  ;;  %v834_v31 = vunpack.c.l.bf16 %v470_v25 }
 0x18f   : > { %v1365_v39 = vadd.f32 %v1364_v33, %v1363_v35  ;;  %v1400_v35 = vsel %vm1007_vm3, %v833_v27, 0.0 }
 0x191   : > { %v1367_v43 = vadd.f32 %v1366_v37, %v1365_v39  ;;  %v1402_v39 = vsel %vm995_vm2, %v834_v31, 0.0  ;;  %v12938_v31 = vunpack.c.h.bf16 %v13217_v23 }
 0x193   : > { %v1369_v46 = vadd.f32 %v1368_v41, %v1367_v43  ;;  %v12917_v41 = vunpack.c.l.bf16 %v13212_v36 }
 0x195   : > { %v1371_v50 = vadd.f32 %v1370_v45, %v1369_v46  ;;  %v1406_v45 = vsel %vm995_vm2, %v12914_v38, 0.0  ;;  %v476_v46 = vld [vmem:[%s15113_s30 + $0x344] sm:$0x3]  ;;  %v1408_v49 = vsel %vm995_vm2, %v12917_v41, 0.0 }
 0x197   : > { %v1373_v53 = vadd.f32 %v1372_v48, %v1371_v50  ;;  %v839_v48 = vunpack.c.h.bf16 %v470_v25  ;;  %v13213_v50 = vld [vmem:[%s15113_s30 + $0x348] sm:$0xff]   ;;  %v12934_v25 = vunpack.c.h.bf16 %v13216_v16 }
 0x198   : > { %v12922_v59 = vunpack.c.h.bf16 %v13213_v50 }
 0x199   : > { %v1375_v56 = vadd.f32 %v1374_v52, %v1373_v53  ;;  %v840_v52 = vunpack.c.l.bf16 %v476_v46  ;;  %v1410_v53 = vsel %vm995_vm2, %v12918_v44, 0.0  ;;  %v13219_v44 = vld [vmem:[%s15113_s30 + $0x388] sm:$0xff]  }
 0x19b   : > { %v1377_v60 = vadd.f32 %v1376_v55, %v1375_v56  ;;  %v12921_v55 = vunpack.c.l.bf16 %v13213_v50  ;;  %v1412_v56 = vsel %vm995_vm2, %v839_v48, 0.0 }
 0x19d   : > { %v1379_v0 = vadd.f32 %v1378_v58, %v1377_v60  ;;  %v1414_v60 = vsel %vm1007_vm3, %v840_v52, 0.0  ;;  %v1416_v63 = vsel %vm995_vm2, %v12921_v55, 0.0 }
 0x19f   : > { %v1381_v4 = vadd.f32 %v1380_v62, %v1379_v0  ;;  %v12925_v62 = vunpack.c.l.bf16 %v13214_v57  ;;  %v13215_v0 = vld [vmem:[%s15113_s30 + $0x358] sm:$0xff]  }
 0x1a1   : > { %v1383_v8 = vadd.f32 %v1382_v3, %v1381_v4  ;;  %v12926_v3 = vunpack.c.h.bf16 %v13214_v57  ;;  %v1418_v4 = vsel %vm995_vm2, %v12922_v59, 0.0  ;;  %v1420_v7 = vsel %vm995_vm2, %v12925_v62, 0.0  ;;  %v498_v62 = vld [vmem:[%s15113_s30 + $0x39c] ss:$20 sps:$4 sm:$0xff]  }
 0x1a3   : > { %v1385_v11 = vadd.f32 %v1384_v6, %v1383_v8  ;;  %v12929_v6 = vunpack.c.l.bf16 %v13215_v0  ;;  %v483_v8 = vld [vmem:[%s15113_s30 + $0x360] sm:$0x3] }
 0x1a4   : > { %v847_v14 = vunpack.c.l.bf16 %v483_v8 }
 0x1a5   : > { %v1387_v15 = vadd.f32 %v1386_v10, %v1385_v11  ;;  %v12930_v10 = vunpack.c.h.bf16 %v13215_v0  ;;  %v1422_v11 = vsel %vm995_vm2, %v12926_v3, 0.0  ;;  %v13221_v3 = vld [vmem:[%s15113_s30 + $0x3a0] sm:$0xff]  }
 0x1a6   : > { %v12953_v8 = vunpack.c.l.bf16 %v13221_v3 }
 0x1a7   : > { %v1389_v18 = vadd.f32 %v1388_v13, %v1387_v15  ;;  %v1424_v15 = vsel %vm995_vm2, %v12929_v6, 0.0  ;;  %v1426_v19 = vsel %vm995_vm2, %v12930_v10, 0.0  ;;  %v13222_v10 = vld [vmem:[%s15113_s30 + $0x3a8] sm:$0xff]  }
 0x1a8   : > { %v1460_v16 = vsel %vm995_vm2, %v12953_v8, 0.0 }
 0x1a9   : > { %v1391_v22 = vadd.f32 %v1390_v17, %v1389_v18  ;;  %v848_v18 = vunpack.c.l.bf16 %v484_v12 }
 0x1ab   : > { %v1393_v26 = vadd.f32 %v1392_v20, %v1391_v22  ;;  %v1428_v22 = vsel %vm1007_vm3, %v847_v14, 0.0 }
 0x1ad   : > { %v1395_v30 = vadd.f32 %v1394_v24, %v1393_v26  ;;  %v1430_v26 = vsel %vm995_vm2, %v848_v18, 0.0  ;;  %v12958_v18 = vunpack.c.h.bf16 %v13222_v10 }
 0x1af   : > { %v1397_v33 = vadd.f32 %v1396_v28, %v1395_v30  ;;  %v12937_v28 = vunpack.c.l.bf16 %v13217_v23 }
 0x1b1   : > { %v1399_v37 = vadd.f32 %v1398_v32, %v1397_v33  ;;  %v1434_v32 = vsel %vm995_vm2, %v12934_v25, 0.0  ;;  %v490_v33 = vld [vmem:[%s15113_s30 + $0x37c] sm:$0x3]  ;;  %v1436_v36 = vsel %vm995_vm2, %v12937_v28, 0.0 }
 0x1b3   : > { %v1401_v40 = vadd.f32 %v1400_v35, %v1399_v37  ;;  %v853_v35 = vunpack.c.h.bf16 %v484_v12  ;;  %v13218_v37 = vld [vmem:[%s15113_s30 + $0x380] sm:$0xff]   ;;  %v12954_v12 = vunpack.c.h.bf16 %v13221_v3 }
 0x1b4   : > { %v12942_v46 = vunpack.c.h.bf16 %v13218_v37 }
 0x1b5   : > { %v1403_v43 = vadd.f32 %v1402_v39, %v1401_v40  ;;  %v854_v39 = vunpack.c.l.bf16 %v490_v33  ;;  %v1438_v40 = vsel %vm995_vm2, %v12938_v31, 0.0  ;;  %v13224_v31 = vld [vmem:[%s15113_s30 + $0x3c0] sm:$0xff]  }
 0x1b7   : > { %v1405_v47 = vadd.f32 %v1404_v42, %v1403_v43  ;;  %v12941_v42 = vunpack.c.l.bf16 %v13218_v37  ;;  %v1440_v43 = vsel %vm995_vm2, %v853_v35, 0.0 }
 0x1b9   : > { %v1407_v51 = vadd.f32 %v1406_v45, %v1405_v47  ;;  %v1442_v47 = vsel %vm1007_vm3, %v854_v39, 0.0  ;;  %v1444_v50 = vsel %vm995_vm2, %v12941_v42, 0.0 }
 0x1bb   : > { %v1409_v54 = vadd.f32 %v1408_v49, %v1407_v51  ;;  %v12945_v49 = vunpack.c.l.bf16 %v13219_v44  ;;  %v13220_v51 = vld [vmem:[%s15113_s30 + $0x390] sm:$0xff]  }
 0x1bd   : > { %v1411_v58 = vadd.f32 %v1410_v53, %v1409_v54  ;;  %v12946_v53 = vunpack.c.h.bf16 %v13219_v44  ;;  %v1446_v54 = vsel %vm995_vm2, %v12942_v46, 0.0  ;;  %v1448_v57 = vsel %vm995_vm2, %v12945_v49, 0.0  ;;  %v512_v49 = vld [vmem:[%s15113_s30 + $0x3d4] ss:$20 sps:$4 sm:$0xff]  }
 0x1bf   : > { %v1413_v61 = vadd.f32 %v1412_v56, %v1411_v58  ;;  %v12949_v56 = vunpack.c.l.bf16 %v13220_v51  ;;  %v497_v58 = vld [vmem:[%s15113_s30 + $0x398] sm:$0x3] }
 0x1c0   : > { %v861_v0 = vunpack.c.l.bf16 %v497_v58 }
 0x1c1   : > { %v1415_v2 = vadd.f32 %v1414_v60, %v1413_v61  ;;  %v12950_v60 = vunpack.c.h.bf16 %v13220_v51  ;;  %v1450_v61 = vsel %vm995_vm2, %v12946_v53, 0.0  ;;  %v13226_v53 = vld [vmem:[%s15113_s30 + $0x3d8] sm:$0xff]  }
 0x1c2   : > { %v12973_v58 = vunpack.c.l.bf16 %v13226_v53 }
 0x1c3   : > { %v1417_v5 = vadd.f32 %v1416_v63, %v1415_v2  ;;  %v1452_v2 = vsel %vm995_vm2, %v12949_v56, 0.0  ;;  %v1454_v6 = vsel %vm995_vm2, %v12950_v60, 0.0  ;;  %v13227_v60 = vld [vmem:[%s15113_s30 + $0x3e0] sm:$0xff]  }
 0x1c4   : > { %v1488_v3 = vsel %vm995_vm2, %v12973_v58, 0.0 }
 0x1c5   : > { %v1419_v9 = vadd.f32 %v1418_v4, %v1417_v5  ;;  %v862_v5 = vunpack.c.l.bf16 %v498_v62 }
 0x1c7   : > { %v1421_v13 = vadd.f32 %v1420_v7, %v1419_v9  ;;  %v1456_v9 = vsel %vm1007_vm3, %v861_v0, 0.0 }
 0x1c9   : > { %v1423_v17 = vadd.f32 %v1422_v11, %v1421_v13  ;;  %v1458_v13 = vsel %vm995_vm2, %v862_v5, 0.0  ;;  %v12978_v5 = vunpack.c.h.bf16 %v13227_v60 }
 0x1cb   : > { %v1425_v20 = vadd.f32 %v1424_v15, %v1423_v17  ;;  %v12957_v15 = vunpack.c.l.bf16 %v13222_v10 }
 0x1cd   : > { %v1427_v24 = vadd.f32 %v1426_v19, %v1425_v20  ;;  %v1462_v19 = vsel %vm995_vm2, %v12954_v12, 0.0  ;;  %v504_v20 = vld [vmem:[%s15113_s30 + $0x3b4] sm:$0x3]  ;;  %v1464_v23 = vsel %vm995_vm2, %v12957_v15, 0.0 }
 0x1cf   : > { %v1429_v27 = vadd.f32 %v1428_v22, %v1427_v24  ;;  %v867_v22 = vunpack.c.h.bf16 %v498_v62  ;;  %v13223_v24 = vld [vmem:[%s15113_s30 + $0x3b8] sm:$0xff]   ;;  %v12974_v62 = vunpack.c.h.bf16 %v13226_v53 }
 0x1d0   : > { %v12962_v33 = vunpack.c.h.bf16 %v13223_v24 }
 0x1d1   : > { %v1431_v30 = vadd.f32 %v1430_v26, %v1429_v27  ;;  %v868_v26 = vunpack.c.l.bf16 %v504_v20  ;;  %v1466_v27 = vsel %vm995_vm2, %v12958_v18, 0.0  ;;  %v13229_v18 = vld [vmem:[%s15113_s30 + $0x3f8] sm:$0xff]  }
 0x1d3   : > { %v1433_v34 = vadd.f32 %v1432_v29, %v1431_v30  ;;  %v12961_v29 = vunpack.c.l.bf16 %v13223_v24  ;;  %v1468_v30 = vsel %vm995_vm2, %v867_v22, 0.0 }
 0x1d5   : > { %v1435_v38 = vadd.f32 %v1434_v32, %v1433_v34  ;;  %v1470_v34 = vsel %vm1007_vm3, %v868_v26, 0.0  ;;  %v1472_v37 = vsel %vm995_vm2, %v12961_v29, 0.0 }
 0x1d7   : > { %v1437_v41 = vadd.f32 %v1436_v36, %v1435_v38  ;;  %v12965_v36 = vunpack.c.l.bf16 %v13224_v31  ;;  %v13225_v38 = vld [vmem:[%s15113_s30 + $0x3c8] sm:$0xff]  }
 0x1d9   : > { %v1439_v45 = vadd.f32 %v1438_v40, %v1437_v41  ;;  %v12966_v40 = vunpack.c.h.bf16 %v13224_v31  ;;  %v1474_v41 = vsel %vm995_vm2, %v12962_v33, 0.0  ;;  %v1476_v44 = vsel %vm995_vm2, %v12965_v36, 0.0  ;;  %v526_v36 = vld [vmem:[%s15113_s30 + $0x40c] ss:$20 sps:$4 sm:$0xff]  }
 0x1db   : > { %v1441_v48 = vadd.f32 %v1440_v43, %v1439_v45  ;;  %v12969_v43 = vunpack.c.l.bf16 %v13225_v38  ;;  %v511_v45 = vld [vmem:[%s15113_s30 + $0x3d0] sm:$0x3] }
 0x1dc   : > { %v875_v51 = vunpack.c.l.bf16 %v511_v45 }
 0x1dd   : > { %v1443_v52 = vadd.f32 %v1442_v47, %v1441_v48  ;;  %v12970_v47 = vunpack.c.h.bf16 %v13225_v38  ;;  %v1478_v48 = vsel %vm995_vm2, %v12966_v40, 0.0  ;;  %v13231_v40 = vld [vmem:[%s15113_s30 + $0x410] sm:$0xff]  }
 0x1de   : > { %v12993_v45 = vunpack.c.l.bf16 %v13231_v40 }
 0x1df   : > { %v1445_v55 = vadd.f32 %v1444_v50, %v1443_v52  ;;  %v1480_v52 = vsel %vm995_vm2, %v12969_v43, 0.0  ;;  %v1482_v56 = vsel %vm995_vm2, %v12970_v47, 0.0  ;;  %v13232_v47 = vld [vmem:[%s15113_s30 + $0x418] sm:$0xff]  }
 0x1e0   : > { %v1516_v53 = vsel %vm995_vm2, %v12993_v45, 0.0 }
 0x1e1   : > { %v1447_v59 = vadd.f32 %v1446_v54, %v1445_v55  ;;  %v876_v55 = vunpack.c.l.bf16 %v512_v49 }
 0x1e3   : > { %v1449_v63 = vadd.f32 %v1448_v57, %v1447_v59  ;;  %v1484_v59 = vsel %vm1007_vm3, %v875_v51, 0.0 }
 0x1e5   : > { %v1451_v4 = vadd.f32 %v1450_v61, %v1449_v63  ;;  %v1486_v63 = vsel %vm995_vm2, %v876_v55, 0.0  ;;  %v12998_v55 = vunpack.c.h.bf16 %v13232_v47 }
 0x1e7   : > { %v1453_v7 = vadd.f32 %v1452_v2, %v1451_v4  ;;  %v12977_v2 = vunpack.c.l.bf16 %v13227_v60 }
 0x1e9   : > { %v1455_v11 = vadd.f32 %v1454_v6, %v1453_v7  ;;  %v1490_v6 = vsel %vm995_vm2, %v12974_v62, 0.0  ;;  %v518_v7 = vld [vmem:[%s15113_s30 + $0x3ec] sm:$0x3]  ;;  %v1492_v10 = vsel %vm995_vm2, %v12977_v2, 0.0 }
 0x1eb   : > { %v1457_v14 = vadd.f32 %v1456_v9, %v1455_v11  ;;  %v881_v9 = vunpack.c.h.bf16 %v512_v49  ;;  %v13228_v11 = vld [vmem:[%s15113_s30 + $0x3f0] sm:$0xff]   ;;  %v12994_v49 = vunpack.c.h.bf16 %v13231_v40 }
 0x1ec   : > { %v12982_v20 = vunpack.c.h.bf16 %v13228_v11 }
 0x1ed   : > { %v1459_v17 = vadd.f32 %v1458_v13, %v1457_v14  ;;  %v882_v13 = vunpack.c.l.bf16 %v518_v7  ;;  %v1494_v14 = vsel %vm995_vm2, %v12978_v5, 0.0  ;;  %v13234_v5 = vld [vmem:[%s15113_s30 + $0x430] sm:$0xff]  }
 0x1ef   : > { %v1461_v21 = vadd.f32 %v1460_v16, %v1459_v17  ;;  %v12981_v16 = vunpack.c.l.bf16 %v13228_v11  ;;  %v1496_v17 = vsel %vm995_vm2, %v881_v9, 0.0 }
 0x1f1   : > { %v1463_v25 = vadd.f32 %v1462_v19, %v1461_v21  ;;  %v1498_v21 = vsel %vm1007_vm3, %v882_v13, 0.0  ;;  %v1500_v24 = vsel %vm995_vm2, %v12981_v16, 0.0 }
 0x1f3   : > { %v1465_v28 = vadd.f32 %v1464_v23, %v1463_v25  ;;  %v12985_v23 = vunpack.c.l.bf16 %v13229_v18  ;;  %v13230_v25 = vld [vmem:[%s15113_s30 + $0x400] sm:$0xff]  }
 0x1f5   : > { %v1467_v32 = vadd.f32 %v1466_v27, %v1465_v28  ;;  %v12986_v27 = vunpack.c.h.bf16 %v13229_v18  ;;  %v1502_v28 = vsel %vm995_vm2, %v12982_v20, 0.0  ;;  %v1504_v31 = vsel %vm995_vm2, %v12985_v23, 0.0  ;;  %v540_v23 = vld [vmem:[%s15113_s30 + $0x444] ss:$20 sps:$4 sm:$0xff]  }
 0x1f7   : > { %v1469_v35 = vadd.f32 %v1468_v30, %v1467_v32  ;;  %v12989_v30 = vunpack.c.l.bf16 %v13230_v25  ;;  %v525_v32 = vld [vmem:[%s15113_s30 + $0x408] sm:$0x3] }
 0x1f8   : > { %v889_v38 = vunpack.c.l.bf16 %v525_v32 }
 0x1f9   : > { %v1471_v39 = vadd.f32 %v1470_v34, %v1469_v35  ;;  %v12990_v34 = vunpack.c.h.bf16 %v13230_v25  ;;  %v1506_v35 = vsel %vm995_vm2, %v12986_v27, 0.0  ;;  %v13236_v27 = vld [vmem:[%s15113_s30 + $0x448] sm:$0xff]  }
 0x1fa   : > { %v13013_v32 = vunpack.c.l.bf16 %v13236_v27 }
 0x1fb   : > { %v1473_v42 = vadd.f32 %v1472_v37, %v1471_v39  ;;  %v1508_v39 = vsel %vm995_vm2, %v12989_v30, 0.0  ;;  %v1510_v43 = vsel %vm995_vm2, %v12990_v34, 0.0  ;;  %v13237_v34 = vld [vmem:[%s15113_s30 + $0x450] sm:$0xff]  }
 0x1fc   : > { %v1544_v40 = vsel %vm995_vm2, %v13013_v32, 0.0 }
 0x1fd   : > { %v1475_v46 = vadd.f32 %v1474_v41, %v1473_v42  ;;  %v890_v42 = vunpack.c.l.bf16 %v526_v36 }
 0x1ff   : > { %v1477_v50 = vadd.f32 %v1476_v44, %v1475_v46  ;;  %v1512_v46 = vsel %vm1007_vm3, %v889_v38, 0.0 }
 0x201   : > { %v1479_v54 = vadd.f32 %v1478_v48, %v1477_v50  ;;  %v1514_v50 = vsel %vm995_vm2, %v890_v42, 0.0  ;;  %v13018_v42 = vunpack.c.h.bf16 %v13237_v34 }
 0x203   : > { %v1481_v57 = vadd.f32 %v1480_v52, %v1479_v54  ;;  %v12997_v52 = vunpack.c.l.bf16 %v13232_v47 }
 0x205   : > { %v1483_v61 = vadd.f32 %v1482_v56, %v1481_v57  ;;  %v1518_v56 = vsel %vm995_vm2, %v12994_v49, 0.0  ;;  %v532_v57 = vld [vmem:[%s15113_s30 + $0x424] sm:$0x3]  ;;  %v1520_v60 = vsel %vm995_vm2, %v12997_v52, 0.0 }
 0x207   : > { %v1485_v0 = vadd.f32 %v1484_v59, %v1483_v61  ;;  %v895_v59 = vunpack.c.h.bf16 %v526_v36  ;;  %v13233_v61 = vld [vmem:[%s15113_s30 + $0x428] sm:$0xff]   ;;  %v13014_v36 = vunpack.c.h.bf16 %v13236_v27 }
 0x208   : > { %v13002_v7 = vunpack.c.h.bf16 %v13233_v61 }
 0x209   : > { %v1487_v4 = vadd.f32 %v1486_v63, %v1485_v0  ;;  %v896_v63 = vunpack.c.l.bf16 %v532_v57  ;;  %v1522_v0 = vsel %vm995_vm2, %v12998_v55, 0.0  ;;  %v13239_v55 = vld [vmem:[%s15113_s30 + $0x468] sm:$0xff]  }
 0x20b   : > { %v1489_v8 = vadd.f32 %v1488_v3, %v1487_v4  ;;  %v13001_v3 = vunpack.c.l.bf16 %v13233_v61  ;;  %v1524_v4 = vsel %vm995_vm2, %v895_v59, 0.0 }
 0x20d   : > { %v1491_v12 = vadd.f32 %v1490_v6, %v1489_v8  ;;  %v1526_v8 = vsel %vm1007_vm3, %v896_v63, 0.0  ;;  %v1528_v11 = vsel %vm995_vm2, %v13001_v3, 0.0 }
 0x20f   : > { %v1493_v15 = vadd.f32 %v1492_v10, %v1491_v12  ;;  %v13005_v10 = vunpack.c.l.bf16 %v13234_v5  ;;  %v13235_v12 = vld [vmem:[%s15113_s30 + $0x438] sm:$0xff]  }
 0x211   : > { %v1495_v19 = vadd.f32 %v1494_v14, %v1493_v15  ;;  %v13006_v14 = vunpack.c.h.bf16 %v13234_v5  ;;  %v1530_v15 = vsel %vm995_vm2, %v13002_v7, 0.0  ;;  %v1532_v18 = vsel %vm995_vm2, %v13005_v10, 0.0  ;;  %v554_v10 = vld [vmem:[%s15113_s30 + $0x47c] ss:$20 sps:$4 sm:$0xff]  }
 0x213   : > { %v1497_v22 = vadd.f32 %v1496_v17, %v1495_v19  ;;  %v13009_v17 = vunpack.c.l.bf16 %v13235_v12  ;;  %v539_v19 = vld [vmem:[%s15113_s30 + $0x440] sm:$0x3] }
 0x214   : > { %v903_v25 = vunpack.c.l.bf16 %v539_v19 }
 0x215   : > { %v1499_v26 = vadd.f32 %v1498_v21, %v1497_v22  ;;  %v13010_v21 = vunpack.c.h.bf16 %v13235_v12  ;;  %v1534_v22 = vsel %vm995_vm2, %v13006_v14, 0.0  ;;  %v13241_v14 = vld [vmem:[%s15113_s30 + $0x480] sm:$0xff]  }
 0x216   : > { %v13033_v19 = vunpack.c.l.bf16 %v13241_v14 }
 0x217   : > { %v1501_v29 = vadd.f32 %v1500_v24, %v1499_v26  ;;  %v1536_v26 = vsel %vm995_vm2, %v13009_v17, 0.0  ;;  %v1538_v30 = vsel %vm995_vm2, %v13010_v21, 0.0  ;;  %v13242_v21 = vld [vmem:[%s15113_s30 + $0x488] sm:$0xff]  }
 0x218   : > { %v1572_v27 = vsel %vm995_vm2, %v13033_v19, 0.0 }
 0x219   : > { %v1503_v33 = vadd.f32 %v1502_v28, %v1501_v29  ;;  %v904_v29 = vunpack.c.l.bf16 %v540_v23 }
 0x21b   : > { %v1505_v37 = vadd.f32 %v1504_v31, %v1503_v33  ;;  %v1540_v33 = vsel %vm1007_vm3, %v903_v25, 0.0 }
 0x21d   : > { %v1507_v41 = vadd.f32 %v1506_v35, %v1505_v37  ;;  %v1542_v37 = vsel %vm995_vm2, %v904_v29, 0.0  ;;  %v13038_v29 = vunpack.c.h.bf16 %v13242_v21 }
 0x21f   : > { %v1509_v44 = vadd.f32 %v1508_v39, %v1507_v41  ;;  %v13017_v39 = vunpack.c.l.bf16 %v13237_v34 }
 0x221   : > { %v1511_v48 = vadd.f32 %v1510_v43, %v1509_v44  ;;  %v1546_v43 = vsel %vm995_vm2, %v13014_v36, 0.0  ;;  %v546_v44 = vld [vmem:[%s15113_s30 + $0x45c] sm:$0x3]  ;;  %v1548_v47 = vsel %vm995_vm2, %v13017_v39, 0.0 }
 0x223   : > { %v1513_v51 = vadd.f32 %v1512_v46, %v1511_v48  ;;  %v909_v46 = vunpack.c.h.bf16 %v540_v23  ;;  %v13238_v48 = vld [vmem:[%s15113_s30 + $0x460] sm:$0xff]   ;;  %v13034_v23 = vunpack.c.h.bf16 %v13241_v14 }
 0x224   : > { %v13022_v57 = vunpack.c.h.bf16 %v13238_v48 }
 0x225   : > { %v1515_v54 = vadd.f32 %v1514_v50, %v1513_v51  ;;  %v910_v50 = vunpack.c.l.bf16 %v546_v44  ;;  %v1550_v51 = vsel %vm995_vm2, %v13018_v42, 0.0  ;;  %v13244_v42 = vld [vmem:[%s15113_s30 + $0x4a0] sm:$0xff]  }
 0x227   : > { %v1517_v58 = vadd.f32 %v1516_v53, %v1515_v54  ;;  %v13021_v53 = vunpack.c.l.bf16 %v13238_v48  ;;  %v1552_v54 = vsel %vm995_vm2, %v909_v46, 0.0 }
 0x229   : > { %v1519_v62 = vadd.f32 %v1518_v56, %v1517_v58  ;;  %v1554_v58 = vsel %vm1007_vm3, %v910_v50, 0.0  ;;  %v1556_v61 = vsel %vm995_vm2, %v13021_v53, 0.0 }
 0x22b   : > { %v1521_v2 = vadd.f32 %v1520_v60, %v1519_v62  ;;  %v13025_v60 = vunpack.c.l.bf16 %v13239_v55  ;;  %v13240_v62 = vld [vmem:[%s15113_s30 + $0x470] sm:$0xff]  }
 0x22d   : > { %v1523_v6 = vadd.f32 %v1522_v0, %v1521_v2  ;;  %v13026_v0 = vunpack.c.h.bf16 %v13239_v55  ;;  %v1558_v2 = vsel %vm995_vm2, %v13022_v57, 0.0  ;;  %v1560_v5 = vsel %vm995_vm2, %v13025_v60, 0.0  ;;  %v568_v60 = vld [vmem:[%s15113_s30 + $0x4b4] ss:$20 sps:$4 sm:$0xff]  }
 0x22f   : > { %v1525_v9 = vadd.f32 %v1524_v4, %v1523_v6  ;;  %v13029_v4 = vunpack.c.l.bf16 %v13240_v62  ;;  %v553_v6 = vld [vmem:[%s15113_s30 + $0x478] sm:$0x3] }
 0x230   : > { %v917_v12 = vunpack.c.l.bf16 %v553_v6 }
 0x231   : > { %v1527_v13 = vadd.f32 %v1526_v8, %v1525_v9  ;;  %v13030_v8 = vunpack.c.h.bf16 %v13240_v62  ;;  %v1562_v9 = vsel %vm995_vm2, %v13026_v0, 0.0  ;;  %v13246_v0 = vld [vmem:[%s15113_s30 + $0x4b8] sm:$0xff]  }
 0x232   : > { %v13053_v6 = vunpack.c.l.bf16 %v13246_v0 }
 0x233   : > { %v1529_v16 = vadd.f32 %v1528_v11, %v1527_v13  ;;  %v1564_v13 = vsel %vm995_vm2, %v13029_v4, 0.0  ;;  %v1566_v17 = vsel %vm995_vm2, %v13030_v8, 0.0  ;;  %v13247_v8 = vld [vmem:[%s15113_s30 + $0x4c0] sm:$0xff]  }
 0x234   : > { %v1600_v14 = vsel %vm995_vm2, %v13053_v6, 0.0 }
 0x235   : > { %v1531_v20 = vadd.f32 %v1530_v15, %v1529_v16  ;;  %v918_v16 = vunpack.c.l.bf16 %v554_v10 }
 0x237   : > { %v1533_v24 = vadd.f32 %v1532_v18, %v1531_v20  ;;  %v1568_v20 = vsel %vm1007_vm3, %v917_v12, 0.0 }
 0x239   : > { %v1535_v28 = vadd.f32 %v1534_v22, %v1533_v24  ;;  %v1570_v24 = vsel %vm995_vm2, %v918_v16, 0.0  ;;  %v13058_v16 = vunpack.c.h.bf16 %v13247_v8 }
 0x23b   : > { %v1537_v31 = vadd.f32 %v1536_v26, %v1535_v28  ;;  %v13037_v26 = vunpack.c.l.bf16 %v13242_v21 }
 0x23d   : > { %v1539_v35 = vadd.f32 %v1538_v30, %v1537_v31  ;;  %v1574_v30 = vsel %vm995_vm2, %v13034_v23, 0.0  ;;  %v560_v31 = vld [vmem:[%s15113_s30 + $0x494] sm:$0x3]  ;;  %v1576_v34 = vsel %vm995_vm2, %v13037_v26, 0.0 }
 0x23f   : > { %v1541_v38 = vadd.f32 %v1540_v33, %v1539_v35  ;;  %v923_v33 = vunpack.c.h.bf16 %v554_v10  ;;  %v13243_v35 = vld [vmem:[%s15113_s30 + $0x498] sm:$0xff]   ;;  %v13054_v10 = vunpack.c.h.bf16 %v13246_v0 }
 0x240   : > { %v13042_v44 = vunpack.c.h.bf16 %v13243_v35  ;;  %v11454_v0 = vld [vmem:[%s15634_s17 + $0x158] sm:$0xe] }
 0x241   : > { %v1543_v41 = vadd.f32 %v1542_v37, %v1541_v38  ;;  %v924_v37 = vunpack.c.l.bf16 %v560_v31  ;;  %v1578_v38 = vsel %vm995_vm2, %v13038_v29, 0.0 }
 0x243   : > { %v1545_v45 = vadd.f32 %v1544_v40, %v1543_v41  ;;  %v13041_v40 = vunpack.c.l.bf16 %v13243_v35  ;;  %v1580_v41 = vsel %vm995_vm2, %v923_v33, 0.0  ;;  %v581_v33 = vld [vmem:[%s15113_s30 + $0x4e8] sm:$0x3]  ;;  %v13251_v35 = vld [vmem:[%s15113_s30 + $0x4f0] sm:$0xff]  }
 0x245   : > { %v1547_v49 = vadd.f32 %v1546_v43, %v1545_v45  ;;  %v1582_v45 = vsel %vm1007_vm3, %v924_v37, 0.0  ;;  %v1584_v48 = vsel %vm995_vm2, %v13041_v40, 0.0 }
 0x247   : > { %v1549_v52 = vadd.f32 %v1548_v47, %v1547_v49  ;;  %v13045_v47 = vunpack.c.l.bf16 %v13244_v42  ;;  %v13245_v49 = vld [vmem:[%s15113_s30 + $0x4a8] sm:$0xff]  }
 0x249   : > { %v1551_v56 = vadd.f32 %v1550_v51, %v1549_v52  ;;  %v13046_v51 = vunpack.c.h.bf16 %v13244_v42  ;;  %v1586_v52 = vsel %vm995_vm2, %v13042_v44, 0.0  ;;  %v1588_v55 = vsel %vm995_vm2, %v13045_v47, 0.0 }
 0x24a   : > { %v945_v44 = vunpack.c.l.bf16 %v581_v33  ;;  %v13074_v47 = vunpack.c.h.bf16 %v13251_v35 }
 0x24b   : > { %v1553_v59 = vadd.f32 %v1552_v54, %v1551_v56  ;;  %v13049_v54 = vunpack.c.l.bf16 %v13245_v49  ;;  %v567_v56 = vld [vmem:[%s15113_s30 + $0x4b0] sm:$0x3] }
 0x24c   : > { %v931_v62 = vunpack.c.l.bf16 %v567_v56 }
 0x24d   : > { %v1555_v63 = vadd.f32 %v1554_v58, %v1553_v59  ;;  %v13050_v58 = vunpack.c.h.bf16 %v13245_v49  ;;  %v1590_v59 = vsel %vm995_vm2, %v13046_v51, 0.0 }
 0x24f   : > { %v1557_v3 = vadd.f32 %v1556_v61, %v1555_v63  ;;  %v1592_v63 = vsel %vm995_vm2, %v13049_v54, 0.0  ;;  %v1594_v4 = vsel %vm995_vm2, %v13050_v58, 0.0 }
 0x251   : > { %v1559_v7 = vadd.f32 %v1558_v2, %v1557_v3  ;;  %v932_v3 = vunpack.c.l.bf16 %v568_v60 }
 0x253   : > { %v1561_v11 = vadd.f32 %v1560_v5, %v1559_v7  ;;  %v1596_v7 = vsel %vm1007_vm3, %v931_v62, 0.0 }
 0x255   : > { %v1563_v15 = vadd.f32 %v1562_v9, %v1561_v11  ;;  %v1598_v11 = vsel %vm995_vm2, %v932_v3, 0.0  ;;  %v11456_v3 = vld [vmem:[%s15634_s17 + $0x160] sm:$0x1] }
 0x257   : > { %v1565_v18 = vadd.f32 %v1564_v13, %v1563_v15  ;;  %v13057_v13 = vunpack.c.l.bf16 %v13247_v8  ;;  %v11457_v8 = vld [vmem:[%s15634_s17 + $0x174] sm:$0xe] }
 0x259   : > { %v1567_v22 = vadd.f32 %v1566_v17, %v1565_v18  ;;  %v1602_v17 = vsel %vm995_vm2, %v13054_v10, 0.0  ;;  %v574_v18 = vld [vmem:[%s15113_s30 + $0x4cc] sm:$0x3]  ;;  %v1604_v21 = vsel %vm995_vm2, %v13057_v13, 0.0  ;;  %v11459_v13 = vld [vmem:[%s15634_s17 + $0x17c] sm:$0x1] }
 0x25b   : > { %v1569_v25 = vadd.f32 %v1568_v20, %v1567_v22  ;;  %v937_v20 = vunpack.c.h.bf16 %v568_v60  ;;  %v13248_v22 = vld [vmem:[%s15113_s30 + $0x4d0] sm:$0xff]  }
 0x25d   : > { %v1571_v28 = vadd.f32 %v1570_v24, %v1569_v25  ;;  %v938_v24 = vunpack.c.l.bf16 %v574_v18  ;;  %v1606_v25 = vsel %vm995_vm2, %v13058_v16, 0.0  ;;  %v1608_v29 = vsel %vm995_vm2, %v937_v20, 0.0  ;;  %v11461_v20 = vld [vmem:[%s15634_s17 + $0x194] sm:$0xf] }
 0x25f   : > { %v1573_v32 = vadd.f32 %v1572_v27, %v1571_v28  ;;  %v13061_v27 = vunpack.c.l.bf16 %v13248_v22  ;;  %v13249_v28 = vld [vmem:[%s15113_s30 + $0x4d8] sm:$0xff]  }
 0x260   : > { %v13065_v37 = vunpack.c.l.bf16 %v13249_v28 }
 0x261   : > { %v1575_v36 = vadd.f32 %v1574_v30, %v1573_v32  ;;  %v13250_v30 = vld [vmem:[%s15113_s30 + $0x4e0] sm:$0xff]   ;;  %v13062_v32 = vunpack.c.h.bf16 %v13248_v22  ;;  %v1612_v42 = vsel %vm995_vm2, %v13061_v27, 0.0  ;;  %v11462_v22 = vld [vmem:[%s15634_s17 + $0x198] sm:$0x1] }
 0x262   : > { %v13069_v40 = vunpack.c.l.bf16 %v13250_v30  ;;  %v1616_v51 = vsel %vm995_vm2, %v13065_v37, 0.0  ;;  %v11466_v37 = vld [vmem:[%s15634_s17 + $0x1c8] sm:$0xe] }
 0x263   : > { %v1577_v39 = vadd.f32 %v1576_v34, %v1575_v36  ;;  %v15603_v34 = vld [vmem:[%s15113_s30 + $0x4ec] ss:$20 sps:$4 sm:$0xff]   ;;  %v1610_v36 = vsel %vm1007_vm3, %v938_v24, 0.0  ;;  %v1614_v49 = vsel %vm995_vm2, %v13062_v32, 0.0  ;;  %v2834_v24 = vrot.slane %v11461_v20, 5 }
 0x264   : > { %v1620_v54 = vsel %vm995_vm2, %v13069_v40, 0.0  ;;  %v951_v10 = vunpack.c.h.bf16 %v15603_v34 }
 0x265   : > { %v1579_v43 = vadd.f32 %v1578_v38, %v1577_v39  ;;  %v13066_v39 = vunpack.c.h.bf16 %v13249_v28 }
 0x267   : > { %v1581_v46 = vadd.f32 %v1580_v41, %v1579_v43  ;;  %v13070_v41 = vunpack.c.h.bf16 %v13250_v30  ;;  %v13073_v43 = vunpack.c.l.bf16 %v13251_v35  ;;  %v11463_v30 = vld [vmem:[%s15634_s17 + $0x1ac] sm:$0xe]  ;;  %v2837_v35 = vrot.slane %v11462_v22, 5 }
 0x268   : > { %v11481_v40 = vrot.slane %v11463_v30, 9 }
 0x269   : > { %v1583_v50 = vadd.f32 %v1582_v45, %v1581_v46  ;;  %v946_v45 = vunpack.c.l.bf16 %v15603_v34  ;;  %v2836_v34 = vrot.slane %v2834_v24, 4 }
 0x26b   : > { %v1585_v53 = vadd.f32 %v1584_v48, %v1583_v50  ;;  %v15610_v48 = vld [vmem:[%s15113_s30 + $0x4f8] sm:$0xff]   ;;  %v15628_v60 = vsel %vm995_vm2, %v946_v45, 0.0 }
 0x26d   : > { %v1587_v57 = vadd.f32 %v1586_v52, %v1585_v53  ;;  %v11486_v52 = vld [vmem:[%s18104_s2 + $0x2] sm:$0x3]  ;;  %v1618_v53 = vsel %vm995_vm2, %v13066_v39, 0.0 }
 0x26e   : > { %14703 = vmatprep.subr.msk.bf16.mxu1 %vm1737_vm0, %v11486_v52  ;;  %v2941_v56 = vsel %vm1737_vm0, %v11486_v52, 0 }
 0x26f   : > { %v1589_v61 = vadd.f32 %v1588_v55, %v1587_v57  ;;  %v1622_v55 = vsel %vm995_vm2, %v13070_v41, 0.0  ;;  %v11519_v57 = vld [vmem:[%s18104_s2 + $0x4] sm:$0x3]  ;;  %13690 = vmatpush3.bf16.msra.mxu1 %v2941_v56  ;;  %v11472_v56 = vld [vmem:[%s15634_s17 + $0x200] sm:$0xe] }
 0x270   : > { %14704 = vmatprep.subr.msk.bf16.mxu1 %vm1737_vm0, %v11519_v57 }
 0x271   : > { %v1591_v2 = vadd.f32 %v1590_v59, %v1589_v61  ;;  %v1624_v59 = vsel %vm1007_vm3, %v945_v44, 0.0  ;;  %v15631_v61 = vsel %vm995_vm2, %v13073_v43, 0.0  ;;  %v11468_v43 = vld [vmem:[%s15634_s17 + $0x1d0] sm:$0x1]  ;;  %v15676_v44 = vld [vmem:[%s18104_s2 + $0x6] sm:$0x3] }
 0x273   : > { %v1593_v5 = vadd.f32 %v1592_v63, %v1591_v2  ;;  %v13077_v63 = vunpack.c.l.bf16 %v15610_v48  ;;  %v11455_v2 = vld [vmem:[%s15634_s17 + $0x15c] sm:$0xf] }
 0x274   : > { %v2820_v6 = vrot.slane %v11455_v2, 5 }
 0x275   : > { %v1595_v9 = vadd.f32 %v1594_v4, %v1593_v5  ;;  %v11478_v5 = vrot.slane %v11454_v0, 9  ;;  %v1632_v52 = vsel %vm995_vm2, %v13077_v63, 0.0  ;;  %v2851_v0 = vrot.slane %v11468_v43, 5 }
 0x277   : > { %v1597_v12 = vadd.f32 %v1596_v7, %v1595_v9  ;;  %v2823_v7 = vrot.slane %v11456_v3, 5  ;;  %v13078_v9 = vunpack.c.h.bf16 %v15610_v48  ;;  %v2821_v16 = vsel %vm15636_vm6, %v11478_v5, %v2820_v6  ;;  %v11473_v3 = vld [vmem:[%s15634_s17 + $0x204] sm:$0xf] }
 0x278   : > { %v11482_v48 = vrot.slane %v11466_v37, 9 }
 0x279   : > { %v1599_v15 = vadd.f32 %v1598_v11, %v1597_v12  ;;  %v15649_v11 = vsel %vm995_vm2, %v13074_v47, 0.0  ;;  %v11458_v12 = vld [vmem:[%s15634_s17 + $0x178] sm:$0xf] }
 0x27a   : > { %v2827_v18 = vrot.slane %v11458_v12, 5 }
 0x27b   : > { %v1601_v19 = vadd.f32 %v1600_v14, %v1599_v15  ;;  %v11479_v14 = vrot.slane %v11457_v8, 9 }
 0x27d   : > { %v1603_v23 = vadd.f32 %v1602_v17, %v1601_v19  ;;  %v2822_v17 = vrot.slane %v2820_v6, 4  ;;  %v11460_v19 = vld [vmem:[%s15634_s17 + $0x190] sm:$0xe]  ;;  %v2828_v28 = vsel %vm15636_vm6, %v11479_v14, %v2827_v18  ;;  %v11474_v6 = vld [vmem:[%s15634_s17 + $0x208] sm:$0x1]  ;;  %v2862_v14 = vrot.slane %v11473_v3, 5 }
 0x27e   : > { %v2865_v20 = vrot.slane %v11474_v6, 5  ;;  %v13257_v6 = vld [vmem:[%s15113_s30 + $0x530] sm:$0xff]  }
 0x27f   : > { %v1605_v26 = vadd.f32 %v1604_v21, %v1603_v23  ;;  %v2830_v21 = vrot.slane %v11459_v13, 5  ;;  %v11480_v23 = vrot.slane %v11460_v19, 9  ;;  %v2824_v27 = vsel %vm15636_vm6, %v2822_v17, %v2823_v7  ;;  %v588_v7 = vld [vmem:[%s15113_s30 + $0x504] sm:$0x3] }
 0x280   : > { %v11487_v32 = vcombine.low %v2821_v16, %v2824_v27  ;;  %v11484_v13 = vrot.slane %v11472_v56, 9  ;;  %v13253_v16 = vld [vmem:[%s15113_s30 + $0x508] sm:$0xff]   ;;  %v11475_v27 = vld [vmem:[%s15634_s17 + $0x21c] sm:$0xe] }
 0x281   : > { %v1607_v31 = vadd.f32 %v1606_v25, %v1605_v26  ;;  %v3171_v25 = vsel %vm1737_vm0, %v11519_v57, 0  ;;  %v2835_v33 = vsel %vm15636_vm6, %v11480_v23, %v2834_v24  ;;  %v1634_v57 = vsel %vm995_vm2, %v13078_v9, 0.0 }
 0x282   : > { %13691 = vmatprep.mubr.msk.bf16.mxu1 %vm995_vm2, %v11487_v32  ;;  %v952_v23 = vunpack.c.l.bf16 %v588_v7  ;;  %v2864_v24 = vrot.slane %v2862_v14, 4 }
 0x283   : > { %v1609_v38 = vadd.f32 %v1608_v29, %v1607_v31  ;;  %v2829_v29 = vrot.slane %v2827_v18, 4  ;;  %v11464_v31 = vld [vmem:[%s15634_s17 + $0x1b0] sm:$0xf] }
 0x284   : > { %v2841_v41 = vrot.slane %v11464_v31, 5  ;;  %v13082_v31 = vunpack.c.h.bf16 %v13253_v16  ;;  %v1638_v32 = vsel %vm1007_vm3, %v952_v23, 0.0  ;;  %v13262_v23 = vld [vmem:[%s15113_s30 + $0x568] sm:$0xff]  }
 0x285   : > { %v1611_v46 = vadd.f32 %v1610_v36, %v1609_v38  ;;  %v11465_v36 = vld [vmem:[%s15634_s17 + $0x1b4] sm:$0x1]  ;;  %v2831_v39 = vsel %vm15636_vm6, %v2829_v29, %v2830_v21 }
 0x286   : > { %v11488_v45 = vcombine.low %v2828_v28, %v2831_v39  ;;  %v2844_v47 = vrot.slane %v11465_v36, 5  ;;  %v2842_v63 = vsel %vm15636_vm6, %v11481_v40, %v2841_v41  ;;  %v13081_v28 = vunpack.c.l.bf16 %v13253_v16 }
 0x287   : > { %v1613_v50 = vadd.f32 %v1612_v42, %v1611_v46  ;;  %v11467_v42 = vld [vmem:[%s15634_s17 + $0x1cc] sm:$0xf]  ;;  %v2838_v46 = vsel %vm15636_vm6, %v2836_v34, %v2837_v35  ;;  %v2866_v34 = vsel %vm15636_vm6, %v2864_v24, %v2865_v20  ;;  %v11477_v35 = vld [vmem:[%s15634_s17 + $0x224] sm:$0x1]  ;;  %v11485_v40 = vrot.slane %v11475_v27, 9  ;;  %v13263_v27 = vld [vmem:[%s15113_s30 + $0x578] sm:$0xff]  }
 0x288   : > { %13692 = vmatmul.mubr.msk.bf16.vlgmr.msra.gmra.mrb[0].mxu1 %vm995_vm2, %v11488_v45  ;;  %v13097_v16 = vunpack.c.l.bf16 %v13257_v6  ;;  %v602_v20 = vld [vmem:[%s15113_s30 + $0x53c] sm:$0x3] }
 0x289   : > { %v1615_v58 = vadd.f32 %v1614_v49, %v1613_v50  ;;  %v11469_v49 = vld [vmem:[%s15634_s17 + $0x1e4] sm:$0xe]  ;;  %v11470_v50 = vld [vmem:[%s15634_s17 + $0x1e8] sm:$0xf]  ;;  %13708 = vmatpush3.bf16.msra.mxu1 %v3171_v25 }
 0x28a   : > { %v2855_v2 = vrot.slane %v11470_v50, 5  ;;  %14705 = vmatprep.subr.msk.bf16.mxu1 %vm1737_vm0, %v15676_v44 }
 0x28b   : > { %v1617_v4 = vadd.f32 %v1616_v51, %v1615_v58  ;;  %v2848_v58 = vrot.slane %v11467_v42, 5 }
 0x28c   : > { %v2857_v19 = vrot.slane %v2855_v2, 4 }
 0x28d   : > { %v1619_v15 = vadd.f32 %v1618_v53, %v1617_v4  ;;  %v11489_v53 = vcombine.low %v2835_v33, %v2838_v46  ;;  %v2849_v8 = vsel %vm15636_vm6, %v11482_v48, %v2848_v58  ;;  %v2850_v9 = vrot.slane %v2848_v58, 4  ;;  %v15735_v58 = vld [vmem:[%s15113_s30 + $0x524] ss:$20 sps:$4 sm:$0xff]  }
 0x28e   : > { %v2863_v33 = vsel %vm15636_vm6, %v11484_v13, %v2862_v14  ;;  %v2872_v46 = vrot.slane %v11477_v35, 5  ;;  %v1642_v48 = vsel %vm995_vm2, %v13082_v31, 0.0  ;;  %v960_v7 = vunpack.c.l.bf16 %v15735_v58  ;;  %v13260_v13 = vld [vmem:[%s15113_s30 + $0x550] sm:$0xff]  }
 0x28f   : > { %v1621_v26 = vadd.f32 %v1620_v54, %v1619_v15  ;;  %v2843_v54 = vrot.slane %v2841_v41, 4  ;;  %13695 = vmatprep.mubr.msk.bf16.mxu1 %vm995_vm2, %v11489_v53  ;;  %v11476_v15 = vld [vmem:[%s15634_s17 + $0x220] sm:$0xf]  ;;  %v2852_v18 = vsel %vm15636_vm6, %v2850_v9, %v2851_v0  ;;  %v13255_v41 = vld [vmem:[%s15113_s30 + $0x518] sm:$0xff]   ;;  %v11493_v43 = vcombine.low %v2863_v33, %v2866_v34 }
 0x290   : > { %v11491_v22 = vcombine.low %v2849_v8, %v2852_v18  ;;  %v2869_v25 = vrot.slane %v11476_v15, 5  ;;  %v13089_v50 = vunpack.c.l.bf16 %v13255_v41  ;;  %v13090_v56 = vunpack.c.h.bf16 %v13255_v41  ;;  %v13258_v9 = vld [vmem:[%s15113_s30 + $0x540] sm:$0xff]   ;;  %v14806_v34 = vld [vmem:[%s15634_s17 + $0x178] sm:$0xff]  }
 0x291   : > { %v1623_v38 = vadd.f32 %v1622_v55, %v1621_v26  ;;  %v11471_v55 = vld [vmem:[%s15634_s17 + $0x1ec] sm:$0x1]  ;;  %v2845_v5 = vsel %vm15636_vm6, %v2843_v54, %v2844_v47  ;;  %v13254_v26 = vld [vmem:[%s15113_s30 + $0x510] sm:$0xff]   ;;  %v1654_v24 = vsel %vm995_vm2, %v960_v7, 0.0 }
 0x292   : > { %v2858_v12 = vrot.slane %v11471_v55, 5  ;;  %v11490_v17 = vcombine.low %v2842_v63, %v2845_v5  ;;  %v13085_v37 = vunpack.c.l.bf16 %v13254_v26  ;;  %v2871_v45 = vrot.slane %v2869_v25, 4  ;;  %v14805_v5 = vld [vmem:[%s15634_s17 + $0x15c] sm:$0xff]   ;;  %v14807_v41 = vld [vmem:[%s15634_s17 + $0x194] sm:$0xff]   ;;  %v15795_v7 = vld [vmem:[%s15113_s30 + $0x588] sm:$0xff]  }
 0x293   : > { %v1625_v51 = vadd.f32 %v1624_v59, %v1623_v38  ;;  %v1636_v59 = vsel %vm995_vm2, %v951_v10, 0.0  ;;  %v1640_v38 = vsel %vm995_vm2, %v13081_v28, 0.0  ;;  %v13086_v47 = vunpack.c.h.bf16 %v13254_v26  ;;  %v610_v35 = vld [vmem:[%s15113_s30 + $0x55c] ss:$20 sps:$4 sm:$0xff]  }
 0x294   : > { %13696 = vmatmul.mubr.msk.bf16.gmra.mrb[4].mxu1 %vm995_vm2, %v11490_v17  ;;  %v2870_v54 = vsel %vm15636_vm6, %v11485_v40, %v2869_v25  ;;  %v2873_v55 = vsel %vm15636_vm6, %v2871_v45, %v2872_v46  ;;  %v1648_v3 = vsel %vm995_vm2, %v13089_v50, 0.0  ;;  %v1650_v8 = vsel %vm995_vm2, %v13090_v56, 0.0  ;;  %v13261_v17 = vld [vmem:[%s15113_s30 + $0x560] sm:$0xff]  }
 0x295   : > { %v1627_v4 = vadd.f32 %v15628_v60, %v1625_v51  ;;  %v11483_v60 = vrot.slane %v11469_v49, 9  ;;  %13699 = vmatprep.mubr.msk.bf16.mxu1 %vm995_vm2, %v11491_v22  ;;  %v1644_v51 = vsel %vm995_vm2, %v13085_v37, 0.0  ;;  %v13102_v22 = vunpack.c.h.bf16 %v13258_v9  ;;  %v616_v37 = vld [vmem:[%s15113_s30 + $0x574] sm:$0x3] }
 0x296   : > { %v13114_v31 = vunpack.c.h.bf16 %v13261_v17  ;;  %v3473_v46 = vsel %vm1737_vm0, %v15676_v44, 0 }
 0x297   : > { %v1629_v10 = vadd.f32 %v15631_v61, %v1627_v4  ;;  %v2856_v30 = vsel %vm15636_vm6, %v11483_v60, %v2855_v2  ;;  %v11494_v4 = vcombine.low %v2870_v54, %v2873_v55  ;;  %v980_v54 = vunpack.c.l.bf16 %v616_v37 }
 0x298   : > { %v1660_v55 = vsel %vm995_vm2, %v13097_v16, 0.0 }
 0x299   : > { %v1631_v21 = vadd.f32 %v15649_v11, %v1629_v10  ;;  %v2859_v11 = vsel %vm15636_vm6, %v2857_v19, %v2858_v12  ;;  %v13259_v10 = vld [vmem:[%s15113_s30 + $0x548] sm:$0xff]   ;;  %v13098_v19 = vunpack.c.h.bf16 %v13257_v6 }
 0x29a   : > { %v11492_v39 = vcombine.low %v2856_v30, %v2859_v11  ;;  %v13105_v25 = vunpack.c.l.bf16 %v13259_v10  ;;  %v13106_v26 = vunpack.c.h.bf16 %v13259_v10  ;;  %v609_v30 = vld [vmem:[%s15113_s30 + $0x558] sm:$0x3]  ;;  %v13113_v11 = vunpack.c.l.bf16 %v13261_v17  ;;  %v14808_v10 = vld [vmem:[%s15634_s17 + $0x1b0] sm:$0xff]  }
 0x29b   : > { %v1633_v61 = vadd.f32 %v1632_v52, %v1631_v21  ;;  %v595_v52 = vld [vmem:[%s15113_s30 + $0x520] sm:$0x3]  ;;  %v13101_v21 = vunpack.c.l.bf16 %v13258_v9  ;;  %v1662_v44 = vsel %vm995_vm2, %v13098_v19, 0.0 }
 0x29c   : > { %13700 = vmatmul.mubr.msk.bf16.gmra.mrb[8].mxu1 %vm995_vm2, %v11492_v39  ;;  %v959_v2 = vunpack.c.l.bf16 %v595_v52  ;;  %v966_v39 = vunpack.c.l.bf16 %v602_v20  ;;  %v974_v52 = vunpack.c.l.bf16 %v610_v35  ;;  %v15801_v9 = vsel %vm995_vm2, %v13113_v11, 0.0  ;;  %v14810_v11 = vld [vmem:[%s15634_s17 + $0x1e8] sm:$0xff]  }
 0x29d   : > { %v1635_v29 = vadd.f32 %v1634_v57, %v1633_v61  ;;  %13703 = vmatprep.mubr.msk.bf16.mxu1 %vm995_vm2, %v11493_v43  ;;  %v1646_v57 = vsel %vm995_vm2, %v13086_v47, 0.0  ;;  %v13109_v61 = vunpack.c.l.bf16 %v13260_v13  ;;  %v13121_v43 = vunpack.c.l.bf16 %v13263_v27 }
 0x29e   : > { %v1652_v14 = vsel %vm1007_vm3, %v959_v2, 0.0  ;;  %v13122_v47 = vunpack.c.h.bf16 %v13263_v27  ;;  %v1670_v2 = vsel %vm995_vm2, %v13102_v22, 0.0  ;;  %v11538_v27 = vld [vmem:[%s15634_s17 + $0x204] sm:$0x3] }
 0x29f   : > { %v1637_v36 = vadd.f32 %v1636_v59, %v1635_v29  ;;  %v13256_v59 = vld [vmem:[%s15113_s30 + $0x528] sm:$0xff]   ;;  %v13110_v29 = vunpack.c.h.bf16 %v13260_v13  ;;  %v15822_v19 = vsel %vm995_vm2, %v13121_v43, 0.0 }
 0x2a0   : > { %v13093_v12 = vunpack.c.l.bf16 %v13256_v59  ;;  %v13094_v15 = vunpack.c.h.bf16 %v13256_v59  ;;  %v14809_v13 = vld [vmem:[%s15634_s17 + $0x1cc] sm:$0xff]  }
 0x2a1   : > { %v1639_v42 = vadd.f32 %v1638_v32, %v1637_v36  ;;  %v15756_v32 = vld [vmem:[%s15113_s30 + $0x580] sm:$0xff]   ;;  %v13117_v36 = vunpack.c.l.bf16 %v13262_v23 }
 0x2a2   : > { %v1656_v33 = vsel %vm995_vm2, %v13093_v12, 0.0  ;;  %v1658_v45 = vsel %vm995_vm2, %v13094_v15, 0.0  ;;  %v11537_v15 = vld [vmem:[%s15634_s17 + $0x200] sm:$0xf] }
 0x2a3   : > { %v1641_v49 = vadd.f32 %v1640_v38, %v1639_v42  ;;  %v965_v38 = vunpack.c.h.bf16 %v15735_v58  ;;  %v13118_v42 = vunpack.c.h.bf16 %v13262_v23  ;;  %v1666_v58 = vsel %vm1007_vm3, %v966_v39, 0.0  ;;  %v11536_v23 = vld [vmem:[%s15634_s17 + $0x1fc] sm:$0xc]  ;;  %v14811_v39 = vld [vmem:[%s15634_s17 + $0x204] sm:$0xff]  }
 0x2a4   : > { %13704 = vmatmul.mubr.msk.bf16.gmra.mrb[12].mxu1 %vm995_vm2, %v11494_v4  ;;  %v1674_v4 = vsel %vm995_vm2, %v13106_v26, 0.0  ;;  %v15807_v12 = vsel %vm995_vm2, %v13117_v36, 0.0  ;;  %v13129_v26 = vunpack.c.l.bf16 %v15795_v7 }
 0x2a5   : > { %v1643_v53 = vadd.f32 %v1642_v48, %v1641_v49  ;;  %13709 = vmatprep.mubr.msk.bf16.mxu1 %vm995_vm2, %v14805_v5  ;;  %v13125_v48 = vunpack.c.l.bf16 %v15756_v32  ;;  %v973_v49 = vunpack.c.l.bf16 %v609_v30  ;;  %v15789_v5 = vsel %vm995_vm2, %v13110_v29, 0.0  ;;  %v15840_v29 = vld [vmem:[%s15634_s17 + $0x21c] sm:$0xf]  ;;  %v15843_v30 = vld [vmem:[%s15634_s17 + $0x238] sm:$0xf] }
 0x2a6   : > { %v15813_v16 = vsel %vm995_vm2, %v13118_v42, 0.0  ;;  %v3355_v42 = vrot.slane %v11538_v27, 6  ;;  %v15917_v27 = vld [vmem:[%s15634_s17 + $0x2a4] sm:$0xc] }
 0x2a7   : > { %v1645_v0 = vadd.f32 %v1644_v51, %v1643_v53  ;;  %v15771_v51 = vld [vmem:[%s18104_s2 + $0x8] sm:$0x3]  ;;  %v979_v53 = vunpack.c.h.bf16 %v610_v35  ;;  %v15792_v6 = vsel %vm1007_vm3, %v973_v49, 0.0  ;;  %v15828_v22 = vsel %vm995_vm2, %v13125_v48, 0.0  ;;  %v11544_v49 = vld [vmem:[%s15634_s17 + $0x23c] sm:$0x3] }
 0x2a8   : > { %v3366_v35 = vrot.slane %v15843_v30, 6  ;;  %v15959_v30 = vld [vmem:[%s18104_s2 + $0xa] sm:$0x3] }
 0x2a9   : > { %v1647_v63 = vadd.f32 %v1646_v57, %v1645_v0  ;;  %v1664_v57 = vsel %vm995_vm2, %v965_v38, 0.0  ;;  %v1668_v0 = vsel %vm995_vm2, %v13101_v21, 0.0  ;;  %v15816_v17 = vsel %vm995_vm2, %v979_v53, 0.0 }
 0x2aa   : > { %v15825_v21 = vsel %vm995_vm2, %v13122_v47, 0.0  ;;  %v15858_v38 = vsel %vm995_vm2, %v13129_v26, 0.0  ;;  %v3368_v53 = vrot.slane %v3366_v35, 4  ;;  %v11553_v26 = vld [vmem:[%s15634_s17 + $0x290] sm:$0x3] }
 0x2ab   : > { %v1649_v60 = vadd.f32 %v1648_v3, %v1647_v63  ;;  %v1672_v3 = vsel %vm995_vm2, %v13105_v25, 0.0  ;;  %v15786_v63 = vsel %vm995_vm2, %v13109_v61, 0.0  ;;  %v13126_v25 = vunpack.c.h.bf16 %v15756_v32 }
 0x2ac   : > { %13710 = vmatmul.mubr.msk.bf16.vlgmr.msra.gmra.mrb[0].mxu1 %vm995_vm2, %v14806_v34  ;;  %v3359_v34 = vrot.slane %v15840_v29, 6 }
 0x2ad   : > { %v1651_v18 = vadd.f32 %v1650_v8, %v1649_v60  ;;  %13713 = vmatprep.mubr.msk.bf16.mxu1 %vm995_vm2, %v14807_v41  ;;  %13726 = vmatpush3.bf16.msra.mxu1 %v3473_v46  ;;  %v15798_v8 = vsel %vm995_vm2, %v974_v52, 0.0  ;;  %v15804_v60 = vsel %vm995_vm2, %v13114_v31, 0.0  ;;  %v15847_v31 = vld [vmem:[%s15634_s17 + $0x220] sm:$0x3]  ;;  %v15855_v37 = vsel %vm995_vm2, %v13126_v25, 0.0 }
 0x2ae   : > { %14706 = vmatprep.subr.msk.bf16.mxu1 %vm1737_vm0, %v15771_v51  ;;  %v3362_v48 = vrot.slane %v15847_v31, 6  ;;  %v15876_v52 = vld [vmem:[%s15634_s17 + $0x254] sm:$0xf] }
 0x2af   : > { %v1653_v28 = vadd.f32 %v1652_v14, %v1651_v18  ;;  %v15819_v18 = vsel %vm1007_vm3, %v980_v54, 0.0  ;;  %v15882_v54 = vld [vmem:[%s15634_s17 + $0x250] sm:$0xc] }
 0x2b1   : > { %v1655_v40 = vadd.f32 %v1654_v24, %v1653_v28  ;;  %v3352_v24 = vrot.slane %v11537_v15, 6  ;;  %v15837_v28 = vld [vmem:[%s15634_s17 + $0x218] sm:$0xc]  ;;  %v11563_v15 = vrot.slane %v15882_v54, 10 }
 0x2b2   : > { %v11561_v43 = vrot.slane %v15837_v28, 10 }
 0x2b3   : > { %v1657_v50 = vadd.f32 %v1656_v33, %v1655_v40  ;;  %v15850_v33 = vld [vmem:[%s15634_s17 + $0x234] sm:$0xc]  ;;  %v11560_v40 = vrot.slane %v11536_v23, 10  ;;  %v3354_v41 = vrot.slane %v3352_v24, 4  ;;  %v15909_v23 = vld [vmem:[%s15634_s17 + $0x288] sm:$0xc] }
 0x2b4   : > { %13714 = vmatmul.mubr.msk.bf16.gmra.mrb[4].mxu1 %vm995_vm2, %v14808_v10  ;;  %v11550_v10 = vld [vmem:[%s15634_s17 + $0x274] sm:$0x3] }
 0x2b5   : > { %v1659_v56 = vadd.f32 %v1658_v45, %v1657_v50  ;;  %13717 = vmatprep.mubr.msk.bf16.mxu1 %vm995_vm2, %v14809_v13  ;;  %v15864_v45 = vsel %vm1737_vm0, %v15771_v51, 0  ;;  %v11562_v50 = vrot.slane %v15850_v33, 10  ;;  %v3361_v51 = vrot.slane %v3359_v34, 4  ;;  %v15903_v13 = vld [vmem:[%s15634_s17 + $0x2a8] sm:$0xf] }
 0x2b6   : > { %v3394_v31 = vrot.slane %v15903_v13, 6  ;;  %v15924_v33 = vld [vmem:[%s15634_s17 + $0x2c0] sm:$0xc] }
 0x2b7   : > { %v1661_v59 = vadd.f32 %v1660_v55, %v1659_v56  ;;  %v15885_v55 = vld [vmem:[%s15634_s17 + $0x258] sm:$0x3] }
 0x2b9   : > { %v1663_v14 = vadd.f32 %v1662_v44, %v1661_v59  ;;  %v15889_v44 = vld [vmem:[%s15634_s17 + $0x26c] sm:$0xc]  ;;  %v3369_v59 = vrot.slane %v11544_v49, 6  ;;  %v11566_v49 = vrot.slane %v15917_v27, 10 }
 0x2bb   : > { %v1665_v20 = vadd.f32 %v1664_v57, %v1663_v14  ;;  %v11549_v57 = vld [vmem:[%s15634_s17 + $0x270] sm:$0xf] }
 0x2bc   : > { %13718 = vmatmul.mubr.msk.bf16.gmra.mrb[8].mxu1 %vm995_vm2, %v14810_v11  ;;  %v3380_v25 = vrot.slane %v11549_v57, 6  ;;  %v11556_v11 = vld [vmem:[%s15634_s17 + $0x2ac] sm:$0x3] }
 0x2bd   : > { %v1667_v61 = vadd.f32 %v1666_v58, %v1665_v20  ;;  %13721 = vmatprep.mubr.msk.bf16.mxu1 %vm995_vm2, %v14811_v39  ;;  %v15893_v58 = vld [vmem:[%s15634_s17 + $0x28c] sm:$0xf]  ;;  %v3376_v20 = vrot.slane %v15885_v55, 6  ;;  %v11565_v39 = vrot.slane %v15909_v23, 10 }
 0x2be   : > { %v3382_v54 = vrot.slane %v3380_v25, 4 }
 0x2bf   : > { %v1669_v32 = vadd.f32 %v1668_v0, %v1667_v61  ;;  %v14812_v0 = vld [vmem:[%s15634_s17 + $0x220] sm:$0xff]   ;;  %v3387_v61 = vrot.slane %v15893_v58, 6  ;;  %v3367_v58 = vsel %vm15868_vm8, %v11562_v50, %v3366_v35 }
 0x2c1   : > { %v1671_v36 = vadd.f32 %v1670_v2, %v1669_v32  ;;  %v3353_v2 = vsel %vm15868_vm8, %v11560_v40, %v3352_v24  ;;  %v15912_v24 = vld [vmem:[%s15634_s17 + $0x2c4] sm:$0xf]  ;;  %v15928_v40 = vld [vmem:[%s15634_s17 + $0x2c8] sm:$0x3]  ;;  %v3389_v55 = vrot.slane %v3387_v61, 4 }
 0x2c3   : > { %v1673_v46 = vadd.f32 %v1672_v3, %v1671_v36  ;;  %v3356_v3 = vsel %vm15868_vm8, %v3354_v41, %v3355_v42  ;;  %v3383_v36 = vrot.slane %v11550_v10, 6  ;;  %v3401_v41 = vrot.slane %v15912_v24, 6  ;;  %v11590_v24 = vld [vmem:[%s15634_s17 + $0x224] sm:$0x1] }
 0x2c4   : > { %v11569_v29 = vcombine.low %v3353_v2, %v3356_v3  ;;  %13722 = vmatmul.mubr.msk.bf16.gmra.mrb[12].mxu1 %vm995_vm2, %v14812_v0  ;;  %v3370_v0 = vsel %vm15868_vm8, %v3368_v53, %v3369_v59 }
 0x2c5   : > { %v1675_v56 = vadd.f32 %v1674_v4, %v1673_v46  ;;  %v3373_v4 = vrot.slane %v15876_v52, 6  ;;  %v3390_v46 = vrot.slane %v11553_v26, 6  ;;  %v15936_v52 = vld [vmem:[%s15634_s17 + $0x204] sm:$0xf]  ;;  %v3403_v2 = vrot.slane %v3401_v41, 4 }
 0x2c6   : > { %13727 = vmatprep.mubr.msk.bf16.mxu1 %vm995_vm2, %v11569_v29  ;;  %v13130_v26 = vunpack.c.h.bf16 %v15795_v7 }
 0x2c7   : > { %v1677_v14 = vadd.f32 %v15786_v63, %v1675_v56  ;;  %v11564_v63 = vrot.slane %v15889_v44, 10  ;;  %v3375_v32 = vrot.slane %v3373_v4, 4  ;;  %v3397_v56 = vrot.slane %v11556_v11, 6 }
 0x2c8   : > { %v11567_v44 = vrot.slane %v15924_v33, 10  ;;  %v3391_v23 = vsel %vm15868_vm8, %v3389_v55, %v3390_v46  ;;  %v1706_v7 = vsel %vm995_vm2, %v13130_v26, 0.0  ;;  %v11588_v55 = vld [vmem:[%s15634_s17 + $0x21c] sm:$0xe] }
 0x2c9   : > { %v1679_v28 = vadd.f32 %v15789_v5, %v1677_v14  ;;  %v3360_v5 = vsel %vm15868_vm8, %v11561_v43, %v3359_v34  ;;  %v3396_v34 = vrot.slane %v3394_v31, 4  ;;  %v3404_v43 = vrot.slane %v15928_v40, 6  ;;  %v623_v14 = vld [vmem:[%s15113_s30 + $0x590] sm:$0x3] }
 0x2ca   : > { %v3381_v53 = vsel %vm15868_vm8, %v11564_v63, %v3380_v25  ;;  %v11587_v25 = vld [vmem:[%s15634_s17 + $0x208] sm:$0x1]  ;;  %v987_v29 = vunpack.c.l.bf16 %v623_v14  ;;  %v11589_v63 = vld [vmem:[%s15634_s17 + $0x220] sm:$0xf] }
 0x2cb   : > { %v1681_v42 = vadd.f32 %v15792_v6, %v1679_v28  ;;  %v3363_v6 = vsel %vm15868_vm8, %v3361_v51, %v3362_v48  ;;  %v11571_v51 = vcombine.low %v3367_v58, %v3370_v0  ;;  %v3398_v27 = vsel %vm15868_vm8, %v3396_v34, %v3397_v56 }
 0x2cc   : > { %v11570_v10 = vcombine.low %v3360_v5, %v3363_v6  ;;  %v3657_v40 = vrot.slane %v11587_v25, 5  ;;  %v11592_v5 = vld [vmem:[%s15634_s17 + $0x23c] sm:$0xf]  ;;  %v3661_v56 = vrot.slane %v11589_v63, 5 }
 0x2cd   : > { %v1683_v57 = vadd.f32 %v15798_v8, %v1681_v42  ;;  %v3654_v8 = vrot.slane %v15936_v52, 5  ;;  %v1708_v52 = vsel %vm1007_vm3, %v987_v29, 0.0  ;;  %v3668_v58 = vrot.slane %v11592_v5, 5  ;;  %v11597_v29 = vld [vmem:[%s15634_s17 + $0x270] sm:$0xe] }
 0x2ce   : > { %13728 = vmatmul.mubr.msk.bf16.vlgmr.msra.gmra.mrb[0].mxu1 %vm995_vm2, %v11570_v10  ;;  %v11610_v10 = vrot.slane %v11588_v55, 9 }
 0x2cf   : > { %v1685_v3 = vadd.f32 %v15801_v9, %v1683_v57  ;;  %13731 = vmatprep.mubr.msk.bf16.mxu1 %vm995_vm2, %v11571_v51  ;;  %v3374_v9 = vsel %vm15868_vm8, %v11563_v15, %v3373_v4  ;;  %13744 = vmatpush3.bf16.msra.mxu1 %v15864_v45  ;;  %v15981_v15 = vld [vmem:[%s15113_s30 + $0x594] ss:$20 sps:$4 sm:$0xff]  }
 0x2d0   : > { %14707 = vmatprep.subr.msk.bf16.mxu1 %vm1737_vm0, %v15959_v30  ;;  %v988_v11 = vunpack.c.l.bf16 %v15981_v15 }
 0x2d1   : > { %v1687_v48 = vadd.f32 %v15804_v60, %v1685_v3  ;;  %v3377_v60 = vsel %vm15868_vm8, %v3375_v32, %v3376_v20 }
 0x2d2   : > { %v11572_v59 = vcombine.low %v3374_v9, %v3377_v60  ;;  %v1710_v57 = vsel %vm995_vm2, %v988_v11, 0.0 }
 0x2d3   : > { %v1689_v35 = vadd.f32 %v15807_v12, %v1687_v48  ;;  %v3384_v12 = vsel %vm15868_vm8, %v3382_v54, %v3383_v36  ;;  %v3405_v54 = vsel %vm15868_vm8, %v3403_v2, %v3404_v43  ;;  %v630_v48 = vld [vmem:[%s15113_s30 + $0x5ac] sm:$0x3] }
 0x2d4   : > { %v11573_v13 = vcombine.low %v3381_v53, %v3384_v12  ;;  %v3670_v53 = vrot.slane %v3668_v58, 4  ;;  %v994_v14 = vunpack.c.l.bf16 %v630_v48 }
 0x2d5   : > { %v1691_v50 = vadd.f32 %v15813_v16, %v1689_v35 }
 0x2d6   : > { %13732 = vmatmul.mubr.msk.bf16.gmra.mrb[4].mxu1 %vm995_vm2, %v11572_v59  ;;  %v1722_v11 = vsel %vm1007_vm3, %v994_v14, 0.0  ;;  %v11608_v14 = vld [vmem:[%s15634_s17 + $0x2cc] sm:$0x1] }
 0x2d7   : > { %v1693_v16 = vadd.f32 %v15816_v17, %v1691_v50  ;;  %13735 = vmatprep.mubr.msk.bf16.mxu1 %vm995_vm2, %v11573_v13  ;;  %v3388_v17 = vsel %vm15868_vm8, %v11565_v39, %v3387_v61  ;;  %v3664_v50 = vrot.slane %v11590_v24, 5  ;;  %v993_v13 = vunpack.c.h.bf16 %v15981_v15  ;;  %v11602_v24 = vld [vmem:[%s15634_s17 + $0x294] sm:$0x1] }
 0x2d8   : > { %v11574_v61 = vcombine.low %v3388_v17, %v3391_v23  ;;  %v3662_v17 = vsel %vm15636_vm6, %v11610_v10, %v3661_v56  ;;  %v3692_v48 = vrot.slane %v11602_v24, 5 }
 0x2d9   : > { %v1695_v4 = vadd.f32 %v15819_v18, %v1693_v16  ;;  %v11585_v18 = vld [vmem:[%s15634_s17 + $0x200] sm:$0xe]  ;;  %v11595_v16 = vld [vmem:[%s15634_s17 + $0x258] sm:$0xf]  ;;  %v1720_v63 = vsel %vm995_vm2, %v993_v13, 0.0 }
 0x2da   : > { %v11609_v39 = vrot.slane %v11585_v18, 9  ;;  %v11594_v18 = vld [vmem:[%s15634_s17 + $0x254] sm:$0xe]  ;;  %v3675_v25 = vrot.slane %v11595_v16, 5  ;;  %v11606_v16 = vld [vmem:[%s15634_s17 + $0x2c4] sm:$0xe] }
 0x2db   : > { %v1697_v45 = vadd.f32 %v15822_v19, %v1695_v4  ;;  %v3395_v19 = vsel %vm15868_vm8, %v11566_v49, %v3394_v31  ;;  %v3656_v31 = vrot.slane %v3654_v8, 4  ;;  %v13267_v49 = vld [vmem:[%s15113_s30 + $0x5a0] sm:$0xff]   ;;  %v11598_v4 = vld [vmem:[%s15634_s17 + $0x274] sm:$0xf] }
 0x2dc   : > { %v11575_v36 = vcombine.low %v3395_v19, %v3398_v27  ;;  %v3655_v6 = vsel %vm15636_vm6, %v11609_v39, %v3654_v8  ;;  %v13137_v33 = vunpack.c.l.bf16 %v13267_v49  ;;  %v13138_v43 = vunpack.c.h.bf16 %v13267_v49  ;;  %v11596_v27 = vld [vmem:[%s15634_s17 + $0x25c] sm:$0x1] }
 0x2dd   : > { %v1699_v20 = vadd.f32 %v15825_v21, %v1697_v45  ;;  %v13266_v21 = vld [vmem:[%s15113_s30 + $0x598] sm:$0xff]   ;;  %v3658_v34 = vsel %vm15636_vm6, %v3656_v31, %v3657_v40  ;;  %v3663_v8 = vrot.slane %v3661_v56, 4  ;;  %v3677_v31 = vrot.slane %v3675_v25, 4  ;;  %v11600_v56 = vld [vmem:[%s15634_s17 + $0x28c] sm:$0xe]  ;;  %s12613_s30 = sshll.u32 %s14975_s25, 5 }
 0x2de   : > { %v13133_v46 = vunpack.c.l.bf16 %v13266_v21  ;;  %13736 = vmatmul.mubr.msk.bf16.gmra.mrb[8].mxu1 %vm995_vm2, %v11574_v61  ;;  %v11618_v35 = vcombine.low %v3655_v6, %v3658_v34  ;;  %v1716_v45 = vsel %vm995_vm2, %v13137_v33, 0.0  ;;  %v1718_v15 = vsel %vm995_vm2, %v13138_v43, 0.0  ;;  %v11599_v61 = vld [vmem:[%s15634_s17 + $0x278] sm:$0x1] }
 0x2df   : > { %v1701_v28 = vadd.f32 %v15828_v22, %v1699_v20  ;;  %v13134_v22 = vunpack.c.h.bf16 %v13266_v21  ;;  %13739 = vmatprep.mubr.msk.bf16.mxu1 %vm995_vm2, %v11575_v36  ;;  %v3665_v23 = vsel %vm15636_vm6, %v3663_v8, %v3664_v50  ;;  %v3682_v21 = vrot.slane %v11598_v4, 5  ;;  %v11607_v50 = vld [vmem:[%s15634_s17 + $0x2c8] sm:$0xf] }
 0x2e0   : > { %v1712_v2 = vsel %vm995_vm2, %v13133_v46, 0.0  ;;  %v11612_v36 = vrot.slane %v11594_v18, 9  ;;  %v3678_v40 = vrot.slane %v11596_v27, 5  ;;  %v3685_v46 = vrot.slane %v11599_v61, 5  ;;  %v14822_v61 = vld [vmem:[%s18105_s3 + $0x108] sm:$0xff]  }
 0x2e1   : > { %v1703_v32 = vadd.f32 %v15855_v37, %v1701_v28  ;;  %v1714_v9 = vsel %vm995_vm2, %v13134_v22, 0.0  ;;  %v3684_v5 = vrot.slane %v3682_v21, 4  ;;  %v11601_v22 = vld [vmem:[%s15634_s17 + $0x290] sm:$0xf]  ;;  %v4005_v49 = vsel %vm1737_vm0, %v15959_v30, 0 }
 0x2e2   : > { %v3676_v55 = vsel %vm15636_vm6, %v11612_v36, %v3675_v25  ;;  %v3679_v30 = vsel %vm15636_vm6, %v3677_v31, %v3678_v40  ;;  %v11614_v43 = vrot.slane %v11600_v56, 9  ;;  %v14824_v36 = vld [vmem:[%s18105_s3 + $0x118] sm:$0xff]   ;;  %v14825_v31 = vld [vmem:[%s18105_s3 + $0x120] sm:$0xff]  }
 0x2e3   : > { %v1705_v42 = vadd.f32 %v15858_v38, %v1703_v32  ;;  %v3402_v38 = vsel %vm15868_vm8, %v11567_v44, %v3401_v41  ;;  %v11591_v41 = vld [vmem:[%s15634_s17 + $0x238] sm:$0xe]  ;;  %v11593_v44 = vld [vmem:[%s15634_s17 + $0x240] sm:$0x1]  ;;  %v11619_v32 = vcombine.low %v3662_v17, %v3665_v23  ;;  %v3686_v34 = vsel %vm15636_vm6, %v3684_v5, %v3685_v46  ;;  %v11670_v46 = vld [vmem:[%s15634_s17 + $0x2a8] sm:$0xf] }
 0x2e4   : > { %v11576_v3 = vcombine.low %v3402_v38, %v3405_v54  ;;  %v11611_v60 = vrot.slane %v11591_v41, 9  ;;  %v3671_v12 = vrot.slane %v11593_v44, 5  ;;  %v16057_v38 = vld [vmem:[%s18104_s2 + $0xc] sm:$0x3]  ;;  %v11605_v41 = vld [vmem:[%s15634_s17 + $0x2b0] sm:$0x1]  ;;  %v11621_v44 = vcombine.low %v3676_v55, %v3679_v30 }
 0x2e5   : > { %v1707_v37 = vadd.f32 %v1706_v7, %v1705_v42  ;;  %v11613_v42 = vrot.slane %v11597_v29, 9  ;;  %v3699_v8 = vrot.slane %v11605_v41, 5  ;;  %v11616_v17 = vrot.slane %v11606_v16, 9  ;;  %v14816_v40 = vld [vmem:[%s15634_s17 + $0x258] sm:$0xff]   ;;  %v11673_v56 = vld [vmem:[%s15634_s17 + $0x2c4] sm:$0xf] }
 0x2e6   : > { %13740 = vmatmul.mubr.msk.bf16.gmra.mrb[12].mxu1 %vm995_vm2, %v11576_v3  ;;  %v3669_v26 = vsel %vm15636_vm6, %v11611_v60, %v3668_v58  ;;  %v3672_v19 = vsel %vm15636_vm6, %v3670_v53, %v3671_v12  ;;  %v14817_v5 = vld [vmem:[%s15634_s17 + $0x274] sm:$0xff]   ;;  %v11675_v41 = vld [vmem:[%s15634_s17 + $0x2dc] sm:$0xc] }
 0x2e7   : > { %v1709_v0 = vadd.f32 %v1708_v52, %v1707_v37  ;;  %13745 = vmatprep.mubr.msk.bf16.mxu1 %vm995_vm2, %v11618_v35  ;;  %v11620_v39 = vcombine.low %v3669_v26, %v3672_v19  ;;  %v11604_v37 = vld [vmem:[%s15634_s17 + $0x2ac] sm:$0xf]  ;;  %v3683_v6 = vsel %vm15636_vm6, %v11613_v42, %v3682_v21  ;;  %v14821_v19 = vld [vmem:[%s18105_s3 + $0x100] sm:$0xff]  }
 0x2e8   : > { %v3696_v58 = vrot.slane %v11604_v37, 5  ;;  %v11622_v3 = vcombine.low %v3683_v6, %v3686_v34  ;;  %v14826_v42 = vld [vmem:[%s18105_s3 + $0x128] sm:$0xff]   ;;  %v14818_v37 = vld [vmem:[%s15634_s17 + $0x290] sm:$0xff]   ;;  %v4197_v6 = vrot.slane %v11673_v56, 6 }
 0x2e9   : > { %v1711_v51 = vadd.f32 %v1710_v57, %v1709_v0  ;;  %v3689_v57 = vrot.slane %v11601_v22, 5  ;;  %v11603_v0 = vld [vmem:[%s15634_s17 + $0x2a8] sm:$0xe]  ;;  %v4190_v22 = vrot.slane %v11670_v46, 6 }
 0x2ea   : > { %v3698_v35 = vrot.slane %v3696_v58, 4 }
 0x2eb   : > { %v1713_v59 = vadd.f32 %v1712_v2, %v1711_v51  ;;  %v3691_v10 = vrot.slane %v3689_v57, 4  ;;  %v11615_v51 = vrot.slane %v11603_v0, 9  ;;  %v3690_v53 = vsel %vm15636_vm6, %v11614_v43, %v3689_v57  ;;  %v11676_v57 = vld [vmem:[%s15634_s17 + $0x2e0] sm:$0xf]  ;;  %v14820_v43 = vld [vmem:[%s15634_s17 + $0x2c8] sm:$0xff]  }
 0x2ec   : > { %v3700_v13 = vsel %vm15636_vm6, %v3698_v35, %v3699_v8  ;;  %v4192_v55 = vrot.slane %v4190_v22, 4  ;;  %v4204_v0 = vrot.slane %v11676_v57, 6 }
 0x2ed   : > { %v1715_v20 = vadd.f32 %v1714_v9, %v1713_v59  ;;  %v3693_v12 = vsel %vm15636_vm6, %v3691_v10, %v3692_v48  ;;  %v3703_v59 = vrot.slane %v11607_v50, 5  ;;  %v3697_v4 = vsel %vm15636_vm6, %v11615_v51, %v3696_v58  ;;  %v11672_v58 = vld [vmem:[%s15634_s17 + $0x2c0] sm:$0xc]  ;;  %v11679_v50 = vld [vmem:[%s15634_s17 + $0x2fc] sm:$0xf] }
 0x2ee   : > { %13746 = vmatmul.mubr.msk.bf16.vlgmr.msra.gmra.mrb[0].mxu1 %vm995_vm2, %v11619_v32  ;;  %v11624_v18 = vcombine.low %v3697_v4, %v3700_v13  ;;  %v14814_v32 = vld [vmem:[%s15634_s17 + $0x220] sm:$0xff]   ;;  %v4199_v10 = vrot.slane %v4197_v6, 4  ;;  %v11695_v51 = vrot.slane %v11675_v41, 10  ;;  %v4206_v35 = vrot.slane %v4204_v0, 4  ;;  %v11678_v4 = vld [vmem:[%s15634_s17 + $0x2f8] sm:$0xc] }
 0x2ef   : > { %v1717_v28 = vadd.f32 %v1716_v45, %v1715_v20  ;;  %13749 = vmatprep.mubr.msk.bf16.mxu1 %vm995_vm2, %v11620_v39  ;;  %13762 = vmatpush3.bf16.msra.mxu1 %v4005_v49  ;;  %v11623_v20 = vcombine.low %v3690_v53, %v3693_v12  ;;  %v3705_v25 = vrot.slane %v3703_v59, 4  ;;  %v3704_v21 = vsel %vm15636_vm6, %v11616_v17, %v3703_v59  ;;  %v11669_v49 = vld [vmem:[%s15634_s17 + $0x2a4] sm:$0xc]  ;;  %v11680_v13 = vld [vmem:[%s15634_s17 + $0x300] sm:$0x3] }
 0x2f0   : > { %14708 = vmatprep.subr.msk.bf16.mxu1 %vm1737_vm0, %v16057_v38  ;;  %v4311_v39 = vsel %vm1737_vm0, %v16057_v38, 0  ;;  %v14819_v38 = vld [vmem:[%s15634_s17 + $0x2ac] sm:$0xff]   ;;  %v4211_v12 = vrot.slane %v11679_v50, 6  ;;  %v4205_v16 = vsel %vm15868_vm8, %v11695_v51, %v4204_v0  ;;  %v11718_v50 = vld [vmem:[%s15634_s17 + $0x2a8] sm:$0xe] }
 0x2f1   : > { %v1719_v7 = vadd.f32 %v1718_v15, %v1717_v28  ;;  %v3706_v15 = vrot.slane %v11608_v14, 5 }
 0x2f3   : > { %v1721_v52 = vadd.f32 %v1720_v63, %v1719_v7  ;;  %v3707_v28 = vsel %vm15636_vm6, %v3705_v25, %v3706_v15  ;;  %v14813_v63 = vld [vmem:[%s15634_s17 + $0x204] sm:$0xff]   ;;  %v14815_v7 = vld [vmem:[%s15634_s17 + $0x23c] sm:$0xff]   ;;  %v4213_v25 = vrot.slane %v4211_v12, 4  ;;  %v4214_v15 = vrot.slane %v11680_v13, 6  ;;  %v11723_v13 = vld [vmem:[%s15634_s17 + $0x2cc] sm:$0x1] }
 0x2f4   : > { %v11625_v29 = vcombine.low %v3704_v21, %v3707_v28  ;;  %v11685_v21 = vld [vmem:[%s15634_s17 + $0x334] sm:$0xf] }
 0x2f5   : > { %v1723_v54 = vadd.f32 %v1722_v11, %v1721_v52  ;;  %v14823_v11 = vld [vmem:[%s18105_s3 + $0x110] sm:$0xff]   ;;  %v11671_v52 = vld [vmem:[%s15634_s17 + $0x2ac] sm:$0x3] }
 0x2f6   : > { %13750 = vmatmul.mubr.msk.bf16.gmra.mrb[4].mxu1 %vm995_vm2, %v11621_v44  ;;  %v4193_v30 = vrot.slane %v11671_v52, 6  ;;  %v11677_v44 = vld [vmem:[%s15634_s17 + $0x2e4] sm:$0x3] }
 0x2f7   : > { %v1724_v33 = vrot.slane %v1723_v54, 4  ;;  %13753 = vmatprep.mubr.msk.bf16.mxu1 %vm995_vm2, %v11622_v3  ;;  %v11694_v3 = vrot.slane %v11672_v58, 10  ;;  %v4207_v8 = vrot.slane %v11677_v44, 6 }
 0x2f8   : > { %v4194_v24 = vsel %vm15868_vm8, %v4192_v55, %v4193_v30  ;;  %v14827_v30 = vld [vmem:[%s18105_s3 + $0x130] sm:$0xff]  }
 0x2f9   : > { %v1725_v2 = vadd.f32 %v1724_v33, %v1723_v54  ;;  %v11693_v54 = vrot.slane %v11669_v49, 10  ;;  %v11674_v33 = vld [vmem:[%s15634_s17 + $0x2c8] sm:$0x3]  ;;  %v4208_v59 = vsel %vm15868_vm8, %v4206_v35, %v4207_v8  ;;  %v11688_v49 = vld [vmem:[%s15634_s17 + $0x350] sm:$0xf] }
 0x2fa   : > { %v4200_v48 = vrot.slane %v11674_v33, 6  ;;  %v4232_v52 = vrot.slane %v11688_v49, 6  ;;  %v11722_v35 = vld [vmem:[%s15634_s17 + $0x2c8] sm:$0xf]  ;;  %v16215_v8 = vld [vmem:[%s18103_s1] sm:$0x3] }
 0x2fb   : > { %v1726_v9 = vrot.slane %v1725_v2, 2  ;;  %v4191_v34 = vsel %vm15868_vm8, %v11693_v54, %v4190_v22  ;;  %v11689_v54 = vld [vmem:[%s15634_s17 + $0x354] sm:$0x3] }
 0x2fc   : > { %v4201_v53 = vsel %vm15868_vm8, %v4199_v10, %v4200_v48  ;;  %v4234_v57 = vrot.slane %v4232_v52, 4  ;;  %v11719_v48 = vld [vmem:[%s15634_s17 + $0x2ac] sm:$0xf] }
 0x2fd   : > { %v1727_v60 = vadd.f32 %v1726_v9, %v1725_v2  ;;  %v11702_v2 = vcombine.low %v4191_v34, %v4194_v24  ;;  %v11682_v9 = vld [vmem:[%s15634_s17 + $0x318] sm:$0xf]  ;;  %v11690_v34 = vld [vmem:[%s15634_s17 + $0x368] sm:$0xc]  ;;  %v11692_v24 = vld [vmem:[%s15634_s17 + $0x370] sm:$0x3] }
 0x2fe   : > { %13754 = vmatmul.mubr.msk.bf16.gmra.mrb[8].mxu1 %vm995_vm2, %v11623_v20  ;;  %v4218_v14 = vrot.slane %v11682_v9, 6  ;;  %v11683_v20 = vld [vmem:[%s15634_s17 + $0x31c] sm:$0x3]  ;;  %v11700_v0 = vrot.slane %v11690_v34, 10  ;;  %v11720_v9 = vld [vmem:[%s15634_s17 + $0x2b0] sm:$0x1] }
 0x2ff   : > { %v1728_v45 = vrot.slane %v1727_v60, 1  ;;  %13757 = vmatprep.mubr.msk.bf16.mxu1 %vm995_vm2, %v11624_v18  ;;  %v11696_v18 = vrot.slane %v11678_v4, 10  ;;  %v11750_v4 = vld [vmem:[%s18104_s2 + $0xe] sm:$0x3] }
 0x301   : > { %v1729_v23 = vadd.f32 %v1728_v45, %v1727_v60  ;;  %v4198_v60 = vsel %vm15868_vm8, %v11694_v3, %v4197_v6  ;;  %v11681_v45 = vld [vmem:[%s15634_s17 + $0x314] sm:$0xc]  ;;  %v4212_v28 = vsel %vm15868_vm8, %v11696_v18, %v4211_v12  ;;  %v4235_v6 = vrot.slane %v11689_v54, 6 }
 0x302   : > { %v11703_v17 = vcombine.low %v4198_v60, %v4201_v53  ;;  %v11742_v60 = vrot.slane %v11718_v50, 9  ;;  %v4495_v12 = vrot.slane %v11720_v9, 5  ;;  %v11740_v50 = vld [vmem:[%s15634_s17 + $0x370] sm:$0xf] }
 0x303   : > { %v1730_v26 = vmul.f32 0.00390625, %v1729_v23  ;;  %v11704_v23 = vcombine.low %v4205_v16, %v4208_v59  ;;  %v4236_v33 = vsel %vm15868_vm8, %v4234_v57, %v4235_v6  ;;  %v11721_v16 = vld [vmem:[%s15634_s17 + $0x2c4] sm:$0xe]  ;;  %v4499_v59 = vrot.slane %v11722_v35, 5  ;;  %v11736_v9 = vld [vmem:[%s15634_s17 + $0x350] sm:$0xe] }
 0x305   : > { %v1731_v27 = vpack.c.bf16 %v1730_v26, %v1730_v26  ;;  %v11697_v26 = vrot.slane %v11681_v45, 10  ;;  %v4613_v45 = vsel %vm1737_vm0, %v11750_v4, 0 }
 0x306   : > { %13758 = vmatmul.mubr.msk.bf16.gmra.mrb[12].mxu1 %vm995_vm2, %v11625_v29  ;;  %v4215_v29 = vsel %vm15868_vm8, %v4213_v25, %v4214_v15  ;;  %v4502_v15 = vrot.slane %v11723_v13, 5 }
 0x307   : > { %13598 = vmatmul.mubr.msk.bf16.vlgmr.msra.gmra.mrb[0].mxu0 %vm995_vm2, %v1731_v27  ;;  %13763 = vmatprep.mubr.msk.bf16.mxu1 %vm995_vm2, %v14813_v63  ;;  %v4221_v27 = vrot.slane %v11683_v20, 6  ;;  %v4219_v63 = vsel %vm15868_vm8, %v11697_v26, %v4218_v14 }
 0x308   : > { %13602 = vmatpush3.bf16.msra.mxu0 %v14821_v19  ;;  %13617 = vmatprep.mubr.msk.bf16.mxu0 %vm14990_vm1, %v14989_v1  ;;  %v4220_v19 = vrot.slane %v4218_v14, 4  ;;  %v11743_v14 = vrot.slane %v11721_v16, 9 }
 0x309   : > { %13603 = vmatprep.subr.bf16.mxu0 %v14989_v1 }
 0x30a   : > { %v4500_v25 = vsel %vm15636_vm6, %v11743_v14, %v4499_v59 }
 0x30c   : > { %13604 = vmatpush3.bf16.msra.mxu0 %v14822_v61  ;;  %v4225_v61 = vrot.slane %v11685_v21, 6 }
 0x30d   : > { %13605 = vmatprep.subr.bf16.mxu0 %v14989_v1 }
 0x30e   : > { %13764 = vmatmul.mubr.msk.bf16.vlgmr.msra.gmra.mrb[0].mxu1 %vm995_vm2, %v14814_v32  ;;  %v11684_v32 = vld [vmem:[%s15634_s17 + $0x330] sm:$0xc] }
 0x30f   : > { %13767 = vmatprep.mubr.msk.bf16.mxu1 %vm995_vm2, %v14815_v7  ;;  %13780 = vmatpush3.bf16.msra.mxu1 %v4311_v39  ;;  %v11705_v7 = vcombine.low %v4212_v28, %v4215_v29  ;;  %v11728_v28 = vld [vmem:[%s15634_s17 + $0x300] sm:$0xf] }
 0x310   : > { %13606 = vmatpush3.bf16.msra.mxu0 %v14823_v11  ;;  %v4222_v11 = vsel %vm15868_vm8, %v4220_v19, %v4221_v27  ;;  %14709 = vmatprep.subr.msk.bf16.mxu1 %vm1737_vm0, %v11750_v4  ;;  %v11725_v19 = vld [vmem:[%s15634_s17 + $0x2e4] sm:$0xf]  ;;  %v11724_v29 = vld [vmem:[%s15634_s17 + $0x2e0] sm:$0xe]  ;;  %v11741_v4 = vld [vmem:[%s15634_s17 + $0x374] sm:$0x1] }
 0x311   : > { %13607 = vmatprep.subr.bf16.mxu0 %v14989_v1  ;;  %v11706_v39 = vcombine.low %v4219_v63, %v4222_v11  ;;  %v4506_v21 = vrot.slane %v11725_v19, 5  ;;  %v4513_v63 = vrot.slane %v11728_v28, 5  ;;  %v11744_v11 = vrot.slane %v11724_v29, 9  ;;  %v11783_v19 = vld [vmem:[%s18104_s2 + $0x10] sm:$0x3]  ;;  %v14830_v28 = vld [vmem:[%s15634_s17 + $0x2c8] sm:$0xff]  }
 0x312   : > { %v14831_v29 = vld [vmem:[%s15634_s17 + $0x2e4] sm:$0xff]  }
 0x314   : > { %13608 = vmatpush3.bf16.msra.mxu0 %v14824_v36  ;;  %v11686_v36 = vld [vmem:[%s15634_s17 + $0x338] sm:$0x3] }
 0x315   : > { %13609 = vmatprep.subr.bf16.mxu0 %v14989_v1 }
 0x316   : > { %13768 = vmatmul.mubr.msk.bf16.gmra.mrb[4].mxu1 %vm995_vm2, %v14816_v40  ;;  %v4227_v40 = vrot.slane %v4225_v61, 4 }
 0x317   : > { %13771 = vmatprep.mubr.msk.bf16.mxu1 %vm995_vm2, %v14817_v5 }
 0x318   : > { %13610 = vmatpush3.bf16.msra.mxu0 %v14825_v31  ;;  %v11698_v31 = vrot.slane %v11684_v32, 10  ;;  %v4508_v32 = vrot.slane %v4506_v21, 4 }
 0x319   : > { %13611 = vmatprep.subr.bf16.mxu0 %v14989_v1 }
 0x31a   : > { %v4226_v5 = vsel %vm15868_vm8, %v11698_v31, %v4225_v61  ;;  %v11726_v61 = vld [vmem:[%s15634_s17 + $0x2e8] sm:$0x1] }
 0x31c   : > { %13612 = vmatpush3.bf16.msra.mxu0 %v14826_v42  ;;  %v4228_v42 = vrot.slane %v11686_v36, 6  ;;  %v4509_v36 = vrot.slane %v11726_v61, 5  ;;  %v14832_v61 = vld [vmem:[%s15634_s17 + $0x300] sm:$0xff]  }
 0x31d   : > { %13613 = vmatprep.subr.bf16.mxu0 %v14989_v1 }
 0x31e   : > { %13772 = vmatmul.mubr.msk.bf16.gmra.mrb[8].mxu1 %vm995_vm2, %v14818_v37  ;;  %v4229_v46 = vsel %vm15868_vm8, %v4227_v40, %v4228_v42  ;;  %v11691_v37 = vld [vmem:[%s15634_s17 + $0x36c] sm:$0xf]  ;;  %v4515_v40 = vrot.slane %v4513_v63, 4  ;;  %v4507_v42 = vsel %vm15636_vm6, %v11744_v11, %v4506_v21  ;;  %v4843_v21 = vsel %vm1737_vm0, %v11783_v19, 0  ;;  %v14834_v11 = vld [vmem:[%s15634_s17 + $0x338] sm:$0xff]  }
 0x31f   : > { %13775 = vmatprep.mubr.msk.bf16.mxu1 %vm995_vm2, %v14819_v38  ;;  %v11707_v22 = vcombine.low %v4226_v5, %v4229_v46  ;;  %v11687_v38 = vld [vmem:[%s15634_s17 + $0x34c] sm:$0xc]  ;;  %v4239_v55 = vrot.slane %v11691_v37, 6  ;;  %v4510_v5 = vsel %vm15636_vm6, %v4508_v32, %v4509_v36  ;;  %v14835_v32 = vld [vmem:[%s15634_s17 + $0x354] sm:$0xff]  }
 0x320   : > { %v11699_v56 = vrot.slane %v11687_v38, 10  ;;  %13614 = vmatpush3.bf16.msra.mxu0 %v14827_v30  ;;  %v11731_v38 = vld [vmem:[%s15634_s17 + $0x31c] sm:$0xf]  ;;  %v11730_v30 = vld [vmem:[%s15634_s17 + $0x318] sm:$0xe]  ;;  %v14836_v36 = vld [vmem:[%s15634_s17 + $0x370] sm:$0xff]  }
 0x321   : > { %v4241_v41 = vrot.slane %v4239_v55, 4  ;;  %13615 = vmatprep.subr.bf16.mxu0 %v14989_v1  ;;  %v4240_v3 = vsel %vm15868_vm8, %v11700_v0, %v4239_v55  ;;  %v4492_v1 = vrot.slane %v11719_v48, 5  ;;  %v4520_v54 = vrot.slane %v11731_v38, 5  ;;  %v11734_v55 = vld [vmem:[%s15634_s17 + $0x338] sm:$0xf] }
 0x322   : > { %v4233_v58 = vsel %vm15868_vm8, %v11699_v56, %v4232_v52  ;;  %v11732_v56 = vld [vmem:[%s15634_s17 + $0x320] sm:$0x1]  ;;  %v4527_v57 = vrot.slane %v11734_v55, 5  ;;  %v11746_v6 = vrot.slane %v11730_v30, 9  ;;  %v11353_v38 = vld [vmem:[%s15634_s17 + $0x23c] sm:$0xf] }
 0x323   : > { %v11708_v44 = vcombine.low %v4233_v58, %v4236_v33  ;;  %v4494_v53 = vrot.slane %v4492_v1, 4  ;;  %v4493_v20 = vsel %vm15636_vm6, %v11742_v60, %v4492_v1  ;;  %v4522_v34 = vrot.slane %v4520_v54, 4  ;;  %v11735_v58 = vld [vmem:[%s15634_s17 + $0x33c] sm:$0x1]  ;;  %v11737_v1 = vld [vmem:[%s15634_s17 + $0x354] sm:$0xf] }
 0x324   : > { %v4523_v33 = vrot.slane %v11732_v56, 5  ;;  %v4534_v35 = vrot.slane %v11737_v1, 5  ;;  %v11738_v60 = vld [vmem:[%s15634_s17 + $0x358] sm:$0x1] }
 0x325   : > { %v4537_v13 = vrot.slane %v11738_v60, 5  ;;  %v11356_v60 = vld [vmem:[%s15634_s17 + $0x258] sm:$0xf] }
 0x326   : > { %13776 = vmatmul.mubr.msk.bf16.gmra.mrb[12].mxu1 %vm995_vm2, %v14820_v43  ;;  %v4242_v43 = vrot.slane %v11692_v24, 6  ;;  %v11733_v24 = vld [vmem:[%s15634_s17 + $0x334] sm:$0xe]  ;;  %v4536_v16 = vrot.slane %v4534_v35, 4 }
 0x327   : > { %13781 = vmatprep.mubr.msk.bf16.mxu1 %vm995_vm2, %v11702_v2  ;;  %v14828_v2 = vld [vmem:[%s18105_s3 + $0x138] sm:$0xff]   ;;  %v11747_v0 = vrot.slane %v11733_v24, 9 }
 0x328   : > { %v4243_v10 = vsel %vm15868_vm8, %v4241_v41, %v4242_v43  ;;  %13616 = vmatpush3.bf16.msra.mxu0 %v14828_v2  ;;  %v4529_v41 = vrot.slane %v4527_v57, 4  ;;  %v4530_v43 = vrot.slane %v11735_v58, 5  ;;  %v4524_v2 = vsel %vm15636_vm6, %v4522_v34, %v4523_v33  ;;  %v11349_v58 = vld [vmem:[%s15634_s17 + $0x21c] sm:$0xe]  ;;  %v11351_v33 = vld [vmem:[%s15634_s17 + $0x224] sm:$0x1] }
 0x329   : > { %v11709_v51 = vcombine.low %v4240_v3, %v4243_v10  ;;  %14701 = vmatprep.subr.msk.bf16.mxu0 %vm1737_vm0, %v16215_v8  ;;  %v4528_v3 = vsel %vm15636_vm6, %v11747_v0, %v4527_v57  ;;  %v1982_v0 = vrot.slane %v11353_v38, 5 }
 0x32a   : > { %v4531_v48 = vsel %vm15636_vm6, %v4529_v41, %v4530_v43  ;;  %v11352_v41 = vld [vmem:[%s15634_s17 + $0x238] sm:$0xe] }
 0x32e   : > { %13782 = vmatmul.mubr.msk.bf16.vlgmr.msra.gmra.mrb[0].mxu1 %vm995_vm2, %v11703_v17  ;;  %v4496_v17 = vsel %vm15636_vm6, %v4494_v53, %v4495_v12  ;;  %v4541_v53 = vrot.slane %v11740_v50, 5  ;;  %v11748_v12 = vrot.slane %v11736_v9, 9  ;;  %v1984_v50 = vrot.slane %v1982_v0, 4 }
 0x32f   : > { %13785 = vmatprep.mubr.msk.bf16.mxu1 %vm995_vm2, %v11704_v23  ;;  %v4501_v23 = vrot.slane %v4499_v59, 4  ;;  %13798 = vmatpush3.bf16.msra.mxu1 %v4613_v45  ;;  %v11751_v18 = vcombine.low %v4493_v20, %v4496_v17  ;;  %v11739_v59 = vld [vmem:[%s15634_s17 + $0x36c] sm:$0xe]  ;;  %v4544_v17 = vrot.slane %v11741_v4, 5 }
 0x330   : > { %v11749_v14 = vrot.slane %v11739_v59, 9  ;;  %v4543_v45 = vrot.slane %v4541_v53, 4  ;;  %v4535_v20 = vsel %vm15636_vm6, %v11748_v12, %v4534_v35  ;;  %14710 = vmatprep.subr.msk.bf16.mxu1 %vm1737_vm0, %v11783_v19  ;;  %v11372_v35 = vrot.slane %v11352_v41, 9  ;;  %v11359_v12 = vld [vmem:[%s15634_s17 + $0x274] sm:$0xf] }
 0x331   : > { %v4503_v26 = vsel %vm15636_vm6, %v4501_v23, %v4502_v15  ;;  %v4538_v23 = vsel %vm15636_vm6, %v4536_v16, %v4537_v13  ;;  %v1989_v59 = vrot.slane %v11356_v60, 5  ;;  %v11369_v41 = vld [vmem:[%s15634_s17 + $0x2cc] sm:$0x1]  ;;  %v14843_v60 = vld [vmem:[%s18105_s3 + $0x30] sm:$0xff]  }
 0x332   : > { %v11752_v27 = vcombine.low %v4500_v25, %v4503_v26  ;;  %v11757_v25 = vcombine.low %v4535_v20, %v4538_v23  ;;  %v4545_v15 = vsel %vm15636_vm6, %v4543_v45, %v4544_v17  ;;  %v1983_v4 = vsel %vm15636_vm6, %v11372_v35, %v1982_v0  ;;  %v11357_v45 = vld [vmem:[%s15634_s17 + $0x25c] sm:$0x1]  ;;  %v11358_v17 = vld [vmem:[%s15634_s17 + $0x270] sm:$0xe]  ;;  %v11360_v23 = vld [vmem:[%s15634_s17 + $0x278] sm:$0x1] }
 0x333   : > { %v1996_v20 = vrot.slane %v11359_v12, 5  ;;  %v1992_v19 = vrot.slane %v11357_v45, 5  ;;  %v11367_v0 = vld [vmem:[%s15634_s17 + $0x2c4] sm:$0xe]  ;;  %v14840_v35 = vld [vmem:[%s18105_s3 + $0x18] sm:$0xff]  }
 0x334   : > { %v16407_v12 = vld [vmem:[%s18104_s2] sm:$0x3] }
 0x336   : > { %13786 = vmatmul.mubr.msk.bf16.gmra.mrb[4].mxu1 %vm995_vm2, %v11705_v7  ;;  %v11727_v7 = vld [vmem:[%s15634_s17 + $0x2fc] sm:$0xe] }
 0x337   : > { %13789 = vmatprep.mubr.msk.bf16.mxu1 %vm995_vm2, %v11706_v39  ;;  %v11729_v39 = vld [vmem:[%s15634_s17 + $0x304] sm:$0x1]  ;;  %v11745_v31 = vrot.slane %v11727_v7, 9 }
 0x338   : > { %v4516_v46 = vrot.slane %v11729_v39, 5  ;;  %v11347_v7 = vld [vmem:[%s15634_s17 + $0x204] sm:$0xf] }
 0x339   : > { %v4514_v49 = vsel %vm15636_vm6, %v11745_v31, %v4513_v63  ;;  %v14833_v63 = vld [vmem:[%s15634_s17 + $0x31c] sm:$0xff]   ;;  %v1968_v39 = vrot.slane %v11347_v7, 5 }
 0x33a   : > { %v4517_v52 = vsel %vm15636_vm6, %v4515_v40, %v4516_v46  ;;  %v11346_v31 = vld [vmem:[%s15634_s17 + $0x200] sm:$0xe]  ;;  %v11348_v40 = vld [vmem:[%s15634_s17 + $0x208] sm:$0x1] }
 0x33b   : > { %v11754_v37 = vcombine.low %v4514_v49, %v4517_v52  ;;  %v1970_v46 = vrot.slane %v1968_v39, 4  ;;  %v11350_v49 = vld [vmem:[%s15634_s17 + $0x220] sm:$0xf] }
 0x33c   : > { %v1975_v56 = vrot.slane %v11350_v49, 5 }
 0x33e   : > { %13790 = vmatmul.mubr.msk.bf16.gmra.mrb[8].mxu1 %vm995_vm2, %v11707_v22  ;;  %v11753_v22 = vcombine.low %v4507_v42, %v4510_v5  ;;  %v1781_v42 = vld [vmem:[%s18106_s4 + $0x4] sm:$0x1]  ;;  %v11370_v5 = vrot.slane %v11346_v31, 9  ;;  %v11361_v31 = vld [vmem:[%s15634_s17 + $0x28c] sm:$0xe] }
 0x33f   : > { %13793 = vmatprep.mubr.msk.bf16.mxu1 %vm995_vm2, %v11708_v44  ;;  %v4521_v44 = vsel %vm15636_vm6, %v11746_v6, %v4520_v54 }
 0x340   : > { %v11755_v10 = vcombine.low %v4521_v44, %v4524_v2  ;;  %v1969_v34 = vsel %vm15636_vm6, %v11370_v5, %v1968_v39  ;;  %v11354_v44 = vld [vmem:[%s15634_s17 + $0x240] sm:$0x1]  ;;  %v2072_v2 = vsel %vm1737_vm0, %v16215_v8, 0  ;;  %v14839_v5 = vld [vmem:[%s18105_s3 + $0x10] sm:$0xff]  }
 0x341   : > { %v1985_v9 = vrot.slane %v11354_v44, 5 }
 0x343   : > { %v1986_v13 = vsel %vm15636_vm6, %v1984_v50, %v1985_v9  ;;  %v14841_v50 = vld [vmem:[%s18105_s3 + $0x20] sm:$0xff]   ;;  %v14842_v9 = vld [vmem:[%s18105_s3 + $0x28] sm:$0xff]  }
 0x346   : > { %13794 = vmatmul.mubr.msk.bf16.gmra.mrb[12].mxu1 %vm995_vm2, %v11709_v51  ;;  %v11756_v51 = vcombine.low %v4528_v3, %v4531_v48  ;;  %v1977_v48 = vrot.slane %v1975_v56, 4 }
 0x347   : > { %13799 = vmatprep.mubr.msk.bf16.mxu1 %vm995_vm2, %v11751_v18  ;;  %v4542_v18 = vsel %vm15636_vm6, %v11749_v14, %v4541_v53  ;;  %v14837_v53 = vld [vmem:[%s18105_s3] sm:$0xff]   ;;  %v11355_v14 = vld [vmem:[%s15634_s17 + $0x254] sm:$0xe] }
 0x348   : > { %v11758_v26 = vcombine.low %v4542_v18, %v4545_v15  ;;  %v11373_v15 = vrot.slane %v11355_v14, 9 }
 0x34e   : > { %13800 = vmatmul.mubr.msk.bf16.vlgmr.msra.gmra.mrb[0].mxu1 %vm995_vm2, %v11752_v27  ;;  %v14829_v27 = vld [vmem:[%s15634_s17 + $0x2ac] sm:$0xff]  }
 0x34f   : > { %13803 = vmatprep.mubr.msk.bf16.mxu1 %vm995_vm2, %v11753_v22  ;;  %13816 = vmatpush3.bf16.msra.mxu1 %v4843_v21  ;;  %v1971_v22 = vrot.slane %v11348_v40, 5  ;;  %v1998_v21 = vrot.slane %v1996_v20, 4  ;;  %v11363_v40 = vld [vmem:[%s15634_s17 + $0x294] sm:$0x1] }
 0x351   : > { %v1972_v24 = vsel %vm15636_vm6, %v1970_v46, %v1971_v22  ;;  %v11364_v46 = vld [vmem:[%s15634_s17 + $0x2a8] sm:$0xe]  ;;  %v11366_v22 = vld [vmem:[%s15634_s17 + $0x2b0] sm:$0x1] }
 0x352   : > { %v11378_v3 = vcombine.low %v1969_v34, %v1972_v24 }
 0x356   : > { %13804 = vmatmul.mubr.msk.bf16.gmra.mrb[4].mxu1 %vm995_vm2, %v11754_v37  ;;  %v1783_v37 = vld [vmem:[%s18107_s5 + $0x4] sm:$0x1] }
 0x357   : > { %13807 = vmatprep.mubr.msk.bf16.mxu1 %vm995_vm2, %v11755_v10  ;;  %v11371_v10 = vrot.slane %v11349_v58, 9 }
 0x359   : > { %v1976_v8 = vsel %vm15636_vm6, %v11371_v10, %v1975_v56  ;;  %v2013_v56 = vrot.slane %v11366_v22, 5  ;;  %v2020_v10 = vrot.slane %v11369_v41, 5  ;;  %v14851_v22 = vld [vmem:[%s15634_s17 + $0xa8] sm:$0xff]  }
 0x35e   : > { %13808 = vmatmul.mubr.msk.bf16.gmra.mrb[8].mxu1 %vm995_vm2, %v11756_v51  ;;  %v1978_v51 = vrot.slane %v11351_v33, 5 }
 0x35f   : > { %13811 = vmatprep.mubr.msk.bf16.mxu1 %vm995_vm2, %v11757_v25  ;;  %v11380_v25 = vcombine.low %v1983_v4, %v1986_v13 }
 0x360   : > { %v1979_v16 = vsel %vm15636_vm6, %v1977_v48, %v1978_v51 }
 0x361   : > { %v11379_v18 = vcombine.low %v1976_v8, %v1979_v16 }
 0x366   : > { %13812 = vmatmul.mubr.msk.bf16.gmra.mrb[12].mxu1 %vm995_vm2, %v11758_v26  ;;  %v1991_v26 = vrot.slane %v1989_v59, 4 }
 0x367   : > { %13817 = vmatprep.mubr.msk.bf16.mxu1 %vm995_vm2, %v14829_v27  ;;  %v11374_v27 = vrot.slane %v11358_v17, 9 }
 0x369   : > { %v1997_v7 = vsel %vm15636_vm6, %v11374_v27, %v1996_v20 }
 0x36e   : > { %13818 = vmatmul.mubr.msk.bf16.vlgmr.msra.gmra.mrb[0].mxu1 %vm995_vm2, %v14830_v28  ;;  %v1999_v28 = vrot.slane %v11360_v23, 5 }
 0x36f   : > { %13821 = vmatprep.mubr.msk.bf16.mxu1 %vm995_vm2, %v14831_v29  ;;  %v11362_v29 = vld [vmem:[%s15634_s17 + $0x290] sm:$0xf] }
 0x370   : > { %v2000_v39 = vsel %vm15636_vm6, %v1998_v21, %v1999_v28  ;;  %v12267_v21 = vld [vmem:[%s18104_s2 + $0x24] sm:$0x3] }
 0x371   : > { %v14845_v28 = vld [vmem:[%s15634_s17] sm:$0xff]   ;;  %14720 = vmatprep.subr.msk.bf16.mxu1 %vm1737_vm0, %v12267_v21 }
 0x376   : > { %13822 = vmatmul.mubr.msk.bf16.gmra.mrb[4].mxu1 %vm995_vm2, %v14832_v61  ;;  %v14838_v61 = vld [vmem:[%s18105_s3 + $0x8] sm:$0xff]  }
 0x377   : > { %13825 = vmatprep.mubr.msk.bf16.mxu1 %vm995_vm2, %v14833_v63  ;;  %v11365_v63 = vld [vmem:[%s15634_s17 + $0x2ac] sm:$0xf] }
 0x37e   : > { %13826 = vmatmul.mubr.msk.bf16.gmra.mrb[8].mxu1 %vm995_vm2, %v14834_v11  ;;  %v1990_v11 = vsel %vm15636_vm6, %v11373_v15, %v1989_v59 }
 0x37f   : > { %13829 = vmatprep.mubr.msk.bf16.mxu1 %vm995_vm2, %v14835_v32  ;;  %v1993_v32 = vsel %vm15636_vm6, %v1991_v26, %v1992_v19 }
 0x380   : > { %v11381_v49 = vcombine.low %v1990_v11, %v1993_v32  ;;  %v12292_v11 = vld [vmem:[%s18104_s2 + $0x26] sm:$0x3] }
 0x381   : > { %v8721_v32 = vsel %vm1737_vm0, %v12292_v11, 0 }
 0x386   : > { %13830 = vmatmul.mubr.msk.bf16.gmra.mrb[12].mxu1 %vm995_vm2, %v14836_v36  ;;  %v2003_v36 = vrot.slane %v11362_v29, 5  ;;  %v8419_v29 = vsel %vm1737_vm0, %v12267_v21, 0  ;;  %v8561_v21 = vld [vmem:[%s15634_s17 + $0x64] sm:$0x1] }
 0x387   : > { %14060 = vmatpush3.bf16.msra.mxu1 %v8419_v29  ;;  %14061 = vmatprep.mubr.msk.bf16.mxu1 %vm995_vm2, %v14845_v28  ;;  %v8562_v29 = vld [vmem:[%s15634_s17 + $0x78] sm:$0xe] }
 0x388   : > { %v2005_v38 = vrot.slane %v2003_v36, 4  ;;  %14721 = vmatprep.subr.msk.bf16.mxu1 %vm1737_vm0, %v12292_v11 }
 0x3da   : > { %v1775_v52 = vpop.f32.mrb[0].mxu0 }
 0x3db   : > { %v1782_v54 = vmul.f32 %v1781_v42, %v1775_v52  ;;  %v13599_v55 = vpop.f32.mrb[1].mxu0  ;;  %v2010_v42 = vrot.slane %v11365_v63, 5  ;;  %v11382_v52 = vcombine.low %v1997_v7, %v2000_v39  ;;  %v14847_v63 = vld [vmem:[%s15634_s17 + $0x38] sm:$0xff]   ;;  %v14849_v7 = vld [vmem:[%s15634_s17 + $0x70] sm:$0xff]   ;;  %v8551_v39 = vld [vmem:[%s15634_s17 + $0xc] sm:$0xf] }
 0x3dc   : > { %v1778_v30 = vpop.f32.mrb[2].mxu0  ;;  %v11376_v55 = vrot.slane %v11364_v46, 9  ;;  %v12317_v46 = vld [vmem:[%s18104_s2 + $0x28] sm:$0x3] }
 0x3dd   : > { %v1784_v57 = vadd.f32 %v1783_v37, %v1782_v54  ;;  %v13600_v6 = vpop.f32.mrb[3].mxu0  ;;  %v11375_v37 = vrot.slane %v11361_v31, 9  ;;  %v2006_v54 = vrot.slane %v11363_v40, 5  ;;  %v2012_v30 = vrot.slane %v2010_v42, 4  ;;  %v8550_v40 = vld [vmem:[%s15634_s17 + $0x8] sm:$0xe] }
 0x3de   : > { %v2011_v58 = vsel %vm15636_vm6, %v11376_v55, %v2010_v42  ;;  %v8600_v31 = vrot.slane %v8551_v39, 5  ;;  %v8552_v42 = vld [vmem:[%s15634_s17 + $0x10] sm:$0x1]  ;;  %v12288_v39 = vrot.slane %v8562_v29, 9 }
 0x3df   : > { %v1785_v43 = vmax.f32 %v1784_v57, 0.0  ;;  %v11368_v57 = vld [vmem:[%s15634_s17 + $0x2c8] sm:$0xf]  ;;  %v2004_v6 = vsel %vm15636_vm6, %v11375_v37, %v2003_v36  ;;  %v2007_v34 = vsel %vm15636_vm6, %v2005_v38, %v2006_v54  ;;  %v2014_v33 = vsel %vm15636_vm6, %v2012_v30, %v2013_v56  ;;  %v14848_v36 = vld [vmem:[%s15634_s17 + $0x54] sm:$0xff]   ;;  %v8557_v54 = vld [vmem:[%s15634_s17 + $0x44] sm:$0xf] }
 0x3e0   : > { %v2017_v24 = vrot.slane %v11368_v57, 5  ;;  %v11383_v44 = vcombine.low %v2004_v6, %v2007_v34  ;;  %v8603_v37 = vrot.slane %v8552_v42, 5  ;;  %v8554_v38 = vld [vmem:[%s15634_s17 + $0x28] sm:$0xf]  ;;  %v8553_v57 = vld [vmem:[%s15634_s17 + $0x24] sm:$0xe] }
 0x3e1   : > { %v1786_v1 = vpack.c.bf16 %v1785_v43, %v1785_v43  ;;  %v11384_v43 = vcombine.low %v2011_v58, %v2014_v33  ;;  %v8607_v55 = vrot.slane %v8554_v38, 5  ;;  %v8555_v6 = vld [vmem:[%s15634_s17 + $0x2c] sm:$0x1]  ;;  %v8614_v34 = vrot.slane %v8557_v54, 5  ;;  %v8558_v58 = vld [vmem:[%s15634_s17 + $0x48] sm:$0x1] }
 0x3e2   : > { %v14852_v33 = vld [vmem:[%s15634_s17 + $0xc4] sm:$0xff]   ;;  %v12285_v41 = vrot.slane %v8553_v57, 9  ;;  %v8566_v42 = vld [vmem:[%s15634_s17 + $0x98] sm:$0xf]  ;;  %v8568_v57 = vld [vmem:[%s15634_s17 + $0xb0] sm:$0xe] }
 0x3e3   : > { %13618 = vmatmul.mubr.bf16.vlgmr.msra.gmra.mrb[4].mxu0 %v1786_v1  ;;  %v8635_v38 = vrot.slane %v8566_v42, 5  ;;  %v8859_v42 = vld [vmem:[%s15634_s17 + $0x4c] sm:$0xf] }
 0x3e4   : > { %13622 = vmatpush3.bf16.msra.mxu0 %v2072_v2  ;;  %13623 = vmatprep.mubr.msk.bf16.mxu0 %vm995_vm2, %v11378_v3  ;;  %v11377_v2 = vrot.slane %v11367_v0, 9  ;;  %v2019_v3 = vrot.slane %v2017_v24, 4 }
 0x3e5   : > { %13639 = vmatprep.subr.bf16.mxu0 %v14837_v53 }
 0x3e6   : > { %v2018_v48 = vsel %vm15636_vm6, %v11377_v2, %v2017_v24  ;;  %v2021_v51 = vsel %vm15636_vm6, %v2019_v3, %v2020_v10  ;;  %v8556_v24 = vld [vmem:[%s15634_s17 + $0x40] sm:$0xe]  ;;  %v8616_v3 = vrot.slane %v8614_v34, 4  ;;  %v8617_v10 = vrot.slane %v8558_v58, 5 }
 0x3e7   : > { %v11385_v1 = vcombine.low %v2018_v48, %v2021_v51  ;;  %v12286_v2 = vrot.slane %v8556_v24, 9  ;;  %v8560_v48 = vld [vmem:[%s15634_s17 + $0x60] sm:$0xf]  ;;  %v8563_v51 = vld [vmem:[%s15634_s17 + $0x7c] sm:$0xf] }
 0x3e8   : > { %v8628_v28 = vrot.slane %v8563_v51, 5 }
 0x3eb   : > { %13624 = vmatmul.mubr.msk.bf16.vlgmr.msra.gmra.mrb[8].mxu0 %vm995_vm2, %v11379_v18 }
 0x3ec   : > { %13627 = vmatprep.mubr.msk.bf16.mxu0 %vm995_vm2, %v11380_v25  ;;  %13640 = vmatpush3.bf16.msra.mxu0 %v14837_v53  ;;  %v14844_v53 = vld [vmem:[%s18105_s3 + $0x38] sm:$0xff]  }
 0x3ed   : > { %13641 = vmatprep.subr.bf16.mxu0 %v14838_v61 }
 0x3f0   : > { %13642 = vmatpush3.bf16.msra.mxu0 %v14838_v61  ;;  %v14846_v61 = vld [vmem:[%s15634_s17 + $0x1c] sm:$0xff]  }
 0x3f1   : > { %13643 = vmatprep.subr.bf16.mxu0 %v14839_v5  ;;  %14062 = vmatmul.mubr.msk.bf16.vlgmr.msra.gmra.mrb[16].mxu1 %vm995_vm2, %v14846_v61  ;;  %v8564_v61 = vld [vmem:[%s15634_s17 + $0x80] sm:$0x1] }
 0x3f2   : > { %14065 = vmatprep.mubr.msk.bf16.mxu1 %vm995_vm2, %v14847_v63  ;;  %14078 = vmatpush3.bf16.msra.mxu1 %v8721_v32 }
 0x3f3   : > { %13628 = vmatmul.mubr.msk.bf16.gmra.mrb[12].mxu0 %vm995_vm2, %v11381_v49  ;;  %14722 = vmatprep.subr.msk.bf16.mxu1 %vm1737_vm0, %v12317_v46  ;;  %v12284_v49 = vrot.slane %v8550_v40, 9  ;;  %v8631_v40 = vrot.slane %v8564_v61, 5 }
 0x3f4   : > { %13631 = vmatprep.mubr.msk.bf16.mxu0 %vm995_vm2, %v11382_v52  ;;  %13644 = vmatpush3.bf16.msra.mxu0 %v14839_v5  ;;  %v14850_v5 = vld [vmem:[%s15634_s17 + $0x8c] sm:$0xff]   ;;  %v8602_v52 = vrot.slane %v8600_v31, 4 }
 0x3f5   : > { %13645 = vmatprep.subr.bf16.mxu0 %v14840_v35  ;;  %v8601_v30 = vsel %vm15636_vm6, %v12284_v49, %v8600_v31  ;;  %v8630_v31 = vrot.slane %v8628_v28, 4  ;;  %v16507_v49 = vld [vmem:[%s18104_s2 + $0x2a] sm:$0x3] }
 0x3f6   : > { %v8604_v56 = vsel %vm15636_vm6, %v8602_v52, %v8603_v37 }
 0x3f7   : > { %v12293_v0 = vcombine.low %v8601_v30, %v8604_v56  ;;  %v8632_v54 = vsel %vm15636_vm6, %v8630_v31, %v8631_v40  ;;  %v8567_v30 = vld [vmem:[%s15634_s17 + $0x9c] sm:$0x1] }
 0x3f8   : > { %13646 = vmatpush3.bf16.msra.mxu0 %v14840_v35 }
 0x3f9   : > { %13647 = vmatprep.subr.bf16.mxu0 %v14841_v50  ;;  %14066 = vmatmul.mubr.msk.bf16.gmra.mrb[20].mxu1 %vm995_vm2, %v14848_v36 }
 0x3fa   : > { %14069 = vmatprep.mubr.msk.bf16.mxu1 %vm995_vm2, %v14849_v7  ;;  %v8624_v7 = vrot.slane %v8561_v21, 5  ;;  %v8854_v21 = vld [vmem:[%s15634_s17 + $0x18] sm:$0x3] }
 0x3fb   : > { %13632 = vmatmul.mubr.msk.bf16.gmra.mrb[16].mxu0 %vm995_vm2, %v11383_v44  ;;  %v8609_v44 = vrot.slane %v8607_v55, 4  ;;  %v8905_v31 = vrot.slane %v8854_v21, 6  ;;  %v8861_v21 = vld [vmem:[%s15634_s17 + $0x64] sm:$0xc] }
 0x3fc   : > { %13635 = vmatprep.mubr.msk.bf16.mxu0 %vm995_vm2, %v11384_v43  ;;  %13648 = vmatpush3.bf16.msra.mxu0 %v14841_v50  ;;  %v8610_v43 = vrot.slane %v8555_v6, 5  ;;  %v8621_v50 = vrot.slane %v8560_v48, 5  ;;  %v8570_v6 = vld [vmem:[%s15634_s17 + $0xb8] sm:$0x1] }
 0x3fd   : > { %13649 = vmatprep.subr.bf16.mxu0 %v14842_v9 }
 0x3fe   : > { %v8611_v35 = vsel %vm15636_vm6, %v8609_v44, %v8610_v43  ;;  %v8623_v36 = vrot.slane %v8621_v50, 4  ;;  %v8645_v43 = vrot.slane %v8570_v6, 5  ;;  %v8860_v6 = vld [vmem:[%s15634_s17 + $0x50] sm:$0x3] }
 0x400   : > { %13650 = vmatpush3.bf16.msra.mxu0 %v14842_v9  ;;  %v8615_v9 = vsel %vm15636_vm6, %v12286_v2, %v8614_v34  ;;  %v8625_v37 = vsel %vm15636_vm6, %v8623_v36, %v8624_v7  ;;  %v8572_v2 = vld [vmem:[%s15634_s17 + $0xd0] sm:$0xf] }
 0x401   : > { %13651 = vmatprep.subr.bf16.mxu0 %v14843_v60  ;;  %14070 = vmatmul.mubr.msk.bf16.gmra.mrb[24].mxu1 %vm995_vm2, %v14850_v5  ;;  %v9023_v5 = vsel %vm1737_vm0, %v12317_v46, 0  ;;  %v8629_v46 = vsel %vm15636_vm6, %v12288_v39, %v8628_v28  ;;  %v8649_v51 = vrot.slane %v8572_v2, 5 }
 0x402   : > { %14073 = vmatprep.mubr.msk.bf16.mxu1 %vm995_vm2, %v14851_v22  ;;  %v8569_v22 = vld [vmem:[%s15634_s17 + $0xb4] sm:$0xf]  ;;  %v12297_v24 = vcombine.low %v8629_v46, %v8632_v54  ;;  %v8855_v46 = vld [vmem:[%s15634_s17 + $0x2c] sm:$0xc] }
 0x403   : > { %13636 = vmatmul.mubr.msk.bf16.gmra.mrb[20].mxu0 %vm995_vm2, %v11385_v1  ;;  %v8608_v1 = vsel %vm15636_vm6, %v12285_v41, %v8607_v55  ;;  %v8565_v55 = vld [vmem:[%s15634_s17 + $0x94] sm:$0xe]  ;;  %v8642_v56 = vrot.slane %v8569_v22, 5  ;;  %v12290_v41 = vrot.slane %v8568_v57, 9  ;;  %v8916_v57 = vrot.slane %v8859_v42, 6 }
 0x404   : > { %13652 = vmatpush3.bf16.msra.mxu0 %v14843_v60  ;;  %v8618_v60 = vsel %vm15636_vm6, %v8616_v3, %v8617_v10  ;;  %v12294_v63 = vcombine.low %v8608_v1, %v8611_v35  ;;  %v12289_v58 = vrot.slane %v8565_v55, 9  ;;  %v8853_v3 = vld [vmem:[%s15634_s17 + $0x14] sm:$0xf]  ;;  %v8866_v42 = vld [vmem:[%s15634_s17 + $0x88] sm:$0x3] }
 0x405   : > { %13653 = vmatprep.subr.bf16.mxu0 %v14844_v53  ;;  %v12295_v11 = vcombine.low %v8615_v9, %v8618_v60  ;;  %v8644_v44 = vrot.slane %v8642_v56, 4  ;;  %v8643_v1 = vsel %vm15636_vm6, %v12290_v41, %v8642_v56  ;;  %v8573_v9 = vld [vmem:[%s15634_s17 + $0xd4] sm:$0x1]  ;;  %v8902_v60 = vrot.slane %v8853_v3, 6  ;;  %v8858_v56 = vld [vmem:[%s15634_s17 + $0x48] sm:$0xc] }
 0x406   : > { %v8636_v10 = vsel %vm15636_vm6, %v12289_v58, %v8635_v38  ;;  %v8857_v54 = vld [vmem:[%s15634_s17 + $0x34] sm:$0x3]  ;;  %v12310_v58 = vrot.slane %v8855_v46, 10  ;;  %v16568_v3 = vld [vmem:[%s18107_s5] ss:$0 sm:$0xff] }
 0x407   : > { %v8646_v35 = vsel %vm15636_vm6, %v8644_v44, %v8645_v43  ;;  %v8904_v39 = vrot.slane %v8902_v60, 4  ;;  %v12311_v44 = vrot.slane %v8858_v56, 10  ;;  %v8862_v43 = vld [vmem:[%s15634_s17 + $0x68] sm:$0xf] }
 0x408   : > { %13654 = vmatpush3.bf16.msra.mxu0 %v14844_v53  ;;  %v8559_v53 = vld [vmem:[%s15634_s17 + $0x5c] sm:$0xe]  ;;  %v12299_v29 = vcombine.low %v8643_v1, %v8646_v35  ;;  %v8865_v35 = vld [vmem:[%s15634_s17 + $0x84] sm:$0xf] }
 0x409   : > { %14702 = vmatprep.subr.msk.bf16.mxu0 %vm1737_vm0, %v16407_v12  ;;  %14074 = vmatmul.mubr.msk.bf16.gmra.mrb[28].mxu1 %vm995_vm2, %v14852_v33  ;;  %v12287_v32 = vrot.slane %v8559_v53, 9  ;;  %v8637_v33 = vrot.slane %v8635_v38, 4  ;;  %v8852_v53 = vld [vmem:[%s15634_s17 + $0x10] sm:$0xc] }
 0x40a   : > { %14079 = vmatprep.mubr.msk.bf16.mxu1 %vm995_vm2, %v12293_v0  ;;  %v8638_v0 = vrot.slane %v8567_v30, 5  ;;  %v12309_v7 = vrot.slane %v8852_v53, 10  ;;  %v8906_v30 = vsel %vm15868_vm8, %v8904_v39, %v8905_v31 }
 0x40b   : > { %v8622_v52 = vsel %vm15636_vm6, %v12287_v32, %v8621_v50  ;;  %v8571_v50 = vld [vmem:[%s15634_s17 + $0xcc] sm:$0xe]  ;;  %v8856_v32 = vld [vmem:[%s15634_s17 + $0x30] sm:$0xf] }
 0x40c   : > { %v12296_v34 = vcombine.low %v8622_v52, %v8625_v37  ;;  %v8639_v48 = vsel %vm15636_vm6, %v8637_v33, %v8638_v0  ;;  %v12291_v61 = vrot.slane %v8571_v50, 9  ;;  %v8909_v22 = vrot.slane %v8856_v32, 6  ;;  %v8863_v32 = vld [vmem:[%s15634_s17 + $0x6c] sm:$0x3] }
 0x40d   : > { %v12298_v28 = vcombine.low %v8636_v10, %v8639_v48  ;;  %v8903_v55 = vsel %vm15868_vm8, %v12309_v7, %v8902_v60  ;;  %v8912_v0 = vrot.slane %v8857_v54, 6  ;;  %v8918_v10 = vrot.slane %v8916_v57, 4  ;;  %v8864_v7 = vld [vmem:[%s15634_s17 + $0x80] sm:$0xc] }
 0x40e   : > { %v8650_v37 = vsel %vm15636_vm6, %v12291_v61, %v8649_v51  ;;  %v8911_v33 = vrot.slane %v8909_v22, 4  ;;  %v12318_v41 = vcombine.low %v8903_v55, %v8906_v30  ;;  %v8919_v48 = vrot.slane %v8860_v6, 6 }
 0x40f   : > { %v8910_v60 = vsel %vm15868_vm8, %v12310_v58, %v8909_v22  ;;  %v8926_v54 = vrot.slane %v8863_v32, 6  ;;  %v12313_v55 = vrot.slane %v8864_v7, 10  ;;  %v8933_v6 = vrot.slane %v8866_v42, 6  ;;  %v16626_v32 = vld [vmem:[%s18105_s3 + $0x40] sm:$0xff]  }
 0x410   : > { %v8913_v53 = vsel %vm15868_vm8, %v8911_v33, %v8912_v0 }
 0x411   : > { %14080 = vmatmul.mubr.msk.bf16.vlgmr.msra.gmra.mrb[16].mxu1 %vm995_vm2, %v12294_v63  ;;  %v8651_v63 = vrot.slane %v8649_v51, 4 }
 0x412   : > { %14083 = vmatprep.mubr.msk.bf16.mxu1 %vm995_vm2, %v12295_v11  ;;  %14096 = vmatpush3.bf16.msra.mxu1 %v9023_v5  ;;  %v8652_v11 = vrot.slane %v8573_v9, 5 }
 0x413   : > { %14723 = vmatprep.subr.msk.bf16.mxu1 %vm1737_vm0, %v16507_v49 }
 0x414   : > { %v8653_v38 = vsel %vm15636_vm6, %v8651_v63, %v8652_v11  ;;  %v8917_v11 = vsel %vm15868_vm8, %v12311_v44, %v8916_v57  ;;  %v9253_v44 = vsel %vm1737_vm0, %v16507_v49, 0 }
 0x419   : > { %14084 = vmatmul.mubr.msk.bf16.gmra.mrb[20].mxu1 %vm995_vm2, %v12296_v34  ;;  %v16562_v34 = vld [vmem:[%s18106_s4] ss:$0 sm:$0xff] }
 0x41a   : > { %14087 = vmatprep.mubr.msk.bf16.mxu1 %vm995_vm2, %v12297_v24  ;;  %v12300_v24 = vcombine.low %v8650_v37, %v8653_v38  ;;  %v12312_v37 = vrot.slane %v8861_v21, 10 }
 0x421   : > { %14088 = vmatmul.mubr.msk.bf16.gmra.mrb[24].mxu1 %vm995_vm2, %v12298_v28  ;;  %v8923_v28 = vrot.slane %v8862_v43, 6 }
 0x422   : > { %14091 = vmatprep.mubr.msk.bf16.mxu1 %vm995_vm2, %v12299_v29 }
 0x423   : > { %v8925_v46 = vrot.slane %v8923_v28, 4 }
 0x425   : > { %v8927_v49 = vsel %vm15868_vm8, %v8925_v46, %v8926_v54 }
 0x429   : > { %14092 = vmatmul.mubr.msk.bf16.gmra.mrb[28].mxu1 %vm995_vm2, %v12300_v24  ;;  %v16594_v24 = vld [vmem:[%s15634_s17 + $0xa0] sm:$0xf] }
 0x42a   : > { %14097 = vmatprep.mubr.msk.bf16.mxu1 %vm995_vm2, %v12318_v41 }
 0x441   : > { %v16411_v8 = vpop.f32.mrb[0].mxu1 }
 0x442   : > { %v16413_v16 = vpop.f32.mrb[1].mxu1 }
 0x443   : > { %v16415_v59 = vpop.f32.mrb[2].mxu1 }
 0x444   : > { %v16417_v4 = vpop.f32.mrb[3].mxu1 }
 0x449   : > { %v16419_v13 = vpop.f32.mrb[4].mxu1 }
 0x44a   : > { %v16421_v14 = vpop.f32.mrb[5].mxu1 }
 0x44b   : > { %v16423_v45 = vpop.f32.mrb[6].mxu1 }
 0x44c   : > { %v16425_v20 = vpop.f32.mrb[7].mxu1 }
 0x451   : > { %v16427_v17 = vpop.f32.mrb[8].mxu1 }
 0x452   : > { %v16429_v23 = vpop.f32.mrb[9].mxu1 }
 0x453   : > { %v16431_v18 = vpop.f32.mrb[10].mxu1 }
 0x454   : > { %v16433_v25 = vpop.f32.mrb[11].mxu1 }
 0x459   : > { %v16435_v15 = vpop.f32.mrb[12].mxu1 }
 0x45a   : > { %v16437_v26 = vpop.f32.mrb[13].mxu1 }
 0x45b   : > { %v16439_v19 = vpop.f32.mrb[14].mxu1 }
 0x45c   : > { %v16441_v27 = vpop.f32.mrb[15].mxu1 }
 0x4b6   : > { %v16542_v36 = vpop.f32.mrb[4].mxu0 }
 0x4b7   : > { %v13619_v40 = vpop.f32.mrb[5].mxu0 }
 0x4b8   : > { %v1888_v5 = vpop.f32.mrb[6].mxu0  ;;  %v8920_v40 = vsel %vm15868_vm8, %v8918_v10, %v8919_v48  ;;  %v8924_v48 = vsel %vm15868_vm8, %v12312_v37, %v8923_v28 }
 0x4b9   : > { %v13620_v52 = vpop.f32.mrb[7].mxu0  ;;  %v8930_v5 = vrot.slane %v8865_v35, 6  ;;  %v12320_v57 = vcombine.low %v8917_v11, %v8920_v40  ;;  %v8869_v11 = vld [vmem:[%s15634_s17 + $0xa4] sm:$0x3]  ;;  %v12321_v37 = vcombine.low %v8924_v48, %v8927_v49 }
 0x4ba   : > { %v12319_v52 = vcombine.low %v8910_v60, %v8913_v53  ;;  %v8867_v60 = vld [vmem:[%s15634_s17 + $0x9c] sm:$0xc]  ;;  %v8937_v53 = vrot.slane %v16594_v24, 6  ;;  %v8940_v46 = vrot.slane %v8869_v11, 6 }
 0x4bb   : > { %v8932_v41 = vrot.slane %v8930_v5, 4 }
 0x4bc   : > { %14098 = vmatmul.mubr.msk.bf16.vlgmr.msra.gmra.mrb[16].mxu1 %vm995_vm2, %v12319_v52 }
 0x4bd   : > { %14101 = vmatprep.mubr.msk.bf16.mxu1 %vm995_vm2, %v12320_v57  ;;  %14114 = vmatpush3.bf16.msra.mxu1 %v9253_v44  ;;  %v8874_v57 = vld [vmem:[%s15634_s17 + $0xd8] sm:$0xf] }
 0x4be   : > { %v13625_v2 = vpop.f32.mrb[8].mxu0 }
 0x4bf   : > { %v2178_v51 = vmul.f32 %v13625_v2, %v16562_v34  ;;  %v2108_v1 = vpop.f32.mrb[9].mxu0 }
 0x4c0   : > { %v2176_v50 = vmul.f32 %v16562_v34, %v2108_v1  ;;  %v13626_v9 = vpop.f32.mrb[10].mxu0  ;;  %v16607_v1 = vld [vmem:[%s18104_s2 + $0x2c] sm:$0x3] }
 0x4c1   : > { %v2199_v29 = vadd.f32 %v16568_v3, %v2178_v51  ;;  %v2179_v61 = vmul.f32 %v13626_v9, %v16562_v34  ;;  %v2111_v63 = vpop.f32.mrb[11].mxu0  ;;  %v16602_v51 = vld [vmem:[%s15634_s17 + $0xbc] sm:$0xf]  ;;  %14724 = vmatprep.subr.msk.bf16.mxu1 %vm1737_vm0, %v16607_v1 }
 0x4c2   : > { %v2197_v39 = vadd.f32 %v16568_v3, %v2176_v50  ;;  %v2177_v31 = vmul.f32 %v16562_v34, %v2111_v63  ;;  %v8931_v63 = vsel %vm15868_vm8, %v12313_v55, %v8930_v5  ;;  %v8944_v40 = vrot.slane %v16602_v51, 6  ;;  %v11407_v51 = vld [vmem:[%s15634_s17 + $0x158] sm:$0xf] }
 0x4c3   : > { %v2200_v22 = vadd.f32 %v16568_v3, %v2179_v61  ;;  %v2215_v30 = vmax.f32 %v2199_v29, 0.0  ;;  %v2639_v61 = vsel %vm1737_vm0, %v16407_v12, 0  ;;  %v8934_v12 = vsel %vm15868_vm8, %v8932_v41, %v8933_v6 }
 0x4c4   : > { %v2198_v38 = vadd.f32 %v16568_v3, %v2177_v31  ;;  %v2213_v58 = vmax.f32 %v2197_v39, 0.0  ;;  %v8870_v31 = vld [vmem:[%s15634_s17 + $0xb8] sm:$0xc]  ;;  %v12314_v5 = vrot.slane %v8867_v60, 10  ;;  %14102 = vmatmul.mubr.msk.bf16.gmra.mrb[20].mxu1 %vm995_vm2, %v12321_v37 }
 0x4c5   : > { %v2216_v56 = vmax.f32 %v2200_v22, 0.0  ;;  %v8872_v22 = vld [vmem:[%s15634_s17 + $0xc0] sm:$0x3] }
 0x4c6   : > { %v2214_v33 = vmax.f32 %v2198_v38, 0.0  ;;  %v13629_v0 = vpop.f32.mrb[12].mxu0  ;;  %v8939_v38 = vrot.slane %v8937_v53, 4  ;;  %v8938_v60 = vsel %vm15868_vm8, %v12314_v5, %v8937_v53  ;;  %v2519_v53 = vrot.slane %v11407_v51, 6 }
 0x4c7   : > { %v2230_v43 = vpack.c.bf16 %v2216_v56, %v2215_v30  ;;  %v2182_v2 = vmul.f32 %v13629_v0, %v16562_v34  ;;  %v2124_v10 = vpop.f32.mrb[13].mxu0  ;;  %v12322_v30 = vcombine.low %v8931_v63, %v8934_v12  ;;  %v12315_v56 = vrot.slane %v8870_v31, 10  ;;  %v11406_v31 = vld [vmem:[%s15634_s17 + $0x154] sm:$0xc] }
 0x4c8   : > { %v2180_v35 = vmul.f32 %v16562_v34, %v2124_v10  ;;  %v13630_v50 = vpop.f32.mrb[14].mxu0  ;;  %v2229_v9 = vpack.c.bf16 %v2214_v33, %v2213_v58  ;;  %v8946_v33 = vrot.slane %v8944_v40, 4  ;;  %v8947_v0 = vrot.slane %v8872_v22, 6 }
 0x4c9   : > { %v2203_v21 = vadd.f32 %v16568_v3, %v2182_v2  ;;  %v2183_v28 = vmul.f32 %v13630_v50, %v16562_v34  ;;  %v2127_v29 = vpop.f32.mrb[15].mxu0  ;;  %14105 = vmatprep.mubr.msk.bf16.mxu1 %vm995_vm2, %v12322_v30  ;;  %v8945_v63 = vsel %vm15868_vm8, %v12315_v56, %v8944_v40 }
 0x4ca   : > { %v2201_v7 = vadd.f32 %v16568_v3, %v2180_v35  ;;  %v2181_v39 = vmul.f32 %v16562_v34, %v2127_v29  ;;  %13655 = vmatprep.mubr.bf16.mxu0 %v2229_v9  ;;  %v8951_v35 = vrot.slane %v8874_v57, 6  ;;  %v8948_v11 = vsel %vm15868_vm8, %v8946_v33, %v8947_v0 }
 0x4cb   : > { %v2204_v42 = vadd.f32 %v16568_v3, %v2183_v28  ;;  %13656 = vmatmul.mubr.bf16.vlgmr.msra.gmra.mrb[24].mxu0 %v2230_v43  ;;  %v2219_v54 = vmax.f32 %v2203_v21, 0.0  ;;  %v8941_v21 = vsel %vm15868_vm8, %v8939_v38, %v8940_v46  ;;  %v8873_v28 = vld [vmem:[%s15634_s17 + $0xd4] sm:$0xc]  ;;  %v11408_v38 = vld [vmem:[%s15634_s17 + $0x15c] sm:$0x3]  ;;  %v12324_v46 = vcombine.low %v8945_v63, %v8948_v11 }
 0x4cc   : > { %v2202_v52 = vadd.f32 %v16568_v3, %v2181_v39  ;;  %13672 = vmatpush3.bf16.msra.mxu0 %v2639_v61  ;;  %v2217_v6 = vmax.f32 %v2201_v7, 0.0  ;;  %v8875_v7 = vld [vmem:[%s15634_s17 + $0xdc] sm:$0x3]  ;;  %v12316_v5 = vrot.slane %v8873_v28, 10  ;;  %v8953_v22 = vrot.slane %v8951_v35, 4 }
 0x4cd   : > { %v2220_v55 = vmax.f32 %v2204_v42, 0.0  ;;  %13833 = vmatprep.subr.bf16.mxu0 %v16626_v32  ;;  %v12323_v42 = vcombine.low %v8938_v60, %v8941_v21  ;;  %v11413_v60 = vld [vmem:[%s15634_s17 + $0x190] sm:$0xf] }
 0x4ce   : > { %v2218_v24 = vmax.f32 %v2202_v52, 0.0  ;;  %v13633_v58 = vpop.f32.mrb[16].mxu0  ;;  %v8952_v51 = vsel %vm15868_vm8, %v12316_v5, %v8951_v35 }
 0x4cf   : > { %v2186_v41 = vmul.f32 %v13633_v58, %v16562_v34  ;;  %v2140_v44 = vpop.f32.mrb[17].mxu0  ;;  %v2232_v43 = vpack.c.bf16 %v2220_v55, %v2219_v54  ;;  %v8954_v54 = vrot.slane %v8875_v7, 6  ;;  %14106 = vmatmul.mubr.msk.bf16.gmra.mrb[24].mxu1 %vm995_vm2, %v12323_v42 }
 0x4d0   : > { %v2184_v2 = vmul.f32 %v16562_v34, %v2140_v44  ;;  %v13634_v10 = vpop.f32.mrb[18].mxu0  ;;  %v2231_v48 = vpack.c.bf16 %v2218_v24, %v2217_v6  ;;  %v11430_v24 = vrot.slane %v11406_v31, 10  ;;  %v2522_v44 = vrot.slane %v11408_v38, 6  ;;  %14109 = vmatprep.mubr.msk.bf16.mxu1 %vm995_vm2, %v12324_v46  ;;  %v14853_v31 = vld [vmem:[%s15634_s17 + $0x1f8] sm:$0xff]  }
 0x4d1   : > { %v2207_v50 = vadd.f32 %v16568_v3, %v2186_v41  ;;  %v2187_v9 = vmul.f32 %v13634_v10, %v16562_v34  ;;  %v2143_v49 = vpop.f32.mrb[19].mxu0  ;;  %v2521_v41 = vrot.slane %v2519_v53, 4 }
 0x4d2   : > { %v2205_v29 = vadd.f32 %v16568_v3, %v2184_v2  ;;  %v2185_v61 = vmul.f32 %v16562_v34, %v2143_v49  ;;  %13659 = vmatprep.mubr.bf16.mxu0 %v2231_v48  ;;  %v11410_v48 = vld [vmem:[%s15634_s17 + $0x174] sm:$0xf]  ;;  %v2520_v35 = vsel %vm15868_vm8, %v11430_v24, %v2519_v53 }
 0x4d3   : > { %v2208_v39 = vadd.f32 %v16568_v3, %v2187_v9  ;;  %13660 = vmatmul.mubr.bf16.gmra.mrb[28].mxu0 %v2232_v43  ;;  %v2223_v52 = vmax.f32 %v2207_v50, 0.0  ;;  %v8955_v50 = vsel %vm15868_vm8, %v8953_v22, %v8954_v54  ;;  %v11412_v22 = vld [vmem:[%s15634_s17 + $0x18c] sm:$0xc] }
 0x4d4   : > { %v2206_v12 = vadd.f32 %v16568_v3, %v2185_v61  ;;  %v2221_v40 = vmax.f32 %v2205_v29, 0.0  ;;  %v11409_v29 = vld [vmem:[%s15634_s17 + $0x170] sm:$0xc]  ;;  %v2526_v61 = vrot.slane %v11410_v48, 6  ;;  %v12325_v63 = vcombine.low %v8952_v51, %v8955_v50  ;;  %v11418_v48 = vld [vmem:[%s15634_s17 + $0x1c4] sm:$0xc] }
 0x4d5   : > { %v2224_v37 = vmax.f32 %v2208_v39, 0.0  ;;  %v11411_v39 = vld [vmem:[%s15634_s17 + $0x178] sm:$0x3]  ;;  %v11420_v51 = vld [vmem:[%s15634_s17 + $0x1cc] sm:$0x3]  ;;  %v9555_v50 = vsel %vm1737_vm0, %v16607_v1, 0 }
 0x4d6   : > { %v2222_v55 = vmax.f32 %v2206_v12, 0.0  ;;  %v13637_v30 = vpop.f32.mrb[20].mxu0  ;;  %v2533_v12 = vrot.slane %v11413_v60, 6  ;;  %v2528_v46 = vrot.slane %v2526_v61, 4  ;;  %v2529_v54 = vrot.slane %v11411_v39, 6  ;;  %v14862_v1 = vld [vmem:[%s18105_s3 + $0x48] sm:$0xff]  }
 0x4d7   : > { %v2190_v56 = vmul.f32 %v13637_v30, %v16562_v34  ;;  %v2156_v57 = vpop.f32.mrb[21].mxu0  ;;  %v2234_v6 = vpack.c.bf16 %v2224_v37, %v2223_v52  ;;  %v11431_v37 = vrot.slane %v11409_v29, 10  ;;  %14110 = vmatmul.mubr.msk.bf16.gmra.mrb[28].mxu1 %vm995_vm2, %v12325_v63  ;;  %v11434_v29 = vrot.slane %v11418_v48, 10 }
 0x4d8   : > { %v2188_v58 = vmul.f32 %v16562_v34, %v2156_v57  ;;  %v13638_v33 = vpop.f32.mrb[22].mxu0  ;;  %v2233_v0 = vpack.c.bf16 %v2222_v55, %v2221_v40  ;;  %v11432_v40 = vrot.slane %v11412_v22, 10  ;;  %v2535_v55 = vrot.slane %v2533_v12, 4  ;;  %14115 = vmatprep.mubr.msk.bf16.mxu1 %vm995_vm2, %v14853_v31  ;;  %v11419_v57 = vld [vmem:[%s15634_s17 + $0x1c8] sm:$0xf] }
 0x4d9   : > { %v2211_v43 = vadd.f32 %v16568_v3, %v2190_v56  ;;  %v2191_v2 = vmul.f32 %v13638_v33, %v16562_v34  ;;  %v2159_v10 = vpop.f32.mrb[23].mxu0  ;;  %v11416_v56 = vld [vmem:[%s15634_s17 + $0x1ac] sm:$0xf]  ;;  %v2530_v24 = vsel %vm15868_vm8, %v2528_v46, %v2529_v54  ;;  %v14854_v33 = vld [vmem:[%s15634_s17 + $0x214] sm:$0xff]   ;;  %v2550_v63 = vrot.slane %v11420_v51, 6  ;;  %v14858_v51 = vld [vmem:[%s15634_s17 + $0x284] sm:$0xff]  }
 0x4da   : > { %v2209_v9 = vadd.f32 %v16568_v3, %v2188_v58  ;;  %v2189_v49 = vmul.f32 %v16562_v34, %v2159_v10  ;;  %13663 = vmatprep.mubr.bf16.mxu0 %v2233_v0  ;;  %v2523_v34 = vsel %vm15868_vm8, %v2521_v41, %v2522_v44  ;;  %v2540_v58 = vrot.slane %v11416_v56, 6  ;;  %v11415_v44 = vld [vmem:[%s15634_s17 + $0x1a8] sm:$0xc]  ;;  %v14855_v10 = vld [vmem:[%s15634_s17 + $0x230] sm:$0xff]   ;;  %v11426_v46 = vld [vmem:[%s15634_s17 + $0x204] sm:$0x3] }
 0x4db   : > { %v2212_v21 = vadd.f32 %v16568_v3, %v2191_v2  ;;  %13664 = vmatmul.mubr.bf16.gmra.mrb[32].mxu0 %v2234_v6  ;;  %v2227_v11 = vmax.f32 %v2211_v43, 0.0  ;;  %v11438_v38 = vcombine.low %v2520_v35, %v2523_v34  ;;  %v2527_v6 = vsel %vm15868_vm8, %v11431_v37, %v2526_v61  ;;  %v11417_v43 = vld [vmem:[%s15634_s17 + $0x1b0] sm:$0x3]  ;;  %v14857_v37 = vld [vmem:[%s15634_s17 + $0x268] sm:$0xff]  }
 0x4dc   : > { %v2210_v28 = vadd.f32 %v16568_v3, %v2189_v49  ;;  %v2225_v42 = vmax.f32 %v2209_v9, 0.0  ;;  %v11414_v3 = vld [vmem:[%s15634_s17 + $0x194] sm:$0x3]  ;;  %v2534_v0 = vsel %vm15868_vm8, %v11432_v40, %v2533_v12  ;;  %v2547_v2 = vrot.slane %v11419_v57, 6  ;;  %v16713_v49 = vld [vmem:[%s18104_s2 + $0x2e] sm:$0x3] }
 0x4dd   : > { %v2228_v7 = vmax.f32 %v2212_v21, 0.0  ;;  %v2536_v30 = vrot.slane %v11414_v3, 6  ;;  %v11439_v9 = vcombine.low %v2527_v6, %v2530_v24  ;;  %v11433_v21 = vrot.slane %v11415_v44, 10  ;;  %v11421_v12 = vld [vmem:[%s15634_s17 + $0x1e0] sm:$0xc] }
 0x4de   : > { %v2226_v5 = vmax.f32 %v2210_v28, 0.0  ;;  %v2542_v28 = vrot.slane %v2540_v58, 4  ;;  %v2543_v35 = vrot.slane %v11417_v43, 6  ;;  %v2549_v61 = vrot.slane %v2547_v2, 4  ;;  %v11423_v3 = vld [vmem:[%s15634_s17 + $0x1e8] sm:$0x3] }
 0x4df   : > { %v2236_v52 = vpack.c.bf16 %v2228_v7, %v2227_v11  ;;  %v2537_v41 = vsel %vm15868_vm8, %v2535_v55, %v2536_v30  ;;  %14116 = vmatmul.mubr.msk.bf16.vlgmr.msra.gmra.mrb[16].mxu1 %vm995_vm2, %v14854_v33  ;;  %v11422_v11 = vld [vmem:[%s15634_s17 + $0x1e4] sm:$0xf]  ;;  %v11425_v7 = vld [vmem:[%s15634_s17 + $0x200] sm:$0xf]  ;;  %v2541_v34 = vsel %vm15868_vm8, %v11433_v21, %v2540_v58  ;;  %v11435_v55 = vrot.slane %v11421_v12, 10  ;;  %v14864_v33 = vld [vmem:[%s18105_s3 + $0x58] sm:$0xff]  }
 0x4e0   : > { %v2235_v53 = vpack.c.bf16 %v2226_v5, %v2225_v42  ;;  %v11440_v60 = vcombine.low %v2534_v0, %v2537_v41  ;;  %14119 = vmatprep.mubr.msk.bf16.mxu1 %vm995_vm2, %v14855_v10  ;;  %14132 = vmatpush3.bf16.msra.mxu1 %v9555_v50  ;;  %v2544_v39 = vsel %vm15868_vm8, %v2542_v28, %v2543_v35  ;;  %v2554_v31 = vrot.slane %v11422_v11, 6  ;;  %v14856_v42 = vld [vmem:[%s15634_s17 + $0x24c] sm:$0xff]   ;;  %v12368_v40 = vld [vmem:[%s15634_s17 + $0x204] sm:$0xf]  ;;  %v11428_v58 = vld [vmem:[%s15634_s17 + $0x21c] sm:$0xf] }
 0x4e1   : > { %14725 = vmatprep.subr.msk.bf16.mxu1 %vm1737_vm0, %v16713_v49  ;;  %v2548_v5 = vsel %vm15868_vm8, %v11434_v29, %v2547_v2  ;;  %v2551_v22 = vsel %vm15868_vm8, %v2549_v61, %v2550_v63  ;;  %v11441_v54 = vcombine.low %v2541_v34, %v2544_v39  ;;  %v2557_v56 = vrot.slane %v11423_v3, 6  ;;  %v12367_v41 = vld [vmem:[%s15634_s17 + $0x200] sm:$0xe]  ;;  %v12369_v44 = vld [vmem:[%s15634_s17 + $0x208] sm:$0x1] }
 0x4e2   : > { %13667 = vmatprep.mubr.bf16.mxu0 %v2235_v53  ;;  %v14863_v53 = vld [vmem:[%s18105_s3 + $0x50] sm:$0xff]   ;;  %v2556_v30 = vrot.slane %v2554_v31, 4  ;;  %v2564_v24 = vrot.slane %v11426_v46, 6  ;;  %v9434_v0 = vrot.slane %v12368_v40, 5  ;;  %v2555_v43 = vsel %vm15868_vm8, %v11435_v55, %v2554_v31  ;;  %v11427_v10 = vld [vmem:[%s15634_s17 + $0x218] sm:$0xc] }
 0x4e3   : > { %13668 = vmatmul.mubr.bf16.gmra.mrb[36].mxu0 %v2236_v52  ;;  %v2561_v52 = vrot.slane %v11425_v7, 6  ;;  %v2568_v48 = vrot.slane %v11428_v58, 6  ;;  %v14859_v21 = vld [vmem:[%s15634_s17 + $0x2a0] sm:$0xff]   ;;  %v12391_v35 = vrot.slane %v12367_v41, 9  ;;  %v9437_v61 = vrot.slane %v12369_v44, 5 }
 0x4e4   : > { %13673 = vmatprep.mubr.msk.bf16.mxu0 %vm995_vm2, %v11438_v38  ;;  %v11424_v38 = vld [vmem:[%s15634_s17 + $0x1fc] sm:$0xc]  ;;  %v2558_v2 = vsel %vm15868_vm8, %v2556_v30, %v2557_v56  ;;  %v14865_v28 = vld [vmem:[%s18105_s3 + $0x60] sm:$0xff]   ;;  %v9436_v29 = vrot.slane %v9434_v0, 4  ;;  %v11437_v34 = vrot.slane %v11427_v10, 10 }
 0x4e5   : > { %v11436_v57 = vrot.slane %v11424_v38, 10  ;;  %v2563_v6 = vrot.slane %v2561_v52, 4  ;;  %v12371_v63 = vld [vmem:[%s15634_s17 + $0x220] sm:$0xf]  ;;  %v11443_v11 = vcombine.low %v2555_v43, %v2558_v2  ;;  %v2570_v39 = vrot.slane %v2568_v48, 4 }
 0x4e6   : > { %v9441_v31 = vrot.slane %v12371_v63, 5  ;;  %v12372_v3 = vld [vmem:[%s15634_s17 + $0x224] sm:$0x1]  ;;  %v2569_v38 = vsel %vm15868_vm8, %v11437_v34, %v2568_v48  ;;  %v12376_v10 = vld [vmem:[%s15634_s17 + $0x254] sm:$0xe] }
 0x4e7   : > { %14120 = vmatmul.mubr.msk.bf16.gmra.mrb[20].mxu1 %vm995_vm2, %v14856_v42  ;;  %v2562_v50 = vsel %vm15868_vm8, %v11436_v57, %v2561_v52  ;;  %v9435_v42 = vsel %vm15636_vm6, %v12391_v35, %v9434_v0  ;;  %v9444_v30 = vrot.slane %v12372_v3, 5  ;;  %v12378_v48 = vld [vmem:[%s15634_s17 + $0x25c] sm:$0x1]  ;;  %v12386_v34 = vld [vmem:[%s15634_s17 + $0x2ac] sm:$0xf] }
 0x4e8   : > { %14123 = vmatprep.mubr.msk.bf16.mxu1 %vm995_vm2, %v14857_v37  ;;  %v12373_v37 = vld [vmem:[%s15634_s17 + $0x238] sm:$0xe]  ;;  %v9443_v55 = vrot.slane %v9441_v31, 4  ;;  %v9476_v3 = vrot.slane %v12386_v34, 5 }
 0x4e9   : > { %v12393_v56 = vrot.slane %v12373_v37, 9  ;;  %v12387_v37 = vld [vmem:[%s15634_s17 + $0x2b0] sm:$0x1] }
 0x4ea   : > { %v9445_v41 = vsel %vm15636_vm6, %v9443_v55, %v9444_v30  ;;  %v9478_v55 = vrot.slane %v9476_v3, 4  ;;  %v9479_v30 = vrot.slane %v12387_v37, 5 }
 0x4eb   : > { %13674 = vmatmul.mubr.msk.bf16.vlgmr.msra.gmra.mrb[40].mxu0 %vm995_vm2, %v11439_v9  ;;  %v2565_v9 = vsel %vm15868_vm8, %v2563_v6, %v2564_v24  ;;  %v12377_v24 = vld [vmem:[%s15634_s17 + $0x258] sm:$0xf] }
 0x4ec   : > { %13677 = vmatprep.mubr.msk.bf16.mxu0 %vm995_vm2, %v11440_v60  ;;  %13834 = vmatpush3.bf16.msra.mxu0 %v16626_v32  ;;  %v11442_v32 = vcombine.low %v2548_v5, %v2551_v22  ;;  %v11429_v60 = vld [vmem:[%s15634_s17 + $0x220] sm:$0x3]  ;;  %v11444_v7 = vcombine.low %v2562_v50, %v2565_v9  ;;  %v9438_v5 = vsel %vm15636_vm6, %v9436_v29, %v9437_v61  ;;  %v12370_v22 = vld [vmem:[%s15634_s17 + $0x21c] sm:$0xe]  ;;  %v9455_v44 = vrot.slane %v12377_v24, 5 }
 0x4ed   : > { %13835 = vmatprep.subr.bf16.mxu0 %v14862_v1  ;;  %v2571_v12 = vrot.slane %v11429_v60, 6  ;;  %v12400_v40 = vcombine.low %v9435_v42, %v9438_v5  ;;  %v12379_v50 = vld [vmem:[%s15634_s17 + $0x270] sm:$0xe]  ;;  %v12381_v9 = vld [vmem:[%s15634_s17 + $0x278] sm:$0x1]  ;;  %v9458_v29 = vrot.slane %v12378_v48, 5 }
 0x4ee   : > { %v9457_v35 = vrot.slane %v9455_v44, 4  ;;  %v12395_v61 = vrot.slane %v12379_v50, 9  ;;  %v12382_v5 = vld [vmem:[%s15634_s17 + $0x28c] sm:$0xe] }
 0x4ef   : > { %14124 = vmatmul.mubr.msk.bf16.gmra.mrb[24].mxu1 %vm995_vm2, %v14858_v51  ;;  %v2572_v46 = vsel %vm15868_vm8, %v2570_v39, %v2571_v12 }
 0x4f0   : > { %13836 = vmatpush3.bf16.msra.mxu0 %v14862_v1  ;;  %v12374_v1 = vld [vmem:[%s15634_s17 + $0x23c] sm:$0xf]  ;;  %14127 = vmatprep.mubr.msk.bf16.mxu1 %vm995_vm2, %v14859_v21  ;;  %v11445_v58 = vcombine.low %v2569_v38, %v2572_v46  ;;  %v9459_v12 = vsel %vm15636_vm6, %v9457_v35, %v9458_v29  ;;  %v12396_v46 = vrot.slane %v12382_v5, 9  ;;  %v12420_v29 = vld [vmem:[%s15634_s17 + $0x228] sm:$0xf] }
 0x4f1   : > { %13837 = vmatprep.subr.bf16.mxu0 %v14863_v53  ;;  %v9448_v52 = vrot.slane %v12374_v1, 5  ;;  %v12383_v1 = vld [vmem:[%s15634_s17 + $0x290] sm:$0xf] }
 0x4f3   : > { %13678 = vmatmul.mubr.msk.bf16.gmra.mrb[44].mxu0 %vm995_vm2, %v11441_v54  ;;  %v14860_v54 = vld [vmem:[%s15634_s17 + $0x2bc] sm:$0xff]   ;;  %v9450_v57 = vrot.slane %v9448_v52, 4  ;;  %v9449_v43 = vsel %vm15636_vm6, %v12393_v56, %v9448_v52  ;;  %v12385_v52 = vld [vmem:[%s15634_s17 + $0x2a8] sm:$0xe] }
 0x4f4   : > { %13681 = vmatprep.mubr.msk.bf16.mxu0 %vm995_vm2, %v11442_v32  ;;  %13838 = vmatpush3.bf16.msra.mxu0 %v14863_v53  ;;  %v12375_v53 = vld [vmem:[%s15634_s17 + $0x240] sm:$0x1]  ;;  %v12392_v32 = vrot.slane %v12370_v22, 9  ;;  %v12384_v22 = vld [vmem:[%s15634_s17 + $0x294] sm:$0x1] }
 0x4f5   : > { %13839 = vmatprep.subr.bf16.mxu0 %v14864_v33  ;;  %v9451_v6 = vrot.slane %v12375_v53, 5  ;;  %v12389_v56 = vld [vmem:[%s15634_s17 + $0x2c8] sm:$0xf] }
 0x4f6   : > { %v9442_v0 = vsel %vm15636_vm6, %v12392_v32, %v9441_v31  ;;  %v9469_v31 = vrot.slane %v12383_v1, 5  ;;  %v12397_v32 = vrot.slane %v12385_v52, 9  ;;  %v9743_v1 = vrot.slane %v12420_v29, 6 }
 0x4f7   : > { %14128 = vmatmul.mubr.msk.bf16.gmra.mrb[28].mxu1 %vm995_vm2, %v14860_v54  ;;  %v9452_v2 = vsel %vm15636_vm6, %v9450_v57, %v9451_v6  ;;  %v12401_v60 = vcombine.low %v9442_v0, %v9445_v41  ;;  %v12417_v57 = vld [vmem:[%s15634_s17 + $0x20c] sm:$0xf]  ;;  %v9480_v0 = vsel %vm15636_vm6, %v9478_v55, %v9479_v30  ;;  %v12388_v41 = vld [vmem:[%s15634_s17 + $0x2c4] sm:$0xe] }
 0x4f8   : > { %13840 = vmatpush3.bf16.msra.mxu0 %v14864_v33  ;;  %v12380_v33 = vld [vmem:[%s15634_s17 + $0x274] sm:$0xf]  ;;  %14133 = vmatprep.mubr.msk.bf16.mxu1 %vm995_vm2, %v12400_v40  ;;  %v12402_v21 = vcombine.low %v9449_v43, %v9452_v2  ;;  %v9471_v54 = vrot.slane %v9469_v31, 4  ;;  %v9472_v40 = vrot.slane %v12384_v22, 5  ;;  %v9470_v6 = vsel %vm15636_vm6, %v12396_v46, %v9469_v31  ;;  %v12416_v2 = vld [vmem:[%s15634_s17 + $0x208] sm:$0xc] }
 0x4f9   : > { %13841 = vmatprep.subr.bf16.mxu0 %v14865_v28  ;;  %v9462_v51 = vrot.slane %v12380_v33, 5  ;;  %v9477_v33 = vsel %vm15636_vm6, %v12397_v32, %v9476_v3  ;;  %v9736_v43 = vrot.slane %v12417_v57, 6  ;;  %v12398_v50 = vrot.slane %v12388_v41, 9 }
 0x4fa   : > { %v9473_v24 = vsel %vm15636_vm6, %v9471_v54, %v9472_v40  ;;  %v9745_v52 = vrot.slane %v9743_v1, 4  ;;  %v12426_v54 = vld [vmem:[%s15634_s17 + $0x260] sm:$0xf]  ;;  %v12429_v40 = vld [vmem:[%s15634_s17 + $0x27c] sm:$0xf] }
 0x4fb   : > { %13682 = vmatmul.mubr.msk.bf16.gmra.mrb[48].mxu0 %vm995_vm2, %v11443_v11  ;;  %v9464_v63 = vrot.slane %v9462_v51, 4  ;;  %v9465_v11 = vrot.slane %v12381_v9, 5  ;;  %v9463_v42 = vsel %vm15636_vm6, %v12395_v61, %v9462_v51  ;;  %v12405_v48 = vcombine.low %v9470_v6, %v9473_v24  ;;  %v12423_v61 = vld [vmem:[%s15634_s17 + $0x244] sm:$0xf]  ;;  %v12425_v6 = vld [vmem:[%s15634_s17 + $0x25c] sm:$0xc] }
 0x4fc   : > { %13685 = vmatprep.mubr.msk.bf16.mxu0 %vm995_vm2, %v11444_v7  ;;  %13842 = vmatpush3.bf16.msra.mxu0 %v14865_v28  ;;  %v12394_v28 = vrot.slane %v12376_v10, 9  ;;  %v9857_v7 = vsel %vm1737_vm0, %v16713_v49, 0  ;;  %v12418_v10 = vld [vmem:[%s15634_s17 + $0x210] sm:$0x3]  ;;  %v12406_v51 = vcombine.low %v9477_v33, %v9480_v0  ;;  %v9750_v31 = vrot.slane %v12423_v61, 6 }
 0x4fd   : > { %v9466_v49 = vsel %vm15636_vm6, %v9464_v63, %v9465_v11  ;;  %v9739_v35 = vrot.slane %v12418_v10, 6  ;;  %v9757_v30 = vrot.slane %v12426_v54, 6  ;;  %v12427_v24 = vld [vmem:[%s15634_s17 + $0x264] sm:$0x3]  ;;  %v12428_v33 = vld [vmem:[%s15634_s17 + $0x278] sm:$0xc] }
 0x4fe   : > { %v9456_v39 = vsel %vm15636_vm6, %v12394_v28, %v9455_v44  ;;  %v12404_v38 = vcombine.low %v9463_v42, %v9466_v49  ;;  %v12390_v44 = vld [vmem:[%s15634_s17 + $0x2cc] sm:$0x1]  ;;  %v9738_v28 = vrot.slane %v9736_v43, 4  ;;  %v12422_v42 = vld [vmem:[%s15634_s17 + $0x240] sm:$0xc]  ;;  %v9760_v10 = vrot.slane %v12427_v24, 6 }
 0x4ff   : > { %14134 = vmatmul.mubr.msk.bf16.vlgmr.msra.gmra.mrb[16].mxu1 %vm995_vm2, %v12401_v60  ;;  %v12403_v53 = vcombine.low %v9456_v39, %v9459_v12  ;;  %v9486_v60 = vrot.slane %v12390_v44, 5  ;;  %v12419_v39 = vld [vmem:[%s15634_s17 + $0x224] sm:$0xc]  ;;  %v12421_v12 = vld [vmem:[%s15634_s17 + $0x22c] sm:$0x3] }
 0x500   : > { %14137 = vmatprep.mubr.msk.bf16.mxu1 %vm995_vm2, %v12402_v21  ;;  %14150 = vmatpush3.bf16.msra.mxu1 %v9857_v7  ;;  %v12440_v21 = vrot.slane %v12416_v2, 10  ;;  %v9740_v34 = vsel %vm15868_vm8, %v9738_v28, %v9739_v35  ;;  %v12424_v49 = vld [vmem:[%s15634_s17 + $0x248] sm:$0x3]  ;;  %v12441_v3 = vrot.slane %v12419_v39, 10  ;;  %v9746_v37 = vrot.slane %v12421_v12, 6 }
 0x501   : > { %v9753_v46 = vrot.slane %v12424_v49, 6  ;;  %v12430_v0 = vld [vmem:[%s15634_s17 + $0x280] sm:$0x3]  ;;  %v9759_v2 = vrot.slane %v9757_v30, 4  ;;  %v12431_v61 = vld [vmem:[%s15634_s17 + $0x294] sm:$0xc] }
 0x502   : > { %v9737_v7 = vsel %vm15868_vm8, %v12440_v21, %v9736_v43  ;;  %v9744_v32 = vsel %vm15868_vm8, %v12441_v3, %v9743_v1  ;;  %v9747_v55 = vsel %vm15868_vm8, %v9745_v52, %v9746_v37  ;;  %v12443_v43 = vrot.slane %v12425_v6, 10  ;;  %v12435_v49 = vld [vmem:[%s15634_s17 + $0x2b4] sm:$0xf]  ;;  %v12434_v3 = vld [vmem:[%s15634_s17 + $0x2b0] sm:$0xc]  ;;  %v14866_v6 = vld [vmem:[%s18105_s3 + $0x68] sm:$0xff]  }
 0x503   : > { %13686 = vmatmul.mubr.msk.bf16.gmra.mrb[52].mxu0 %vm995_vm2, %v11445_v58  ;;  %v9483_v58 = vrot.slane %v12389_v56, 5  ;;  %v12449_v22 = vcombine.low %v9737_v7, %v9740_v34  ;;  %v12450_v41 = vcombine.low %v9744_v32, %v9747_v55  ;;  %v9761_v21 = vsel %vm15868_vm8, %v9759_v2, %v9760_v10  ;;  %v12436_v52 = vld [vmem:[%s15634_s17 + $0x2b8] sm:$0x3]  ;;  %v12437_v54 = vld [vmem:[%s15634_s17 + $0x2cc] sm:$0xc]  ;;  %13843 = vmatprep.subr.bf16.mxu0 %v14866_v6  ;;  %v14869_v10 = vld [vmem:[%s15634_s17 + $0x3f0] sm:$0xff]  }
 0x504   : > { %v12445_v7 = vrot.slane %v12431_v61, 10  ;;  %v12447_v32 = vrot.slane %v12437_v54, 10  ;;  %13844 = vmatpush3.bf16.msra.mxu0 %v14866_v6  ;;  %v14868_v2 = vld [vmem:[%s18105_s3 + $0x78] sm:$0xff]   ;;  %v12509_v6 = vld [vmem:[%s15634_s17 + $0x44c] sm:$0xe] }
 0x505   : > { %v9485_v9 = vrot.slane %v9483_v58, 4  ;;  %v9484_v63 = vsel %vm15636_vm6, %v12398_v50, %v9483_v58  ;;  %v9764_v58 = vrot.slane %v12429_v40, 6  ;;  %v9767_v50 = vrot.slane %v12430_v0, 6  ;;  %v12439_v40 = vld [vmem:[%s15634_s17 + $0x2d4] sm:$0x3] }
 0x507   : > { %14138 = vmatmul.mubr.msk.bf16.gmra.mrb[20].mxu1 %vm995_vm2, %v12403_v53  ;;  %v9487_v11 = vsel %vm15636_vm6, %v9485_v9, %v9486_v60  ;;  %v12442_v53 = vrot.slane %v12422_v42, 10  ;;  %v12432_v9 = vld [vmem:[%s15634_s17 + $0x298] sm:$0xf]  ;;  %v9758_v60 = vsel %vm15868_vm8, %v12443_v43, %v9757_v30 }
 0x508   : > { %14141 = vmatprep.mubr.msk.bf16.mxu1 %vm995_vm2, %v12404_v38  ;;  %v12407_v5 = vcombine.low %v9484_v63, %v9487_v11  ;;  %v9752_v38 = vrot.slane %v9750_v31, 4  ;;  %v9771_v28 = vrot.slane %v12432_v9, 6  ;;  %v12433_v63 = vld [vmem:[%s15634_s17 + $0x29c] sm:$0x3]  ;;  %v12452_v11 = vcombine.low %v9758_v60, %v9761_v21  ;;  %v14872_v9 = vld [vmem:[%s15634_s17 + $0x444] sm:$0xff]  }
 0x509   : > { %v9751_v56 = vsel %vm15868_vm8, %v12442_v53, %v9750_v31  ;;  %v9774_v39 = vrot.slane %v12433_v63, 6  ;;  %v12446_v53 = vrot.slane %v12434_v3, 10  ;;  %v14873_v60 = vld [vmem:[%s15634_s17 + $0x460] sm:$0xff]   ;;  %v12504_v63 = vld [vmem:[%s15634_s17 + $0x418] sm:$0xf] }
 0x50a   : > { %v9754_v57 = vsel %vm15868_vm8, %v9752_v38, %v9753_v46  ;;  %v9773_v34 = vrot.slane %v9771_v28, 4  ;;  %v9772_v12 = vsel %vm15868_vm8, %v12445_v7, %v9771_v28  ;;  %v9781_v46 = vrot.slane %v12436_v52, 6  ;;  %v14874_v21 = vld [vmem:[%s15634_s17 + $0x47c] sm:$0xff]  }
 0x50b   : > { %v12451_v44 = vcombine.low %v9751_v56, %v9754_v57  ;;  %v9788_v57 = vrot.slane %v12439_v40, 6  ;;  %v14875_v28 = vld [vmem:[%s15634_s17 + $0x498] sm:$0xff]   ;;  %v10279_v7 = vrot.slane %v12504_v63, 5  ;;  %v12514_v63 = vld [vmem:[%s15634_s17 + $0x470] sm:$0x1] }
 0x50c   : > { %v9775_v31 = vsel %vm15868_vm8, %v9773_v34, %v9774_v39 }
 0x50d   : > { %v12454_v42 = vcombine.low %v9772_v12, %v9775_v31  ;;  %v12503_v31 = vld [vmem:[%s15634_s17 + $0x414] sm:$0xe] }
 0x50f   : > { %14142 = vmatmul.mubr.msk.bf16.gmra.mrb[24].mxu1 %vm995_vm2, %v12405_v48  ;;  %v12444_v48 = vrot.slane %v12428_v33, 10 }
 0x510   : > { %14145 = vmatprep.mubr.msk.bf16.mxu1 %vm995_vm2, %v12406_v51  ;;  %v9766_v51 = vrot.slane %v9764_v58, 4 }
 0x511   : > { %v9765_v35 = vsel %vm15868_vm8, %v12444_v48, %v9764_v58  ;;  %v14870_v48 = vld [vmem:[%s15634_s17 + $0x40c] sm:$0xff]  }
 0x512   : > { %v9768_v29 = vsel %vm15868_vm8, %v9766_v51, %v9767_v50  ;;  %v14871_v51 = vld [vmem:[%s15634_s17 + $0x428] sm:$0xff]   ;;  %v16930_v50 = vld [vmem:[%s18104_s2 + $0x12] sm:$0x3] }
 0x513   : > { %v12453_v1 = vcombine.low %v9765_v35, %v9768_v29  ;;  %v14876_v35 = vld [vmem:[%s15634_s17 + $0x4b4] sm:$0xff]   ;;  %v12501_v29 = vld [vmem:[%s15634_s17 + $0x3fc] sm:$0xf] }
 0x514   : > { %v10272_v61 = vrot.slane %v12501_v29, 5 }
 0x516   : > { %v10274_v39 = vrot.slane %v10272_v61, 4 }
 0x517   : > { %14146 = vmatmul.mubr.msk.bf16.gmra.mrb[28].mxu1 %vm995_vm2, %v12407_v5  ;;  %v9778_v5 = vrot.slane %v12435_v49, 6  ;;  %v12505_v49 = vld [vmem:[%s15634_s17 + $0x41c] sm:$0x1] }
 0x518   : > { %14151 = vmatprep.mubr.msk.bf16.mxu1 %vm995_vm2, %v12449_v22  ;;  %v12438_v22 = vld [vmem:[%s15634_s17 + $0x2d0] sm:$0xf] }
 0x519   : > { %v9785_v37 = vrot.slane %v12438_v22, 6  ;;  %v9780_v38 = vrot.slane %v9778_v5, 4  ;;  %v9779_v30 = vsel %vm15868_vm8, %v12446_v53, %v9778_v5  ;;  %v12525_v5 = vrot.slane %v12503_v31, 9 }
 0x51a   : > { %v10281_v22 = vrot.slane %v10279_v7, 4  ;;  %v10282_v53 = vrot.slane %v12505_v49, 5 }
 0x51b   : > { %v9787_v55 = vrot.slane %v9785_v37, 4  ;;  %v9782_v56 = vsel %vm15868_vm8, %v9780_v38, %v9781_v46  ;;  %v9786_v58 = vsel %vm15868_vm8, %v12447_v32, %v9785_v37  ;;  %v10280_v46 = vsel %vm15636_vm6, %v12525_v5, %v10279_v7  ;;  %v12507_v32 = vld [vmem:[%s15634_s17 + $0x434] sm:$0xf] }
 0x51c   : > { %v12455_v24 = vcombine.low %v9779_v30, %v9782_v56  ;;  %v10283_v54 = vsel %vm15636_vm6, %v10281_v22, %v10282_v53  ;;  %v12508_v30 = vld [vmem:[%s15634_s17 + $0x438] sm:$0x1]  ;;  %v10286_v56 = vrot.slane %v12507_v32, 5  ;;  %v12520_v32 = vld [vmem:[%s15634_s17 + $0x4a8] sm:$0x1] }
 0x51d   : > { %v9789_v33 = vsel %vm15868_vm8, %v9787_v55, %v9788_v57  ;;  %v12534_v40 = vcombine.low %v10280_v46, %v10283_v54  ;;  %v12506_v55 = vld [vmem:[%s15634_s17 + $0x430] sm:$0xe]  ;;  %v12522_v54 = vld [vmem:[%s15634_s17 + $0x4c0] sm:$0xf] }
 0x51e   : > { %v12456_v0 = vcombine.low %v9786_v58, %v9789_v33  ;;  %v12526_v57 = vrot.slane %v12506_v55, 9  ;;  %v10288_v58 = vrot.slane %v10286_v56, 4  ;;  %v10289_v33 = vrot.slane %v12508_v30, 5 }
 0x51f   : > { %14152 = vmatmul.mubr.msk.bf16.vlgmr.msra.gmra.mrb[16].mxu1 %vm995_vm2, %v12450_v41  ;;  %v14867_v41 = vld [vmem:[%s18105_s3 + $0x70] sm:$0xff]   ;;  %v10321_v55 = vrot.slane %v12522_v54, 5  ;;  %v12557_v54 = vld [vmem:[%s15634_s17 + $0x440] sm:$0x3] }
 0x520   : > { %14155 = vmatprep.mubr.msk.bf16.mxu1 %vm995_vm2, %v12451_v44  ;;  %13845 = vmatprep.subr.bf16.mxu0 %v14867_v41  ;;  %v12483_v44 = vld [vmem:[%s18104_s2 + $0x30] sm:$0x3] }
 0x521   : > { %13846 = vmatpush3.bf16.msra.mxu0 %v14867_v41  ;;  %14726 = vmatprep.subr.msk.bf16.mxu1 %vm1737_vm0, %v12483_v44  ;;  %v10091_v43 = vsel %vm1737_vm0, %v12483_v44, 0  ;;  %v10287_v41 = vsel %vm15636_vm6, %v12526_v57, %v10286_v56  ;;  %v12527_v44 = vrot.slane %v12509_v6, 9  ;;  %v12521_v57 = vld [vmem:[%s15634_s17 + $0x4bc] sm:$0xe]  ;;  %v12523_v6 = vld [vmem:[%s15634_s17 + $0x4c4] sm:$0x1] }
 0x522   : > { %14168 = vmatpush3.bf16.msra.mxu1 %v10091_v43  ;;  %13847 = vmatprep.subr.bf16.mxu0 %v14868_v2 }
 0x525   : > { %13848 = vmatpush3.bf16.msra.mxu0 %v14868_v2  ;;  %v10290_v2 = vsel %vm15636_vm6, %v10288_v58, %v10289_v33  ;;  %v12531_v58 = vrot.slane %v12521_v57, 9  ;;  %v10323_v33 = vrot.slane %v10321_v55, 4  ;;  %v10591_v57 = vrot.slane %v12557_v54, 6  ;;  %v12570_v54 = vld [vmem:[%s15634_s17 + $0x4c4] sm:$0xc] }
 0x526   : > { %14711 = vmatprep.subr.msk.bf16.mxu0 %vm1737_vm0, %v16930_v50 }
 0x527   : > { %14156 = vmatmul.mubr.msk.bf16.gmra.mrb[20].mxu1 %vm995_vm2, %v12452_v11  ;;  %v12500_v11 = vld [vmem:[%s15634_s17 + $0x3f8] sm:$0xe] }
 0x528   : > { %14159 = vmatprep.mubr.msk.bf16.mxu1 %vm995_vm2, %v12453_v1  ;;  %v12502_v1 = vld [vmem:[%s15634_s17 + $0x400] sm:$0x1]  ;;  %v12524_v34 = vrot.slane %v12500_v11, 9 }
 0x529   : > { %v10275_v12 = vrot.slane %v12502_v1, 5 }
 0x52a   : > { %v10273_v52 = vsel %vm15636_vm6, %v12524_v34, %v10272_v61  ;;  %v12512_v61 = vld [vmem:[%s15634_s17 + $0x468] sm:$0xe]  ;;  %v10303_v34 = vrot.slane %v12514_v63, 5  ;;  %v12552_v63 = vld [vmem:[%s15634_s17 + $0x41c] sm:$0xc] }
 0x52b   : > { %v10276_v37 = vsel %vm15636_vm6, %v10274_v39, %v10275_v12  ;;  %v12528_v1 = vrot.slane %v12512_v61, 9  ;;  %v12515_v39 = vld [vmem:[%s15634_s17 + $0x484] sm:$0xe]  ;;  %v12517_v12 = vld [vmem:[%s15634_s17 + $0x48c] sm:$0x1] }
 0x52c   : > { %v12533_v38 = vcombine.low %v10273_v52, %v10276_v37  ;;  %v12529_v31 = vrot.slane %v12515_v39, 9  ;;  %v10310_v22 = vrot.slane %v12517_v12, 5 }
 0x52f   : > { %14160 = vmatmul.mubr.msk.bf16.gmra.mrb[24].mxu1 %vm995_vm2, %v12454_v42  ;;  %v12532_v42 = vld [vmem:[%s18104_s2 + $0x32] sm:$0x3] }
 0x530   : > { %14163 = vmatprep.mubr.msk.bf16.mxu1 %vm995_vm2, %v12455_v24  ;;  %14727 = vmatprep.subr.msk.bf16.mxu1 %vm1737_vm0, %v12532_v42  ;;  %v10393_v3 = vsel %vm1737_vm0, %v12532_v42, 0  ;;  %v12510_v24 = vld [vmem:[%s15634_s17 + $0x450] sm:$0xf] }
 0x531   : > { %v10293_v43 = vrot.slane %v12510_v24, 5  ;;  %v10317_v24 = vrot.slane %v12520_v32, 5 }
 0x537   : > { %14164 = vmatmul.mubr.msk.bf16.gmra.mrb[28].mxu1 %vm995_vm2, %v12456_v0  ;;  %v12511_v0 = vld [vmem:[%s15634_s17 + $0x454] sm:$0x1] }
 0x538   : > { %14169 = vmatprep.mubr.msk.bf16.mxu1 %vm995_vm2, %v14869_v10  ;;  %v10296_v10 = vrot.slane %v12511_v0, 5 }
 0x53f   : > { %14170 = vmatmul.mubr.msk.bf16.vlgmr.msra.gmra.mrb[16].mxu1 %vm995_vm2, %v14870_v48  ;;  %v12535_v48 = vcombine.low %v10287_v41, %v10290_v2  ;;  %v10324_v41 = vrot.slane %v12523_v6, 5 }
 0x540   : > { %14173 = vmatprep.mubr.msk.bf16.mxu1 %vm995_vm2, %v14871_v51  ;;  %14186 = vmatpush3.bf16.msra.mxu1 %v10393_v3  ;;  %v10294_v51 = vsel %vm15636_vm6, %v12527_v44, %v10293_v43 }
 0x547   : > { %14174 = vmatmul.mubr.msk.bf16.gmra.mrb[20].mxu1 %vm995_vm2, %v14872_v9  ;;  %v10295_v9 = vrot.slane %v10293_v43, 4  ;;  %v10322_v43 = vsel %vm15636_vm6, %v12531_v58, %v10321_v55  ;;  %v12558_v55 = vld [vmem:[%s15634_s17 + $0x454] sm:$0xc] }
 0x548   : > { %14177 = vmatprep.mubr.msk.bf16.mxu1 %vm995_vm2, %v14873_v60  ;;  %v12513_v60 = vld [vmem:[%s15634_s17 + $0x46c] sm:$0xf]  ;;  %v12576_v6 = vrot.slane %v12558_v55, 10  ;;  %v12580_v55 = vrot.slane %v12570_v54, 10 }
 0x54f   : > { %14178 = vmatmul.mubr.msk.bf16.gmra.mrb[24].mxu1 %vm995_vm2, %v14874_v21  ;;  %v10297_v21 = vsel %vm15636_vm6, %v10295_v9, %v10296_v10  ;;  %v10325_v10 = vsel %vm15636_vm6, %v10323_v33, %v10324_v41 }
 0x550   : > { %14181 = vmatprep.mubr.msk.bf16.mxu1 %vm995_vm2, %v14875_v28  ;;  %v10300_v28 = vrot.slane %v12513_v60, 5  ;;  %v12536_v29 = vcombine.low %v10294_v51, %v10297_v21  ;;  %v12550_v51 = vld [vmem:[%s15634_s17 + $0x404] sm:$0xf]  ;;  %v12553_v60 = vld [vmem:[%s15634_s17 + $0x420] sm:$0xf] }
 0x551   : > { %v10574_v9 = vrot.slane %v12550_v51, 6  ;;  %v12549_v21 = vld [vmem:[%s15634_s17 + $0x400] sm:$0xc]  ;;  %v12565_v51 = vld [vmem:[%s15634_s17 + $0x490] sm:$0xf] }
 0x552   : > { %v10302_v7 = vrot.slane %v10300_v28, 4  ;;  %v10301_v49 = vsel %vm15636_vm6, %v12528_v1, %v10300_v28  ;;  %v12551_v28 = vld [vmem:[%s15634_s17 + $0x408] sm:$0x3]  ;;  %v12581_v1 = vld [vmem:[%s18104_s2 + $0x34] sm:$0x3] }
 0x553   : > { %v10576_v61 = vrot.slane %v10574_v9, 4  ;;  %14728 = vmatprep.subr.msk.bf16.mxu1 %vm1737_vm0, %v12581_v1  ;;  %v10695_v12 = vsel %vm1737_vm0, %v12581_v1, 0 }
 0x554   : > { %v10304_v5 = vsel %vm15636_vm6, %v10302_v7, %v10303_v34  ;;  %v10577_v7 = vrot.slane %v12551_v28, 6  ;;  %v12574_v34 = vrot.slane %v12552_v63, 10  ;;  %v12566_v63 = vld [vmem:[%s15634_s17 + $0x494] sm:$0x3] }
 0x555   : > { %v12537_v3 = vcombine.low %v10301_v49, %v10304_v5 }
 0x556   : > { %v10578_v49 = vsel %vm15868_vm8, %v10576_v61, %v10577_v7  ;;  %v12564_v61 = vld [vmem:[%s15634_s17 + $0x48c] sm:$0xc] }
 0x557   : > { %14182 = vmatmul.mubr.msk.bf16.gmra.mrb[28].mxu1 %vm995_vm2, %v14876_v35  ;;  %v12516_v35 = vld [vmem:[%s15634_s17 + $0x488] sm:$0xf] }
 0x558   : > { %14187 = vmatprep.mubr.msk.bf16.mxu1 %vm995_vm2, %v12533_v38  ;;  %v10307_v11 = vrot.slane %v12516_v35, 5  ;;  %v12519_v38 = vld [vmem:[%s15634_s17 + $0x4a4] sm:$0xf]  ;;  %v10581_v35 = vrot.slane %v12553_v60, 6  ;;  %v12563_v60 = vld [vmem:[%s15634_s17 + $0x478] sm:$0x3] }
 0x559   : > { %v10314_v46 = vrot.slane %v12519_v38, 5  ;;  %v12559_v38 = vld [vmem:[%s15634_s17 + $0x458] sm:$0xf] }
 0x55a   : > { %v10309_v42 = vrot.slane %v10307_v11, 4  ;;  %v10308_v52 = vsel %vm15636_vm6, %v12529_v31, %v10307_v11  ;;  %v12554_v11 = vld [vmem:[%s15634_s17 + $0x424] sm:$0x3]  ;;  %v10583_v39 = vrot.slane %v10581_v35, 4  ;;  %v10582_v5 = vsel %vm15868_vm8, %v12574_v34, %v10581_v35 }
 0x55b   : > { %v10316_v56 = vrot.slane %v10314_v46, 4 }
 0x55c   : > { %v10311_v37 = vsel %vm15636_vm6, %v10309_v42, %v10310_v22  ;;  %v10584_v42 = vrot.slane %v12554_v11, 6  ;;  %v12578_v11 = vrot.slane %v12564_v61, 10 }
 0x55d   : > { %v12538_v53 = vcombine.low %v10308_v52, %v10311_v37  ;;  %v10318_v44 = vsel %vm15636_vm6, %v10316_v56, %v10317_v24  ;;  %v12556_v37 = vld [vmem:[%s15634_s17 + $0x43c] sm:$0xf] }
 0x55f   : > { %14188 = vmatmul.mubr.msk.bf16.vlgmr.msra.gmra.mrb[16].mxu1 %vm995_vm2, %v12534_v40  ;;  %v12518_v40 = vld [vmem:[%s15634_s17 + $0x4a0] sm:$0xe] }
 0x560   : > { %14191 = vmatprep.mubr.msk.bf16.mxu1 %vm995_vm2, %v12535_v48  ;;  %v12530_v30 = vrot.slane %v12518_v40, 9  ;;  %v12540_v48 = vcombine.low %v10322_v43, %v10325_v10  ;;  %14204 = vmatpush3.bf16.msra.mxu1 %v10695_v12  ;;  %v10595_v40 = vrot.slane %v12559_v38, 6  ;;  %v12562_v10 = vld [vmem:[%s15634_s17 + $0x474] sm:$0xf] }
 0x562   : > { %v10315_v0 = vsel %vm15636_vm6, %v12530_v30, %v10314_v46  ;;  %v12555_v46 = vld [vmem:[%s15634_s17 + $0x438] sm:$0xc]  ;;  %v12560_v30 = vld [vmem:[%s15634_s17 + $0x45c] sm:$0x3]  ;;  %v10597_v58 = vrot.slane %v10595_v40, 4  ;;  %v10596_v41 = vsel %vm15868_vm8, %v12576_v6, %v10595_v40 }
 0x563   : > { %v12539_v2 = vcombine.low %v10315_v0, %v10318_v44  ;;  %v12575_v32 = vrot.slane %v12555_v46, 10  ;;  %v10598_v33 = vrot.slane %v12560_v30, 6  ;;  %v12572_v40 = vld [vmem:[%s15634_s17 + $0x4cc] sm:$0x3] }
 0x565   : > { %v10599_v43 = vsel %vm15868_vm8, %v10597_v58, %v10598_v33 }
 0x567   : > { %14192 = vmatmul.mubr.msk.bf16.gmra.mrb[20].mxu1 %vm995_vm2, %v12536_v29  ;;  %v12573_v29 = vrot.slane %v12549_v21, 10  ;;  %v10609_v21 = vrot.slane %v12565_v51, 6 }
 0x568   : > { %14195 = vmatprep.mubr.msk.bf16.mxu1 %vm995_vm2, %v12537_v3  ;;  %v10585_v3 = vsel %vm15868_vm8, %v10583_v39, %v10584_v42  ;;  %v10612_v39 = vrot.slane %v12566_v63, 6 }
 0x569   : > { %v10575_v31 = vsel %vm15868_vm8, %v12573_v29, %v10574_v9  ;;  %v12583_v52 = vcombine.low %v10582_v5, %v10585_v3  ;;  %v12561_v9 = vld [vmem:[%s15634_s17 + $0x470] sm:$0xc]  ;;  %v10605_v29 = vrot.slane %v12563_v60, 6  ;;  %v10611_v1 = vrot.slane %v10609_v21, 4  ;;  %v12568_v5 = vld [vmem:[%s15634_s17 + $0x4ac] sm:$0xf] }
 0x56a   : > { %v12582_v22 = vcombine.low %v10575_v31, %v10578_v49  ;;  %v12577_v28 = vrot.slane %v12561_v9, 10  ;;  %v10610_v31 = vsel %vm15868_vm8, %v12578_v11, %v10609_v21  ;;  %v12571_v3 = vld [vmem:[%s15634_s17 + $0x4c8] sm:$0xf] }
 0x56b   : > { %v10613_v42 = vsel %vm15868_vm8, %v10611_v1, %v10612_v39 }
 0x56c   : > { %v12587_v49 = vcombine.low %v10610_v31, %v10613_v42 }
 0x56f   : > { %14196 = vmatmul.mubr.msk.bf16.gmra.mrb[24].mxu1 %vm995_vm2, %v12538_v53  ;;  %v10588_v53 = vrot.slane %v12556_v37, 6  ;;  %v12569_v37 = vld [vmem:[%s15634_s17 + $0x4b0] sm:$0x3] }
 0x570   : > { %14199 = vmatprep.mubr.msk.bf16.mxu1 %vm995_vm2, %v12539_v2  ;;  %v12585_v2 = vcombine.low %v10596_v41, %v10599_v43 }
 0x571   : > { %v10590_v56 = vrot.slane %v10588_v53, 4  ;;  %v10589_v24 = vsel %vm15868_vm8, %v12575_v32, %v10588_v53  ;;  %v10623_v53 = vrot.slane %v12571_v3, 6  ;;  %v10619_v32 = vrot.slane %v12569_v37, 6 }
 0x573   : > { %v10592_v0 = vsel %vm15868_vm8, %v10590_v56, %v10591_v57  ;;  %v10625_v30 = vrot.slane %v10623_v53, 4  ;;  %v10626_v57 = vrot.slane %v12572_v40, 6 }
 0x574   : > { %v12584_v44 = vcombine.low %v10589_v24, %v10592_v0  ;;  %v10624_v24 = vsel %vm15868_vm8, %v12580_v55, %v10623_v53 }
 0x575   : > { %v10627_v33 = vsel %vm15868_vm8, %v10625_v30, %v10626_v57 }
 0x576   : > { %v12589_v0 = vcombine.low %v10624_v24, %v10627_v33 }
 0x577   : > { %14200 = vmatmul.mubr.msk.bf16.gmra.mrb[28].mxu1 %vm995_vm2, %v12540_v48  ;;  %v10602_v48 = vrot.slane %v12562_v10, 6  ;;  %v17092_v10 = vld [vmem:[%s18107_s5 + $0x1] ss:$0 sm:$0xff] }
 0x578   : > { %14205 = vmatprep.mubr.msk.bf16.mxu1 %vm995_vm2, %v12582_v22  ;;  %v10616_v22 = vrot.slane %v12568_v5, 6 }
 0x579   : > { %v10604_v35 = vrot.slane %v10602_v48, 4  ;;  %v10603_v7 = vsel %vm15868_vm8, %v12577_v28, %v10602_v48 }
 0x57a   : > { %v10618_v46 = vrot.slane %v10616_v22, 4 }
 0x57b   : > { %v10606_v34 = vsel %vm15868_vm8, %v10604_v35, %v10605_v29 }
 0x57c   : > { %v12586_v12 = vcombine.low %v10603_v7, %v10606_v34  ;;  %v10620_v6 = vsel %vm15868_vm8, %v10618_v46, %v10619_v32 }
 0x57f   : > { %14206 = vmatmul.mubr.msk.bf16.vlgmr.msra.gmra.mrb[16].mxu1 %vm995_vm2, %v12583_v52  ;;  %v12567_v52 = vld [vmem:[%s15634_s17 + $0x4a8] sm:$0xc] }
 0x580   : > { %14209 = vmatprep.mubr.msk.bf16.mxu1 %vm995_vm2, %v12584_v44  ;;  %v12579_v38 = vrot.slane %v12567_v52, 10  ;;  %v17086_v44 = vld [vmem:[%s18106_s4 + $0x1] ss:$0 sm:$0xff] }
 0x582   : > { %v10617_v56 = vsel %vm15868_vm8, %v12579_v38, %v10616_v22  ;;  %v5459_v38 = vsel %vm1737_vm0, %v16930_v50, 0 }
 0x583   : > { %v12588_v58 = vcombine.low %v10617_v56, %v10620_v6 }
 0x587   : > { %14210 = vmatmul.mubr.msk.bf16.gmra.mrb[20].mxu1 %vm995_vm2, %v12585_v2 }
 0x588   : > { %14213 = vmatprep.mubr.msk.bf16.mxu1 %vm995_vm2, %v12586_v12 }
 0x58f   : > { %14214 = vmatmul.mubr.msk.bf16.gmra.mrb[24].mxu1 %vm995_vm2, %v12587_v49 }
 0x590   : > { %14217 = vmatprep.mubr.msk.bf16.mxu1 %vm995_vm2, %v12588_v58 }
 0x597   : > { %14218 = vmatmul.mubr.msk.bf16.gmra.mrb[28].mxu1 %vm995_vm2, %v12589_v0 }
 0x5be   : > { %v13675_v41 = vpop.f32.mrb[40].mxu0 }
 0x5bf   : > { %v14269_v43 = vadd.f32 %v16411_v8, %v13675_v41  ;;  %v2675_v2 = vpop.f32.mrb[41].mxu0 }
 0x5c0   : > { %v14270_v47 = vadd.f32 %v16413_v16, %v2675_v2  ;;  %v13676_v48 = vpop.f32.mrb[42].mxu0 }
 0x5c1   : > { %v4997_v51 = vmul.f32 %v14269_v43, %v17086_v44  ;;  %v14271_v9 = vadd.f32 %v16415_v59, %v13676_v48  ;;  %v2678_v60 = vpop.f32.mrb[43].mxu0 }
 0x5c2   : > { %v4995_v21 = vmul.f32 %v14270_v47, %v17086_v44  ;;  %v14272_v28 = vadd.f32 %v16417_v4, %v2678_v60 }
 0x5c3   : > { %v5018_v8 = vadd.f32 %v17092_v10, %v4997_v51  ;;  %v4998_v35 = vmul.f32 %v14271_v9, %v17086_v44  ;;  %v11813_v9 = vld [vmem:[%s15634_s17 + $0xac] sm:$0xf] }
 0x5c4   : > { %v5016_v29 = vadd.f32 %v17092_v10, %v4995_v21  ;;  %v4996_v61 = vmul.f32 %v14272_v28, %v17086_v44 }
 0x5c5   : > { %v5019_v16 = vadd.f32 %v17092_v10, %v4998_v35  ;;  %v5034_v1 = vmax.f32 %v5018_v8, 0.0 }
 0x5c6   : > { %v5017_v63 = vadd.f32 %v17092_v10, %v4996_v61  ;;  %v13679_v11 = vpop.f32.mrb[44].mxu0  ;;  %v5032_v39 = vmax.f32 %v5016_v29, 0.0  ;;  %v11812_v29 = vld [vmem:[%s15634_s17 + $0xa8] sm:$0x8]  ;;  %v5338_v61 = vrot.slane %v11813_v9, 7 }
 0x5c7   : > { %v5035_v59 = vmax.f32 %v5019_v16, 0.0  ;;  %v14273_v7 = vadd.f32 %v16419_v13, %v13679_v11  ;;  %v2691_v34 = vpop.f32.mrb[45].mxu0 }
 0x5c8   : > { %v5033_v4 = vmax.f32 %v5017_v63, 0.0  ;;  %v14274_v12 = vadd.f32 %v16421_v14, %v2691_v34  ;;  %v13680_v31 = vpop.f32.mrb[46].mxu0 }
 0x5c9   : > { %v5049_v42 = vpack.c.bf16 %v5035_v59, %v5034_v1  ;;  %v5001_v49 = vmul.f32 %v14273_v7, %v17086_v44  ;;  %v14275_v5 = vadd.f32 %v16423_v45, %v13680_v31  ;;  %v2694_v22 = vpop.f32.mrb[47].mxu0  ;;  %v17120_v45 = vld [vmem:[%s18104_s2 + $0x14] sm:$0x3]  ;;  %v11814_v59 = vld [vmem:[%s15634_s17 + $0xb0] sm:$0x7] }
 0x5ca   : > { %v4999_v3 = vmul.f32 %v14274_v12, %v17086_v44  ;;  %v14276_v52 = vadd.f32 %v16425_v20, %v2694_v22  ;;  %v5048_v37 = vpack.c.bf16 %v5033_v4, %v5032_v39  ;;  %v5341_v22 = vrot.slane %v11814_v59, 7 }
 0x5cb   : > { %v5022_v53 = vadd.f32 %v17092_v10, %v5001_v49  ;;  %v5002_v13 = vmul.f32 %v14275_v5, %v17086_v44  ;;  %v14884_v5 = vld [vmem:[%s18105_s3 + $0xb8] sm:$0xff]  }
 0x5cc   : > { %v5020_v14 = vadd.f32 %v17092_v10, %v4999_v3  ;;  %v5000_v46 = vmul.f32 %v14276_v52, %v17086_v44  ;;  %13849 = vmatprep.mubr.bf16.mxu0 %v5048_v37  ;;  %v11816_v3 = vld [vmem:[%s15634_s17 + $0xc8] sm:$0xf]  ;;  %v11819_v37 = vld [vmem:[%s15634_s17 + $0xe4] sm:$0xf] }
 0x5cd   : > { %v5023_v20 = vadd.f32 %v17092_v10, %v5002_v13  ;;  %13850 = vmatmul.mubr.bf16.vlgmr.msra.gmra.mrb[24].mxu0 %v5049_v42  ;;  %v5038_v32 = vmax.f32 %v5022_v53, 0.0  ;;  %v11836_v42 = vrot.slane %v11812_v29, 11 }
 0x5ce   : > { %v5021_v54 = vadd.f32 %v17092_v10, %v5000_v46  ;;  %13866 = vmatpush3.bf16.msra.mxu0 %v5459_v38  ;;  %v13683_v40 = vpop.f32.mrb[48].mxu0  ;;  %v5036_v56 = vmax.f32 %v5020_v14, 0.0  ;;  %v11815_v14 = vld [vmem:[%s15634_s17 + $0xc4] sm:$0x8]  ;;  %v5345_v46 = vrot.slane %v11816_v3, 7 }
 0x5cf   : > { %v5039_v55 = vmax.f32 %v5023_v20, 0.0  ;;  %v14277_v50 = vadd.f32 %v16427_v17, %v13683_v40  ;;  %v2707_v30 = vpop.f32.mrb[49].mxu0  ;;  %14712 = vmatprep.subr.msk.bf16.mxu0 %vm1737_vm0, %v17120_v45  ;;  %v5339_v38 = vsel %vm17150_vm11, %v11836_v42, %v5338_v61  ;;  %v11827_v42 = vld [vmem:[%s15634_s17 + $0x134] sm:$0x8] }
 0x5d0   : > { %v5037_v57 = vmax.f32 %v5021_v54, 0.0  ;;  %v14278_v6 = vadd.f32 %v16429_v23, %v2707_v30  ;;  %v13684_v24 = vpop.f32.mrb[50].mxu0  ;;  %v11818_v30 = vld [vmem:[%s15634_s17 + $0xe0] sm:$0x8] }
 0x5d1   : > { %v5005_v58 = vmul.f32 %v14277_v50, %v17086_v44  ;;  %v14279_v33 = vadd.f32 %v16431_v18, %v13684_v24  ;;  %v2710_v0 = vpop.f32.mrb[51].mxu0  ;;  %v5051_v41 = vpack.c.bf16 %v5039_v55, %v5038_v32  ;;  %v5352_v32 = vrot.slane %v11819_v37, 7 }
 0x5d2   : > { %v5003_v43 = vmul.f32 %v14278_v6, %v17086_v44  ;;  %v14280_v17 = vadd.f32 %v16433_v25, %v2710_v0  ;;  %v5050_v2 = vpack.c.bf16 %v5037_v57, %v5036_v56  ;;  %v11820_v56 = vld [vmem:[%s15634_s17 + $0xe8] sm:$0x7]  ;;  %v11838_v0 = vrot.slane %v11818_v30, 11  ;;  %v11835_v30 = vld [vmem:[%s15634_s17 + $0x174] sm:$0x7] }
 0x5d3   : > { %v5026_v47 = vadd.f32 %v17092_v10, %v5005_v58  ;;  %v5006_v48 = vmul.f32 %v14279_v33, %v17086_v44  ;;  %v5347_v58 = vrot.slane %v5345_v46, 4 }
 0x5d4   : > { %v5024_v51 = vadd.f32 %v17092_v10, %v5003_v43  ;;  %v5004_v23 = vmul.f32 %v14280_v17, %v17086_v44  ;;  %13853 = vmatprep.mubr.bf16.mxu0 %v5050_v2  ;;  %v5355_v43 = vrot.slane %v11820_v56, 7  ;;  %v11822_v17 = vld [vmem:[%s15634_s17 + $0x100] sm:$0xf]  ;;  %v11825_v2 = vld [vmem:[%s15634_s17 + $0x11c] sm:$0xf] }
 0x5d5   : > { %v5027_v18 = vadd.f32 %v17092_v10, %v5006_v48  ;;  %13854 = vmatmul.mubr.bf16.gmra.mrb[28].mxu0 %v5051_v41  ;;  %v5042_v25 = vmax.f32 %v5026_v47, 0.0  ;;  %v5354_v41 = vrot.slane %v5352_v32, 4 }
 0x5d6   : > { %v5025_v60 = vadd.f32 %v17092_v10, %v5004_v23  ;;  %v13687_v21 = vpop.f32.mrb[52].mxu0  ;;  %v5040_v16 = vmax.f32 %v5024_v51, 0.0  ;;  %v5359_v51 = vrot.slane %v11822_v17, 7  ;;  %v5353_v23 = vsel %vm17150_vm11, %v11838_v0, %v5352_v32 }
 0x5d7   : > { %v5043_v28 = vmax.f32 %v5027_v18, 0.0  ;;  %v14281_v8 = vadd.f32 %v16435_v15, %v13687_v21  ;;  %v2723_v35 = vpop.f32.mrb[53].mxu0  ;;  %v5356_v9 = vsel %vm17150_vm11, %v5354_v41, %v5355_v43  ;;  %v11821_v18 = vld [vmem:[%s15634_s17 + $0xfc] sm:$0x8]  ;;  %v5366_v21 = vrot.slane %v11825_v2, 7 }
 0x5d8   : > { %v5041_v63 = vmax.f32 %v5025_v60, 0.0  ;;  %v14282_v11 = vadd.f32 %v16437_v26, %v2723_v35  ;;  %v13688_v1 = vpop.f32.mrb[54].mxu0  ;;  %v11823_v60 = vld [vmem:[%s15634_s17 + $0x104] sm:$0x7]  ;;  %v11847_v35 = vcombine.low %v5353_v23, %v5356_v9  ;;  %v11839_v29 = vrot.slane %v11821_v18, 11 }
 0x5d9   : > { %v5009_v7 = vmul.f32 %v14281_v8, %v17086_v44  ;;  %v14283_v34 = vadd.f32 %v16439_v19, %v13688_v1  ;;  %v2726_v39 = vpop.f32.mrb[55].mxu0  ;;  %v5053_v4 = vpack.c.bf16 %v5043_v28, %v5042_v25  ;;  %v5340_v19 = vrot.slane %v5338_v61, 4  ;;  %v11824_v25 = vld [vmem:[%s15634_s17 + $0x118] sm:$0x8]  ;;  %v11826_v28 = vld [vmem:[%s15634_s17 + $0x120] sm:$0x7] }
 0x5da   : > { %v5007_v15 = vmul.f32 %v14282_v11, %v17086_v44  ;;  %v14284_v12 = vadd.f32 %v16441_v27, %v2726_v39  ;;  %v5052_v31 = vpack.c.bf16 %v5041_v63, %v5040_v16  ;;  %v5361_v61 = vrot.slane %v5359_v51, 4  ;;  %v17190_v39 = vld [vmem:[%s18104_s2 + $0x16] sm:$0x3]  ;;  %v11865_v2 = vld [vmem:[%s15634_s17 + $0xd0] sm:$0xf] }
 0x5db   : > { %v5030_v26 = vadd.f32 %v17092_v10, %v5009_v7  ;;  %v5010_v49 = vmul.f32 %v14283_v34, %v17086_v44  ;;  %v5342_v40 = vsel %vm17150_vm11, %v5340_v19, %v5341_v22  ;;  %v5362_v16 = vrot.slane %v11823_v60, 7  ;;  %v11828_v7 = vld [vmem:[%s15634_s17 + $0x138] sm:$0xf]  ;;  %v11831_v34 = vld [vmem:[%s15634_s17 + $0x154] sm:$0xf] }
 0x5dc   : > { %v5028_v52 = vadd.f32 %v17092_v10, %v5007_v15  ;;  %v5008_v27 = vmul.f32 %v14284_v12, %v17086_v44  ;;  %13857 = vmatprep.mubr.bf16.mxu0 %v5052_v31  ;;  %v11817_v44 = vld [vmem:[%s15634_s17 + $0xcc] sm:$0x7]  ;;  %v11845_v24 = vcombine.low %v5339_v38, %v5342_v40  ;;  %v5761_v63 = vsel %vm1737_vm0, %v17120_v45, 0  ;;  %v11830_v19 = vld [vmem:[%s15634_s17 + $0x150] sm:$0x8] }
 0x5dd   : > { %v5031_v53 = vadd.f32 %v17092_v10, %v5010_v49  ;;  %13858 = vmatmul.mubr.bf16.gmra.mrb[32].mxu0 %v5053_v4  ;;  %v5046_v20 = vmax.f32 %v5030_v26, 0.0  ;;  %v5348_v33 = vrot.slane %v11817_v44, 7  ;;  %v11840_v11 = vrot.slane %v11824_v25, 11  ;;  %v11829_v26 = vld [vmem:[%s15634_s17 + $0x13c] sm:$0x7] }
 0x5de   : > { %v5029_v13 = vadd.f32 %v17092_v10, %v5008_v27  ;;  %v5044_v55 = vmax.f32 %v5028_v52, 0.0  ;;  %v11837_v10 = vrot.slane %v11815_v14, 11  ;;  %v5368_v1 = vrot.slane %v5366_v21, 4  ;;  %v11832_v22 = vld [vmem:[%s15634_s17 + $0x158] sm:$0x7] }
 0x5df   : > { %v5047_v54 = vmax.f32 %v5031_v53, 0.0  ;;  %v5349_v48 = vsel %vm17150_vm11, %v5347_v58, %v5348_v33  ;;  %v5369_v59 = vrot.slane %v11826_v28, 7  ;;  %v5360_v45 = vsel %vm17150_vm11, %v11839_v29, %v5359_v51  ;;  %v11864_v60 = vld [vmem:[%s15634_s17 + $0xcc] sm:$0xe]  ;;  %v11867_v28 = vld [vmem:[%s15634_s17 + $0xe8] sm:$0xe] }
 0x5e0   : > { %v5045_v50 = vmax.f32 %v5029_v13, 0.0  ;;  %v5346_v47 = vsel %vm17150_vm11, %v11837_v10, %v5345_v46  ;;  %v5363_v4 = vsel %vm17150_vm11, %v5361_v61, %v5362_v16  ;;  %v5373_v15 = vrot.slane %v11828_v7, 7  ;;  %v11834_v46 = vld [vmem:[%s15634_s17 + $0x170] sm:$0xf]  ;;  %v11863_v10 = vld [vmem:[%s15634_s17 + $0xb8] sm:$0x1] }
 0x5e1   : > { %v5055_v57 = vpack.c.bf16 %v5047_v54, %v5046_v20  ;;  %v11846_v8 = vcombine.low %v5346_v47, %v5349_v48  ;;  %v5367_v12 = vsel %vm17150_vm11, %v11840_v11, %v5366_v21  ;;  %v5370_v31 = vsel %vm17150_vm11, %v5368_v1, %v5369_v59  ;;  %v11862_v20 = vld [vmem:[%s15634_s17 + $0xb4] sm:$0xf]  ;;  %v11868_v47 = vld [vmem:[%s15634_s17 + $0xec] sm:$0xf]  ;;  %v11871_v7 = vld [vmem:[%s15634_s17 + $0x108] sm:$0xf] }
 0x5e2   : > { %v5054_v6 = vpack.c.bf16 %v5045_v50, %v5044_v55  ;;  %v5380_v49 = vrot.slane %v11831_v34, 7  ;;  %v11848_v3 = vcombine.low %v5360_v45, %v5363_v4  ;;  %v11849_v52 = vcombine.low %v5367_v12, %v5370_v31  ;;  %v11833_v50 = vld [vmem:[%s15634_s17 + $0x16c] sm:$0x8]  ;;  %v11866_v21 = vld [vmem:[%s15634_s17 + $0xd4] sm:$0x1] }
 0x5e3   : > { %v11841_v27 = vrot.slane %v11827_v42, 11  ;;  %v5375_v37 = vrot.slane %v5373_v15, 4  ;;  %v5376_v53 = vrot.slane %v11829_v26, 7  ;;  %v11842_v13 = vrot.slane %v11830_v19, 11  ;;  %v11874_v34 = vld [vmem:[%s15634_s17 + $0x124] sm:$0xf] }
 0x5e4   : > { %13861 = vmatprep.mubr.bf16.mxu0 %v5054_v6  ;;  %v5382_v38 = vrot.slane %v5380_v49, 4  ;;  %v5383_v14 = vrot.slane %v11832_v22, 7  ;;  %v5387_v44 = vrot.slane %v11834_v46, 7  ;;  %v5640_v56 = vrot.slane %v11862_v20, 5  ;;  %v11870_v42 = vld [vmem:[%s15634_s17 + $0x104] sm:$0xe] }
 0x5e5   : > { %13862 = vmatmul.mubr.bf16.gmra.mrb[36].mxu0 %v5055_v57  ;;  %v5374_v54 = vsel %vm17150_vm11, %v11841_v27, %v5373_v15  ;;  %v5377_v40 = vsel %vm17150_vm11, %v5375_v37, %v5376_v53  ;;  %v5381_v32 = vsel %vm17150_vm11, %v11842_v13, %v5380_v49  ;;  %v11861_v57 = vld [vmem:[%s15634_s17 + $0xb0] sm:$0xe]  ;;  %v11843_v58 = vrot.slane %v11833_v50, 11  ;;  %v11872_v26 = vld [vmem:[%s15634_s17 + $0x10c] sm:$0x1] }
 0x5e6   : > { %13867 = vmatprep.mubr.msk.bf16.mxu0 %vm995_vm2, %v11845_v24  ;;  %v5384_v55 = vsel %vm17150_vm11, %v5382_v38, %v5383_v14  ;;  %v11850_v6 = vcombine.low %v5374_v54, %v5377_v40  ;;  %v5389_v33 = vrot.slane %v5387_v44, 4  ;;  %v5390_v0 = vrot.slane %v11835_v30, 7  ;;  %v11873_v19 = vld [vmem:[%s15634_s17 + $0x120] sm:$0xe]  ;;  %v11875_v22 = vld [vmem:[%s15634_s17 + $0x128] sm:$0x1] }
 0x5e7   : > { %v11851_v24 = vcombine.low %v5381_v32, %v5384_v55  ;;  %v11885_v41 = vrot.slane %v11861_v57, 9  ;;  %v5642_v43 = vrot.slane %v5640_v56, 4  ;;  %v5643_v17 = vrot.slane %v11863_v10, 5  ;;  %v11877_v20 = vld [vmem:[%s15634_s17 + $0x140] sm:$0xf] }
 0x5e8   : > { %v5388_v48 = vsel %vm17150_vm11, %v11843_v58, %v5387_v44  ;;  %v5391_v51 = vsel %vm17150_vm11, %v5389_v33, %v5390_v0  ;;  %v5647_v23 = vrot.slane %v11865_v2, 5  ;;  %v5654_v25 = vrot.slane %v11868_v47, 5  ;;  %v11880_v54 = vld [vmem:[%s15634_s17 + $0x15c] sm:$0xf]  ;;  %v17263_v40 = vld [vmem:[%s18104_s2 + $0x18] sm:$0x3] }
 0x5e9   : > { %v5641_v9 = vsel %vm15636_vm6, %v11885_v41, %v5640_v56  ;;  %v5644_v18 = vsel %vm15636_vm6, %v5642_v43, %v5643_v17  ;;  %v11886_v61 = vrot.slane %v11864_v60, 9  ;;  %v11887_v11 = vrot.slane %v11867_v28, 9  ;;  %v11876_v30 = vld [vmem:[%s15634_s17 + $0x13c] sm:$0xe]  ;;  %v11878_v56 = vld [vmem:[%s15634_s17 + $0x144] sm:$0x1] }
 0x5ea   : > { %v11894_v29 = vcombine.low %v5641_v9, %v5644_v18  ;;  %v5649_v16 = vrot.slane %v5647_v23, 4  ;;  %v5656_v1 = vrot.slane %v5654_v25, 4  ;;  %v5661_v15 = vrot.slane %v11871_v7, 5  ;;  %v11879_v10 = vld [vmem:[%s15634_s17 + $0x158] sm:$0xe] }
 0x5eb   : > { %v5648_v45 = vsel %vm15636_vm6, %v11886_v61, %v5647_v23  ;;  %v5655_v12 = vsel %vm15636_vm6, %v11887_v11, %v5654_v25  ;;  %v5668_v49 = vrot.slane %v11874_v34, 5  ;;  %v11888_v27 = vrot.slane %v11870_v42, 9  ;;  %v11883_v47 = vld [vmem:[%s15634_s17 + $0x178] sm:$0xf]  ;;  %v11884_v25 = vld [vmem:[%s15634_s17 + $0x17c] sm:$0x1] }
 0x5ec   : > { %v5663_v37 = vrot.slane %v5661_v15, 4  ;;  %v5664_v53 = vrot.slane %v11872_v26, 5  ;;  %v6063_v13 = vsel %vm1737_vm0, %v17190_v39, 0  ;;  %v11889_v38 = vrot.slane %v11873_v19, 9  ;;  %v11914_v34 = vld [vmem:[%s15634_s17 + $0xd4] sm:$0xf] }
 0x5ed   : > { %13868 = vmatmul.mubr.msk.bf16.vlgmr.msra.gmra.mrb[56].mxu0 %vm995_vm2, %v11846_v8  ;;  %v11869_v8 = vld [vmem:[%s15634_s17 + $0xf0] sm:$0x1]  ;;  %v5670_v14 = vrot.slane %v5668_v49, 4  ;;  %v5671_v46 = vrot.slane %v11875_v22, 5  ;;  %v5675_v32 = vrot.slane %v11877_v20, 5  ;;  %v5682_v57 = vrot.slane %v11880_v54, 5 }
 0x5ee   : > { %13884 = vmatpush3.bf16.msra.mxu0 %v5761_v63  ;;  %13871 = vmatprep.mubr.msk.bf16.mxu0 %vm995_vm2, %v11847_v35  ;;  %v11852_v35 = vcombine.low %v5388_v48, %v5391_v51  ;;  %v5650_v63 = vrot.slane %v11866_v21, 5  ;;  %v5657_v59 = vrot.slane %v11869_v8, 5  ;;  %v5665_v44 = vsel %vm15636_vm6, %v5663_v37, %v5664_v53  ;;  %v11911_v48 = vld [vmem:[%s15634_s17 + $0xb8] sm:$0xf]  ;;  %v11882_v21 = vld [vmem:[%s15634_s17 + $0x174] sm:$0xe] }
 0x5ef   : > { %14713 = vmatprep.subr.msk.bf16.mxu0 %vm1737_vm0, %v17190_v39  ;;  %v5662_v39 = vsel %vm15636_vm6, %v11888_v27, %v5661_v15  ;;  %v5669_v55 = vsel %vm15636_vm6, %v11889_v38, %v5668_v49  ;;  %v5672_v50 = vsel %vm15636_vm6, %v5670_v14, %v5671_v46  ;;  %v11890_v33 = vrot.slane %v11876_v30, 9  ;;  %v11910_v8 = vld [vmem:[%s15634_s17 + $0xb4] sm:$0x8]  ;;  %v11913_v26 = vld [vmem:[%s15634_s17 + $0xd0] sm:$0x8] }
 0x5f0   : > { %v5651_v4 = vsel %vm15636_vm6, %v5649_v16, %v5650_v63  ;;  %v5658_v31 = vsel %vm15636_vm6, %v5656_v1, %v5657_v59  ;;  %v11898_v58 = vcombine.low %v5669_v55, %v5672_v50  ;;  %v5677_v0 = vrot.slane %v5675_v32, 4  ;;  %v11915_v49 = vld [vmem:[%s15634_s17 + $0xd8] sm:$0x7]  ;;  %v11916_v22 = vld [vmem:[%s15634_s17 + $0xec] sm:$0x8] }
 0x5f1   : > { %v5678_v41 = vrot.slane %v11878_v56, 5  ;;  %v11891_v43 = vrot.slane %v11879_v10, 9  ;;  %v5684_v17 = vrot.slane %v5682_v57, 4  ;;  %v5676_v51 = vsel %vm15636_vm6, %v11890_v33, %v5675_v32  ;;  %v11920_v20 = vld [vmem:[%s15634_s17 + $0x10c] sm:$0xf] }
 0x5f2   : > { %v5689_v9 = vrot.slane %v11883_v47, 5  ;;  %v5942_v28 = vrot.slane %v11911_v48, 7  ;;  %v11892_v16 = vrot.slane %v11882_v21, 9  ;;  %v5692_v11 = vrot.slane %v11884_v25, 5  ;;  %v11923_v54 = vld [vmem:[%s15634_s17 + $0x128] sm:$0xf] }
 0x5f3   : > { %v5679_v23 = vsel %vm15636_vm6, %v5677_v0, %v5678_v41  ;;  %v5683_v18 = vsel %vm15636_vm6, %v11891_v43, %v5682_v57  ;;  %v11934_v1 = vrot.slane %v11910_v8, 11  ;;  %v11935_v37 = vrot.slane %v11913_v26, 11  ;;  %v11919_v30 = vld [vmem:[%s15634_s17 + $0x108] sm:$0x8]  ;;  %v11921_v56 = vld [vmem:[%s15634_s17 + $0x110] sm:$0x7] }
 0x5f4   : > { %v5691_v63 = vrot.slane %v5689_v9, 4  ;;  %v5944_v59 = vrot.slane %v5942_v28, 4  ;;  %v11936_v38 = vrot.slane %v11916_v22, 11  ;;  %v5963_v32 = vrot.slane %v11920_v20, 7  ;;  %v11922_v10 = vld [vmem:[%s15634_s17 + $0x124] sm:$0x8] }
 0x5f5   : > { %13872 = vmatmul.mubr.msk.bf16.gmra.mrb[60].mxu0 %vm995_vm2, %v11848_v3  ;;  %v11895_v3 = vcombine.low %v5648_v45, %v5651_v4  ;;  %v11917_v45 = vld [vmem:[%s15634_s17 + $0xf0] sm:$0xf]  ;;  %v5690_v4 = vsel %vm15636_vm6, %v11892_v16, %v5689_v9  ;;  %v5970_v57 = vrot.slane %v11923_v54, 7  ;;  %v11937_v33 = vrot.slane %v11919_v30, 11  ;;  %v11926_v48 = vld [vmem:[%s15634_s17 + $0x144] sm:$0xf] }
 0x5f6   : > { %13875 = vmatprep.mubr.msk.bf16.mxu0 %vm995_vm2, %v11849_v52  ;;  %v11896_v52 = vcombine.low %v5655_v12, %v5658_v31  ;;  %v5693_v15 = vsel %vm15636_vm6, %v5691_v63, %v5692_v11  ;;  %v5949_v12 = vrot.slane %v11914_v34, 7  ;;  %v5943_v31 = vsel %vm17150_vm11, %v11934_v1, %v5942_v28  ;;  %v11925_v25 = vld [vmem:[%s15634_s17 + $0x140] sm:$0x8]  ;;  %v11927_v28 = vld [vmem:[%s15634_s17 + $0x148] sm:$0x7] }
 0x5f7   : > { %v5956_v19 = vrot.slane %v11917_v45, 7  ;;  %v5965_v0 = vrot.slane %v5963_v32, 4  ;;  %v5966_v41 = vrot.slane %v11921_v56, 7  ;;  %v6365_v43 = vsel %vm1737_vm0, %v17263_v40, 0  ;;  %v11932_v45 = vld [vmem:[%s15634_s17 + $0x17c] sm:$0xf] }
 0x5f8   : > { %v5951_v53 = vrot.slane %v5949_v12, 4  ;;  %v11939_v63 = vrot.slane %v11925_v25, 11  ;;  %v5980_v1 = vrot.slane %v11927_v28, 7  ;;  %v11963_v54 = vld [vmem:[%s15634_s17 + $0x218] sm:$0xf] }
 0x5f9   : > { %v5958_v14 = vrot.slane %v5956_v19, 4  ;;  %v5957_v55 = vsel %vm17150_vm11, %v11936_v38, %v5956_v19  ;;  %v5967_v9 = vsel %vm17150_vm11, %v5965_v0, %v5966_v41  ;;  %v11933_v19 = vld [vmem:[%s15634_s17 + $0x180] sm:$0x7]  ;;  %v11962_v56 = vld [vmem:[%s15634_s17 + $0x214] sm:$0x8] }
 0x5fa   : > { %v5994_v38 = vrot.slane %v11933_v19, 7  ;;  %v11984_v0 = vrot.slane %v11962_v56, 11  ;;  %v11968_v25 = vld [vmem:[%s15634_s17 + $0x24c] sm:$0x8]  ;;  %v11970_v28 = vld [vmem:[%s15634_s17 + $0x254] sm:$0x7] }
 0x5fb   : > { %v11974_v19 = vld [vmem:[%s15634_s17 + $0x284] sm:$0x8] }
 0x5fd   : > { %13876 = vmatmul.mubr.msk.bf16.gmra.mrb[64].mxu0 %vm995_vm2, %v11850_v6  ;;  %v11881_v6 = vld [vmem:[%s15634_s17 + $0x160] sm:$0x1] }
 0x5fe   : > { %13879 = vmatprep.mubr.msk.bf16.mxu0 %vm995_vm2, %v11851_v24  ;;  %v11897_v24 = vcombine.low %v5662_v39, %v5665_v44  ;;  %v5685_v2 = vrot.slane %v11881_v6, 5  ;;  %v5950_v39 = vsel %vm17150_vm11, %v11935_v37, %v5949_v12  ;;  %v11924_v6 = vld [vmem:[%s15634_s17 + $0x12c] sm:$0x7] }
 0x5ff   : > { %v5973_v47 = vrot.slane %v11924_v6, 7  ;;  %v11965_v6 = vld [vmem:[%s15634_s17 + $0x230] sm:$0x8] }
 0x600   : > { %v5686_v60 = vsel %vm15636_vm6, %v5684_v17, %v5685_v2  ;;  %v11938_v17 = vrot.slane %v11922_v10, 11  ;;  %v5972_v2 = vrot.slane %v5970_v57, 4 }
 0x601   : > { %v11900_v61 = vcombine.low %v5683_v18, %v5686_v60  ;;  %v5977_v18 = vrot.slane %v11926_v48, 7  ;;  %v11969_v48 = vld [vmem:[%s15634_s17 + $0x250] sm:$0xf] }
 0x602   : > { %v5971_v60 = vsel %vm17150_vm11, %v11938_v17, %v5970_v57  ;;  %v5974_v21 = vsel %vm17150_vm11, %v5972_v2, %v5973_v47  ;;  %v11964_v57 = vld [vmem:[%s15634_s17 + $0x21c] sm:$0x7]  ;;  %v11985_v17 = vrot.slane %v11965_v6, 11 }
 0x603   : > { %v11947_v16 = vcombine.low %v5971_v60, %v5974_v21  ;;  %v5979_v11 = vrot.slane %v5977_v18, 4 }
 0x605   : > { %13880 = vmatmul.mubr.msk.bf16.gmra.mrb[68].mxu0 %vm995_vm2, %v11852_v35  ;;  %v11912_v35 = vld [vmem:[%s15634_s17 + $0xbc] sm:$0x7]  ;;  %v5981_v12 = vsel %vm17150_vm11, %v5979_v11, %v5980_v1  ;;  %v6268_v1 = vrot.slane %v11970_v28, 7  ;;  %v17456_v28 = vld [vmem:[%s18106_s4 + $0x3] ss:$0 sm:$0xff] }
 0x606   : > { %13885 = vmatprep.mubr.msk.bf16.mxu0 %vm995_vm2, %v11894_v29  ;;  %v11899_v29 = vcombine.low %v5676_v51, %v5679_v23  ;;  %v5945_v7 = vrot.slane %v11912_v35, 7  ;;  %v11929_v51 = vld [vmem:[%s15634_s17 + $0x160] sm:$0xf]  ;;  %v17336_v23 = vld [vmem:[%s18104_s2 + $0x1a] sm:$0x3] }
 0x607   : > { %v5984_v8 = vrot.slane %v11929_v51, 7  ;;  %v11928_v35 = vld [vmem:[%s15634_s17 + $0x15c] sm:$0x8]  ;;  %v11972_v51 = vld [vmem:[%s15634_s17 + $0x26c] sm:$0xf] }
 0x608   : > { %v5946_v42 = vsel %vm17150_vm11, %v5944_v59, %v5945_v7  ;;  %v11940_v59 = vrot.slane %v11928_v35, 11  ;;  %v11971_v35 = vld [vmem:[%s15634_s17 + $0x268] sm:$0x8] }
 0x609   : > { %v11943_v27 = vcombine.low %v5943_v31, %v5946_v42  ;;  %v5986_v7 = vrot.slane %v5984_v8, 4  ;;  %v5991_v31 = vrot.slane %v11932_v45, 7 }
 0x60a   : > { %v5985_v42 = vsel %vm17150_vm11, %v11940_v59, %v5984_v8  ;;  %v6272_v8 = vrot.slane %v11972_v51, 7  ;;  %v6667_v59 = vsel %vm1737_vm0, %v17336_v23, 0 }
 0x60d   : > { %13886 = vmatmul.mubr.msk.bf16.vlgmr.msra.gmra.mrb[56].mxu0 %vm995_vm2, %v11895_v3  ;;  %v11918_v3 = vld [vmem:[%s15634_s17 + $0xf4] sm:$0x7] }
 0x60e   : > { %13902 = vmatpush3.bf16.msra.mxu0 %v6063_v13  ;;  %13889 = vmatprep.mubr.msk.bf16.mxu0 %vm995_vm2, %v11896_v52  ;;  %v11901_v52 = vcombine.low %v5690_v4, %v5693_v15  ;;  %v5952_v13 = vrot.slane %v11915_v49, 7  ;;  %v5959_v46 = vrot.slane %v11918_v3, 7  ;;  %v11960_v4 = vld [vmem:[%s15634_s17 + $0x1fc] sm:$0xf]  ;;  %v5978_v15 = vsel %vm17150_vm11, %v11939_v63, %v5977_v18  ;;  %v11931_v49 = vld [vmem:[%s15634_s17 + $0x178] sm:$0x8] }
 0x60f   : > { %14714 = vmatprep.subr.msk.bf16.mxu0 %vm1737_vm0, %v17263_v40  ;;  %v5964_v40 = vsel %vm17150_vm11, %v11937_v33, %v5963_v32  ;;  %v6244_v22 = vrot.slane %v11960_v4, 7  ;;  %v11959_v3 = vld [vmem:[%s15634_s17 + $0x1f8] sm:$0x8]  ;;  %v6265_v18 = vrot.slane %v11969_v48, 7  ;;  %v11986_v63 = vrot.slane %v11968_v25, 11 }
 0x610   : > { %v5953_v44 = vsel %vm17150_vm11, %v5951_v53, %v5952_v13  ;;  %v5960_v50 = vsel %vm17150_vm11, %v5958_v14, %v5959_v46  ;;  %v11941_v53 = vrot.slane %v11931_v49, 11  ;;  %v5993_v13 = vrot.slane %v5991_v31, 4  ;;  %v11975_v4 = vld [vmem:[%s15634_s17 + $0x288] sm:$0xf]  ;;  %v12013_v25 = vld [vmem:[%s15634_s17 + $0x224] sm:$0x1] }
 0x611   : > { %v11983_v14 = vrot.slane %v11959_v3, 11  ;;  %v6246_v46 = vrot.slane %v6244_v22, 4  ;;  %v6267_v11 = vrot.slane %v6265_v18, 4 }
 0x612   : > { %v5995_v32 = vsel %vm17150_vm11, %v5993_v13, %v5994_v38  ;;  %v11988_v13 = vrot.slane %v11974_v19, 11 }
 0x615   : > { %13890 = vmatmul.mubr.msk.bf16.gmra.mrb[60].mxu0 %vm995_vm2, %v11897_v24  ;;  %v11944_v24 = vcombine.low %v5950_v39, %v5953_v44  ;;  %v11966_v39 = vld [vmem:[%s15634_s17 + $0x234] sm:$0xf]  ;;  %v5992_v44 = vsel %vm17150_vm11, %v11941_v53, %v5991_v31  ;;  %v6269_v31 = vsel %vm17150_vm11, %v6267_v11, %v6268_v1  ;;  %v17467_v1 = vld [vmem:[%s18107_s5 + $0x3] ss:$0 sm:$0xff] }
 0x616   : > { %13893 = vmatprep.mubr.msk.bf16.mxu0 %vm995_vm2, %v11898_v58  ;;  %v11945_v58 = vcombine.low %v5957_v55, %v5960_v50  ;;  %v6251_v55 = vrot.slane %v11963_v54, 7  ;;  %v6245_v50 = vsel %vm17150_vm11, %v11983_v14, %v6244_v22  ;;  %v6258_v10 = vrot.slane %v11966_v39, 7  ;;  %v11976_v22 = vld [vmem:[%s15634_s17 + $0x28c] sm:$0x7]  ;;  %v11981_v39 = vld [vmem:[%s15634_s17 + $0x2c0] sm:$0xf] }
 0x617   : > { %v6282_v14 = vrot.slane %v11976_v22, 7 }
 0x618   : > { %v6253_v41 = vrot.slane %v6251_v55, 4  ;;  %v6260_v2 = vrot.slane %v6258_v10, 4  ;;  %v6259_v60 = vsel %vm17150_vm11, %v11985_v17, %v6258_v10  ;;  %v11982_v10 = vld [vmem:[%s15634_s17 + $0x2c4] sm:$0x7] }
 0x619   : > { %v6296_v17 = vrot.slane %v11982_v10, 7 }
 0x61d   : > { %13894 = vmatmul.mubr.msk.bf16.gmra.mrb[64].mxu0 %vm995_vm2, %v11899_v29  ;;  %v11930_v29 = vld [vmem:[%s15634_s17 + $0x164] sm:$0x7] }
 0x61e   : > { %13897 = vmatprep.mubr.msk.bf16.mxu0 %vm995_vm2, %v11900_v61  ;;  %v11946_v61 = vcombine.low %v5964_v40, %v5967_v9  ;;  %v5987_v34 = vrot.slane %v11930_v29, 7  ;;  %v6252_v40 = vsel %vm17150_vm11, %v11984_v0, %v6251_v55  ;;  %v11973_v29 = vld [vmem:[%s15634_s17 + $0x270] sm:$0x7] }
 0x61f   : > { %v6275_v45 = vrot.slane %v11973_v29, 7  ;;  %v12014_v29 = vld [vmem:[%s15634_s17 + $0x238] sm:$0xe] }
 0x620   : > { %v5988_v26 = vsel %vm17150_vm11, %v5986_v7, %v5987_v34  ;;  %v11987_v7 = vrot.slane %v11971_v35, 11  ;;  %v6274_v34 = vrot.slane %v6272_v8, 4 }
 0x621   : > { %v11949_v37 = vcombine.low %v5985_v42, %v5988_v26  ;;  %v6279_v42 = vrot.slane %v11975_v4, 7 }
 0x622   : > { %v6273_v26 = vsel %vm17150_vm11, %v11987_v7, %v6272_v8  ;;  %v6276_v49 = vsel %vm17150_vm11, %v6274_v34, %v6275_v45  ;;  %v6556_v34 = vrot.slane %v12013_v25, 5 }
 0x623   : > { %v11996_v53 = vcombine.low %v6273_v26, %v6276_v49  ;;  %v6281_v38 = vrot.slane %v6279_v42, 4 }
 0x625   : > { %13898 = vmatmul.mubr.msk.bf16.gmra.mrb[68].mxu0 %vm995_vm2, %v11901_v52  ;;  %v11961_v52 = vld [vmem:[%s15634_s17 + $0x200] sm:$0x7]  ;;  %v6283_v55 = vsel %vm17150_vm11, %v6281_v38, %v6282_v14  ;;  %v12017_v14 = vld [vmem:[%s15634_s17 + $0x254] sm:$0xe] }
 0x626   : > { %13903 = vmatprep.mubr.msk.bf16.mxu0 %vm995_vm2, %v11943_v27  ;;  %v11948_v27 = vcombine.low %v5978_v15, %v5981_v12  ;;  %v6247_v20 = vrot.slane %v11961_v52, 7  ;;  %v11978_v15 = vld [vmem:[%s15634_s17 + $0x2a4] sm:$0xf]  ;;  %v17409_v12 = vld [vmem:[%s18104_s2 + $0x1c] sm:$0x3] }
 0x627   : > { %v6286_v3 = vrot.slane %v11978_v15, 7  ;;  %v11977_v52 = vld [vmem:[%s15634_s17 + $0x2a0] sm:$0x8] }
 0x628   : > { %v6248_v30 = vsel %vm17150_vm11, %v6246_v46, %v6247_v20  ;;  %v11989_v46 = vrot.slane %v11977_v52, 11 }
 0x629   : > { %v11992_v33 = vcombine.low %v6245_v50, %v6248_v30  ;;  %v6288_v20 = vrot.slane %v6286_v3, 4  ;;  %v6293_v50 = vrot.slane %v11981_v39, 7 }
 0x62a   : > { %v6287_v30 = vsel %vm17150_vm11, %v11989_v46, %v6286_v3 }
 0x62d   : > { %13904 = vmatmul.mubr.msk.bf16.vlgmr.msra.gmra.mrb[56].mxu0 %vm995_vm2, %v11944_v24  ;;  %v11967_v24 = vld [vmem:[%s15634_s17 + $0x238] sm:$0x7] }
 0x62e   : > { %13920 = vmatpush3.bf16.msra.mxu0 %v6365_v43  ;;  %13907 = vmatprep.mubr.msk.bf16.mxu0 %vm995_vm2, %v11945_v58  ;;  %v11950_v58 = vcombine.low %v5992_v44, %v5995_v32  ;;  %v6254_v43 = vrot.slane %v11964_v57, 7  ;;  %v6261_v47 = vrot.slane %v11967_v24, 7  ;;  %v12009_v44 = vld [vmem:[%s15634_s17 + $0x204] sm:$0xf]  ;;  %v6280_v32 = vsel %vm17150_vm11, %v11988_v13, %v6279_v42  ;;  %v11980_v57 = vld [vmem:[%s15634_s17 + $0x2bc] sm:$0x8] }
 0x62f   : > { %14715 = vmatprep.subr.msk.bf16.mxu0 %vm1737_vm0, %v17336_v23  ;;  %v6266_v23 = vsel %vm17150_vm11, %v11986_v63, %v6265_v18  ;;  %v6546_v6 = vrot.slane %v12009_v44, 5  ;;  %v12008_v24 = vld [vmem:[%s15634_s17 + $0x200] sm:$0xe]  ;;  %v12016_v63 = vld [vmem:[%s15634_s17 + $0x240] sm:$0x1] }
 0x630   : > { %v6255_v9 = vsel %vm17150_vm11, %v6253_v41, %v6254_v43  ;;  %v6262_v21 = vsel %vm17150_vm11, %v6260_v2, %v6261_v47  ;;  %v11990_v41 = vrot.slane %v11980_v57, 11  ;;  %v6295_v43 = vrot.slane %v6293_v50, 4  ;;  %v12012_v2 = vld [vmem:[%s15634_s17 + $0x220] sm:$0xf]  ;;  %v12019_v44 = vld [vmem:[%s15634_s17 + $0x25c] sm:$0x1] }
 0x631   : > { %v12032_v47 = vrot.slane %v12008_v24, 9  ;;  %v6548_v48 = vrot.slane %v6546_v6, 4  ;;  %v6553_v18 = vrot.slane %v12012_v2, 5  ;;  %v6563_v19 = vrot.slane %v12016_v63, 5 }
 0x632   : > { %v6969_v24 = vsel %vm1737_vm0, %v17409_v12, 0 }
 0x633   : > { %v6547_v8 = vsel %vm15636_vm6, %v12032_v47, %v6546_v6  ;;  %v6555_v7 = vrot.slane %v6553_v18, 4 }
 0x635   : > { %13908 = vmatmul.mubr.msk.bf16.gmra.mrb[60].mxu0 %vm995_vm2, %v11946_v61  ;;  %v11993_v61 = vcombine.low %v6252_v40, %v6255_v9  ;;  %v12015_v40 = vld [vmem:[%s15634_s17 + $0x23c] sm:$0xf]  ;;  %v6557_v38 = vsel %vm15636_vm6, %v6555_v7, %v6556_v34  ;;  %v12023_v7 = vld [vmem:[%s15634_s17 + $0x28c] sm:$0xe] }
 0x636   : > { %13911 = vmatprep.mubr.msk.bf16.mxu0 %vm995_vm2, %v11947_v16  ;;  %v11994_v16 = vcombine.low %v6259_v60, %v6262_v21  ;;  %v12011_v9 = vld [vmem:[%s15634_s17 + $0x21c] sm:$0xe]  ;;  %v6294_v60 = vsel %vm17150_vm11, %v11990_v41, %v6293_v50  ;;  %v6297_v21 = vsel %vm17150_vm11, %v6295_v43, %v6296_v17  ;;  %v6570_v43 = vrot.slane %v12019_v44, 5 }
 0x63d   : > { %13912 = vmatmul.mubr.msk.bf16.gmra.mrb[64].mxu0 %vm995_vm2, %v11948_v27  ;;  %v11979_v27 = vld [vmem:[%s15634_s17 + $0x2a8] sm:$0x7] }
 0x63e   : > { %13915 = vmatprep.mubr.msk.bf16.mxu0 %vm995_vm2, %v11949_v37  ;;  %v11995_v37 = vcombine.low %v6266_v23, %v6269_v31  ;;  %v6289_v54 = vrot.slane %v11979_v27, 7  ;;  %v12034_v23 = vrot.slane %v12014_v29, 9  ;;  %v12018_v31 = vld [vmem:[%s15634_s17 + $0x258] sm:$0xf] }
 0x63f   : > { %v6567_v46 = vrot.slane %v12018_v31, 5  ;;  %v12026_v31 = vld [vmem:[%s15634_s17 + $0x2a8] sm:$0xe] }
 0x640   : > { %v6290_v56 = vsel %vm17150_vm11, %v6288_v20, %v6289_v54 }
 0x641   : > { %v11998_v0 = vcombine.low %v6287_v30, %v6290_v56  ;;  %v12022_v30 = vld [vmem:[%s15634_s17 + $0x278] sm:$0x1]  ;;  %v6569_v41 = vrot.slane %v6567_v46, 4 }
 0x645   : > { %13916 = vmatmul.mubr.msk.bf16.gmra.mrb[68].mxu0 %vm995_vm2, %v11950_v58  ;;  %v12010_v58 = vld [vmem:[%s15634_s17 + $0x208] sm:$0x1] }
 0x646   : > { %13921 = vmatprep.mubr.msk.bf16.mxu0 %vm995_vm2, %v11992_v33  ;;  %v11997_v33 = vcombine.low %v6280_v32, %v6283_v55  ;;  %v6549_v51 = vrot.slane %v12010_v58, 5  ;;  %v12020_v32 = vld [vmem:[%s15634_s17 + $0x270] sm:$0xe]  ;;  %v12035_v58 = vrot.slane %v12017_v14, 9 }
 0x648   : > { %v6550_v35 = vsel %vm15636_vm6, %v6548_v48, %v6549_v51  ;;  %v12036_v51 = vrot.slane %v12020_v32, 9  ;;  %v6568_v29 = vsel %vm15636_vm6, %v12035_v58, %v6567_v46  ;;  %v12030_v32 = vld [vmem:[%s15634_s17 + $0x2c8] sm:$0xf] }
 0x649   : > { %v12041_v15 = vcombine.low %v6547_v8, %v6550_v35  ;;  %v12058_v58 = vld [vmem:[%s15634_s17 + $0x208] sm:$0xf] }
 0x64d   : > { %13922 = vmatmul.mubr.msk.bf16.vlgmr.msra.gmra.mrb[56].mxu0 %vm995_vm2, %v11993_v61  ;;  %v6560_v61 = vrot.slane %v12015_v40, 5  ;;  %v6577_v40 = vrot.slane %v12022_v30, 5 }
 0x64e   : > { %13938 = vmatpush3.bf16.msra.mxu0 %v6667_v59  ;;  %13925 = vmatprep.mubr.msk.bf16.mxu0 %vm995_vm2, %v11994_v16  ;;  %v12033_v16 = vrot.slane %v12011_v9, 9  ;;  %v11999_v59 = vcombine.low %v6294_v60, %v6297_v21  ;;  %v12024_v9 = vld [vmem:[%s15634_s17 + $0x290] sm:$0xf] }
 0x64f   : > { %14716 = vmatprep.subr.msk.bf16.mxu0 %vm1737_vm0, %v17409_v12  ;;  %v6562_v49 = vrot.slane %v6560_v61, 4  ;;  %v6561_v39 = vsel %vm15636_vm6, %v12034_v23, %v6560_v61  ;;  %v12027_v61 = vld [vmem:[%s15634_s17 + $0x2ac] sm:$0xf]  ;;  %v6581_v34 = vrot.slane %v12024_v9, 5  ;;  %v12025_v23 = vld [vmem:[%s15634_s17 + $0x294] sm:$0x1] }
 0x650   : > { %v6554_v27 = vsel %vm15636_vm6, %v12033_v16, %v6553_v18  ;;  %v17510_v16 = vld [vmem:[%s18104_s2 + $0x1e] sm:$0x3]  ;;  %v12057_v9 = vld [vmem:[%s15634_s17 + $0x204] sm:$0x8] }
 0x651   : > { %v6564_v50 = vsel %vm15636_vm6, %v6562_v49, %v6563_v19  ;;  %v12042_v6 = vcombine.low %v6554_v27, %v6557_v38  ;;  %v12028_v49 = vld [vmem:[%s15634_s17 + $0x2b0] sm:$0x1]  ;;  %v6588_v19 = vrot.slane %v12027_v61, 5  ;;  %v12037_v27 = vrot.slane %v12023_v7, 9 }
 0x652   : > { %v14207_v11 = vpop.f32.mrb[16].mxu1  ;;  %v12043_v48 = vcombine.low %v6561_v39, %v6564_v50  ;;  %v6584_v38 = vrot.slane %v12025_v23, 5  ;;  %v12038_v39 = vrot.slane %v12026_v31, 9  ;;  %v6591_v44 = vrot.slane %v12028_v49, 5 }
 0x653   : > { %v10849_v45 = vmul.f32 %v14207_v11, %v17456_v28  ;;  %v10731_v4 = vpop.f32.mrb[17].mxu1  ;;  %v6590_v30 = vrot.slane %v6588_v19, 4  ;;  %v12081_v23 = vrot.slane %v12057_v9, 11  ;;  %v12067_v9 = vld [vmem:[%s15634_s17 + $0x25c] sm:$0xf] }
 0x654   : > { %v10847_v42 = vmul.f32 %v17456_v28, %v10731_v4  ;;  %v14208_v26 = vpop.f32.mrb[18].mxu1 }
 0x655   : > { %13926 = vmatmul.mubr.msk.bf16.gmra.mrb[60].mxu0 %vm995_vm2, %v11995_v37  ;;  %v10870_v22 = vadd.f32 %v17467_v1, %v10849_v45  ;;  %v10850_v3 = vmul.f32 %v14208_v26, %v17456_v28  ;;  %v10734_v52 = vpop.f32.mrb[19].mxu1  ;;  %v12021_v37 = vld [vmem:[%s15634_s17 + $0x274] sm:$0xf] }
 0x656   : > { %13929 = vmatprep.mubr.msk.bf16.mxu0 %vm995_vm2, %v11996_v53  ;;  %v10868_v53 = vadd.f32 %v17467_v1, %v10847_v42  ;;  %v10848_v13 = vmul.f32 %v17456_v28, %v10734_v52  ;;  %v6574_v56 = vrot.slane %v12021_v37, 5 }
 0x657   : > { %v10886_v20 = vmax.f32 %v10870_v22, 0.0  ;;  %v10871_v54 = vadd.f32 %v17467_v1, %v10850_v3 }
 0x658   : > { %v10869_v55 = vadd.f32 %v17467_v1, %v10848_v13  ;;  %v10884_v57 = vmax.f32 %v10868_v53, 0.0  ;;  %v6576_v12 = vrot.slane %v6574_v56, 4  ;;  %v6583_v13 = vrot.slane %v6581_v34, 4 }
 0x659   : > { %v10887_v10 = vmax.f32 %v10871_v54, 0.0 }
 0x65a   : > { %v6578_v26 = vsel %vm15636_vm6, %v6576_v12, %v6577_v40  ;;  %v12031_v40 = vld [vmem:[%s15634_s17 + $0x2cc] sm:$0x1] }
 0x65b   : > { %v17495_v17 = vpack.c.bf16 %v10887_v10, %v10886_v20  ;;  %v12059_v12 = vld [vmem:[%s15634_s17 + $0x20c] sm:$0x7]  ;;  %v6598_v7 = vrot.slane %v12031_v40, 5 }
 0x65c   : > { %v6851_v31 = vrot.slane %v12059_v12, 7 }
 0x65d   : > { %13930 = vmatmul.mubr.msk.bf16.gmra.mrb[64].mxu0 %vm995_vm2, %v11997_v33  ;;  %v10885_v33 = vmax.f32 %v10869_v55, 0.0 }
 0x65e   : > { %13933 = vmatprep.mubr.msk.bf16.mxu0 %vm995_vm2, %v11998_v0  ;;  %v14211_v0 = vpop.f32.mrb[20].mxu1 }
 0x65f   : > { %v10853_v2 = vmul.f32 %v14211_v0, %v17456_v28  ;;  %v10747_v47 = vpop.f32.mrb[21].mxu1  ;;  %v17502_v35 = vpack.c.bf16 %v10885_v33, %v10884_v57 }
 0x660   : > { %v10851_v18 = vmul.f32 %v17456_v28, %v10747_v47  ;;  %v14212_v60 = vpop.f32.mrb[22].mxu1 }
 0x661   : > { %v10874_v21 = vadd.f32 %v17467_v1, %v10853_v2  ;;  %v10854_v25 = vmul.f32 %v14212_v60, %v17456_v28  ;;  %v10750_v8 = vpop.f32.mrb[23].mxu1  ;;  %v6595_v2 = vrot.slane %v12030_v32, 5  ;;  %v6592_v60 = vsel %vm15636_vm6, %v6590_v30, %v6591_v44  ;;  %v12062_v30 = vld [vmem:[%s15634_s17 + $0x228] sm:$0x7] }
 0x662   : > { %v10872_v63 = vadd.f32 %v17467_v1, %v10851_v18  ;;  %v10852_v11 = vmul.f32 %v17456_v28, %v10750_v8  ;;  %v14215_v53 = vpop.f32.mrb[24].mxu1 }
 0x663   : > { %v10890_v45 = vmax.f32 %v10874_v21, 0.0  ;;  %v10875_v4 = vadd.f32 %v17467_v1, %v10854_v25  ;;  %v10857_v14 = vmul.f32 %v14215_v53, %v17456_v28  ;;  %v10763_v46 = vpop.f32.mrb[25].mxu1  ;;  %v6848_v21 = vrot.slane %v12058_v58, 7 }
 0x664   : > { %v10873_v42 = vadd.f32 %v17467_v1, %v10852_v11  ;;  %v10888_v22 = vmax.f32 %v10872_v63, 0.0  ;;  %v10855_v55 = vmul.f32 %v17456_v28, %v10763_v46  ;;  %v14216_v50 = vpop.f32.mrb[26].mxu1 }
 0x665   : > { %13934 = vmatmul.mubr.msk.bf16.gmra.mrb[68].mxu0 %vm995_vm2, %v11999_v59  ;;  %v6571_v59 = vsel %vm15636_vm6, %v6569_v41, %v6570_v43  ;;  %v10891_v3 = vmax.f32 %v10875_v4, 0.0  ;;  %v10858_v57 = vmul.f32 %v14216_v50, %v17456_v28  ;;  %v10766_v10 = vpop.f32.mrb[27].mxu1  ;;  %v6585_v41 = vsel %vm15636_vm6, %v6583_v13, %v6584_v38  ;;  %v12029_v43 = vld [vmem:[%s15634_s17 + $0x2c4] sm:$0xe] }
 0x666   : > { %13939 = vmatprep.mubr.msk.bf16.mxu0 %vm995_vm2, %v12041_v15  ;;  %v6575_v15 = vsel %vm15636_vm6, %v12036_v51, %v6574_v56  ;;  %v12044_v52 = vcombine.low %v6568_v29, %v6571_v59  ;;  %v10889_v37 = vmax.f32 %v10873_v42, 0.0  ;;  %v10878_v56 = vadd.f32 %v17467_v1, %v10857_v14 }
 0x667   : > { %v17531_v20 = vpack.c.bf16 %v10891_v3, %v10890_v45  ;;  %v12045_v54 = vcombine.low %v6575_v15, %v6578_v26  ;;  %v10876_v33 = vadd.f32 %v17467_v1, %v10855_v55  ;;  %v10856_v0 = vmul.f32 %v17456_v28, %v10766_v10  ;;  %v12063_v10 = vld [vmem:[%s15634_s17 + $0x23c] sm:$0x8] }
 0x668   : > { %v10894_v47 = vmax.f32 %v10878_v56, 0.0  ;;  %v6589_v51 = vsel %vm15636_vm6, %v12038_v39, %v6588_v19  ;;  %v12039_v61 = vrot.slane %v12029_v43, 9  ;;  %v6597_v59 = vrot.slane %v6595_v2, 4  ;;  %v12061_v19 = vld [vmem:[%s15634_s17 + $0x224] sm:$0xf] }
 0x669   : > { %v10877_v18 = vadd.f32 %v17467_v1, %v10856_v0  ;;  %v10892_v25 = vmax.f32 %v10876_v33, 0.0  ;;  %v12047_v15 = vcombine.low %v6589_v51, %v6592_v60  ;;  %v6850_v49 = vrot.slane %v6848_v21, 4  ;;  %v12060_v39 = vld [vmem:[%s15634_s17 + $0x220] sm:$0x8] }
 0x66a   : > { %v14219_v11 = vpop.f32.mrb[28].mxu1  ;;  %v6596_v38 = vsel %vm15636_vm6, %v12039_v61, %v6595_v2  ;;  %v6855_v44 = vrot.slane %v12061_v19, 7  ;;  %v6849_v55 = vsel %vm17150_vm11, %v12081_v23, %v6848_v21  ;;  %v12082_v0 = vrot.slane %v12060_v39, 11  ;;  %v12068_v61 = vld [vmem:[%s15634_s17 + $0x260] sm:$0x7] }
 0x66b   : > { %v10893_v63 = vmax.f32 %v10877_v18, 0.0  ;;  %v10779_v45 = vpop.f32.mrb[29].mxu1  ;;  %v6852_v50 = vsel %vm17150_vm11, %v6850_v49, %v6851_v31  ;;  %v6858_v2 = vrot.slane %v12062_v30, 7  ;;  %v12070_v18 = vld [vmem:[%s15634_s17 + $0x278] sm:$0xf]  ;;  %v6869_v21 = vrot.slane %v12067_v9, 7 }
 0x66c   : > { %v10859_v42 = vmul.f32 %v17456_v28, %v10779_v45  ;;  %v14220_v26 = vpop.f32.mrb[30].mxu1  ;;  %v12090_v43 = vcombine.low %v6849_v55, %v6852_v50  ;;  %v6856_v60 = vsel %vm17150_vm11, %v12082_v0, %v6855_v44  ;;  %v6872_v23 = vrot.slane %v12068_v61, 7  ;;  %v12073_v19 = vld [vmem:[%s15634_s17 + $0x294] sm:$0xf]  ;;  %v12110_v9 = vld [vmem:[%s15634_s17 + $0x350] sm:$0x7] }
 0x66d   : > { %13940 = vmatmul.mubr.msk.bf16.vlgmr.msra.gmra.mrb[56].mxu0 %vm995_vm2, %v12042_v6  ;;  %v17537_v6 = vpack.c.bf16 %v10889_v37, %v10888_v22  ;;  %v10862_v3 = vmul.f32 %v14220_v26, %v17456_v28  ;;  %v12064_v37 = vld [vmem:[%s15634_s17 + $0x240] sm:$0xf]  ;;  %v7275_v31 = vsel %vm1737_vm0, %v17510_v16, 0  ;;  %v12077_v39 = vld [vmem:[%s15634_s17 + $0x2b4] sm:$0x7]  ;;  %v7157_v61 = vrot.slane %v12110_v9, 7 }
 0x66e   : > { %13956 = vmatpush3.bf16.msra.mxu0 %v6969_v24  ;;  %13943 = vmatprep.mubr.msk.bf16.mxu0 %vm995_vm2, %v12043_v48  ;;  %v6582_v24 = vsel %vm15636_vm6, %v12037_v27, %v6581_v34  ;;  %v10879_v48 = vadd.f32 %v17467_v1, %v10858_v57  ;;  %v10861_v34 = vmul.f32 %v14219_v11, %v17456_v28  ;;  %v6862_v56 = vrot.slane %v12064_v37, 7  ;;  %v12069_v11 = vld [vmem:[%s15634_s17 + $0x274] sm:$0x8]  ;;  %v17686_v9 = vld [vmem:[%s18104_s2 + $0x22] sm:$0x3] }
 0x66f   : > { %14717 = vmatprep.subr.msk.bf16.mxu0 %vm1737_vm0, %v17510_v16  ;;  %v12046_v29 = vcombine.low %v6582_v24, %v6585_v41  ;;  %v17565_v27 = vpack.c.bf16 %v10893_v63, %v10892_v25  ;;  %v10880_v53 = vadd.f32 %v17467_v1, %v10859_v42  ;;  %v10883_v46 = vadd.f32 %v17467_v1, %v10862_v3  ;;  %v12065_v24 = vld [vmem:[%s15634_s17 + $0x244] sm:$0x7]  ;;  %v17613_v3 = vld [vmem:[%s18104_s2 + $0x20] sm:$0x3] }
 0x670   : > { %v10895_v8 = vmax.f32 %v10879_v48, 0.0  ;;  %v10882_v22 = vadd.f32 %v17467_v1, %v10861_v34  ;;  %v12083_v48 = vrot.slane %v12063_v10, 11  ;;  %v6864_v51 = vrot.slane %v6862_v56, 4  ;;  %v12079_v10 = vld [vmem:[%s15634_s17 + $0x2cc] sm:$0xf] }
 0x671   : > { %v10896_v32 = vmax.f32 %v10880_v53, 0.0  ;;  %v10899_v57 = vmax.f32 %v10883_v46, 0.0  ;;  %v6865_v40 = vrot.slane %v12065_v24, 7  ;;  %v6876_v63 = vrot.slane %v12070_v18, 7  ;;  %v12109_v24 = vld [vmem:[%s15634_s17 + $0x34c] sm:$0xf] }
 0x672   : > { %v17559_v4 = vpack.c.bf16 %v10895_v8, %v10894_v47  ;;  %v10898_v14 = vmax.f32 %v10882_v22, 0.0  ;;  %v6863_v25 = vsel %vm17150_vm11, %v12083_v48, %v6862_v56  ;;  %v12085_v42 = vrot.slane %v12069_v11, 11  ;;  %v12076_v22 = vld [vmem:[%s15634_s17 + $0x2b0] sm:$0xf]  ;;  %v12115_v11 = vld [vmem:[%s15634_s17 + $0x384] sm:$0xf] }
 0x673   : > { %v6866_v8 = vsel %vm17150_vm11, %v6864_v51, %v6865_v40  ;;  %v6878_v26 = vrot.slane %v6876_v63, 4  ;;  %v6883_v37 = vrot.slane %v12073_v19, 7  ;;  %v6890_v46 = vrot.slane %v12076_v22, 7  ;;  %v12080_v48 = vld [vmem:[%s15634_s17 + $0x2d0] sm:$0x7] }
 0x674   : > { %v17586_v41 = vpack.c.bf16 %v10899_v57, %v10898_v14  ;;  %v12092_v34 = vcombine.low %v6863_v25, %v6866_v8  ;;  %v6877_v53 = vsel %vm17150_vm11, %v12085_v42, %v6876_v63  ;;  %v12074_v14 = vld [vmem:[%s15634_s17 + $0x298] sm:$0x7]  ;;  %v6893_v57 = vrot.slane %v12077_v39, 7  ;;  %v12108_v40 = vld [vmem:[%s15634_s17 + $0x348] sm:$0x8] }
 0x675   : > { %13944 = vmatmul.mubr.msk.bf16.gmra.mrb[60].mxu0 %vm995_vm2, %v12044_v52  ;;  %v10782_v52 = vpop.f32.mrb[31].mxu1  ;;  %v6885_v55 = vrot.slane %v6883_v37, 4  ;;  %v6886_v50 = vrot.slane %v12074_v14, 7  ;;  %v6892_v56 = vrot.slane %v6890_v46, 4  ;;  %v6897_v0 = vrot.slane %v12079_v10, 7 }
 0x676   : > { %13947 = vmatprep.mubr.msk.bf16.mxu0 %vm995_vm2, %v12045_v54  ;;  %v10860_v13 = vmul.f32 %v17456_v28, %v10782_v52  ;;  %v6599_v54 = vsel %vm15636_vm6, %v6597_v59, %v6598_v7  ;;  %v12071_v59 = vld [vmem:[%s15634_s17 + $0x27c] sm:$0x7]  ;;  %v7154_v51 = vrot.slane %v12109_v24, 7  ;;  %v6900_v25 = vrot.slane %v12080_v48, 7  ;;  %v12112_v63 = vld [vmem:[%s15634_s17 + $0x368] sm:$0xf] }
 0x677   : > { %v12048_v33 = vcombine.low %v6596_v38, %v6599_v54  ;;  %v6879_v49 = vrot.slane %v12071_v59, 7  ;;  %v12072_v38 = vld [vmem:[%s15634_s17 + $0x290] sm:$0x8]  ;;  %v12075_v54 = vld [vmem:[%s15634_s17 + $0x2ac] sm:$0x8]  ;;  %v12132_v8 = vrot.slane %v12108_v40, 11 }
 0x678   : > { %v10881_v28 = vadd.f32 %v17467_v1, %v10860_v13  ;;  %v6857_v1 = vrot.slane %v6855_v44, 4  ;;  %v12087_v30 = vrot.slane %v12075_v54, 11  ;;  %v7168_v42 = vrot.slane %v12115_v11, 7  ;;  %v12118_v14 = vld [vmem:[%s15634_s17 + $0x3a0] sm:$0xf] }
 0x679   : > { %v6880_v13 = vsel %vm17150_vm11, %v6878_v26, %v6879_v49  ;;  %v12114_v26 = vld [vmem:[%s15634_s17 + $0x380] sm:$0x8]  ;;  %v12116_v49 = vld [vmem:[%s15634_s17 + $0x388] sm:$0x7]  ;;  %v12127_v40 = vld [vmem:[%s15634_s17 + $0x3f4] sm:$0xf] }
 0x67a   : > { %v10897_v58 = vmax.f32 %v10881_v28, 0.0  ;;  %v6859_v12 = vsel %vm17150_vm11, %v6857_v1, %v6858_v2  ;;  %v12086_v28 = vrot.slane %v12072_v38, 11  ;;  %v6894_v1 = vsel %vm17150_vm11, %v6892_v56, %v6893_v57  ;;  %v12078_v2 = vld [vmem:[%s15634_s17 + $0x2c8] sm:$0x8]  ;;  %v12120_v56 = vld [vmem:[%s15634_s17 + $0x3b8] sm:$0x8] }
 0x67b   : > { %v12091_v7 = vcombine.low %v6856_v60, %v6859_v12  ;;  %v12088_v12 = vrot.slane %v12078_v2, 11  ;;  %v7171_v38 = vrot.slane %v12116_v49, 7  ;;  %v12122_v57 = vld [vmem:[%s15634_s17 + $0x3c0] sm:$0x7] }
 0x67c   : > { %v17588_v47 = vpack.c.bf16 %v10897_v58, %v10896_v32  ;;  %v12094_v32 = vcombine.low %v6877_v53, %v6880_v13  ;;  %v6884_v58 = vsel %vm17150_vm11, %v12086_v28, %v6883_v37  ;;  %v12134_v53 = vrot.slane %v12114_v26, 11  ;;  %v12158_v26 = vld [vmem:[%s15634_s17 + $0x354] sm:$0xf] }
 0x67d   : > { %13948 = vmatmul.mubr.msk.bf16.gmra.mrb[64].mxu0 %vm995_vm2, %v12046_v29  ;;  %v12066_v29 = vld [vmem:[%s15634_s17 + $0x258] sm:$0x8]  ;;  %v6898_v59 = vsel %vm17150_vm11, %v12088_v12, %v6897_v0  ;;  %v7170_v13 = vrot.slane %v7168_v42, 4  ;;  %v7185_v48 = vrot.slane %v12122_v57, 7 }
 0x67e   : > { %13951 = vmatprep.mubr.msk.bf16.mxu0 %vm995_vm2, %v12047_v15  ;;  %v12084_v45 = vrot.slane %v12066_v29, 11  ;;  %v6871_v15 = vrot.slane %v6869_v21, 4  ;;  %v7156_v29 = vrot.slane %v7154_v51, 4 }
 0x67f   : > { %v7172_v28 = vsel %vm17150_vm11, %v7170_v13, %v7171_v38  ;;  %v7456_v13 = vrot.slane %v12158_v26, 5  ;;  %v12157_v38 = vld [vmem:[%s15634_s17 + $0x350] sm:$0xe]  ;;  %v7879_v26 = vsel %vm1737_vm0, %v17686_v9, 0 }
 0x680   : > { %v6870_v16 = vsel %vm17150_vm11, %v12084_v45, %v6869_v21  ;;  %v6873_v52 = vsel %vm17150_vm11, %v6871_v15, %v6872_v23  ;;  %v6899_v21 = vrot.slane %v6897_v0, 4  ;;  %v7155_v45 = vsel %vm17150_vm11, %v12132_v8, %v7154_v51  ;;  %v12111_v23 = vld [vmem:[%s15634_s17 + $0x364] sm:$0x8]  ;;  %v12124_v51 = vld [vmem:[%s15634_s17 + $0x3d8] sm:$0xf] }
 0x681   : > { %v12093_v44 = vcombine.low %v6870_v16, %v6873_v52  ;;  %v7158_v15 = vsel %vm17150_vm11, %v7156_v29, %v7157_v61  ;;  %v12133_v16 = vrot.slane %v12111_v23, 11  ;;  %v12125_v8 = vld [vmem:[%s15634_s17 + $0x3dc] sm:$0x7]  ;;  %v7196_v29 = vrot.slane %v12127_v40, 7  ;;  %v12126_v61 = vld [vmem:[%s15634_s17 + $0x3f0] sm:$0x8] }
 0x682   : > { %v12141_v22 = vcombine.low %v7155_v45, %v7158_v15  ;;  %v7192_v45 = vrot.slane %v12125_v8, 7  ;;  %v12138_v15 = vrot.slane %v12126_v61, 11  ;;  %v12167_v8 = vld [vmem:[%s15634_s17 + $0x3a8] sm:$0xf] }
 0x683   : > { %v7198_v23 = vrot.slane %v7196_v29, 4 }
 0x685   : > { %13952 = vmatmul.mubr.msk.bf16.gmra.mrb[68].mxu0 %vm995_vm2, %v12048_v33  ;;  %v6887_v33 = vsel %vm17150_vm11, %v6885_v55, %v6886_v50  ;;  %v12117_v55 = vld [vmem:[%s15634_s17 + $0x39c] sm:$0x8]  ;;  %v12119_v50 = vld [vmem:[%s15634_s17 + $0x3a4] sm:$0x7] }
 0x686   : > { %13957 = vmatprep.mubr.msk.bf16.mxu0 %vm995_vm2, %v12090_v43  ;;  %v6891_v43 = vsel %vm17150_vm11, %v12087_v30, %v6890_v46  ;;  %v12095_v18 = vcombine.low %v6884_v58, %v6887_v33  ;;  %v12121_v46 = vld [vmem:[%s15634_s17 + $0x3bc] sm:$0xf]  ;;  %v12135_v58 = vrot.slane %v12117_v55, 11  ;;  %v7178_v0 = vrot.slane %v12119_v50, 7 }
 0x687   : > { %v12096_v60 = vcombine.low %v6891_v43, %v6894_v1  ;;  %v7182_v30 = vrot.slane %v12121_v46, 7  ;;  %v7577_v43 = vsel %vm1737_vm0, %v17613_v3, 0  ;;  %v12136_v1 = vrot.slane %v12120_v56, 11  ;;  %v12164_v56 = vld [vmem:[%s15634_s17 + $0x38c] sm:$0xf] }
 0x688   : > { %v7458_v55 = vrot.slane %v7456_v13, 4 }
 0x689   : > { %v7184_v2 = vrot.slane %v7182_v30, 4  ;;  %v7183_v12 = vsel %vm17150_vm11, %v12136_v1, %v7182_v30  ;;  %v12161_v30 = vld [vmem:[%s15634_s17 + $0x370] sm:$0xf]  ;;  %v7470_v1 = vrot.slane %v12164_v56, 5 }
 0x68d   : > { %13958 = vmatmul.mubr.msk.bf16.vlgmr.msra.gmra.mrb[56].mxu0 %vm995_vm2, %v12091_v7  ;;  %v6901_v7 = vsel %vm17150_vm11, %v6899_v21, %v6900_v25  ;;  %v7186_v21 = vsel %vm17150_vm11, %v7184_v2, %v7185_v48  ;;  %v12123_v25 = vld [vmem:[%s15634_s17 + $0x3d4] sm:$0x8]  ;;  %v12163_v2 = vld [vmem:[%s15634_s17 + $0x388] sm:$0xe]  ;;  %v12165_v48 = vld [vmem:[%s15634_s17 + $0x390] sm:$0x1] }
 0x68e   : > { %13974 = vmatpush3.bf16.msra.mxu0 %v7275_v31  ;;  %13961 = vmatprep.mubr.msk.bf16.mxu0 %vm995_vm2, %v12092_v34  ;;  %v7161_v34 = vrot.slane %v12112_v63, 7  ;;  %v12113_v31 = vld [vmem:[%s15634_s17 + $0x36c] sm:$0x7]  ;;  %v12097_v19 = vcombine.low %v6898_v59, %v6901_v7  ;;  %v12128_v63 = vld [vmem:[%s15634_s17 + $0x3f8] sm:$0x7]  ;;  %v12145_v59 = vcombine.low %v7183_v12, %v7186_v21  ;;  %v12137_v7 = vrot.slane %v12123_v25, 11 }
 0x68f   : > { %14718 = vmatprep.subr.msk.bf16.mxu0 %vm1737_vm0, %v17613_v3  ;;  %v7164_v37 = vrot.slane %v12113_v31, 7  ;;  %v7199_v31 = vrot.slane %v12128_v63, 7  ;;  %v12183_v12 = vrot.slane %v12163_v2, 9  ;;  %v7472_v21 = vrot.slane %v7470_v1, 4  ;;  %v12207_v2 = vld [vmem:[%s15634_s17 + $0x358] sm:$0xf] }
 0x690   : > { %v7163_v52 = vrot.slane %v7161_v34, 4  ;;  %v7162_v54 = vsel %vm17150_vm11, %v12133_v16, %v7161_v34  ;;  %v7197_v16 = vsel %vm17150_vm11, %v12138_v15, %v7196_v29  ;;  %v7473_v25 = vrot.slane %v12165_v48, 5  ;;  %v12170_v29 = vld [vmem:[%s15634_s17 + $0x3c4] sm:$0xf] }
 0x691   : > { %v7484_v15 = vrot.slane %v12170_v29, 5 }
 0x692   : > { %v7165_v39 = vsel %vm17150_vm11, %v7163_v52, %v7164_v37  ;;  %v7200_v52 = vsel %vm17150_vm11, %v7198_v23, %v7199_v31  ;;  %v12129_v37 = vld [vmem:[%s15634_s17 + $0x40c] sm:$0x8]  ;;  %v12169_v23 = vld [vmem:[%s15634_s17 + $0x3c0] sm:$0xe]  ;;  %v12171_v31 = vld [vmem:[%s15634_s17 + $0x3c8] sm:$0x1] }
 0x693   : > { %v12142_v10 = vcombine.low %v7162_v54, %v7165_v39  ;;  %v12147_v54 = vcombine.low %v7197_v16, %v7200_v52  ;;  %v12139_v39 = vrot.slane %v12129_v37, 11  ;;  %v12185_v52 = vrot.slane %v12169_v23, 9  ;;  %v12213_v23 = vld [vmem:[%s15634_s17 + $0x390] sm:$0xf] }
 0x694   : > { %v7486_v37 = vrot.slane %v7484_v15, 4 }
 0x695   : > { %13962 = vmatmul.mubr.msk.bf16.gmra.mrb[60].mxu0 %vm995_vm2, %v12093_v44  ;;  %v7175_v44 = vrot.slane %v12118_v14, 7  ;;  %v12159_v14 = vld [vmem:[%s15634_s17 + $0x358] sm:$0x1] }
 0x696   : > { %13965 = vmatprep.mubr.msk.bf16.mxu0 %vm995_vm2, %v12094_v32  ;;  %v7169_v32 = vsel %vm17150_vm11, %v12134_v53, %v7168_v42  ;;  %v12130_v42 = vld [vmem:[%s15634_s17 + $0x410] sm:$0xf]  ;;  %v12131_v53 = vld [vmem:[%s15634_s17 + $0x414] sm:$0x7]  ;;  %v7459_v50 = vrot.slane %v12159_v14, 5 }
 0x697   : > { %v12143_v24 = vcombine.low %v7169_v32, %v7172_v28  ;;  %v7177_v33 = vrot.slane %v7175_v44, 4  ;;  %v7176_v3 = vsel %vm17150_vm11, %v12135_v58, %v7175_v44  ;;  %v7206_v32 = vrot.slane %v12131_v53, 7  ;;  %v12176_v14 = vld [vmem:[%s15634_s17 + $0x3fc] sm:$0xf] }
 0x698   : > { %v12181_v28 = vrot.slane %v12157_v38, 9  ;;  %v7487_v53 = vrot.slane %v12171_v31, 5  ;;  %v17758_v38 = vld [vmem:[%s18105_s3 + $0x80] sm:$0xff]  }
 0x69a   : > { %v7457_v58 = vsel %vm15636_vm6, %v12181_v28, %v7456_v13  ;;  %v12173_v13 = vld [vmem:[%s15634_s17 + $0x3e0] sm:$0xf]  ;;  %v12174_v28 = vld [vmem:[%s15634_s17 + $0x3e4] sm:$0x1] }
 0x69d   : > { %13966 = vmatmul.mubr.msk.bf16.gmra.mrb[64].mxu0 %vm995_vm2, %v12095_v18  ;;  %v7179_v18 = vsel %vm17150_vm11, %v7177_v33, %v7178_v0  ;;  %v7460_v33 = vsel %vm15636_vm6, %v7458_v55, %v7459_v50  ;;  %v12160_v0 = vld [vmem:[%s15634_s17 + $0x36c] sm:$0xe]  ;;  %v7498_v55 = vrot.slane %v12176_v14, 5  ;;  %v12175_v50 = vld [vmem:[%s15634_s17 + $0x3f8] sm:$0xe] }
 0x69e   : > { %13969 = vmatprep.mubr.msk.bf16.mxu0 %vm995_vm2, %v12096_v60  ;;  %v7189_v60 = vrot.slane %v12124_v51, 7  ;;  %v12144_v11 = vcombine.low %v7176_v3, %v7179_v18  ;;  %v12190_v40 = vcombine.low %v7457_v58, %v7460_v33  ;;  %v12182_v3 = vrot.slane %v12160_v0, 9 }
 0x69f   : > { %v7494_v58 = vrot.slane %v12174_v28, 5  ;;  %v12187_v33 = vrot.slane %v12175_v50, 9  ;;  %v7500_v0 = vrot.slane %v7498_v55, 4  ;;  %v12219_v28 = vld [vmem:[%s15634_s17 + $0x3c8] sm:$0xf] }
 0x6a0   : > { %v7191_v34 = vrot.slane %v7189_v60, 4  ;;  %v7190_v49 = vsel %vm17150_vm11, %v12137_v7, %v7189_v60  ;;  %v7474_v7 = vsel %vm15636_vm6, %v7472_v21, %v7473_v25  ;;  %v7758_v21 = vrot.slane %v12207_v2, 7  ;;  %v12206_v25 = vld [vmem:[%s15634_s17 + $0x354] sm:$0x8] }
 0x6a5   : > { %13970 = vmatmul.mubr.msk.bf16.gmra.mrb[68].mxu0 %vm995_vm2, %v12097_v19  ;;  %v7193_v19 = vsel %vm17150_vm11, %v7191_v34, %v7192_v45  ;;  %v12166_v34 = vld [vmem:[%s15634_s17 + $0x3a4] sm:$0xe]  ;;  %v12168_v45 = vld [vmem:[%s15634_s17 + $0x3ac] sm:$0x1] }
 0x6a6   : > { %13975 = vmatprep.mubr.msk.bf16.mxu0 %vm995_vm2, %v12141_v22  ;;  %v7203_v22 = vrot.slane %v12130_v42, 7  ;;  %v12146_v46 = vcombine.low %v7190_v49, %v7193_v19  ;;  %v12184_v19 = vrot.slane %v12166_v34, 9  ;;  %v7480_v16 = vrot.slane %v12168_v45, 5 }
 0x6a7   : > { %v7760_v34 = vrot.slane %v7758_v21, 4 }
 0x6a8   : > { %v7205_v44 = vrot.slane %v7203_v22, 4  ;;  %v7204_v57 = vsel %vm17150_vm11, %v12139_v39, %v7203_v22  ;;  %v7485_v39 = vsel %vm15636_vm6, %v12185_v52, %v7484_v15  ;;  %v12210_v15 = vld [vmem:[%s15634_s17 + $0x374] sm:$0xf]  ;;  %v7772_v52 = vrot.slane %v12213_v23, 7 }
 0x6ad   : > { %13976 = vmatmul.mubr.msk.bf16.vlgmr.msra.gmra.mrb[56].mxu0 %vm995_vm2, %v12142_v10  ;;  %v7207_v10 = vsel %vm17150_vm11, %v7205_v44, %v7206_v32  ;;  %v7488_v44 = vsel %vm15636_vm6, %v7486_v37, %v7487_v53  ;;  %v12172_v32 = vld [vmem:[%s15634_s17 + $0x3dc] sm:$0xe]  ;;  %v12212_v37 = vld [vmem:[%s15634_s17 + $0x38c] sm:$0x8]  ;;  %v12214_v53 = vld [vmem:[%s15634_s17 + $0x394] sm:$0x7] }
 0x6ae   : > { %13992 = vmatpush3.bf16.msra.mxu0 %v7577_v43  ;;  %13979 = vmatprep.mubr.msk.bf16.mxu0 %vm995_vm2, %v12143_v24  ;;  %v7463_v24 = vrot.slane %v12161_v30, 5  ;;  %v12162_v43 = vld [vmem:[%s15634_s17 + $0x374] sm:$0x1]  ;;  %v12148_v51 = vcombine.low %v7204_v57, %v7207_v10  ;;  %v12177_v30 = vld [vmem:[%s15634_s17 + $0x400] sm:$0x1]  ;;  %v12194_v57 = vcombine.low %v7485_v39, %v7488_v44  ;;  %v12186_v10 = vrot.slane %v12172_v32, 9 }
 0x6af   : > { %14719 = vmatprep.subr.msk.bf16.mxu0 %vm1737_vm0, %v17686_v9  ;;  %v7466_v60 = vrot.slane %v12162_v43, 5  ;;  %v7501_v43 = vrot.slane %v12177_v30, 5  ;;  %v7774_v39 = vrot.slane %v7772_v52, 4  ;;  %v7775_v44 = vrot.slane %v12214_v53, 7  ;;  %v12216_v32 = vld [vmem:[%s15634_s17 + $0x3ac] sm:$0xf] }
 0x6b0   : > { %v7465_v18 = vrot.slane %v7463_v24, 4  ;;  %v7464_v61 = vsel %vm15636_vm6, %v12182_v3, %v7463_v24  ;;  %v7499_v3 = vsel %vm15636_vm6, %v12187_v33, %v7498_v55  ;;  %v7779_v30 = vrot.slane %v12216_v32, 7  ;;  %v12218_v33 = vld [vmem:[%s15634_s17 + $0x3c4] sm:$0x8] }
 0x6b2   : > { %v7467_v63 = vsel %vm15636_vm6, %v7465_v18, %v7466_v60  ;;  %v7502_v18 = vsel %vm15636_vm6, %v7500_v0, %v7501_v43  ;;  %v12178_v60 = vld [vmem:[%s15634_s17 + $0x414] sm:$0xe]  ;;  %v12220_v0 = vld [vmem:[%s15634_s17 + $0x3cc] sm:$0x7] }
 0x6b3   : > { %v12191_v42 = vcombine.low %v7464_v61, %v7467_v63  ;;  %v12196_v61 = vcombine.low %v7499_v3, %v7502_v18  ;;  %v12188_v63 = vrot.slane %v12178_v60, 9  ;;  %v7789_v18 = vrot.slane %v12220_v0, 7  ;;  %v12222_v60 = vld [vmem:[%s15634_s17 + $0x3e4] sm:$0xf]  ;;  %v17893_v0 = vld [vmem:[%s18107_s5 + $0x2] ss:$0 sm:$0xff] }
 0x6b5   : > { %13980 = vmatmul.mubr.msk.bf16.gmra.mrb[60].mxu0 %vm995_vm2, %v12144_v11  ;;  %v7477_v11 = vrot.slane %v12167_v8, 5  ;;  %v12208_v8 = vld [vmem:[%s15634_s17 + $0x35c] sm:$0x7] }
 0x6b6   : > { %13983 = vmatprep.mubr.msk.bf16.mxu0 %vm995_vm2, %v12145_v59  ;;  %v7471_v59 = vsel %vm15636_vm6, %v12183_v12, %v7470_v1  ;;  %v12179_v1 = vld [vmem:[%s15634_s17 + $0x418] sm:$0xf]  ;;  %v12180_v12 = vld [vmem:[%s15634_s17 + $0x41c] sm:$0x1]  ;;  %v7761_v45 = vrot.slane %v12208_v8, 7 }
 0x6b7   : > { %v12192_v49 = vcombine.low %v7471_v59, %v7474_v7  ;;  %v7479_v22 = vrot.slane %v7477_v11, 4  ;;  %v7478_v9 = vsel %vm15636_vm6, %v12184_v19, %v7477_v11  ;;  %v7508_v59 = vrot.slane %v12180_v12, 5  ;;  %v14878_v12 = vld [vmem:[%s18105_s3 + $0x88] sm:$0xff]  }
 0x6b8   : > { %v12230_v7 = vrot.slane %v12206_v25, 11  ;;  %v7762_v19 = vsel %vm17150_vm11, %v7760_v34, %v7761_v45  ;;  %v14879_v34 = vld [vmem:[%s18105_s3 + $0x90] sm:$0xff]   ;;  %v12224_v45 = vld [vmem:[%s15634_s17 + $0x3fc] sm:$0x8] }
 0x6bd   : > { %13984 = vmatmul.mubr.msk.bf16.gmra.mrb[64].mxu0 %vm995_vm2, %v12146_v46  ;;  %v7481_v46 = vsel %vm15636_vm6, %v7479_v22, %v7480_v16  ;;  %v12209_v22 = vld [vmem:[%s15634_s17 + $0x370] sm:$0x8]  ;;  %v12211_v16 = vld [vmem:[%s15634_s17 + $0x378] sm:$0x7] }
 0x6be   : > { %13987 = vmatprep.mubr.msk.bf16.mxu0 %vm995_vm2, %v12147_v54  ;;  %v7491_v54 = vrot.slane %v12173_v13, 5  ;;  %v12193_v56 = vcombine.low %v7478_v9, %v7481_v46  ;;  %v12231_v9 = vrot.slane %v12209_v22, 11  ;;  %v7768_v46 = vrot.slane %v12211_v16, 7  ;;  %v12228_v16 = vld [vmem:[%s15634_s17 + $0x41c] sm:$0xf] }
 0x6c0   : > { %v7493_v24 = vrot.slane %v7491_v54, 4  ;;  %v7492_v48 = vsel %vm15636_vm6, %v12186_v10, %v7491_v54  ;;  %v12232_v54 = vrot.slane %v12212_v37, 11  ;;  %v12215_v10 = vld [vmem:[%s15634_s17 + $0x3a8] sm:$0x8] }
 0x6c1   : > { %v12233_v2 = vrot.slane %v12215_v10, 11  ;;  %v14883_v10 = vld [vmem:[%s18105_s3 + $0xb0] sm:$0xff]  }
 0x6c3   : > { %v7780_v25 = vsel %vm17150_vm11, %v12233_v2, %v7779_v30 }
 0x6c5   : > { %13988 = vmatmul.mubr.msk.bf16.gmra.mrb[68].mxu0 %vm995_vm2, %v12148_v51  ;;  %v7495_v51 = vsel %vm15636_vm6, %v7493_v24, %v7494_v58  ;;  %v12217_v24 = vld [vmem:[%s15634_s17 + $0x3b0] sm:$0x7]  ;;  %v7786_v58 = vrot.slane %v12219_v28, 7 }
 0x6c6   : > { %13993 = vmatprep.mubr.msk.bf16.mxu0 %vm995_vm2, %v12190_v40  ;;  %v7505_v40 = vrot.slane %v12179_v1, 5  ;;  %v12195_v29 = vcombine.low %v7492_v48, %v7495_v51  ;;  %v7781_v48 = vrot.slane %v7779_v30, 4  ;;  %v7782_v51 = vrot.slane %v12217_v24, 7  ;;  %v14885_v24 = vld [vmem:[%s18105_s3 + $0xc0] sm:$0xff]  }
 0x6c7   : > { %v7788_v3 = vrot.slane %v7786_v58, 4 }
 0x6c8   : > { %v7507_v11 = vrot.slane %v7505_v40, 4  ;;  %v7506_v31 = vsel %vm15636_vm6, %v12188_v63, %v7505_v40  ;;  %v12234_v40 = vrot.slane %v12218_v33, 11  ;;  %v7783_v8 = vsel %vm17150_vm11, %v7781_v48, %v7782_v51 }
 0x6c9   : > { %v7790_v63 = vsel %vm17150_vm11, %v7788_v3, %v7789_v18  ;;  %v12242_v23 = vcombine.low %v7780_v25, %v7783_v8 }
 0x6cd   : > { %13994 = vmatmul.mubr.msk.bf16.vlgmr.msra.gmra.mrb[56].mxu0 %vm995_vm2, %v12191_v42  ;;  %v7509_v42 = vsel %vm15636_vm6, %v7507_v11, %v7508_v59  ;;  %v12221_v11 = vld [vmem:[%s15634_s17 + $0x3e0] sm:$0x8]  ;;  %v12223_v59 = vld [vmem:[%s15634_s17 + $0x3e8] sm:$0x7] }
 0x6ce   : > { %14010 = vmatpush3.bf16.msra.mxu0 %v7879_v26  ;;  %13997 = vmatprep.mubr.msk.bf16.mxu0 %vm995_vm2, %v12192_v49  ;;  %v7765_v26 = vrot.slane %v12210_v15, 7  ;;  %v7759_v49 = vsel %vm17150_vm11, %v12230_v7, %v7758_v21  ;;  %v12197_v13 = vcombine.low %v7506_v31, %v7509_v42  ;;  %v12225_v21 = vld [vmem:[%s15634_s17 + $0x400] sm:$0xf]  ;;  %v12226_v15 = vld [vmem:[%s15634_s17 + $0x404] sm:$0x7] }
 0x6cf   : > { %14027 = vmatprep.subr.bf16.mxu0 %v17758_v38  ;;  %v12239_v14 = vcombine.low %v7759_v49, %v7762_v19  ;;  %v7800_v7 = vrot.slane %v12225_v21, 7  ;;  %v12236_v49 = vrot.slane %v12224_v45, 11  ;;  %v7803_v22 = vrot.slane %v12226_v15, 7 }
 0x6d0   : > { %v7767_v62 = vrot.slane %v7765_v26, 4  ;;  %v7766_v55 = vsel %vm17150_vm11, %v12231_v9, %v7765_v26  ;;  %v7796_v26 = vrot.slane %v12223_v59, 7 }
 0x6d1   : > { %v7802_v19 = vrot.slane %v7800_v7, 4 }
 0x6d2   : > { %v7769_v50 = vsel %vm17150_vm11, %v7767_v62, %v7768_v46  ;;  %v12227_v62 = vld [vmem:[%s15634_s17 + $0x418] sm:$0x8]  ;;  %v12229_v46 = vld [vmem:[%s15634_s17 + $0x420] sm:$0x7]  ;;  %s12618_s17 = sshll.u32 %s14971_s24, 4 }
 0x6d3   : > { %v12240_v43 = vcombine.low %v7766_v55, %v7769_v50  ;;  %v7804_v9 = vsel %vm17150_vm11, %v7802_v19, %v7803_v22  ;;  %v12237_v32 = vrot.slane %v12227_v62, 11  ;;  %v7810_v55 = vrot.slane %v12229_v46, 7  ;;  %s11221_s24 = sadd.s32 %s12618_s17, %s12613_s30  ;;  %s14897_s17 = sshll.u32 %s14991_s9, 4  ;;  %s14898_s17 = int_to_ptr.vmem [resolvable:$false] %s14897_s17 }
 0x6d4   : > { %s12614_s25 = sshll.u32 %s11221_s24, 7  ;;  %s14899_s30 = scalar_lea.vmem %s14898_s17, 4096 }
 0x6d5   : > { %13998 = vmatmul.mubr.msk.bf16.gmra.mrb[60].mxu0 %vm995_vm2, %v12193_v56  ;;  %v7773_v56 = vsel %vm17150_vm11, %v12232_v54, %v7772_v52  ;;  %v14880_v52 = vld [vmem:[%s18105_s3 + $0x98] sm:$0xff]   ;;  %v14881_v54 = vld [vmem:[%s18105_s3 + $0xa0] sm:$0xff]   ;;  %s18041_s19 = scalar_lea.hbm %s18108_s6, %s12614_s25  ;;  %p14900_p2 = scmp.lt.s32.totalorder %s18043_s13, %s14898_s17 }
 0x6d6   : > { %14001 = vmatprep.mubr.msk.bf16.mxu0 %vm995_vm2, %v12194_v57  ;;  %v7776_v57 = vsel %vm17150_vm11, %v7774_v39, %v7775_v44  ;;  %p14901_p4 = scmp.lt.s32.totalorder %s14899_s30, %s14893_s29 }
 0x6d7   : > { %v12241_v1 = vcombine.low %v7773_v56, %v7776_v57  ;;  %v14882_v57 = vld [vmem:[%s18105_s3 + $0xa8] sm:$0xff]  }
 0x6d8   : > { %p14902_p5 = por %p14901_p4, %p14900_p2 }
 0x6da   : > { %p14903_p6 = pnand %p14902_p5, %p14896_p1 }
 0x6dd   : > { %14002 = vmatmul.mubr.msk.bf16.gmra.mrb[64].mxu0 %vm995_vm2, %v12195_v29  ;;  %v7793_v29 = vrot.slane %v12222_v60, 7 }
 0x6de   : > { %14005 = vmatprep.mubr.msk.bf16.mxu0 %vm995_vm2, %v12196_v61  ;;  %v7787_v61 = vsel %vm17150_vm11, %v12234_v40, %v7786_v58  ;;  %v17888_v58 = vld [vmem:[%s18106_s4 + $0x2] ss:$0 sm:$0xff] }
 0x6df   : > { %v12243_v31 = vcombine.low %v7787_v61, %v7790_v63  ;;  %v7795_v42 = vrot.slane %v7793_v29, 4 }
 0x6e1   : > { %v7797_v53 = vsel %vm17150_vm11, %v7795_v42, %v7796_v26  ;;  %v14886_v42 = vld [vmem:[%s18105_s3 + $0xc8] sm:$0xff]  }
 0x6e5   : > { %14006 = vmatmul.mubr.msk.bf16.gmra.mrb[68].mxu0 %vm995_vm2, %v12197_v13  ;;  %v7807_v13 = vrot.slane %v12228_v16, 7 }
 0x6e6   : > { %14011 = vmatprep.mubr.msk.bf16.mxu0 %vm995_vm2, %v12239_v14  ;;  %v7801_v14 = vsel %vm17150_vm11, %v12236_v49, %v7800_v7 }
 0x6e7   : > { %v12245_v44 = vcombine.low %v7801_v14, %v7804_v9  ;;  %v7809_v28 = vrot.slane %v7807_v13, 4  ;;  %v7808_v50 = vsel %vm17150_vm11, %v12237_v32, %v7807_v13 }
 0x6e9   : > { %v7811_v30 = vsel %vm17150_vm11, %v7809_v28, %v7810_v55 }
 0x6ea   : > { %v12246_v56 = vcombine.low %v7808_v50, %v7811_v30  ;;  %v14888_v50 = vld [vmem:[%s18105_s3 + $0xd8] sm:$0xff]  }
 0x6ed   : > { %14012 = vmatmul.mubr.msk.bf16.vlgmr.msra.gmra.mrb[56].mxu0 %vm995_vm2, %v12240_v43 }
 0x6ee   : > { %14015 = vmatprep.mubr.msk.bf16.mxu0 %vm995_vm2, %v12241_v1  ;;  %14028 = vmatpush3.bf16.msra.mxu0 %v17758_v38  ;;  %v12235_v38 = vrot.slane %v12221_v11, 11 }
 0x6ef   : > { %14029 = vmatprep.subr.bf16.mxu0 %v14878_v12 }
 0x6f0   : > { %v7794_v37 = vsel %vm17150_vm11, %v12235_v38, %v7793_v29 }
 0x6f1   : > { %v12244_v39 = vcombine.low %v7794_v37, %v7797_v53  ;;  %v14887_v37 = vld [vmem:[%s18105_s3 + $0xd0] sm:$0xff]  }
 0x6f2   : > { %14030 = vmatpush3.bf16.msra.mxu0 %v14878_v12 }
 0x6f3   : > { %14031 = vmatprep.subr.bf16.mxu0 %v14879_v34 }
 0x6f5   : > { %14016 = vmatmul.mubr.msk.bf16.gmra.mrb[60].mxu0 %vm995_vm2, %v12242_v23 }
 0x6f6   : > { %14019 = vmatprep.mubr.msk.bf16.mxu0 %vm995_vm2, %v12243_v31  ;;  %14032 = vmatpush3.bf16.msra.mxu0 %v14879_v34 }
 0x6f7   : > { %14033 = vmatprep.subr.bf16.mxu0 %v14880_v52 }
 0x6fa   : > { %14034 = vmatpush3.bf16.msra.mxu0 %v14880_v52 }
 0x6fb   : > { %14035 = vmatprep.subr.bf16.mxu0 %v14881_v54 }
 0x6fd   : > { %14020 = vmatmul.mubr.msk.bf16.gmra.mrb[64].mxu0 %vm995_vm2, %v12244_v39 }
 0x6fe   : > { %14023 = vmatprep.mubr.msk.bf16.mxu0 %vm995_vm2, %v12245_v44  ;;  %14036 = vmatpush3.bf16.msra.mxu0 %v14881_v54 }
 0x6ff   : > { %14037 = vmatprep.subr.bf16.mxu0 %v14882_v57 }
 0x702   : > { %14038 = vmatpush3.bf16.msra.mxu0 %v14882_v57 }
 0x703   : > { %14039 = vmatprep.subr.bf16.mxu0 %v14883_v10 }
 0x705   : > { %14024 = vmatmul.mubr.msk.bf16.gmra.mrb[68].mxu0 %vm995_vm2, %v12246_v56 }
 0x706   : > { %14040 = vmatpush3.bf16.msra.mxu0 %v14883_v10 }
 0x707   : > { %14041 = vmatprep.subr.bf16.mxu0 %v14884_v5 }
 0x70a   : > { %14042 = vmatpush3.bf16.msra.mxu0 %v14884_v5 }
 0x70b   : > { %14221 = vmatprep.subr.bf16.mxu0 %v14885_v24 }
 0x7c0   : > { %v14013_v33 = vpop.f32.mrb[56].mxu0 }
 0x7c1   : > { %v8033_v43 = vmul.f32 %v14013_v33, %v17888_v58  ;;  %v7915_v1 = vpop.f32.mrb[57].mxu0  ;;  %v14889_v33 = vld [vmem:[%s18105_s3 + $0xe0] sm:$0xff]  }
 0x7c2   : > { %v8031_v2 = vmul.f32 %v17888_v58, %v7915_v1  ;;  %v14014_v48 = vpop.f32.mrb[58].mxu0 }
 0x7c3   : > { %v8054_v51 = vadd.f32 %v17893_v0, %v8033_v43  ;;  %v8034_v40 = vmul.f32 %v14014_v48, %v17888_v58  ;;  %v7918_v3 = vpop.f32.mrb[59].mxu0 }
 0x7c4   : > { %v8052_v18 = vadd.f32 %v17893_v0, %v8031_v2  ;;  %v8032_v60 = vmul.f32 %v17888_v58, %v7918_v3 }
 0x7c5   : > { %v8055_v12 = vadd.f32 %v17893_v0, %v8034_v40  ;;  %v8070_v25 = vmax.f32 %v8054_v51, 0.0 }
 0x7c6   : > { %v8053_v21 = vadd.f32 %v17893_v0, %v8032_v60  ;;  %v8068_v29 = vmax.f32 %v8052_v18, 0.0 }
 0x7c7   : > { %v8071_v8 = vmax.f32 %v8055_v12, 0.0 }
 0x7c8   : > { %v8069_v61 = vmax.f32 %v8053_v21, 0.0  ;;  %v14017_v63 = vpop.f32.mrb[60].mxu0 }
 0x7c9   : > { %v8085_v11 = vpack.c.bf16 %v8071_v8, %v8070_v25  ;;  %v8037_v59 = vmul.f32 %v14017_v63, %v17888_v58  ;;  %v7931_v7 = vpop.f32.mrb[61].mxu0  ;;  %v14890_v8 = vld [vmem:[%s18105_s3 + $0xe8] sm:$0xff]  }
 0x7ca   : > { %v8035_v34 = vmul.f32 %v17888_v58, %v7931_v7  ;;  %v14018_v45 = vpop.f32.mrb[62].mxu0  ;;  %v8084_v15 = vpack.c.bf16 %v8069_v61, %v8068_v29 }
 0x7cb   : > { %v8058_v23 = vadd.f32 %v17893_v0, %v8037_v59  ;;  %v8038_v31 = vmul.f32 %v14018_v45, %v17888_v58  ;;  %v7934_v38 = vpop.f32.mrb[63].mxu0 }
 0x7cc   : > { %v8056_v26 = vadd.f32 %v17893_v0, %v8035_v34  ;;  %v8036_v49 = vmul.f32 %v17888_v58, %v7934_v38  ;;  %14043 = vmatprep.mubr.bf16.mxu0 %v8084_v15  ;;  %v14891_v34 = vld [vmem:[%s18105_s3 + $0xf0] sm:$0xff]  }
 0x7cd   : > { %v8059_v19 = vadd.f32 %v17893_v0, %v8038_v31  ;;  %14044 = vmatmul.mubr.bf16.vlgmr.msra.gmra.mrb[24].mxu0 %v8085_v11  ;;  %v8074_v16 = vmax.f32 %v8058_v23, 0.0 }
 0x7ce   : > { %v8057_v22 = vadd.f32 %v17893_v0, %v8036_v49  ;;  %14222 = vmatpush3.bf16.msra.mxu0 %v14885_v24  ;;  %v8072_v53 = vmax.f32 %v8056_v26, 0.0 }
 0x7cf   : > { %v8075_v52 = vmax.f32 %v8059_v19, 0.0  ;;  %14223 = vmatprep.subr.bf16.mxu0 %v14886_v42 }
 0x7d0   : > { %v8073_v13 = vmax.f32 %v8057_v22, 0.0  ;;  %v14021_v14 = vpop.f32.mrb[64].mxu0 }
 0x7d1   : > { %v8041_v9 = vmul.f32 %v14021_v14, %v17888_v58  ;;  %v7947_v62 = vpop.f32.mrb[65].mxu0  ;;  %v8087_v46 = vpack.c.bf16 %v8075_v52, %v8074_v16 }
 0x7d2   : > { %v8039_v54 = vmul.f32 %v17888_v58, %v7947_v62  ;;  %14224 = vmatpush3.bf16.msra.mxu0 %v14886_v42  ;;  %v14022_v39 = vpop.f32.mrb[66].mxu0  ;;  %v8086_v44 = vpack.c.bf16 %v8073_v13, %v8072_v53 }
 0x7d3   : > { %v8062_v32 = vadd.f32 %v17893_v0, %v8041_v9  ;;  %v8042_v28 = vmul.f32 %v14022_v39, %v17888_v58  ;;  %v7950_v55 = vpop.f32.mrb[67].mxu0  ;;  %14225 = vmatprep.subr.bf16.mxu0 %v14887_v37 }
 0x7d4   : > { %v8060_v30 = vadd.f32 %v17893_v0, %v8039_v54  ;;  %v8040_v56 = vmul.f32 %v17888_v58, %v7950_v55  ;;  %14047 = vmatprep.mubr.bf16.mxu0 %v8086_v44 }
 0x7d5   : > { %v8063_v57 = vadd.f32 %v17893_v0, %v8042_v28  ;;  %14048 = vmatmul.mubr.bf16.gmra.mrb[28].mxu0 %v8087_v46  ;;  %v8078_v5 = vmax.f32 %v8062_v32, 0.0 }
 0x7d6   : > { %v8061_v10 = vadd.f32 %v17893_v0, %v8040_v56  ;;  %14226 = vmatpush3.bf16.msra.mxu0 %v14887_v37  ;;  %v8076_v43 = vmax.f32 %v8060_v30, 0.0 }
 0x7d7   : > { %v8079_v24 = vmax.f32 %v8063_v57, 0.0  ;;  %14227 = vmatprep.subr.bf16.mxu0 %v14888_v50 }
 0x7d8   : > { %v8077_v1 = vmax.f32 %v8061_v10, 0.0  ;;  %v14025_v2 = vpop.f32.mrb[68].mxu0 }
 0x7d9   : > { %v8045_v48 = vmul.f32 %v14025_v2, %v17888_v58  ;;  %v7963_v51 = vpop.f32.mrb[69].mxu0  ;;  %v8089_v40 = vpack.c.bf16 %v8079_v24, %v8078_v5 }
 0x7da   : > { %v8043_v3 = vmul.f32 %v17888_v58, %v7963_v51  ;;  %14228 = vmatpush3.bf16.msra.mxu0 %v14888_v50  ;;  %v14026_v18 = vpop.f32.mrb[70].mxu0  ;;  %v8088_v60 = vpack.c.bf16 %v8077_v1, %v8076_v43 }
 0x7db   : > { %v8066_v12 = vadd.f32 %v17893_v0, %v8045_v48  ;;  %v8046_v21 = vmul.f32 %v14026_v18, %v17888_v58  ;;  %v7966_v25 = vpop.f32.mrb[71].mxu0  ;;  %14229 = vmatprep.subr.bf16.mxu0 %v14889_v33 }
 0x7dc   : > { %v8064_v29 = vadd.f32 %v17893_v0, %v8043_v3  ;;  %v8044_v61 = vmul.f32 %v17888_v58, %v7966_v25  ;;  %14051 = vmatprep.mubr.bf16.mxu0 %v8088_v60  ;;  %v14892_v58 = vld [vmem:[%s18105_s3 + $0xf8] sm:$0xff]  }
 0x7dd   : > { %v8067_v63 = vadd.f32 %v17893_v0, %v8046_v21  ;;  %14052 = vmatmul.mubr.bf16.gmra.mrb[32].mxu0 %v8089_v40  ;;  %v8082_v59 = vmax.f32 %v8066_v12, 0.0 }
 0x7de   : > { %v8065_v11 = vadd.f32 %v17893_v0, %v8044_v61  ;;  %14230 = vmatpush3.bf16.msra.mxu0 %v14889_v33  ;;  %v8080_v45 = vmax.f32 %v8064_v29, 0.0  ;;  %v1891_v0 = vlaneseq }
 0x7df   : > { %v8083_v7 = vmax.f32 %v8067_v63, 0.0  ;;  %14231 = vmatprep.subr.bf16.mxu0 %v14890_v8 }
 0x7e0   : > { %v8081_v15 = vmax.f32 %v8065_v11, 0.0  ;;  %v1892_v38 = vshrl.u32 %v1891_v0, 7 }
 0x7e1   : > { %v8091_v23 = vpack.c.bf16 %v8083_v7, %v8082_v59 }
 0x7e2   : > { %14232 = vmatpush3.bf16.msra.mxu0 %v14890_v8  ;;  %v8090_v31 = vpack.c.bf16 %v8081_v15, %v8080_v45 }
 0x7e3   : > { %14233 = vmatprep.subr.bf16.mxu0 %v14891_v34 }
 0x7e4   : > { %14055 = vmatprep.mubr.bf16.mxu0 %v8090_v31 }
 0x7e5   : > { %14056 = vmatmul.mubr.bf16.gmra.mrb[36].mxu0 %v8091_v23 }
 0x7e6   : > { %14234 = vmatpush3.bf16.msra.mxu0 %v14891_v34  ;;  %14237 = vmatprep.mubr.bf16.mxu0 %v17502_v35  ;;  %v1893_v35 = vsub.s32 0, %v1892_v38 }
 0x7e7   : > { %14235 = vmatprep.subr.bf16.mxu0 %v14892_v58 }
 0x7e8   : > { %v17957_v42 = vrot.slane %v16542_v36, %v1893_v35 }
 0x7ea   : > { %14236 = vmatpush3.bf16.msra.mxu0 %v14892_v58 }
 0x7ed   : > { %14238 = vmatmul.mubr.bf16.vlgmr.msra.gmra.mrb[24].mxu0 %v17495_v17 }
 0x7ee   : > { %14241 = vmatprep.mubr.bf16.mxu0 %v17537_v6 }
 0x7f5   : > { %14242 = vmatmul.mubr.bf16.gmra.mrb[28].mxu0 %v17531_v20  ;;  %v17963_v20 = vld [vmem:[%s18106_s4 + $0x5] ss:$0 sm:$0xff] }
 0x7f6   : > { %14245 = vmatprep.mubr.bf16.mxu0 %v17565_v27  ;;  %v17969_v27 = vld [vmem:[%s18107_s5 + $0x5] ss:$0 sm:$0xff] }
 0x7fd   : > { %14246 = vmatmul.mubr.bf16.gmra.mrb[32].mxu0 %v17559_v4 }
 0x7fe   : > { %14249 = vmatprep.mubr.bf16.mxu0 %v17588_v47 }
 0x805   : > { %14250 = vmatmul.mubr.bf16.gmra.mrb[36].mxu0 %v17586_v41 }
 0x8c0   : > { %v14239_v17 = vpop.f32.mrb[24].mxu0 }
 0x8c1   : > { %v14253_v6 = vadd.f32 %v14239_v17, %v17957_v42  ;;  %v11022_v4 = vpop.f32.mrb[25].mxu0 }
 0x8c2   : > { %v14254_v41 = vadd.f32 %v11022_v4, %v17957_v42  ;;  %v14240_v47 = vpop.f32.mrb[26].mxu0 }
 0x8c3   : > { %v11140_v36 = vmul.f32 %v14253_v6, %v17963_v20  ;;  %v14255_v26 = vadd.f32 %v14240_v47, %v17957_v42  ;;  %v11025_v49 = vpop.f32.mrb[27].mxu0 }
 0x8c4   : > { %v11138_v19 = vmul.f32 %v14254_v41, %v17963_v20  ;;  %v14256_v22 = vadd.f32 %v11025_v49, %v17957_v42 }
 0x8c5   : > { %v11161_v16 = vadd.f32 %v17969_v27, %v11140_v36  ;;  %v11141_v52 = vmul.f32 %v14255_v26, %v17963_v20 }
 0x8c6   : > { %v11159_v37 = vadd.f32 %v17969_v27, %v11138_v19  ;;  %v11139_v53 = vmul.f32 %v14256_v22, %v17963_v20 }
 0x8c7   : > { %v11177_v13 = vmax.f32 %v11161_v16, 0.0  ;;  %v11162_v14 = vadd.f32 %v17969_v27, %v11141_v52 }
 0x8c8   : > { %v11175_v9 = vmax.f32 %v11159_v37, 0.0  ;;  %v11160_v62 = vadd.f32 %v17969_v27, %v11139_v53  ;;  %v14243_v46 = vpop.f32.mrb[28].mxu0 }
 0x8c9   : > { %11193 = vst [vmem:[%s17984_s12 + $0x10] sm:$0xff] %v11177_v13  ;;  %v11178_v54 = vmax.f32 %v11162_v14, 0.0  ;;  %v14257_v39 = vadd.f32 %v14243_v46, %v17957_v42  ;;  %v11038_v44 = vpop.f32.mrb[29].mxu0 }
 0x8ca   : > { %11191 = vst [vmem:[%s17984_s12] sm:$0xff] %v11175_v9  ;;  %v11176_v32 = vmax.f32 %v11160_v62, 0.0  ;;  %v14258_v28 = vadd.f32 %v11038_v44, %v17957_v42  ;;  %v14244_v55 = vpop.f32.mrb[30].mxu0 }
 0x8cb   : > { %11194 = vst [vmem:[%s17984_s12 + $0x18] sm:$0xff] %v11178_v54  ;;  %v11144_v50 = vmul.f32 %v14257_v39, %v17963_v20  ;;  %v14259_v30 = vadd.f32 %v14244_v55, %v17957_v42  ;;  %v11041_v56 = vpop.f32.mrb[31].mxu0 }
 0x8cc   : > { %11192 = vst [vmem:[%s17984_s12 + $0x8] sm:$0xff] %v11176_v32  ;;  %v11142_v57 = vmul.f32 %v14258_v28, %v17963_v20  ;;  %v14260_v10 = vadd.f32 %v11041_v56, %v17957_v42 }
 0x8cd   : > { %v11165_v5 = vadd.f32 %v17969_v27, %v11144_v50  ;;  %v11145_v24 = vmul.f32 %v14259_v30, %v17963_v20 }
 0x8ce   : > { %v11163_v33 = vadd.f32 %v17969_v27, %v11142_v57  ;;  %v11143_v43 = vmul.f32 %v14260_v10, %v17963_v20 }
 0x8cf   : > { %v11181_v1 = vmax.f32 %v11165_v5, 0.0  ;;  %v11166_v2 = vadd.f32 %v17969_v27, %v11145_v24 }
 0x8d0   : > { %v11179_v48 = vmax.f32 %v11163_v33, 0.0  ;;  %v11164_v51 = vadd.f32 %v17969_v27, %v11143_v43  ;;  %v14247_v40 = vpop.f32.mrb[32].mxu0 }
 0x8d1   : > { %11197 = vst [vmem:[%s17984_s12 + $0x30] sm:$0xff] %v11181_v1  ;;  %v11182_v3 = vmax.f32 %v11166_v2, 0.0  ;;  %v14261_v18 = vadd.f32 %v14247_v40, %v17957_v42  ;;  %v11054_v60 = vpop.f32.mrb[33].mxu0 }
 0x8d2   : > { %11195 = vst [vmem:[%s17984_s12 + $0x20] sm:$0xff] %v11179_v48  ;;  %v11180_v12 = vmax.f32 %v11164_v51, 0.0  ;;  %v14262_v21 = vadd.f32 %v11054_v60, %v17957_v42  ;;  %v14248_v25 = vpop.f32.mrb[34].mxu0 }
 0x8d3   : > { %11198 = vst [vmem:[%s17984_s12 + $0x38] sm:$0xff] %v11182_v3  ;;  %v11148_v8 = vmul.f32 %v14261_v18, %v17963_v20  ;;  %v14263_v29 = vadd.f32 %v14248_v25, %v17957_v42  ;;  %v11057_v61 = vpop.f32.mrb[35].mxu0 }
 0x8d4   : > { %11196 = vst [vmem:[%s17984_s12 + $0x28] sm:$0xff] %v11180_v12  ;;  %v11146_v63 = vmul.f32 %v14262_v21, %v17963_v20  ;;  %v14264_v11 = vadd.f32 %v11057_v61, %v17957_v42 }
 0x8d5   : > { %v11169_v59 = vadd.f32 %v17969_v27, %v11148_v8  ;;  %v11149_v7 = vmul.f32 %v14263_v29, %v17963_v20 }
 0x8d6   : > { %v11167_v34 = vadd.f32 %v17969_v27, %v11146_v63  ;;  %v11147_v45 = vmul.f32 %v14264_v11, %v17963_v20 }
 0x8d7   : > { %v11185_v15 = vmax.f32 %v11169_v59, 0.0  ;;  %v11170_v23 = vadd.f32 %v17969_v27, %v11149_v7 }
 0x8d8   : > { %v11183_v31 = vmax.f32 %v11167_v34, 0.0  ;;  %v11168_v58 = vadd.f32 %v17969_v27, %v11147_v45  ;;  %v14251_v0 = vpop.f32.mrb[36].mxu0 }
 0x8d9   : > { %11201 = vst [vmem:[%s17984_s12 + $0x50] sm:$0xff] %v11185_v15  ;;  %v11186_v38 = vmax.f32 %v11170_v23, 0.0  ;;  %v14265_v35 = vadd.f32 %v14251_v0, %v17957_v42  ;;  %v11070_v17 = vpop.f32.mrb[37].mxu0 }
 0x8da   : > { %11199 = vst [vmem:[%s17984_s12 + $0x40] sm:$0xff] %v11183_v31  ;;  %v11184_v6 = vmax.f32 %v11168_v58, 0.0  ;;  %v14266_v4 = vadd.f32 %v11070_v17, %v17957_v42  ;;  %v14252_v41 = vpop.f32.mrb[38].mxu0 }
 0x8db   : > { %11202 = vst [vmem:[%s17984_s12 + $0x58] sm:$0xff] %v11186_v38  ;;  %v11152_v47 = vmul.f32 %v14265_v35, %v17963_v20  ;;  %v14267_v36 = vadd.f32 %v14252_v41, %v17957_v42  ;;  %v11073_v26 = vpop.f32.mrb[39].mxu0 }
 0x8dc   : > { %11200 = vst [vmem:[%s17984_s12 + $0x48] sm:$0xff] %v11184_v6  ;;  %v11150_v49 = vmul.f32 %v14266_v4, %v17963_v20  ;;  %v14268_v19 = vadd.f32 %v11073_v26, %v17957_v42 }
 0x8dd   : > { %v11173_v22 = vadd.f32 %v17969_v27, %v11152_v47  ;;  %v11153_v16 = vmul.f32 %v14267_v36, %v17963_v20 }
 0x8de   : > { %v11171_v52 = vadd.f32 %v17969_v27, %v11150_v49  ;;  %v11151_v37 = vmul.f32 %v14268_v19, %v17963_v20 }
 0x8df   : > { %v11189_v53 = vmax.f32 %v11173_v22, 0.0  ;;  %v11174_v13 = vadd.f32 %v17969_v27, %v11153_v16 }
 0x8e0   : > { %v11187_v14 = vmax.f32 %v11171_v52, 0.0  ;;  %v11172_v42 = vadd.f32 %v17969_v27, %v11151_v37 }
 0x8e1   : > { %11205 = vst [vmem:[%s17984_s12 + $0x70] sm:$0xff] %v11189_v53  ;;  %v11190_v9 = vmax.f32 %v11174_v13, 0.0 }
 0x8e2   : > { %11203 = vst [vmem:[%s17984_s12 + $0x60] sm:$0xff] %v11187_v14  ;;  %v11188_v20 = vmax.f32 %v11172_v42, 0.0 }
 0x8e3   : > { %11206 = vst [vmem:[%s17984_s12 + $0x78] sm:$0xff] %v11190_v9 }
 0x8e4   : > { %11204 = vst [vmem:[%s17984_s12 + $0x68] sm:$0xff] %v11188_v20 }
 0x8e5   : > { %14906 = shalt.err (!%p14903_p6)
}
 0x8e6   : > { %s14907_s16 = scalar_lea.hbm %s18041_s19, 2048  ;;  %s14911_s25 = scalar_lea.hbm %s18108_s6, 8192 }
 0x8e7   : > { %p14908_p7 = scmp.ne.s32.totalorder %s18041_s19, %s14907_s16  ;;  %p14912_p11 = scmp.lt.u32.totalorder %s18041_s19, %s18108_s6 }
 0x8e8   : > { %p14913_p12 = scmp.lt.u32.totalorder %s14911_s25, %s14907_s16  ;;  %p14915_p0 = scmp.lt.u32.totalorder %s14907_s16, %s18041_s19 }
 0x8e9   : > { %p14909_p9 = pnand %p14908_p7, %p15080_p3 }
 0x8ea   : > { %p14914_p13 = por %p14913_p12, %p14912_p11 }
 0x8eb   : > { %p14910_p10 = pneg %p14909_p9 }
 0x8ec   : > { %p14916_p1 = por %p14915_p0, %p14914_p13 }
 0x8ee   : > { %p14917_p2 = pnand %p14916_p1, %p14910_p10 }
 0x8f0   : > { %14920 = shalt.err (!%p14917_p2)
}
 0x8f1   : > { %s14992_s29 = smov 128   ;;  %s14993_s9 = smov 8  }
 0x8f2   : > { %14730 = dma.vmem_to_hbm [thread:$0]  (%p15080_p3), %s18043_s13, 2048, %s18041_s19, %s18050_s20, %s14992_s29, %s14992_s29, %s14993_s9  }
 0x8f3 PF: > { %p14736_p4 = scmp.ge.s32.totalorder %s14987_s28, 2  ;;  %s11239_s17 = sand.u32 1, %s14959_s21  }
 0x8f4   : > { %s11240_s30 = scalar_lea.sflag [#allocation5], %s11239_s17 }
 0x8f5   : > { %p14733_p5 = pnand %p14736_p4, %p15089_p8 }
 0x8f7   : > { %14954 = dma.done.wait (!%p14733_p5), %s11240_s30, 2048  }
 0x8f8   : > { %14956 = vsyncadd (!%p14733_p5), %s11240_s30, 4294965248  ;;  %s19_s28 = sadd.s32 1, %s14987_s28   ;;  %s18117_s21 = smov %s14963_s22 }
 0x8f9   : > { %p16_p6 = scmp.ge.s32.totalorder %s19_s28, 6   ;;  %s18118_s22 = smov %s14967_s23 }
 0x8fa   : > { %s18119_s23 = smov %s15098_s15  ;;  %s18120_s24 = smov %s14979_s26 }
 0x8fb   : > { %s18121_s25 = smov %s14983_s27  ;;  %s18122_s26 = smov %s18125_s7 }
 0x8fc   : > { %s18123_s27 = smov %s18129_s8  ;;  %18 = sbr.rel (!%p16_p6) target bundleno = 5 (0x5), region = 113 }
 0x903   :  { %11245 = vsyncpa [#allocation5], 1 }
 0x904   :  { %11247 = vsyncpa [#allocation5 + $0x1], 1 }

</bundles_post_ra>
